<compile_context>
chip_gen: v7x
topology: tpu7x:2x2x1
jax: 0.10.0
libtpu: 0.0.40
codegen_flags: <defaults>
</compile_context>

<pallas_src>
import jax
import jax.numpy as jnp
from jax.experimental import pallas as pl
from jax.experimental.pallas import tpu as pltpu

CP = 8  # padded channel count (5 real channels + 3 zero channels -> 8*W = 128 lanes)


# ----------------------------------------------------------------------------
# Weight packing (runs ONCE at init, outside the jitted call path).
# Activations are laid out as X[n*H + i, c*W + j] = x[n, c, i, j].
# ----------------------------------------------------------------------------
def _pad_w(w):
    w = jnp.asarray(w, jnp.float32)
    cout, cin, K, _ = w.shape
    wp = jnp.zeros((CP, CP, K, K), jnp.float32)
    return wp.at[:cout, :cin].set(w)


def _pad_b(b):
    b = jnp.asarray(b, jnp.float32)
    return jnp.zeros((CP,), jnp.float32).at[: b.shape[0]].set(b)


def _band(w_pad, W, dy):
    """(CP*W, CP*W) matrix B so that row_shift_dy(X) @ B applies the conv taps with
    row offset dy, including channel mixing and zero padding along W."""
    _, _, K, _ = w_pad.shape
    c = K // 2
    B = jnp.zeros((CP * W, CP * W), jnp.float32)
    for dx in range(-c, c + 1):
        E = jnp.eye(W, k=-dx, dtype=jnp.float32)   # zero 'same' padding along W
        B = B + jnp.kron(w_pad[:, :, dy + c, dx + c].T, E)
    return B


def _band3_stacked(w_pad, W):
    # K-stacked (3*CP*W, CP*W); row blocks match the kernel's [v_m1, v, v_p1] concat.
    return jnp.concatenate(
        [_band(w_pad, W, -1), _band(w_pad, W, 0), _band(w_pad, W, 1)], axis=0)


def pack_params(params, W):
    """Pack all 37 convs into four stacked tables. Call once at init."""
    w3, b3, w1, b1 = [], [], [], []

    def add3(w, b):
        w3.append(_band3_stacked(_pad_w(w), W))
        b3.append(jnp.repeat(_pad_b(b), W))

    def add1(w, b):
        w1.append(_band(_pad_w(w), W, 0))
        b1.append(jnp.repeat(_pad_b(b), W))

    add3(params["coord_w"], params["coord_b"])          # CoordConv's conv
    for p in params["scpa"]:
        # order must match the kernel's independent 1x1 / 3x3 cursors:
        add1(p["c1b1_w"], p["c1b1_b"])
        add3(p["c2b1_w"], p["c2b1_b"])
        add1(p["c1b2_w"], p["c1b2_b"])
        add1(p["c2b2_w"], p["c2b2_b"])
        add3(p["c3b2_w"], p["c3b2_b"])
        add3(p["c4b2_w"], p["c4b2_b"])
        add1(p["fc_w"], p["fc_b"])
    add3(params["out_w"], params["out_b"])               # closing 3x3 (3 real out ch)

    return dict(w3=jnp.stack(w3), b3=jnp.stack(b3),      # (17, 3*CP*W, CP*W), (17, CP*W)
                w1=jnp.stack(w1), b1=jnp.stack(b1))      # (20, CP*W, CP*W),   (20, CP*W)


# ----------------------------------------------------------------------------
# Fused Pallas kernel: the entire branch, all batch rows at once, no grid.
# ----------------------------------------------------------------------------
def _make_kernel(n_scpa, H, n_rows, cw):
    def kernel(x_ref, w3_ref, b3_ref, w1_ref, b1_ref, o_ref):
        x = x_ref[...]                                    # (M, CW) lane-dense plane

        rows = jax.lax.broadcasted_iota(jnp.int32, (n_rows, cw), 0)
        keep_m1 = (rows % H) != 0          # rows where a dy=-1 neighbor exists
        keep_p1 = (rows % H) != (H - 1)    # rows where a dy=+1 neighbor exists

        cur1 = {"i": 0}
        cur3 = {"i": 0}

        def mm(a, b):
            return jnp.dot(a, b, preferred_element_type=jnp.float32)

        def conv1x1(v):
            i = cur1["i"]; cur1["i"] = i + 1
            return mm(v, w1_ref[i]) + b1_ref[i]

        def conv3x3(v):
            i = cur3["i"]; cur3["i"] = i + 1
            # roll on the XLU + mask on the VPU (no shift matmuls); masks also zero
            # the rows that would leak across batch-element boundaries.
            v_m1 = jnp.where(keep_m1, pltpu.roll(v, shift=1, axis=0), 0.0)
            v_p1 = jnp.where(keep_p1, pltpu.roll(v, shift=n_rows - 1, axis=0), 0.0)
            vk = jnp.concatenate([v_m1, v, v_p1], axis=-1)      # (M, 3*CW), 128-aligned
            return mm(vk, w3_ref[i]) + b3_ref[i]                # single K-stacked dot

        def sigmoid(v):
            # exp on the EUP; exact reciprocal keeps the 1e-4 tolerance.
            return 1.0 / (1.0 + jnp.exp(-v))

        h = conv3x3(x)                                    # CoordConv conv (5 -> 5)
        for _ in range(n_scpa):                           # 5 fused SCPA blocks
            branch1 = conv3x3(conv1x1(h))                 # c1b1 -> c2b1
            b2 = conv1x1(h)                               # c1b2
            b2a = sigmoid(conv1x1(b2))                    # c2b2 + sigmoid
            b2b = conv3x3(b2)                             # c3b2
            merged = conv3x3(b2a * b2b) + branch1         # c4b2 + branch add
            h = conv1x1(merged) + h                       # final_conv + residual
        o_ref[...] = conv3x3(h)                           # closing 3x3 (padded 8 ch)

    return kernel


# ----------------------------------------------------------------------------
# Wrapper: coord channels, channel-pad, stack to (N*H, CP*W), single pallas_call.
# ----------------------------------------------------------------------------
def add_coord_channels(x):
    N, _, H, W = x.shape
    xx = (jnp.arange(W, dtype=jnp.float32) / max(W - 1, 1))[None, None, None, :]
    yy = (jnp.arange(H, dtype=jnp.float32) / max(H - 1, 1))[None, None, :, None]
    xx = jnp.broadcast_to(xx, (N, 1, H, W))
    yy = jnp.broadcast_to(yy, (N, 1, H, W))
    return jnp.concatenate([x, xx, yy], axis=1)


@jax.jit
def scpa_branch_pallas(x, packed):
    N, _, H, W = x.shape
    xc = add_coord_channels(x)                                     # (N, 5, H, W)
    xp = jnp.pad(xc, ((0, 0), (0, CP - xc.shape[1]), (0, 0), (0, 0)))
    xs = jnp.transpose(xp, (0, 2, 1, 3)).reshape(N * H, CP * W)    # (N*H, 128)

    w3, b3, w1, b1 = packed["w3"], packed["b3"], packed["w1"], packed["b1"]
    n_scpa = w1.shape[0] // 4
    cw = CP * W

    out = pl.pallas_call(
        _make_kernel(n_scpa, H, N * H, cw),
        out_shape=jax.ShapeDtypeStruct((N * H, cw), jnp.float32),
        in_specs=[pl.BlockSpec(memory_space=pltpu.MemorySpace.VMEM)] * 5,
        out_specs=pl.BlockSpec(memory_space=pltpu.MemorySpace.VMEM),
    )(xs, w3, b3, w1, b1)

    # lane-dense 8-channel slab -> (N, 3, H, W)
    return out.reshape(N, H, CP, W).transpose(0, 2, 1, 3)[:, :3]


# ----------------------------------------------------------------------------
# Pure-JAX reference (independent implementation, for the correctness check)
# ----------------------------------------------------------------------------
def conv_ref(x, w, b, padding):
    out = jax.lax.conv_general_dilated(
        x, w, window_strides=(1, 1),
        padding=[(padding, padding), (padding, padding)],
        dimension_numbers=("NCHW", "OIHW", "NCHW"))
    return out + b[None, :, None, None]


def scpa_ref(x, p):
    branch1 = conv_ref(conv_ref(x, p["c1b1_w"], p["c1b1_b"], 0),
                       p["c2b1_w"], p["c2b1_b"], 1)
    b2 = conv_ref(x, p["c1b2_w"], p["c1b2_b"], 0)
    b2a = jax.nn.sigmoid(conv_ref(b2, p["c2b2_w"], p["c2b2_b"], 0))
    b2b = conv_ref(b2, p["c3b2_w"], p["c3b2_b"], 1)
    branch2 = conv_ref(b2a * b2b, p["c4b2_w"], p["c4b2_b"], 1)
    out = branch2 + branch1
    return conv_ref(out, p["fc_w"], p["fc_b"], 0) + x


def scpa_branch_ref(x, params):
    xc = add_coord_channels(x)
    h = conv_ref(xc, params["coord_w"], params["coord_b"], 1)
    for i in range(5):
        h = scpa_ref(h, params["scpa"][i])
    return conv_ref(h, params["out_w"], params["out_b"], 1)


# ----------------------------------------------------------------------------
# Deterministic parameter init (shapes follow the PyTorch __init__)
# ----------------------------------------------------------------------------
def init_conv(key, cout, cin, k, scale=0.1):
    kw, kb = jax.random.split(key)
    w = scale * jax.random.normal(kw, (cout, cin, k, k), jnp.float32)
    b = scale * jax.random.normal(kb, (cout,), jnp.float32)
    return w, b


def init_params(key):
    keys = jax.random.split(key, 2 + 5 * 7)
    params = {}
    params["coord_w"], params["coord_b"] = init_conv(keys[0], 5, 5, 3)  # Conv2d(3+2, 5, 3)
    params["out_w"], params["out_b"] = init_conv(keys[1], 3, 5, 3)      # Conv2d(5, 3, 3)
    scpa_list = []
    ki = 2
    for _ in range(5):
        p = {}
        p["c1b1_w"], p["c1b1_b"] = init_conv(keys[ki + 0], 5, 5, 1)
        p["c2b1_w"], p["c2b1_b"] = init_conv(keys[ki + 1], 5, 5, 3)
        p["c1b2_w"], p["c1b2_b"] = init_conv(keys[ki + 2], 5, 5, 1)
        p["c2b2_w"], p["c2b2_b"] = init_conv(keys[ki + 3], 5, 5, 1)
        p["c3b2_w"], p["c3b2_b"] = init_conv(keys[ki + 4], 5, 5, 3)
        p["c4b2_w"], p["c4b2_b"] = init_conv(keys[ki + 5], 5, 5, 3)
        p["fc_w"], p["fc_b"] = init_conv(keys[ki + 6], 5, 5, 1)
        ki += 7
        scpa_list.append(p)
    params["scpa"] = scpa_list
    return params


if __name__ == "__main__":
    root = jax.random.PRNGKey(0)
    k_x, k_p = jax.random.split(root)
    x = jax.random.normal(k_x, (2, 3, 16, 16), jnp.float32)   # NCHW, like PyTorch
    params = init_params(k_p)

    # weight packing hoisted out of the per-call path: done once here.
    packed = jax.tree_util.tree_map(jax.block_until_ready, pack_params(params, W=16))

    out = jax.block_until_ready(scpa_branch_pallas(x, packed))

    ref = jax.block_until_ready(scpa_branch_ref(x, params))
    assert out.shape == (2, 3, 16, 16)
    assert jnp.allclose(out, ref, rtol=1e-4, atol=1e-4), (
        "mismatch vs reference: max abs err "
        f"{float(jnp.max(jnp.abs(out - ref)))}")

    print("KERNEL_OK")
</pallas_src>

<mosaic_0001>
module attributes {stable_mosaic.version = 11 : i64} {
  func.func @kernel(%arg0: memref<32x128xf32, #tpu.memory_space<vmem>>, %arg1: memref<17x384x128xf32, #tpu.memory_space<vmem>>, %arg2: memref<17x128xf32, #tpu.memory_space<vmem>>, %arg3: memref<20x128x128xf32, #tpu.memory_space<vmem>>, %arg4: memref<20x128xf32, #tpu.memory_space<vmem>>, %arg5: memref<32x128xf32, #tpu.memory_space<vmem>>) attributes {dimension_semantics = [], scalar_prefetch = 0 : i64, scratch_operands = 0 : i64, tpu.core_type = #tpu.core_type<tc>} {
    %c0 = arith.constant 0 : index
    %c0_0 = arith.constant 0 : index
    %0 = vector.load %arg0[%c0, %c0_0] : memref<32x128xf32, #tpu.memory_space<vmem>>, vector<32x128xf32>
    %1 = tpu.iota {dimensions = array<i32: 0>} : vector<32x128xi32>
    %c16_i32 = arith.constant 16 : i32
    %c0_i32 = arith.constant 0 : i32
    %2 = arith.cmpi eq, %c16_i32, %c0_i32 : i32
    %c1_i32 = arith.constant 1 : i32
    %3 = arith.select %2, %c1_i32, %c16_i32 : i32
    %4 = vector.broadcast %3 : i32 to vector<32x128xi32>
    %5 = arith.remsi %1, %4 : vector<32x128xi32>
    %c0_i32_1 = arith.constant 0 : i32
    %6 = vector.broadcast %c0_i32_1 : i32 to vector<32x128xi32>
    %7 = arith.cmpi ne, %5, %6 : vector<32x128xi32>
    %c0_i32_2 = arith.constant 0 : i32
    %8 = vector.broadcast %c0_i32_2 : i32 to vector<32x128xi32>
    %9 = arith.cmpi slt, %5, %8 : vector<32x128xi32>
    %c0_i32_3 = arith.constant 0 : i32
    %10 = arith.cmpi slt, %3, %c0_i32_3 : i32
    %11 = vector.broadcast %10 : i1 to vector<32x128xi1>
    %12 = vector.broadcast %11 : vector<32x128xi1> to vector<32x128xi1>
    %13 = arith.xori %9, %12 : vector<32x128xi1>
    %14 = arith.andi %13, %7 : vector<32x128xi1>
    %15 = vector.broadcast %3 : i32 to vector<32x128xi32>
    %16 = arith.addi %5, %15 : vector<32x128xi32>
    %17 = arith.select %14, %16, %5 : vector<32x128xi1>, vector<32x128xi32>
    %c0_i32_4 = arith.constant 0 : i32
    %18 = vector.broadcast %c0_i32_4 : i32 to vector<32x128xi32>
    %19 = arith.cmpi ne, %17, %18 : vector<32x128xi32>
    %c16_i32_5 = arith.constant 16 : i32
    %c0_i32_6 = arith.constant 0 : i32
    %20 = arith.cmpi eq, %c16_i32_5, %c0_i32_6 : i32
    %c1_i32_7 = arith.constant 1 : i32
    %21 = arith.select %20, %c1_i32_7, %c16_i32_5 : i32
    %22 = vector.broadcast %21 : i32 to vector<32x128xi32>
    %23 = arith.remsi %1, %22 : vector<32x128xi32>
    %c0_i32_8 = arith.constant 0 : i32
    %24 = vector.broadcast %c0_i32_8 : i32 to vector<32x128xi32>
    %25 = arith.cmpi ne, %23, %24 : vector<32x128xi32>
    %c0_i32_9 = arith.constant 0 : i32
    %26 = vector.broadcast %c0_i32_9 : i32 to vector<32x128xi32>
    %27 = arith.cmpi slt, %23, %26 : vector<32x128xi32>
    %c0_i32_10 = arith.constant 0 : i32
    %28 = arith.cmpi slt, %21, %c0_i32_10 : i32
    %29 = vector.broadcast %28 : i1 to vector<32x128xi1>
    %30 = vector.broadcast %29 : vector<32x128xi1> to vector<32x128xi1>
    %31 = arith.xori %27, %30 : vector<32x128xi1>
    %32 = arith.andi %31, %25 : vector<32x128xi1>
    %33 = vector.broadcast %21 : i32 to vector<32x128xi32>
    %34 = arith.addi %23, %33 : vector<32x128xi32>
    %35 = arith.select %32, %34, %23 : vector<32x128xi1>, vector<32x128xi32>
    %c15_i32 = arith.constant 15 : i32
    %36 = vector.broadcast %c15_i32 : i32 to vector<32x128xi32>
    %37 = arith.cmpi ne, %35, %36 : vector<32x128xi32>
    %c1_i32_11 = arith.constant 1 : i32
    %38 = tpu.dynamic_rotate %0 by %c1_i32_11 dim 0 : vector<32x128xf32>, i32 -> vector<32x128xf32>
    %cst = arith.constant 0.000000e+00 : f32
    %39 = vector.broadcast %cst : f32 to vector<32x128xf32>
    %40 = arith.select %19, %38, %39 : vector<32x128xi1>, vector<32x128xf32>
    %c31_i32 = arith.constant 31 : i32
    %41 = tpu.dynamic_rotate %0 by %c31_i32 dim 0 : vector<32x128xf32>, i32 -> vector<32x128xf32>
    %cst_12 = arith.constant 0.000000e+00 : f32
    %42 = vector.broadcast %cst_12 : f32 to vector<32x128xf32>
    %43 = arith.select %37, %41, %42 : vector<32x128xi1>, vector<32x128xf32>
    %44 = tpu.concatenate %40, %0, %43 in 1 : vector<32x128xf32>, vector<32x128xf32>, vector<32x128xf32> -> vector<32x384xf32>
    %c0_13 = arith.constant 0 : index
    %c0_14 = arith.constant 0 : index
    %c0_15 = arith.constant 0 : index
    %45 = vector.load %arg1[%c0_13, %c0_14, %c0_15] : memref<17x384x128xf32, #tpu.memory_space<vmem>>, vector<1x384x128xf32>
    %46 = vector.shape_cast %45 : vector<1x384x128xf32> to vector<384x128xf32>
    %cst_16 = arith.constant dense<0.000000e+00> : vector<32x128xf32>
    %47 = tpu.matmul %44, %46, %cst_16 {dimension_numbers = #tpu.dot_dimension_numbers<[1], [0], [0], [1], [0, 0, 1, 1], [], []>} : vector<32x384xf32>, vector<384x128xf32>, vector<32x128xf32> -> vector<32x128xf32>
    %c0_17 = arith.constant 0 : index
    %c0_18 = arith.constant 0 : index
    %48 = vector.load %arg2[%c0_17, %c0_18] : memref<17x128xf32, #tpu.memory_space<vmem>>, vector<1x128xf32>
    %49 = vector.shape_cast %48 : vector<1x128xf32> to vector<128xf32>
    %50 = vector.shape_cast %49 : vector<128xf32> to vector<1x128xf32>
    %51 = vector.broadcast %50 : vector<1x128xf32> to vector<32x128xf32>
    %52 = arith.addf %47, %51 : vector<32x128xf32>
    %c0_19 = arith.constant 0 : index
    %c0_20 = arith.constant 0 : index
    %c0_21 = arith.constant 0 : index
    %53 = vector.load %arg3[%c0_19, %c0_20, %c0_21] : memref<20x128x128xf32, #tpu.memory_space<vmem>>, vector<1x128x128xf32>
    %54 = vector.shape_cast %53 : vector<1x128x128xf32> to vector<128x128xf32>
    %cst_22 = arith.constant dense<0.000000e+00> : vector<32x128xf32>
    %55 = tpu.matmul %52, %54, %cst_22 {dimension_numbers = #tpu.dot_dimension_numbers<[1], [0], [0], [1], [0, 0, 1, 1], [], []>} : vector<32x128xf32>, vector<128x128xf32>, vector<32x128xf32> -> vector<32x128xf32>
    %c0_23 = arith.constant 0 : index
    %c0_24 = arith.constant 0 : index
    %56 = vector.load %arg4[%c0_23, %c0_24] : memref<20x128xf32, #tpu.memory_space<vmem>>, vector<1x128xf32>
    %57 = vector.shape_cast %56 : vector<1x128xf32> to vector<128xf32>
    %58 = vector.shape_cast %57 : vector<128xf32> to vector<1x128xf32>
    %59 = vector.broadcast %58 : vector<1x128xf32> to vector<32x128xf32>
    %60 = arith.addf %55, %59 : vector<32x128xf32>
    %c1_i32_25 = arith.constant 1 : i32
    %61 = tpu.dynamic_rotate %60 by %c1_i32_25 dim 0 : vector<32x128xf32>, i32 -> vector<32x128xf32>
    %cst_26 = arith.constant 0.000000e+00 : f32
    %62 = vector.broadcast %cst_26 : f32 to vector<32x128xf32>
    %63 = arith.select %19, %61, %62 : vector<32x128xi1>, vector<32x128xf32>
    %c31_i32_27 = arith.constant 31 : i32
    %64 = tpu.dynamic_rotate %60 by %c31_i32_27 dim 0 : vector<32x128xf32>, i32 -> vector<32x128xf32>
    %cst_28 = arith.constant 0.000000e+00 : f32
    %65 = vector.broadcast %cst_28 : f32 to vector<32x128xf32>
    %66 = arith.select %37, %64, %65 : vector<32x128xi1>, vector<32x128xf32>
    %67 = tpu.concatenate %63, %60, %66 in 1 : vector<32x128xf32>, vector<32x128xf32>, vector<32x128xf32> -> vector<32x384xf32>
    %c1 = arith.constant 1 : index
    %c0_29 = arith.constant 0 : index
    %c0_30 = arith.constant 0 : index
    %68 = vector.load %arg1[%c1, %c0_29, %c0_30] : memref<17x384x128xf32, #tpu.memory_space<vmem>>, vector<1x384x128xf32>
    %69 = vector.shape_cast %68 : vector<1x384x128xf32> to vector<384x128xf32>
    %cst_31 = arith.constant dense<0.000000e+00> : vector<32x128xf32>
    %70 = tpu.matmul %67, %69, %cst_31 {dimension_numbers = #tpu.dot_dimension_numbers<[1], [0], [0], [1], [0, 0, 1, 1], [], []>} : vector<32x384xf32>, vector<384x128xf32>, vector<32x128xf32> -> vector<32x128xf32>
    %c1_32 = arith.constant 1 : index
    %c0_33 = arith.constant 0 : index
    %71 = vector.load %arg2[%c1_32, %c0_33] : memref<17x128xf32, #tpu.memory_space<vmem>>, vector<1x128xf32>
    %72 = vector.shape_cast %71 : vector<1x128xf32> to vector<128xf32>
    %73 = vector.shape_cast %72 : vector<128xf32> to vector<1x128xf32>
    %74 = vector.broadcast %73 : vector<1x128xf32> to vector<32x128xf32>
    %75 = arith.addf %70, %74 : vector<32x128xf32>
    %c1_34 = arith.constant 1 : index
    %c0_35 = arith.constant 0 : index
    %c0_36 = arith.constant 0 : index
    %76 = vector.load %arg3[%c1_34, %c0_35, %c0_36] : memref<20x128x128xf32, #tpu.memory_space<vmem>>, vector<1x128x128xf32>
    %77 = vector.shape_cast %76 : vector<1x128x128xf32> to vector<128x128xf32>
    %cst_37 = arith.constant dense<0.000000e+00> : vector<32x128xf32>
    %78 = tpu.matmul %52, %77, %cst_37 {dimension_numbers = #tpu.dot_dimension_numbers<[1], [0], [0], [1], [0, 0, 1, 1], [], []>} : vector<32x128xf32>, vector<128x128xf32>, vector<32x128xf32> -> vector<32x128xf32>
    %c1_38 = arith.constant 1 : index
    %c0_39 = arith.constant 0 : index
    %79 = vector.load %arg4[%c1_38, %c0_39] : memref<20x128xf32, #tpu.memory_space<vmem>>, vector<1x128xf32>
    %80 = vector.shape_cast %79 : vector<1x128xf32> to vector<128xf32>
    %81 = vector.shape_cast %80 : vector<128xf32> to vector<1x128xf32>
    %82 = vector.broadcast %81 : vector<1x128xf32> to vector<32x128xf32>
    %83 = arith.addf %78, %82 : vector<32x128xf32>
    %c2 = arith.constant 2 : index
    %c0_40 = arith.constant 0 : index
    %c0_41 = arith.constant 0 : index
    %84 = vector.load %arg3[%c2, %c0_40, %c0_41] : memref<20x128x128xf32, #tpu.memory_space<vmem>>, vector<1x128x128xf32>
    %85 = vector.shape_cast %84 : vector<1x128x128xf32> to vector<128x128xf32>
    %cst_42 = arith.constant dense<0.000000e+00> : vector<32x128xf32>
    %86 = tpu.matmul %83, %85, %cst_42 {dimension_numbers = #tpu.dot_dimension_numbers<[1], [0], [0], [1], [0, 0, 1, 1], [], []>} : vector<32x128xf32>, vector<128x128xf32>, vector<32x128xf32> -> vector<32x128xf32>
    %c2_43 = arith.constant 2 : index
    %c0_44 = arith.constant 0 : index
    %87 = vector.load %arg4[%c2_43, %c0_44] : memref<20x128xf32, #tpu.memory_space<vmem>>, vector<1x128xf32>
    %88 = vector.shape_cast %87 : vector<1x128xf32> to vector<128xf32>
    %89 = vector.shape_cast %88 : vector<128xf32> to vector<1x128xf32>
    %90 = vector.broadcast %89 : vector<1x128xf32> to vector<32x128xf32>
    %91 = arith.addf %86, %90 : vector<32x128xf32>
    %cst_45 = arith.constant 0.000000e+00 : f32
    %92 = vector.broadcast %cst_45 : f32 to vector<32x128xf32>
    %93 = arith.subf %92, %91 : vector<32x128xf32>
    %94 = math.exp %93 : vector<32x128xf32>
    %cst_46 = arith.constant 1.000000e+00 : f32
    %95 = vector.broadcast %cst_46 : f32 to vector<32x128xf32>
    %96 = arith.addf %95, %94 : vector<32x128xf32>
    %cst_47 = arith.constant 1.000000e+00 : f32
    %97 = vector.broadcast %cst_47 : f32 to vector<32x128xf32>
    %98 = arith.divf %97, %96 : vector<32x128xf32>
    %c1_i32_48 = arith.constant 1 : i32
    %99 = tpu.dynamic_rotate %83 by %c1_i32_48 dim 0 : vector<32x128xf32>, i32 -> vector<32x128xf32>
    %cst_49 = arith.constant 0.000000e+00 : f32
    %100 = vector.broadcast %cst_49 : f32 to vector<32x128xf32>
    %101 = arith.select %19, %99, %100 : vector<32x128xi1>, vector<32x128xf32>
    %c31_i32_50 = arith.constant 31 : i32
    %102 = tpu.dynamic_rotate %83 by %c31_i32_50 dim 0 : vector<32x128xf32>, i32 -> vector<32x128xf32>
    %cst_51 = arith.constant 0.000000e+00 : f32
    %103 = vector.broadcast %cst_51 : f32 to vector<32x128xf32>
    %104 = arith.select %37, %102, %103 : vector<32x128xi1>, vector<32x128xf32>
    %105 = tpu.concatenate %101, %83, %104 in 1 : vector<32x128xf32>, vector<32x128xf32>, vector<32x128xf32> -> vector<32x384xf32>
    %c2_52 = arith.constant 2 : index
    %c0_53 = arith.constant 0 : index
    %c0_54 = arith.constant 0 : index
    %106 = vector.load %arg1[%c2_52, %c0_53, %c0_54] : memref<17x384x128xf32, #tpu.memory_space<vmem>>, vector<1x384x128xf32>
    %107 = vector.shape_cast %106 : vector<1x384x128xf32> to vector<384x128xf32>
    %cst_55 = arith.constant dense<0.000000e+00> : vector<32x128xf32>
    %108 = tpu.matmul %105, %107, %cst_55 {dimension_numbers = #tpu.dot_dimension_numbers<[1], [0], [0], [1], [0, 0, 1, 1], [], []>} : vector<32x384xf32>, vector<384x128xf32>, vector<32x128xf32> -> vector<32x128xf32>
    %c2_56 = arith.constant 2 : index
    %c0_57 = arith.constant 0 : index
    %109 = vector.load %arg2[%c2_56, %c0_57] : memref<17x128xf32, #tpu.memory_space<vmem>>, vector<1x128xf32>
    %110 = vector.shape_cast %109 : vector<1x128xf32> to vector<128xf32>
    %111 = vector.shape_cast %110 : vector<128xf32> to vector<1x128xf32>
    %112 = vector.broadcast %111 : vector<1x128xf32> to vector<32x128xf32>
    %113 = arith.addf %108, %112 : vector<32x128xf32>
    %114 = arith.mulf %98, %113 : vector<32x128xf32>
    %c1_i32_58 = arith.constant 1 : i32
    %115 = tpu.dynamic_rotate %114 by %c1_i32_58 dim 0 : vector<32x128xf32>, i32 -> vector<32x128xf32>
    %cst_59 = arith.constant 0.000000e+00 : f32
    %116 = vector.broadcast %cst_59 : f32 to vector<32x128xf32>
    %117 = arith.select %19, %115, %116 : vector<32x128xi1>, vector<32x128xf32>
    %c31_i32_60 = arith.constant 31 : i32
    %118 = tpu.dynamic_rotate %114 by %c31_i32_60 dim 0 : vector<32x128xf32>, i32 -> vector<32x128xf32>
    %cst_61 = arith.constant 0.000000e+00 : f32
    %119 = vector.broadcast %cst_61 : f32 to vector<32x128xf32>
    %120 = arith.select %37, %118, %119 : vector<32x128xi1>, vector<32x128xf32>
    %121 = tpu.concatenate %117, %114, %120 in 1 : vector<32x128xf32>, vector<32x128xf32>, vector<32x128xf32> -> vector<32x384xf32>
    %c3 = arith.constant 3 : index
    %c0_62 = arith.constant 0 : index
    %c0_63 = arith.constant 0 : index
    %122 = vector.load %arg1[%c3, %c0_62, %c0_63] : memref<17x384x128xf32, #tpu.memory_space<vmem>>, vector<1x384x128xf32>
    %123 = vector.shape_cast %122 : vector<1x384x128xf32> to vector<384x128xf32>
    %cst_64 = arith.constant dense<0.000000e+00> : vector<32x128xf32>
    %124 = tpu.matmul %121, %123, %cst_64 {dimension_numbers = #tpu.dot_dimension_numbers<[1], [0], [0], [1], [0, 0, 1, 1], [], []>} : vector<32x384xf32>, vector<384x128xf32>, vector<32x128xf32> -> vector<32x128xf32>
    %c3_65 = arith.constant 3 : index
    %c0_66 = arith.constant 0 : index
    %125 = vector.load %arg2[%c3_65, %c0_66] : memref<17x128xf32, #tpu.memory_space<vmem>>, vector<1x128xf32>
    %126 = vector.shape_cast %125 : vector<1x128xf32> to vector<128xf32>
    %127 = vector.shape_cast %126 : vector<128xf32> to vector<1x128xf32>
    %128 = vector.broadcast %127 : vector<1x128xf32> to vector<32x128xf32>
    %129 = arith.addf %124, %128 : vector<32x128xf32>
    %130 = arith.addf %129, %75 : vector<32x128xf32>
    %c3_67 = arith.constant 3 : index
    %c0_68 = arith.constant 0 : index
    %c0_69 = arith.constant 0 : index
    %131 = vector.load %arg3[%c3_67, %c0_68, %c0_69] : memref<20x128x128xf32, #tpu.memory_space<vmem>>, vector<1x128x128xf32>
    %132 = vector.shape_cast %131 : vector<1x128x128xf32> to vector<128x128xf32>
    %cst_70 = arith.constant dense<0.000000e+00> : vector<32x128xf32>
    %133 = tpu.matmul %130, %132, %cst_70 {dimension_numbers = #tpu.dot_dimension_numbers<[1], [0], [0], [1], [0, 0, 1, 1], [], []>} : vector<32x128xf32>, vector<128x128xf32>, vector<32x128xf32> -> vector<32x128xf32>
    %c3_71 = arith.constant 3 : index
    %c0_72 = arith.constant 0 : index
    %134 = vector.load %arg4[%c3_71, %c0_72] : memref<20x128xf32, #tpu.memory_space<vmem>>, vector<1x128xf32>
    %135 = vector.shape_cast %134 : vector<1x128xf32> to vector<128xf32>
    %136 = vector.shape_cast %135 : vector<128xf32> to vector<1x128xf32>
    %137 = vector.broadcast %136 : vector<1x128xf32> to vector<32x128xf32>
    %138 = arith.addf %133, %137 : vector<32x128xf32>
    %139 = arith.addf %138, %52 : vector<32x128xf32>
    %c4 = arith.constant 4 : index
    %c0_73 = arith.constant 0 : index
    %c0_74 = arith.constant 0 : index
    %140 = vector.load %arg3[%c4, %c0_73, %c0_74] : memref<20x128x128xf32, #tpu.memory_space<vmem>>, vector<1x128x128xf32>
    %141 = vector.shape_cast %140 : vector<1x128x128xf32> to vector<128x128xf32>
    %cst_75 = arith.constant dense<0.000000e+00> : vector<32x128xf32>
    %142 = tpu.matmul %139, %141, %cst_75 {dimension_numbers = #tpu.dot_dimension_numbers<[1], [0], [0], [1], [0, 0, 1, 1], [], []>} : vector<32x128xf32>, vector<128x128xf32>, vector<32x128xf32> -> vector<32x128xf32>
    %c4_76 = arith.constant 4 : index
    %c0_77 = arith.constant 0 : index
    %143 = vector.load %arg4[%c4_76, %c0_77] : memref<20x128xf32, #tpu.memory_space<vmem>>, vector<1x128xf32>
    %144 = vector.shape_cast %143 : vector<1x128xf32> to vector<128xf32>
    %145 = vector.shape_cast %144 : vector<128xf32> to vector<1x128xf32>
    %146 = vector.broadcast %145 : vector<1x128xf32> to vector<32x128xf32>
    %147 = arith.addf %142, %146 : vector<32x128xf32>
    %c1_i32_78 = arith.constant 1 : i32
    %148 = tpu.dynamic_rotate %147 by %c1_i32_78 dim 0 : vector<32x128xf32>, i32 -> vector<32x128xf32>
    %cst_79 = arith.constant 0.000000e+00 : f32
    %149 = vector.broadcast %cst_79 : f32 to vector<32x128xf32>
    %150 = arith.select %19, %148, %149 : vector<32x128xi1>, vector<32x128xf32>
    %c31_i32_80 = arith.constant 31 : i32
    %151 = tpu.dynamic_rotate %147 by %c31_i32_80 dim 0 : vector<32x128xf32>, i32 -> vector<32x128xf32>
    %cst_81 = arith.constant 0.000000e+00 : f32
    %152 = vector.broadcast %cst_81 : f32 to vector<32x128xf32>
    %153 = arith.select %37, %151, %152 : vector<32x128xi1>, vector<32x128xf32>
    %154 = tpu.concatenate %150, %147, %153 in 1 : vector<32x128xf32>, vector<32x128xf32>, vector<32x128xf32> -> vector<32x384xf32>
    %c4_82 = arith.constant 4 : index
    %c0_83 = arith.constant 0 : index
    %c0_84 = arith.constant 0 : index
    %155 = vector.load %arg1[%c4_82, %c0_83, %c0_84] : memref<17x384x128xf32, #tpu.memory_space<vmem>>, vector<1x384x128xf32>
    %156 = vector.shape_cast %155 : vector<1x384x128xf32> to vector<384x128xf32>
    %cst_85 = arith.constant dense<0.000000e+00> : vector<32x128xf32>
    %157 = tpu.matmul %154, %156, %cst_85 {dimension_numbers = #tpu.dot_dimension_numbers<[1], [0], [0], [1], [0, 0, 1, 1], [], []>} : vector<32x384xf32>, vector<384x128xf32>, vector<32x128xf32> -> vector<32x128xf32>
    %c4_86 = arith.constant 4 : index
    %c0_87 = arith.constant 0 : index
    %158 = vector.load %arg2[%c4_86, %c0_87] : memref<17x128xf32, #tpu.memory_space<vmem>>, vector<1x128xf32>
    %159 = vector.shape_cast %158 : vector<1x128xf32> to vector<128xf32>
    %160 = vector.shape_cast %159 : vector<128xf32> to vector<1x128xf32>
    %161 = vector.broadcast %160 : vector<1x128xf32> to vector<32x128xf32>
    %162 = arith.addf %157, %161 : vector<32x128xf32>
    %c5 = arith.constant 5 : index
    %c0_88 = arith.constant 0 : index
    %c0_89 = arith.constant 0 : index
    %163 = vector.load %arg3[%c5, %c0_88, %c0_89] : memref<20x128x128xf32, #tpu.memory_space<vmem>>, vector<1x128x128xf32>
    %164 = vector.shape_cast %163 : vector<1x128x128xf32> to vector<128x128xf32>
    %cst_90 = arith.constant dense<0.000000e+00> : vector<32x128xf32>
    %165 = tpu.matmul %139, %164, %cst_90 {dimension_numbers = #tpu.dot_dimension_numbers<[1], [0], [0], [1], [0, 0, 1, 1], [], []>} : vector<32x128xf32>, vector<128x128xf32>, vector<32x128xf32> -> vector<32x128xf32>
    %c5_91 = arith.constant 5 : index
    %c0_92 = arith.constant 0 : index
    %166 = vector.load %arg4[%c5_91, %c0_92] : memref<20x128xf32, #tpu.memory_space<vmem>>, vector<1x128xf32>
    %167 = vector.shape_cast %166 : vector<1x128xf32> to vector<128xf32>
    %168 = vector.shape_cast %167 : vector<128xf32> to vector<1x128xf32>
    %169 = vector.broadcast %168 : vector<1x128xf32> to vector<32x128xf32>
    %170 = arith.addf %165, %169 : vector<32x128xf32>
    %c6 = arith.constant 6 : index
    %c0_93 = arith.constant 0 : index
    %c0_94 = arith.constant 0 : index
    %171 = vector.load %arg3[%c6, %c0_93, %c0_94] : memref<20x128x128xf32, #tpu.memory_space<vmem>>, vector<1x128x128xf32>
    %172 = vector.shape_cast %171 : vector<1x128x128xf32> to vector<128x128xf32>
    %cst_95 = arith.constant dense<0.000000e+00> : vector<32x128xf32>
    %173 = tpu.matmul %170, %172, %cst_95 {dimension_numbers = #tpu.dot_dimension_numbers<[1], [0], [0], [1], [0, 0, 1, 1], [], []>} : vector<32x128xf32>, vector<128x128xf32>, vector<32x128xf32> -> vector<32x128xf32>
    %c6_96 = arith.constant 6 : index
    %c0_97 = arith.constant 0 : index
    %174 = vector.load %arg4[%c6_96, %c0_97] : memref<20x128xf32, #tpu.memory_space<vmem>>, vector<1x128xf32>
    %175 = vector.shape_cast %174 : vector<1x128xf32> to vector<128xf32>
    %176 = vector.shape_cast %175 : vector<128xf32> to vector<1x128xf32>
    %177 = vector.broadcast %176 : vector<1x128xf32> to vector<32x128xf32>
    %178 = arith.addf %173, %177 : vector<32x128xf32>
    %cst_98 = arith.constant 0.000000e+00 : f32
    %179 = vector.broadcast %cst_98 : f32 to vector<32x128xf32>
    %180 = arith.subf %179, %178 : vector<32x128xf32>
    %181 = math.exp %180 : vector<32x128xf32>
    %cst_99 = arith.constant 1.000000e+00 : f32
    %182 = vector.broadcast %cst_99 : f32 to vector<32x128xf32>
    %183 = arith.addf %182, %181 : vector<32x128xf32>
    %cst_100 = arith.constant 1.000000e+00 : f32
    %184 = vector.broadcast %cst_100 : f32 to vector<32x128xf32>
    %185 = arith.divf %184, %183 : vector<32x128xf32>
    %c1_i32_101 = arith.constant 1 : i32
    %186 = tpu.dynamic_rotate %170 by %c1_i32_101 dim 0 : vector<32x128xf32>, i32 -> vector<32x128xf32>
    %cst_102 = arith.constant 0.000000e+00 : f32
    %187 = vector.broadcast %cst_102 : f32 to vector<32x128xf32>
    %188 = arith.select %19, %186, %187 : vector<32x128xi1>, vector<32x128xf32>
    %c31_i32_103 = arith.constant 31 : i32
    %189 = tpu.dynamic_rotate %170 by %c31_i32_103 dim 0 : vector<32x128xf32>, i32 -> vector<32x128xf32>
    %cst_104 = arith.constant 0.000000e+00 : f32
    %190 = vector.broadcast %cst_104 : f32 to vector<32x128xf32>
    %191 = arith.select %37, %189, %190 : vector<32x128xi1>, vector<32x128xf32>
    %192 = tpu.concatenate %188, %170, %191 in 1 : vector<32x128xf32>, vector<32x128xf32>, vector<32x128xf32> -> vector<32x384xf32>
    %c5_105 = arith.constant 5 : index
    %c0_106 = arith.constant 0 : index
    %c0_107 = arith.constant 0 : index
    %193 = vector.load %arg1[%c5_105, %c0_106, %c0_107] : memref<17x384x128xf32, #tpu.memory_space<vmem>>, vector<1x384x128xf32>
    %194 = vector.shape_cast %193 : vector<1x384x128xf32> to vector<384x128xf32>
    %cst_108 = arith.constant dense<0.000000e+00> : vector<32x128xf32>
    %195 = tpu.matmul %192, %194, %cst_108 {dimension_numbers = #tpu.dot_dimension_numbers<[1], [0], [0], [1], [0, 0, 1, 1], [], []>} : vector<32x384xf32>, vector<384x128xf32>, vector<32x128xf32> -> vector<32x128xf32>
    %c5_109 = arith.constant 5 : index
    %c0_110 = arith.constant 0 : index
    %196 = vector.load %arg2[%c5_109, %c0_110] : memref<17x128xf32, #tpu.memory_space<vmem>>, vector<1x128xf32>
    %197 = vector.shape_cast %196 : vector<1x128xf32> to vector<128xf32>
    %198 = vector.shape_cast %197 : vector<128xf32> to vector<1x128xf32>
    %199 = vector.broadcast %198 : vector<1x128xf32> to vector<32x128xf32>
    %200 = arith.addf %195, %199 : vector<32x128xf32>
    %201 = arith.mulf %185, %200 : vector<32x128xf32>
    %c1_i32_111 = arith.constant 1 : i32
    %202 = tpu.dynamic_rotate %201 by %c1_i32_111 dim 0 : vector<32x128xf32>, i32 -> vector<32x128xf32>
    %cst_112 = arith.constant 0.000000e+00 : f32
    %203 = vector.broadcast %cst_112 : f32 to vector<32x128xf32>
    %204 = arith.select %19, %202, %203 : vector<32x128xi1>, vector<32x128xf32>
    %c31_i32_113 = arith.constant 31 : i32
    %205 = tpu.dynamic_rotate %201 by %c31_i32_113 dim 0 : vector<32x128xf32>, i32 -> vector<32x128xf32>
    %cst_114 = arith.constant 0.000000e+00 : f32
    %206 = vector.broadcast %cst_114 : f32 to vector<32x128xf32>
    %207 = arith.select %37, %205, %206 : vector<32x128xi1>, vector<32x128xf32>
    %208 = tpu.concatenate %204, %201, %207 in 1 : vector<32x128xf32>, vector<32x128xf32>, vector<32x128xf32> -> vector<32x384xf32>
    %c6_115 = arith.constant 6 : index
    %c0_116 = arith.constant 0 : index
    %c0_117 = arith.constant 0 : index
    %209 = vector.load %arg1[%c6_115, %c0_116, %c0_117] : memref<17x384x128xf32, #tpu.memory_space<vmem>>, vector<1x384x128xf32>
    %210 = vector.shape_cast %209 : vector<1x384x128xf32> to vector<384x128xf32>
    %cst_118 = arith.constant dense<0.000000e+00> : vector<32x128xf32>
    %211 = tpu.matmul %208, %210, %cst_118 {dimension_numbers = #tpu.dot_dimension_numbers<[1], [0], [0], [1], [0, 0, 1, 1], [], []>} : vector<32x384xf32>, vector<384x128xf32>, vector<32x128xf32> -> vector<32x128xf32>
    %c6_119 = arith.constant 6 : index
    %c0_120 = arith.constant 0 : index
    %212 = vector.load %arg2[%c6_119, %c0_120] : memref<17x128xf32, #tpu.memory_space<vmem>>, vector<1x128xf32>
    %213 = vector.shape_cast %212 : vector<1x128xf32> to vector<128xf32>
    %214 = vector.shape_cast %213 : vector<128xf32> to vector<1x128xf32>
    %215 = vector.broadcast %214 : vector<1x128xf32> to vector<32x128xf32>
    %216 = arith.addf %211, %215 : vector<32x128xf32>
    %217 = arith.addf %216, %162 : vector<32x128xf32>
    %c7 = arith.constant 7 : index
    %c0_121 = arith.constant 0 : index
    %c0_122 = arith.constant 0 : index
    %218 = vector.load %arg3[%c7, %c0_121, %c0_122] : memref<20x128x128xf32, #tpu.memory_space<vmem>>, vector<1x128x128xf32>
    %219 = vector.shape_cast %218 : vector<1x128x128xf32> to vector<128x128xf32>
    %cst_123 = arith.constant dense<0.000000e+00> : vector<32x128xf32>
    %220 = tpu.matmul %217, %219, %cst_123 {dimension_numbers = #tpu.dot_dimension_numbers<[1], [0], [0], [1], [0, 0, 1, 1], [], []>} : vector<32x128xf32>, vector<128x128xf32>, vector<32x128xf32> -> vector<32x128xf32>
    %c7_124 = arith.constant 7 : index
    %c0_125 = arith.constant 0 : index
    %221 = vector.load %arg4[%c7_124, %c0_125] : memref<20x128xf32, #tpu.memory_space<vmem>>, vector<1x128xf32>
    %222 = vector.shape_cast %221 : vector<1x128xf32> to vector<128xf32>
    %223 = vector.shape_cast %222 : vector<128xf32> to vector<1x128xf32>
    %224 = vector.broadcast %223 : vector<1x128xf32> to vector<32x128xf32>
    %225 = arith.addf %220, %224 : vector<32x128xf32>
    %226 = arith.addf %225, %139 : vector<32x128xf32>
    %c8 = arith.constant 8 : index
    %c0_126 = arith.constant 0 : index
    %c0_127 = arith.constant 0 : index
    %227 = vector.load %arg3[%c8, %c0_126, %c0_127] : memref<20x128x128xf32, #tpu.memory_space<vmem>>, vector<1x128x128xf32>
    %228 = vector.shape_cast %227 : vector<1x128x128xf32> to vector<128x128xf32>
    %cst_128 = arith.constant dense<0.000000e+00> : vector<32x128xf32>
    %229 = tpu.matmul %226, %228, %cst_128 {dimension_numbers = #tpu.dot_dimension_numbers<[1], [0], [0], [1], [0, 0, 1, 1], [], []>} : vector<32x128xf32>, vector<128x128xf32>, vector<32x128xf32> -> vector<32x128xf32>
    %c8_129 = arith.constant 8 : index
    %c0_130 = arith.constant 0 : index
    %230 = vector.load %arg4[%c8_129, %c0_130] : memref<20x128xf32, #tpu.memory_space<vmem>>, vector<1x128xf32>
    %231 = vector.shape_cast %230 : vector<1x128xf32> to vector<128xf32>
    %232 = vector.shape_cast %231 : vector<128xf32> to vector<1x128xf32>
    %233 = vector.broadcast %232 : vector<1x128xf32> to vector<32x128xf32>
    %234 = arith.addf %229, %233 : vector<32x128xf32>
    %c1_i32_131 = arith.constant 1 : i32
    %235 = tpu.dynamic_rotate %234 by %c1_i32_131 dim 0 : vector<32x128xf32>, i32 -> vector<32x128xf32>
    %cst_132 = arith.constant 0.000000e+00 : f32
    %236 = vector.broadcast %cst_132 : f32 to vector<32x128xf32>
    %237 = arith.select %19, %235, %236 : vector<32x128xi1>, vector<32x128xf32>
    %c31_i32_133 = arith.constant 31 : i32
    %238 = tpu.dynamic_rotate %234 by %c31_i32_133 dim 0 : vector<32x128xf32>, i32 -> vector<32x128xf32>
    %cst_134 = arith.constant 0.000000e+00 : f32
    %239 = vector.broadcast %cst_134 : f32 to vector<32x128xf32>
    %240 = arith.select %37, %238, %239 : vector<32x128xi1>, vector<32x128xf32>
    %241 = tpu.concatenate %237, %234, %240 in 1 : vector<32x128xf32>, vector<32x128xf32>, vector<32x128xf32> -> vector<32x384xf32>
    %c7_135 = arith.constant 7 : index
    %c0_136 = arith.constant 0 : index
    %c0_137 = arith.constant 0 : index
    %242 = vector.load %arg1[%c7_135, %c0_136, %c0_137] : memref<17x384x128xf32, #tpu.memory_space<vmem>>, vector<1x384x128xf32>
    %243 = vector.shape_cast %242 : vector<1x384x128xf32> to vector<384x128xf32>
    %cst_138 = arith.constant dense<0.000000e+00> : vector<32x128xf32>
    %244 = tpu.matmul %241, %243, %cst_138 {dimension_numbers = #tpu.dot_dimension_numbers<[1], [0], [0], [1], [0, 0, 1, 1], [], []>} : vector<32x384xf32>, vector<384x128xf32>, vector<32x128xf32> -> vector<32x128xf32>
    %c7_139 = arith.constant 7 : index
    %c0_140 = arith.constant 0 : index
    %245 = vector.load %arg2[%c7_139, %c0_140] : memref<17x128xf32, #tpu.memory_space<vmem>>, vector<1x128xf32>
    %246 = vector.shape_cast %245 : vector<1x128xf32> to vector<128xf32>
    %247 = vector.shape_cast %246 : vector<128xf32> to vector<1x128xf32>
    %248 = vector.broadcast %247 : vector<1x128xf32> to vector<32x128xf32>
    %249 = arith.addf %244, %248 : vector<32x128xf32>
    %c9 = arith.constant 9 : index
    %c0_141 = arith.constant 0 : index
    %c0_142 = arith.constant 0 : index
    %250 = vector.load %arg3[%c9, %c0_141, %c0_142] : memref<20x128x128xf32, #tpu.memory_space<vmem>>, vector<1x128x128xf32>
    %251 = vector.shape_cast %250 : vector<1x128x128xf32> to vector<128x128xf32>
    %cst_143 = arith.constant dense<0.000000e+00> : vector<32x128xf32>
    %252 = tpu.matmul %226, %251, %cst_143 {dimension_numbers = #tpu.dot_dimension_numbers<[1], [0], [0], [1], [0, 0, 1, 1], [], []>} : vector<32x128xf32>, vector<128x128xf32>, vector<32x128xf32> -> vector<32x128xf32>
    %c9_144 = arith.constant 9 : index
    %c0_145 = arith.constant 0 : index
    %253 = vector.load %arg4[%c9_144, %c0_145] : memref<20x128xf32, #tpu.memory_space<vmem>>, vector<1x128xf32>
    %254 = vector.shape_cast %253 : vector<1x128xf32> to vector<128xf32>
    %255 = vector.shape_cast %254 : vector<128xf32> to vector<1x128xf32>
    %256 = vector.broadcast %255 : vector<1x128xf32> to vector<32x128xf32>
    %257 = arith.addf %252, %256 : vector<32x128xf32>
    %c10 = arith.constant 10 : index
    %c0_146 = arith.constant 0 : index
    %c0_147 = arith.constant 0 : index
    %258 = vector.load %arg3[%c10, %c0_146, %c0_147] : memref<20x128x128xf32, #tpu.memory_space<vmem>>, vector<1x128x128xf32>
    %259 = vector.shape_cast %258 : vector<1x128x128xf32> to vector<128x128xf32>
    %cst_148 = arith.constant dense<0.000000e+00> : vector<32x128xf32>
    %260 = tpu.matmul %257, %259, %cst_148 {dimension_numbers = #tpu.dot_dimension_numbers<[1], [0], [0], [1], [0, 0, 1, 1], [], []>} : vector<32x128xf32>, vector<128x128xf32>, vector<32x128xf32> -> vector<32x128xf32>
    %c10_149 = arith.constant 10 : index
    %c0_150 = arith.constant 0 : index
    %261 = vector.load %arg4[%c10_149, %c0_150] : memref<20x128xf32, #tpu.memory_space<vmem>>, vector<1x128xf32>
    %262 = vector.shape_cast %261 : vector<1x128xf32> to vector<128xf32>
    %263 = vector.shape_cast %262 : vector<128xf32> to vector<1x128xf32>
    %264 = vector.broadcast %263 : vector<1x128xf32> to vector<32x128xf32>
    %265 = arith.addf %260, %264 : vector<32x128xf32>
    %cst_151 = arith.constant 0.000000e+00 : f32
    %266 = vector.broadcast %cst_151 : f32 to vector<32x128xf32>
    %267 = arith.subf %266, %265 : vector<32x128xf32>
    %268 = math.exp %267 : vector<32x128xf32>
    %cst_152 = arith.constant 1.000000e+00 : f32
    %269 = vector.broadcast %cst_152 : f32 to vector<32x128xf32>
    %270 = arith.addf %269, %268 : vector<32x128xf32>
    %cst_153 = arith.constant 1.000000e+00 : f32
    %271 = vector.broadcast %cst_153 : f32 to vector<32x128xf32>
    %272 = arith.divf %271, %270 : vector<32x128xf32>
    %c1_i32_154 = arith.constant 1 : i32
    %273 = tpu.dynamic_rotate %257 by %c1_i32_154 dim 0 : vector<32x128xf32>, i32 -> vector<32x128xf32>
    %cst_155 = arith.constant 0.000000e+00 : f32
    %274 = vector.broadcast %cst_155 : f32 to vector<32x128xf32>
    %275 = arith.select %19, %273, %274 : vector<32x128xi1>, vector<32x128xf32>
    %c31_i32_156 = arith.constant 31 : i32
    %276 = tpu.dynamic_rotate %257 by %c31_i32_156 dim 0 : vector<32x128xf32>, i32 -> vector<32x128xf32>
    %cst_157 = arith.constant 0.000000e+00 : f32
    %277 = vector.broadcast %cst_157 : f32 to vector<32x128xf32>
    %278 = arith.select %37, %276, %277 : vector<32x128xi1>, vector<32x128xf32>
    %279 = tpu.concatenate %275, %257, %278 in 1 : vector<32x128xf32>, vector<32x128xf32>, vector<32x128xf32> -> vector<32x384xf32>
    %c8_158 = arith.constant 8 : index
    %c0_159 = arith.constant 0 : index
    %c0_160 = arith.constant 0 : index
    %280 = vector.load %arg1[%c8_158, %c0_159, %c0_160] : memref<17x384x128xf32, #tpu.memory_space<vmem>>, vector<1x384x128xf32>
    %281 = vector.shape_cast %280 : vector<1x384x128xf32> to vector<384x128xf32>
    %cst_161 = arith.constant dense<0.000000e+00> : vector<32x128xf32>
    %282 = tpu.matmul %279, %281, %cst_161 {dimension_numbers = #tpu.dot_dimension_numbers<[1], [0], [0], [1], [0, 0, 1, 1], [], []>} : vector<32x384xf32>, vector<384x128xf32>, vector<32x128xf32> -> vector<32x128xf32>
    %c8_162 = arith.constant 8 : index
    %c0_163 = arith.constant 0 : index
    %283 = vector.load %arg2[%c8_162, %c0_163] : memref<17x128xf32, #tpu.memory_space<vmem>>, vector<1x128xf32>
    %284 = vector.shape_cast %283 : vector<1x128xf32> to vector<128xf32>
    %285 = vector.shape_cast %284 : vector<128xf32> to vector<1x128xf32>
    %286 = vector.broadcast %285 : vector<1x128xf32> to vector<32x128xf32>
    %287 = arith.addf %282, %286 : vector<32x128xf32>
    %288 = arith.mulf %272, %287 : vector<32x128xf32>
    %c1_i32_164 = arith.constant 1 : i32
    %289 = tpu.dynamic_rotate %288 by %c1_i32_164 dim 0 : vector<32x128xf32>, i32 -> vector<32x128xf32>
    %cst_165 = arith.constant 0.000000e+00 : f32
    %290 = vector.broadcast %cst_165 : f32 to vector<32x128xf32>
    %291 = arith.select %19, %289, %290 : vector<32x128xi1>, vector<32x128xf32>
    %c31_i32_166 = arith.constant 31 : i32
    %292 = tpu.dynamic_rotate %288 by %c31_i32_166 dim 0 : vector<32x128xf32>, i32 -> vector<32x128xf32>
    %cst_167 = arith.constant 0.000000e+00 : f32
    %293 = vector.broadcast %cst_167 : f32 to vector<32x128xf32>
    %294 = arith.select %37, %292, %293 : vector<32x128xi1>, vector<32x128xf32>
    %295 = tpu.concatenate %291, %288, %294 in 1 : vector<32x128xf32>, vector<32x128xf32>, vector<32x128xf32> -> vector<32x384xf32>
    %c9_168 = arith.constant 9 : index
    %c0_169 = arith.constant 0 : index
    %c0_170 = arith.constant 0 : index
    %296 = vector.load %arg1[%c9_168, %c0_169, %c0_170] : memref<17x384x128xf32, #tpu.memory_space<vmem>>, vector<1x384x128xf32>
    %297 = vector.shape_cast %296 : vector<1x384x128xf32> to vector<384x128xf32>
    %cst_171 = arith.constant dense<0.000000e+00> : vector<32x128xf32>
    %298 = tpu.matmul %295, %297, %cst_171 {dimension_numbers = #tpu.dot_dimension_numbers<[1], [0], [0], [1], [0, 0, 1, 1], [], []>} : vector<32x384xf32>, vector<384x128xf32>, vector<32x128xf32> -> vector<32x128xf32>
    %c9_172 = arith.constant 9 : index
    %c0_173 = arith.constant 0 : index
    %299 = vector.load %arg2[%c9_172, %c0_173] : memref<17x128xf32, #tpu.memory_space<vmem>>, vector<1x128xf32>
    %300 = vector.shape_cast %299 : vector<1x128xf32> to vector<128xf32>
    %301 = vector.shape_cast %300 : vector<128xf32> to vector<1x128xf32>
    %302 = vector.broadcast %301 : vector<1x128xf32> to vector<32x128xf32>
    %303 = arith.addf %298, %302 : vector<32x128xf32>
    %304 = arith.addf %303, %249 : vector<32x128xf32>
    %c11 = arith.constant 11 : index
    %c0_174 = arith.constant 0 : index
    %c0_175 = arith.constant 0 : index
    %305 = vector.load %arg3[%c11, %c0_174, %c0_175] : memref<20x128x128xf32, #tpu.memory_space<vmem>>, vector<1x128x128xf32>
    %306 = vector.shape_cast %305 : vector<1x128x128xf32> to vector<128x128xf32>
    %cst_176 = arith.constant dense<0.000000e+00> : vector<32x128xf32>
    %307 = tpu.matmul %304, %306, %cst_176 {dimension_numbers = #tpu.dot_dimension_numbers<[1], [0], [0], [1], [0, 0, 1, 1], [], []>} : vector<32x128xf32>, vector<128x128xf32>, vector<32x128xf32> -> vector<32x128xf32>
    %c11_177 = arith.constant 11 : index
    %c0_178 = arith.constant 0 : index
    %308 = vector.load %arg4[%c11_177, %c0_178] : memref<20x128xf32, #tpu.memory_space<vmem>>, vector<1x128xf32>
    %309 = vector.shape_cast %308 : vector<1x128xf32> to vector<128xf32>
    %310 = vector.shape_cast %309 : vector<128xf32> to vector<1x128xf32>
    %311 = vector.broadcast %310 : vector<1x128xf32> to vector<32x128xf32>
    %312 = arith.addf %307, %311 : vector<32x128xf32>
    %313 = arith.addf %312, %226 : vector<32x128xf32>
    %c12 = arith.constant 12 : index
    %c0_179 = arith.constant 0 : index
    %c0_180 = arith.constant 0 : index
    %314 = vector.load %arg3[%c12, %c0_179, %c0_180] : memref<20x128x128xf32, #tpu.memory_space<vmem>>, vector<1x128x128xf32>
    %315 = vector.shape_cast %314 : vector<1x128x128xf32> to vector<128x128xf32>
    %cst_181 = arith.constant dense<0.000000e+00> : vector<32x128xf32>
    %316 = tpu.matmul %313, %315, %cst_181 {dimension_numbers = #tpu.dot_dimension_numbers<[1], [0], [0], [1], [0, 0, 1, 1], [], []>} : vector<32x128xf32>, vector<128x128xf32>, vector<32x128xf32> -> vector<32x128xf32>
    %c12_182 = arith.constant 12 : index
    %c0_183 = arith.constant 0 : index
    %317 = vector.load %arg4[%c12_182, %c0_183] : memref<20x128xf32, #tpu.memory_space<vmem>>, vector<1x128xf32>
    %318 = vector.shape_cast %317 : vector<1x128xf32> to vector<128xf32>
    %319 = vector.shape_cast %318 : vector<128xf32> to vector<1x128xf32>
    %320 = vector.broadcast %319 : vector<1x128xf32> to vector<32x128xf32>
    %321 = arith.addf %316, %320 : vector<32x128xf32>
    %c1_i32_184 = arith.constant 1 : i32
    %322 = tpu.dynamic_rotate %321 by %c1_i32_184 dim 0 : vector<32x128xf32>, i32 -> vector<32x128xf32>
    %cst_185 = arith.constant 0.000000e+00 : f32
    %323 = vector.broadcast %cst_185 : f32 to vector<32x128xf32>
    %324 = arith.select %19, %322, %323 : vector<32x128xi1>, vector<32x128xf32>
    %c31_i32_186 = arith.constant 31 : i32
    %325 = tpu.dynamic_rotate %321 by %c31_i32_186 dim 0 : vector<32x128xf32>, i32 -> vector<32x128xf32>
    %cst_187 = arith.constant 0.000000e+00 : f32
    %326 = vector.broadcast %cst_187 : f32 to vector<32x128xf32>
    %327 = arith.select %37, %325, %326 : vector<32x128xi1>, vector<32x128xf32>
    %328 = tpu.concatenate %324, %321, %327 in 1 : vector<32x128xf32>, vector<32x128xf32>, vector<32x128xf32> -> vector<32x384xf32>
    %c10_188 = arith.constant 10 : index
    %c0_189 = arith.constant 0 : index
    %c0_190 = arith.constant 0 : index
    %329 = vector.load %arg1[%c10_188, %c0_189, %c0_190] : memref<17x384x128xf32, #tpu.memory_space<vmem>>, vector<1x384x128xf32>
    %330 = vector.shape_cast %329 : vector<1x384x128xf32> to vector<384x128xf32>
    %cst_191 = arith.constant dense<0.000000e+00> : vector<32x128xf32>
    %331 = tpu.matmul %328, %330, %cst_191 {dimension_numbers = #tpu.dot_dimension_numbers<[1], [0], [0], [1], [0, 0, 1, 1], [], []>} : vector<32x384xf32>, vector<384x128xf32>, vector<32x128xf32> -> vector<32x128xf32>
    %c10_192 = arith.constant 10 : index
    %c0_193 = arith.constant 0 : index
    %332 = vector.load %arg2[%c10_192, %c0_193] : memref<17x128xf32, #tpu.memory_space<vmem>>, vector<1x128xf32>
    %333 = vector.shape_cast %332 : vector<1x128xf32> to vector<128xf32>
    %334 = vector.shape_cast %333 : vector<128xf32> to vector<1x128xf32>
    %335 = vector.broadcast %334 : vector<1x128xf32> to vector<32x128xf32>
    %336 = arith.addf %331, %335 : vector<32x128xf32>
    %c13 = arith.constant 13 : index
    %c0_194 = arith.constant 0 : index
    %c0_195 = arith.constant 0 : index
    %337 = vector.load %arg3[%c13, %c0_194, %c0_195] : memref<20x128x128xf32, #tpu.memory_space<vmem>>, vector<1x128x128xf32>
    %338 = vector.shape_cast %337 : vector<1x128x128xf32> to vector<128x128xf32>
    %cst_196 = arith.constant dense<0.000000e+00> : vector<32x128xf32>
    %339 = tpu.matmul %313, %338, %cst_196 {dimension_numbers = #tpu.dot_dimension_numbers<[1], [0], [0], [1], [0, 0, 1, 1], [], []>} : vector<32x128xf32>, vector<128x128xf32>, vector<32x128xf32> -> vector<32x128xf32>
    %c13_197 = arith.constant 13 : index
    %c0_198 = arith.constant 0 : index
    %340 = vector.load %arg4[%c13_197, %c0_198] : memref<20x128xf32, #tpu.memory_space<vmem>>, vector<1x128xf32>
    %341 = vector.shape_cast %340 : vector<1x128xf32> to vector<128xf32>
    %342 = vector.shape_cast %341 : vector<128xf32> to vector<1x128xf32>
    %343 = vector.broadcast %342 : vector<1x128xf32> to vector<32x128xf32>
    %344 = arith.addf %339, %343 : vector<32x128xf32>
    %c14 = arith.constant 14 : index
    %c0_199 = arith.constant 0 : index
    %c0_200 = arith.constant 0 : index
    %345 = vector.load %arg3[%c14, %c0_199, %c0_200] : memref<20x128x128xf32, #tpu.memory_space<vmem>>, vector<1x128x128xf32>
    %346 = vector.shape_cast %345 : vector<1x128x128xf32> to vector<128x128xf32>
    %cst_201 = arith.constant dense<0.000000e+00> : vector<32x128xf32>
    %347 = tpu.matmul %344, %346, %cst_201 {dimension_numbers = #tpu.dot_dimension_numbers<[1], [0], [0], [1], [0, 0, 1, 1], [], []>} : vector<32x128xf32>, vector<128x128xf32>, vector<32x128xf32> -> vector<32x128xf32>
    %c14_202 = arith.constant 14 : index
    %c0_203 = arith.constant 0 : index
    %348 = vector.load %arg4[%c14_202, %c0_203] : memref<20x128xf32, #tpu.memory_space<vmem>>, vector<1x128xf32>
    %349 = vector.shape_cast %348 : vector<1x128xf32> to vector<128xf32>
    %350 = vector.shape_cast %349 : vector<128xf32> to vector<1x128xf32>
    %351 = vector.broadcast %350 : vector<1x128xf32> to vector<32x128xf32>
    %352 = arith.addf %347, %351 : vector<32x128xf32>
    %cst_204 = arith.constant 0.000000e+00 : f32
    %353 = vector.broadcast %cst_204 : f32 to vector<32x128xf32>
    %354 = arith.subf %353, %352 : vector<32x128xf32>
    %355 = math.exp %354 : vector<32x128xf32>
    %cst_205 = arith.constant 1.000000e+00 : f32
    %356 = vector.broadcast %cst_205 : f32 to vector<32x128xf32>
    %357 = arith.addf %356, %355 : vector<32x128xf32>
    %cst_206 = arith.constant 1.000000e+00 : f32
    %358 = vector.broadcast %cst_206 : f32 to vector<32x128xf32>
    %359 = arith.divf %358, %357 : vector<32x128xf32>
    %c1_i32_207 = arith.constant 1 : i32
    %360 = tpu.dynamic_rotate %344 by %c1_i32_207 dim 0 : vector<32x128xf32>, i32 -> vector<32x128xf32>
    %cst_208 = arith.constant 0.000000e+00 : f32
    %361 = vector.broadcast %cst_208 : f32 to vector<32x128xf32>
    %362 = arith.select %19, %360, %361 : vector<32x128xi1>, vector<32x128xf32>
    %c31_i32_209 = arith.constant 31 : i32
    %363 = tpu.dynamic_rotate %344 by %c31_i32_209 dim 0 : vector<32x128xf32>, i32 -> vector<32x128xf32>
    %cst_210 = arith.constant 0.000000e+00 : f32
    %364 = vector.broadcast %cst_210 : f32 to vector<32x128xf32>
    %365 = arith.select %37, %363, %364 : vector<32x128xi1>, vector<32x128xf32>
    %366 = tpu.concatenate %362, %344, %365 in 1 : vector<32x128xf32>, vector<32x128xf32>, vector<32x128xf32> -> vector<32x384xf32>
    %c11_211 = arith.constant 11 : index
    %c0_212 = arith.constant 0 : index
    %c0_213 = arith.constant 0 : index
    %367 = vector.load %arg1[%c11_211, %c0_212, %c0_213] : memref<17x384x128xf32, #tpu.memory_space<vmem>>, vector<1x384x128xf32>
    %368 = vector.shape_cast %367 : vector<1x384x128xf32> to vector<384x128xf32>
    %cst_214 = arith.constant dense<0.000000e+00> : vector<32x128xf32>
    %369 = tpu.matmul %366, %368, %cst_214 {dimension_numbers = #tpu.dot_dimension_numbers<[1], [0], [0], [1], [0, 0, 1, 1], [], []>} : vector<32x384xf32>, vector<384x128xf32>, vector<32x128xf32> -> vector<32x128xf32>
    %c11_215 = arith.constant 11 : index
    %c0_216 = arith.constant 0 : index
    %370 = vector.load %arg2[%c11_215, %c0_216] : memref<17x128xf32, #tpu.memory_space<vmem>>, vector<1x128xf32>
    %371 = vector.shape_cast %370 : vector<1x128xf32> to vector<128xf32>
    %372 = vector.shape_cast %371 : vector<128xf32> to vector<1x128xf32>
    %373 = vector.broadcast %372 : vector<1x128xf32> to vector<32x128xf32>
    %374 = arith.addf %369, %373 : vector<32x128xf32>
    %375 = arith.mulf %359, %374 : vector<32x128xf32>
    %c1_i32_217 = arith.constant 1 : i32
    %376 = tpu.dynamic_rotate %375 by %c1_i32_217 dim 0 : vector<32x128xf32>, i32 -> vector<32x128xf32>
    %cst_218 = arith.constant 0.000000e+00 : f32
    %377 = vector.broadcast %cst_218 : f32 to vector<32x128xf32>
    %378 = arith.select %19, %376, %377 : vector<32x128xi1>, vector<32x128xf32>
    %c31_i32_219 = arith.constant 31 : i32
    %379 = tpu.dynamic_rotate %375 by %c31_i32_219 dim 0 : vector<32x128xf32>, i32 -> vector<32x128xf32>
    %cst_220 = arith.constant 0.000000e+00 : f32
    %380 = vector.broadcast %cst_220 : f32 to vector<32x128xf32>
    %381 = arith.select %37, %379, %380 : vector<32x128xi1>, vector<32x128xf32>
    %382 = tpu.concatenate %378, %375, %381 in 1 : vector<32x128xf32>, vector<32x128xf32>, vector<32x128xf32> -> vector<32x384xf32>
    %c12_221 = arith.constant 12 : index
    %c0_222 = arith.constant 0 : index
    %c0_223 = arith.constant 0 : index
    %383 = vector.load %arg1[%c12_221, %c0_222, %c0_223] : memref<17x384x128xf32, #tpu.memory_space<vmem>>, vector<1x384x128xf32>
    %384 = vector.shape_cast %383 : vector<1x384x128xf32> to vector<384x128xf32>
    %cst_224 = arith.constant dense<0.000000e+00> : vector<32x128xf32>
    %385 = tpu.matmul %382, %384, %cst_224 {dimension_numbers = #tpu.dot_dimension_numbers<[1], [0], [0], [1], [0, 0, 1, 1], [], []>} : vector<32x384xf32>, vector<384x128xf32>, vector<32x128xf32> -> vector<32x128xf32>
    %c12_225 = arith.constant 12 : index
    %c0_226 = arith.constant 0 : index
    %386 = vector.load %arg2[%c12_225, %c0_226] : memref<17x128xf32, #tpu.memory_space<vmem>>, vector<1x128xf32>
    %387 = vector.shape_cast %386 : vector<1x128xf32> to vector<128xf32>
    %388 = vector.shape_cast %387 : vector<128xf32> to vector<1x128xf32>
    %389 = vector.broadcast %388 : vector<1x128xf32> to vector<32x128xf32>
    %390 = arith.addf %385, %389 : vector<32x128xf32>
    %391 = arith.addf %390, %336 : vector<32x128xf32>
    %c15 = arith.constant 15 : index
    %c0_227 = arith.constant 0 : index
    %c0_228 = arith.constant 0 : index
    %392 = vector.load %arg3[%c15, %c0_227, %c0_228] : memref<20x128x128xf32, #tpu.memory_space<vmem>>, vector<1x128x128xf32>
    %393 = vector.shape_cast %392 : vector<1x128x128xf32> to vector<128x128xf32>
    %cst_229 = arith.constant dense<0.000000e+00> : vector<32x128xf32>
    %394 = tpu.matmul %391, %393, %cst_229 {dimension_numbers = #tpu.dot_dimension_numbers<[1], [0], [0], [1], [0, 0, 1, 1], [], []>} : vector<32x128xf32>, vector<128x128xf32>, vector<32x128xf32> -> vector<32x128xf32>
    %c15_230 = arith.constant 15 : index
    %c0_231 = arith.constant 0 : index
    %395 = vector.load %arg4[%c15_230, %c0_231] : memref<20x128xf32, #tpu.memory_space<vmem>>, vector<1x128xf32>
    %396 = vector.shape_cast %395 : vector<1x128xf32> to vector<128xf32>
    %397 = vector.shape_cast %396 : vector<128xf32> to vector<1x128xf32>
    %398 = vector.broadcast %397 : vector<1x128xf32> to vector<32x128xf32>
    %399 = arith.addf %394, %398 : vector<32x128xf32>
    %400 = arith.addf %399, %313 : vector<32x128xf32>
    %c16 = arith.constant 16 : index
    %c0_232 = arith.constant 0 : index
    %c0_233 = arith.constant 0 : index
    %401 = vector.load %arg3[%c16, %c0_232, %c0_233] : memref<20x128x128xf32, #tpu.memory_space<vmem>>, vector<1x128x128xf32>
    %402 = vector.shape_cast %401 : vector<1x128x128xf32> to vector<128x128xf32>
    %cst_234 = arith.constant dense<0.000000e+00> : vector<32x128xf32>
    %403 = tpu.matmul %400, %402, %cst_234 {dimension_numbers = #tpu.dot_dimension_numbers<[1], [0], [0], [1], [0, 0, 1, 1], [], []>} : vector<32x128xf32>, vector<128x128xf32>, vector<32x128xf32> -> vector<32x128xf32>
    %c16_235 = arith.constant 16 : index
    %c0_236 = arith.constant 0 : index
    %404 = vector.load %arg4[%c16_235, %c0_236] : memref<20x128xf32, #tpu.memory_space<vmem>>, vector<1x128xf32>
    %405 = vector.shape_cast %404 : vector<1x128xf32> to vector<128xf32>
    %406 = vector.shape_cast %405 : vector<128xf32> to vector<1x128xf32>
    %407 = vector.broadcast %406 : vector<1x128xf32> to vector<32x128xf32>
    %408 = arith.addf %403, %407 : vector<32x128xf32>
    %c1_i32_237 = arith.constant 1 : i32
    %409 = tpu.dynamic_rotate %408 by %c1_i32_237 dim 0 : vector<32x128xf32>, i32 -> vector<32x128xf32>
    %cst_238 = arith.constant 0.000000e+00 : f32
    %410 = vector.broadcast %cst_238 : f32 to vector<32x128xf32>
    %411 = arith.select %19, %409, %410 : vector<32x128xi1>, vector<32x128xf32>
    %c31_i32_239 = arith.constant 31 : i32
    %412 = tpu.dynamic_rotate %408 by %c31_i32_239 dim 0 : vector<32x128xf32>, i32 -> vector<32x128xf32>
    %cst_240 = arith.constant 0.000000e+00 : f32
    %413 = vector.broadcast %cst_240 : f32 to vector<32x128xf32>
    %414 = arith.select %37, %412, %413 : vector<32x128xi1>, vector<32x128xf32>
    %415 = tpu.concatenate %411, %408, %414 in 1 : vector<32x128xf32>, vector<32x128xf32>, vector<32x128xf32> -> vector<32x384xf32>
    %c13_241 = arith.constant 13 : index
    %c0_242 = arith.constant 0 : index
    %c0_243 = arith.constant 0 : index
    %416 = vector.load %arg1[%c13_241, %c0_242, %c0_243] : memref<17x384x128xf32, #tpu.memory_space<vmem>>, vector<1x384x128xf32>
    %417 = vector.shape_cast %416 : vector<1x384x128xf32> to vector<384x128xf32>
    %cst_244 = arith.constant dense<0.000000e+00> : vector<32x128xf32>
    %418 = tpu.matmul %415, %417, %cst_244 {dimension_numbers = #tpu.dot_dimension_numbers<[1], [0], [0], [1], [0, 0, 1, 1], [], []>} : vector<32x384xf32>, vector<384x128xf32>, vector<32x128xf32> -> vector<32x128xf32>
    %c13_245 = arith.constant 13 : index
    %c0_246 = arith.constant 0 : index
    %419 = vector.load %arg2[%c13_245, %c0_246] : memref<17x128xf32, #tpu.memory_space<vmem>>, vector<1x128xf32>
    %420 = vector.shape_cast %419 : vector<1x128xf32> to vector<128xf32>
    %421 = vector.shape_cast %420 : vector<128xf32> to vector<1x128xf32>
    %422 = vector.broadcast %421 : vector<1x128xf32> to vector<32x128xf32>
    %423 = arith.addf %418, %422 : vector<32x128xf32>
    %c17 = arith.constant 17 : index
    %c0_247 = arith.constant 0 : index
    %c0_248 = arith.constant 0 : index
    %424 = vector.load %arg3[%c17, %c0_247, %c0_248] : memref<20x128x128xf32, #tpu.memory_space<vmem>>, vector<1x128x128xf32>
    %425 = vector.shape_cast %424 : vector<1x128x128xf32> to vector<128x128xf32>
    %cst_249 = arith.constant dense<0.000000e+00> : vector<32x128xf32>
    %426 = tpu.matmul %400, %425, %cst_249 {dimension_numbers = #tpu.dot_dimension_numbers<[1], [0], [0], [1], [0, 0, 1, 1], [], []>} : vector<32x128xf32>, vector<128x128xf32>, vector<32x128xf32> -> vector<32x128xf32>
    %c17_250 = arith.constant 17 : index
    %c0_251 = arith.constant 0 : index
    %427 = vector.load %arg4[%c17_250, %c0_251] : memref<20x128xf32, #tpu.memory_space<vmem>>, vector<1x128xf32>
    %428 = vector.shape_cast %427 : vector<1x128xf32> to vector<128xf32>
    %429 = vector.shape_cast %428 : vector<128xf32> to vector<1x128xf32>
    %430 = vector.broadcast %429 : vector<1x128xf32> to vector<32x128xf32>
    %431 = arith.addf %426, %430 : vector<32x128xf32>
    %c18 = arith.constant 18 : index
    %c0_252 = arith.constant 0 : index
    %c0_253 = arith.constant 0 : index
    %432 = vector.load %arg3[%c18, %c0_252, %c0_253] : memref<20x128x128xf32, #tpu.memory_space<vmem>>, vector<1x128x128xf32>
    %433 = vector.shape_cast %432 : vector<1x128x128xf32> to vector<128x128xf32>
    %cst_254 = arith.constant dense<0.000000e+00> : vector<32x128xf32>
    %434 = tpu.matmul %431, %433, %cst_254 {dimension_numbers = #tpu.dot_dimension_numbers<[1], [0], [0], [1], [0, 0, 1, 1], [], []>} : vector<32x128xf32>, vector<128x128xf32>, vector<32x128xf32> -> vector<32x128xf32>
    %c18_255 = arith.constant 18 : index
    %c0_256 = arith.constant 0 : index
    %435 = vector.load %arg4[%c18_255, %c0_256] : memref<20x128xf32, #tpu.memory_space<vmem>>, vector<1x128xf32>
    %436 = vector.shape_cast %435 : vector<1x128xf32> to vector<128xf32>
    %437 = vector.shape_cast %436 : vector<128xf32> to vector<1x128xf32>
    %438 = vector.broadcast %437 : vector<1x128xf32> to vector<32x128xf32>
    %439 = arith.addf %434, %438 : vector<32x128xf32>
    %cst_257 = arith.constant 0.000000e+00 : f32
    %440 = vector.broadcast %cst_257 : f32 to vector<32x128xf32>
    %441 = arith.subf %440, %439 : vector<32x128xf32>
    %442 = math.exp %441 : vector<32x128xf32>
    %cst_258 = arith.constant 1.000000e+00 : f32
    %443 = vector.broadcast %cst_258 : f32 to vector<32x128xf32>
    %444 = arith.addf %443, %442 : vector<32x128xf32>
    %cst_259 = arith.constant 1.000000e+00 : f32
    %445 = vector.broadcast %cst_259 : f32 to vector<32x128xf32>
    %446 = arith.divf %445, %444 : vector<32x128xf32>
    %c1_i32_260 = arith.constant 1 : i32
    %447 = tpu.dynamic_rotate %431 by %c1_i32_260 dim 0 : vector<32x128xf32>, i32 -> vector<32x128xf32>
    %cst_261 = arith.constant 0.000000e+00 : f32
    %448 = vector.broadcast %cst_261 : f32 to vector<32x128xf32>
    %449 = arith.select %19, %447, %448 : vector<32x128xi1>, vector<32x128xf32>
    %c31_i32_262 = arith.constant 31 : i32
    %450 = tpu.dynamic_rotate %431 by %c31_i32_262 dim 0 : vector<32x128xf32>, i32 -> vector<32x128xf32>
    %cst_263 = arith.constant 0.000000e+00 : f32
    %451 = vector.broadcast %cst_263 : f32 to vector<32x128xf32>
    %452 = arith.select %37, %450, %451 : vector<32x128xi1>, vector<32x128xf32>
    %453 = tpu.concatenate %449, %431, %452 in 1 : vector<32x128xf32>, vector<32x128xf32>, vector<32x128xf32> -> vector<32x384xf32>
    %c14_264 = arith.constant 14 : index
    %c0_265 = arith.constant 0 : index
    %c0_266 = arith.constant 0 : index
    %454 = vector.load %arg1[%c14_264, %c0_265, %c0_266] : memref<17x384x128xf32, #tpu.memory_space<vmem>>, vector<1x384x128xf32>
    %455 = vector.shape_cast %454 : vector<1x384x128xf32> to vector<384x128xf32>
    %cst_267 = arith.constant dense<0.000000e+00> : vector<32x128xf32>
    %456 = tpu.matmul %453, %455, %cst_267 {dimension_numbers = #tpu.dot_dimension_numbers<[1], [0], [0], [1], [0, 0, 1, 1], [], []>} : vector<32x384xf32>, vector<384x128xf32>, vector<32x128xf32> -> vector<32x128xf32>
    %c14_268 = arith.constant 14 : index
    %c0_269 = arith.constant 0 : index
    %457 = vector.load %arg2[%c14_268, %c0_269] : memref<17x128xf32, #tpu.memory_space<vmem>>, vector<1x128xf32>
    %458 = vector.shape_cast %457 : vector<1x128xf32> to vector<128xf32>
    %459 = vector.shape_cast %458 : vector<128xf32> to vector<1x128xf32>
    %460 = vector.broadcast %459 : vector<1x128xf32> to vector<32x128xf32>
    %461 = arith.addf %456, %460 : vector<32x128xf32>
    %462 = arith.mulf %446, %461 : vector<32x128xf32>
    %c1_i32_270 = arith.constant 1 : i32
    %463 = tpu.dynamic_rotate %462 by %c1_i32_270 dim 0 : vector<32x128xf32>, i32 -> vector<32x128xf32>
    %cst_271 = arith.constant 0.000000e+00 : f32
    %464 = vector.broadcast %cst_271 : f32 to vector<32x128xf32>
    %465 = arith.select %19, %463, %464 : vector<32x128xi1>, vector<32x128xf32>
    %c31_i32_272 = arith.constant 31 : i32
    %466 = tpu.dynamic_rotate %462 by %c31_i32_272 dim 0 : vector<32x128xf32>, i32 -> vector<32x128xf32>
    %cst_273 = arith.constant 0.000000e+00 : f32
    %467 = vector.broadcast %cst_273 : f32 to vector<32x128xf32>
    %468 = arith.select %37, %466, %467 : vector<32x128xi1>, vector<32x128xf32>
    %469 = tpu.concatenate %465, %462, %468 in 1 : vector<32x128xf32>, vector<32x128xf32>, vector<32x128xf32> -> vector<32x384xf32>
    %c15_274 = arith.constant 15 : index
    %c0_275 = arith.constant 0 : index
    %c0_276 = arith.constant 0 : index
    %470 = vector.load %arg1[%c15_274, %c0_275, %c0_276] : memref<17x384x128xf32, #tpu.memory_space<vmem>>, vector<1x384x128xf32>
    %471 = vector.shape_cast %470 : vector<1x384x128xf32> to vector<384x128xf32>
    %cst_277 = arith.constant dense<0.000000e+00> : vector<32x128xf32>
    %472 = tpu.matmul %469, %471, %cst_277 {dimension_numbers = #tpu.dot_dimension_numbers<[1], [0], [0], [1], [0, 0, 1, 1], [], []>} : vector<32x384xf32>, vector<384x128xf32>, vector<32x128xf32> -> vector<32x128xf32>
    %c15_278 = arith.constant 15 : index
    %c0_279 = arith.constant 0 : index
    %473 = vector.load %arg2[%c15_278, %c0_279] : memref<17x128xf32, #tpu.memory_space<vmem>>, vector<1x128xf32>
    %474 = vector.shape_cast %473 : vector<1x128xf32> to vector<128xf32>
    %475 = vector.shape_cast %474 : vector<128xf32> to vector<1x128xf32>
    %476 = vector.broadcast %475 : vector<1x128xf32> to vector<32x128xf32>
    %477 = arith.addf %472, %476 : vector<32x128xf32>
    %478 = arith.addf %477, %423 : vector<32x128xf32>
    %c19 = arith.constant 19 : index
    %c0_280 = arith.constant 0 : index
    %c0_281 = arith.constant 0 : index
    %479 = vector.load %arg3[%c19, %c0_280, %c0_281] : memref<20x128x128xf32, #tpu.memory_space<vmem>>, vector<1x128x128xf32>
    %480 = vector.shape_cast %479 : vector<1x128x128xf32> to vector<128x128xf32>
    %cst_282 = arith.constant dense<0.000000e+00> : vector<32x128xf32>
    %481 = tpu.matmul %478, %480, %cst_282 {dimension_numbers = #tpu.dot_dimension_numbers<[1], [0], [0], [1], [0, 0, 1, 1], [], []>} : vector<32x128xf32>, vector<128x128xf32>, vector<32x128xf32> -> vector<32x128xf32>
    %c19_283 = arith.constant 19 : index
    %c0_284 = arith.constant 0 : index
    %482 = vector.load %arg4[%c19_283, %c0_284] : memref<20x128xf32, #tpu.memory_space<vmem>>, vector<1x128xf32>
    %483 = vector.shape_cast %482 : vector<1x128xf32> to vector<128xf32>
    %484 = vector.shape_cast %483 : vector<128xf32> to vector<1x128xf32>
    %485 = vector.broadcast %484 : vector<1x128xf32> to vector<32x128xf32>
    %486 = arith.addf %481, %485 : vector<32x128xf32>
    %487 = arith.addf %486, %400 : vector<32x128xf32>
    %c1_i32_285 = arith.constant 1 : i32
    %488 = tpu.dynamic_rotate %487 by %c1_i32_285 dim 0 : vector<32x128xf32>, i32 -> vector<32x128xf32>
    %cst_286 = arith.constant 0.000000e+00 : f32
    %489 = vector.broadcast %cst_286 : f32 to vector<32x128xf32>
    %490 = arith.select %19, %488, %489 : vector<32x128xi1>, vector<32x128xf32>
    %c31_i32_287 = arith.constant 31 : i32
    %491 = tpu.dynamic_rotate %487 by %c31_i32_287 dim 0 : vector<32x128xf32>, i32 -> vector<32x128xf32>
    %cst_288 = arith.constant 0.000000e+00 : f32
    %492 = vector.broadcast %cst_288 : f32 to vector<32x128xf32>
    %493 = arith.select %37, %491, %492 : vector<32x128xi1>, vector<32x128xf32>
    %494 = tpu.concatenate %490, %487, %493 in 1 : vector<32x128xf32>, vector<32x128xf32>, vector<32x128xf32> -> vector<32x384xf32>
    %c16_289 = arith.constant 16 : index
    %c0_290 = arith.constant 0 : index
    %c0_291 = arith.constant 0 : index
    %495 = vector.load %arg1[%c16_289, %c0_290, %c0_291] : memref<17x384x128xf32, #tpu.memory_space<vmem>>, vector<1x384x128xf32>
    %496 = vector.shape_cast %495 : vector<1x384x128xf32> to vector<384x128xf32>
    %cst_292 = arith.constant dense<0.000000e+00> : vector<32x128xf32>
    %497 = tpu.matmul %494, %496, %cst_292 {dimension_numbers = #tpu.dot_dimension_numbers<[1], [0], [0], [1], [0, 0, 1, 1], [], []>} : vector<32x384xf32>, vector<384x128xf32>, vector<32x128xf32> -> vector<32x128xf32>
    %c16_293 = arith.constant 16 : index
    %c0_294 = arith.constant 0 : index
    %498 = vector.load %arg2[%c16_293, %c0_294] : memref<17x128xf32, #tpu.memory_space<vmem>>, vector<1x128xf32>
    %499 = vector.shape_cast %498 : vector<1x128xf32> to vector<128xf32>
    %500 = vector.shape_cast %499 : vector<128xf32> to vector<1x128xf32>
    %501 = vector.broadcast %500 : vector<1x128xf32> to vector<32x128xf32>
    %502 = arith.addf %497, %501 : vector<32x128xf32>
    %c0_295 = arith.constant 0 : index
    %c0_296 = arith.constant 0 : index
    %503 = vector.load %arg5[%c0_295, %c0_296] : memref<32x128xf32, #tpu.memory_space<vmem>>, vector<32x128xf32>
    tpu.vector_store %arg5[%c0_295, %c0_296], %502 {strides = array<i32>} : memref<32x128xf32, #tpu.memory_space<vmem>>, vector<32x128xf32>,
    return
  }
}

</mosaic_0001>

<bundles_post_ra>
// kernel: scpa_branch_pallas.1
= control target key start
LH: loop header
LB: loop body
LE: loop exit
PB: predicated region body
PF: predicated region fallthrough
CT: control target
= control target key end

     0   :  { %10 = vsyncpa [#allocation3], 0  ;;  %s12431_s0 = inlined_call_operand.vmem [shape: f32[32,128], index: 0, kind: input, shape index: {}]   ;;  %s12432_s1 = inlined_call_operand.hbm [shape: f32[17,384,128], index: 1, kind: input, shape index: {}]   ;;  %s12433_s2 = inlined_call_operand.hbm [shape: f32[17,128], index: 2, kind: input, shape index: {}]   ;;  %s12434_s3 = inlined_call_operand.hbm [shape: f32[20,128,128], index: 3, kind: input, shape index: {}]   ;;  %s12435_s4 = inlined_call_operand.hbm [shape: f32[20,128], index: 4, kind: input, shape index: {}]   ;;  %s12436_s5 = inlined_call_operand.vmem [shape: f32[32,128], index: 5, kind: output, shape index: {}]  }
   0x1   :  { %11 = vsyncpa [#allocation5], 0 }
   0x2   :  { %12 = vsyncpa [#allocation8], 0  ;;  %s11654_s18 = smov [#allocation4]   ;;  %s11655_s20 = smov [#allocation2]  }
   0x3   :  { %s32_s19 = sshll.u32 %s11654_s18, 4  ;;  %s20_s21 = sshll.u32 %s11655_s20, 4  ;;  %s33_s19 = int_to_ptr.vmem [resolvable:$true] %s32_s19  ;;  %s11690_s21 = int_to_ptr.vmem [resolvable:$true] %s20_s21 }
   0x4   :  { %s11560_s24 = scalar_lea.hbm %s12433_s2, 384 }
   0x5   :  { %p11561_p0 = scmp.ne.s32.totalorder %s12433_s2, %s11560_s24  ;;  %p11564_p1 = scmp.lt.u32.totalorder %s11560_s24, %s12433_s2 }
   0x7   :  { %p11566_p2 = pnand %p11564_p1, %p11561_p0 }
   0x9   :  { %11569 = shalt.err (!%p11566_p2)
}
   0xa   :  { %s11570_s29 = scalar_lea.vmem %s33_s19, 384  ;;  %p11575_p4 = scmp.lt.s32.totalorder %s33_s19, %s33_s19 }
   0xb   :  { %p11571_p3 = scmp.ne.s32.totalorder %s33_s19, %s11570_s29  ;;  %p11576_p5 = scmp.lt.s32.totalorder %s11570_s29, %s11570_s29 }
   0xd   :  { %p11577_p6 = por %p11576_p5, %p11575_p4 }
   0xf   :  { %p11578_p7 = pnand %p11577_p6, %p11571_p3 }
  0x11   :  { %11581 = shalt.err (!%p11578_p7)
}
  0x12   :  { %s11656_s30 = smov 128   ;;  %s11657_s6 = smov 8  }
  0x13   :  { %38 = dma.hbm_to_vmem [thread:$0]  %s12433_s2, 384, %s33_s19, [#allocation5], %s11656_s30, %s11656_s30, %s11657_s6  }
  0x14   :  { %s11582_s11 = scalar_lea.hbm %s12432_s1, 104448 }
  0x15   :  { %p11583_p8 = scmp.ne.s32.totalorder %s12432_s1, %s11582_s11  ;;  %p11586_p9 = scmp.lt.u32.totalorder %s11582_s11, %s12432_s1 }
  0x17   :  { %p11588_p10 = pnand %p11586_p9, %p11583_p8 }
  0x19   :  { %11591 = shalt.err (!%p11588_p10)
}
  0x1a   :  { %s11592_s16 = scalar_lea.vmem %s11690_s21, 104448  ;;  %p11597_p12 = scmp.lt.s32.totalorder %s11690_s21, %s11690_s21 }
  0x1b   :  { %p11593_p11 = scmp.ne.s32.totalorder %s11690_s21, %s11592_s16  ;;  %p11598_p13 = scmp.lt.s32.totalorder %s11592_s16, %s11592_s16 }
  0x1d   :  { %p11599_p0 = por %p11598_p13, %p11597_p12 }
  0x1f   :  { %p11600_p1 = pnand %p11599_p0, %p11593_p11 }
  0x21   :  { %11603 = shalt.err (!%p11600_p1)
}
  0x22   :  { %26 = dma.hbm_to_vmem [thread:$0]  %s12432_s1, 104448, %s11690_s21, [#allocation3], %s11656_s30, %s11656_s30, %s11657_s6  }
  0x23   :  { %s11658_s18 = smov [#allocation6]   ;;  %s11659_s20 = smov [#allocation7]  }
  0x24   :  { %s44_s19 = sshll.u32 %s11658_s18, 4  ;;  %s56_s22 = sshll.u32 %s11659_s20, 4  ;;  %s45_s19 = int_to_ptr.vmem [resolvable:$true] %s44_s19  ;;  %s11727_s22 = int_to_ptr.vmem [resolvable:$true] %s56_s22 }
  0x25   :  { %s11604_s25 = scalar_lea.hbm %s12434_s3, 40960 }
  0x26   :  { %p11605_p2 = scmp.ne.s32.totalorder %s12434_s3, %s11604_s25  ;;  %p11608_p3 = scmp.lt.u32.totalorder %s11604_s25, %s12434_s3 }
  0x28   :  { %p11610_p4 = pnand %p11608_p3, %p11605_p2 }
  0x2a   :  { %11613 = shalt.err (!%p11610_p4)
}
  0x2b   :  { %s11614_s1 = scalar_lea.vmem %s45_s19, 40960  ;;  %p11619_p6 = scmp.lt.s32.totalorder %s45_s19, %s45_s19 }
  0x2c   :  { %p11615_p5 = scmp.ne.s32.totalorder %s45_s19, %s11614_s1  ;;  %p11620_p7 = scmp.lt.s32.totalorder %s11614_s1, %s11614_s1 }
  0x2e   :  { %p11621_p8 = por %p11620_p7, %p11619_p6 }
  0x30   :  { %p11622_p9 = pnand %p11621_p8, %p11615_p5 }
  0x32   :  { %11625 = shalt.err (!%p11622_p9)
}
  0x33   :  { %50 = dma.hbm_to_vmem [thread:$0]  %s12434_s3, 40960, %s45_s19, [#allocation5], %s11656_s30, %s11656_s30, %s11657_s6  }
  0x34   :  { %s11626_s10 = scalar_lea.hbm %s12435_s4, 384 }
  0x35   :  { %p11627_p10 = scmp.ne.s32.totalorder %s12435_s4, %s11626_s10  ;;  %p11630_p11 = scmp.lt.u32.totalorder %s11626_s10, %s12435_s4 }
  0x37   :  { %p11632_p12 = pnand %p11630_p11, %p11627_p10 }
  0x39   :  { %11635 = shalt.err (!%p11632_p12)
}
  0x3a   :  { %s11636_s15 = scalar_lea.vmem %s11727_s22, 384  ;;  %p11641_p0 = scmp.lt.s32.totalorder %s11727_s22, %s11727_s22 }
  0x3b   :  { %p11637_p13 = scmp.ne.s32.totalorder %s11727_s22, %s11636_s15  ;;  %p11642_p1 = scmp.lt.s32.totalorder %s11636_s15, %s11636_s15 }
  0x3d   :  { %p11643_p2 = por %p11642_p1, %p11641_p0 }
  0x3f   :  { %p11644_p3 = pnand %p11643_p2, %p11637_p13 }
  0x41   :  { %11647 = shalt.err (!%p11644_p3)
}
  0x42   :  { %62 = dma.hbm_to_vmem [thread:$0]  %s12435_s4, 384, %s11727_s22, [#allocation8], %s11656_s30, %s11656_s30, %s11657_s6  }
  0x43   :  { %11648 = dma.done.wait [#allocation3], 104448  }
  0x44   :  { %11649 = vsyncadd [#allocation3], 4294862848 }
  0x45   :  { %11650 = dma.done.wait [#allocation5], 41344  }
  0x46   :  { %11651 = vsyncadd [#allocation5], 4294925952 }
  0x47   :  { %11652 = dma.done.wait [#allocation8], 384  }
  0x48   :  { %11653 = vsyncadd [#allocation8], 4294966912  ;;  %v182_v0 = vld [vmem:[#allocation2 + $0x80] sm:$0xff]  ;;  %v183_v1 = vld [vmem:[#allocation2 + $0x88] sm:$0xff]  ;;  %v79_v36 = vlaneseq }
  0x49   :  { %v166_v2 = vld [vmem:[#allocation2] sm:$0xff]  ;;  %v9686_v3 = vpack.c.bf16 %v183_v1, %v182_v0  ;;  %v167_v4 = vld [vmem:[#allocation2 + $0x8] sm:$0xff]  ;;  %v184_v5 = vld [vmem:[#allocation2 + $0x90] sm:$0xff] }
  0x4a   :  { %v185_v6 = vld [vmem:[#allocation2 + $0x98] sm:$0xff]  ;;  %v9688_v7 = vpack.c.bf16 %v167_v4, %v166_v2  ;;  %v198_v9 = vld [vmem:[#allocation2 + $0x100] sm:$0xff]  ;;  %v199_v10 = vld [vmem:[#allocation2 + $0x108] sm:$0xff]  ;;  %v11764_v46 = vshrl.u32 %v79_v36, 7 }
  0x4b   :  { %v9690_v8 = vpack.c.bf16 %v185_v6, %v184_v5  ;;  %v168_v11 = vld [vmem:[#allocation2 + $0x10] sm:$0xff]  ;;  %9687 = vmatprep.subr.bf16.mxu0 %v9686_v3  ;;  %v9718_v12 = vpack.c.bf16 %v199_v10, %v198_v9  ;;  %v169_v13 = vld [vmem:[#allocation2 + $0x18] sm:$0xff]  ;;  %v186_v14 = vld [vmem:[#allocation2 + $0xa0] sm:$0xff] }
  0x4c   :  { %v187_v15 = vld [vmem:[#allocation2 + $0xa8] sm:$0xff]  ;;  %9689 = vmatpush3.bf16.msra.mxu0 %v9688_v7  ;;  %v9692_v16 = vpack.c.bf16 %v169_v13, %v168_v11  ;;  %v200_v17 = vld [vmem:[#allocation2 + $0x110] sm:$0xff]  ;;  %v201_v18 = vld [vmem:[#allocation2 + $0x118] sm:$0xff]  ;;  %vm157_vm0 = vcmp.lt.s32.totalorder %v11764_v46, 7  ;;  %vm144_vm1 = vcmp.lt.s32.totalorder %v11764_v46, 1 }
  0x4d   :  { %9691 = vmatprep.subr.bf16.mxu0 %v9690_v8  ;;  %9719 = vmatprep.subr.bf16.mxu1 %v9718_v12  ;;  %v9694_v19 = vpack.c.bf16 %v187_v15, %v186_v14  ;;  %v9722_v20 = vpack.c.bf16 %v201_v18, %v200_v17  ;;  %v170_v21 = vld [vmem:[#allocation2 + $0x20] sm:$0xff]  ;;  %v171_v22 = vld [vmem:[#allocation2 + $0x28] sm:$0xff]  ;;  %v188_v23 = vld [vmem:[#allocation2 + $0xb0] sm:$0xff]  ;;  %v81_v14 = vadd.s32 8, %v11764_v46 }
  0x4e   :  { %9721 = vmatpush3.bf16.msra.mxu1 %v9718_v12  ;;  %v189_v24 = vld [vmem:[#allocation2 + $0xb8] sm:$0xff]  ;;  %v202_v25 = vld [vmem:[#allocation2 + $0x120] sm:$0xff]  ;;  %v203_v26 = vld [vmem:[#allocation2 + $0x128] sm:$0xff]  ;;  %v9696_v28 = vpack.c.bf16 %v171_v22, %v170_v21  ;;  %v88_v21 = vand.u32 15, %v11764_v46 }
  0x4f   :  { %9723 = vmatprep.subr.bf16.mxu1 %v9722_v20  ;;  %v9726_v27 = vpack.c.bf16 %v203_v26, %v202_v25  ;;  %v204_v29 = vld [vmem:[#allocation2 + $0x130] sm:$0xff]  ;;  %v205_v30 = vld [vmem:[#allocation2 + $0x138] sm:$0xff]  ;;  %v9698_v31 = vpack.c.bf16 %v189_v24, %v188_v23  ;;  %v190_v34 = vld [vmem:[#allocation2 + $0xc0] sm:$0xff]  ;;  %v95_v24 = vand.u32 15, %v81_v14  ;;  %v83_v26 = vadd.s32 24, %v11764_v46 }
  0x50   :  { %9693 = vmatpush3.bf16.msra.mxu0 %v9692_v16  ;;  %v172_v32 = vld [vmem:[#allocation2 + $0x30] sm:$0xff]  ;;  %v173_v33 = vld [vmem:[#allocation2 + $0x38] sm:$0xff]  ;;  %v191_v35 = vld [vmem:[#allocation2 + $0xc8] sm:$0xff]  ;;  %v9730_v37 = vpack.c.bf16 %v205_v30, %v204_v29  ;;  %vm11801_vm2 = vcmp.ne.s32.totalorder %v88_v21, 0 }
  0x51   :  { %9695 = vmatprep.subr.bf16.mxu0 %v9694_v19  ;;  %v9700_v38 = vpack.c.bf16 %v173_v33, %v172_v32  ;;  %v206_v39 = vld [vmem:[#allocation2 + $0x140] sm:$0xff]  ;;  %v207_v40 = vld [vmem:[#allocation2 + $0x148] sm:$0xff]  ;;  %v9702_v41 = vpack.c.bf16 %v191_v35, %v190_v34  ;;  %v192_v44 = vld [vmem:[#allocation2 + $0xd0] sm:$0xff]  ;;  %v82_v33 = vadd.s32 16, %v11764_v46  ;;  %vm11809_vm3 = vcmp.ne.s32.totalorder %v95_v24, 15 }
  0x52   :  { %9725 = vmatpush3.bf16.msra.mxu1 %v9722_v20  ;;  %v174_v42 = vld [vmem:[#allocation2 + $0x40] sm:$0xff]  ;;  %v175_v43 = vld [vmem:[#allocation2 + $0x48] sm:$0xff]  ;;  %v193_v45 = vld [vmem:[#allocation2 + $0xd8] sm:$0xff]  ;;  %v9734_v47 = vpack.c.bf16 %v207_v40, %v206_v39 }
  0x53   :  { %9727 = vmatprep.subr.bf16.mxu1 %v9726_v27  ;;  %v11769_v48 = vld [vmem:[%s12431_s0] sm:$0xff]  ;;  %v9704_v49 = vpack.c.bf16 %v175_v43, %v174_v42  ;;  %v208_v50 = vld [vmem:[#allocation2 + $0x150] sm:$0xff]  ;;  %v209_v51 = vld [vmem:[#allocation2 + $0x158] sm:$0xff]  ;;  %v9706_v54 = vpack.c.bf16 %v193_v45, %v192_v44  ;;  %v102_v42 = vand.u32 15, %v82_v33 }
  0x54   :  { %9697 = vmatpush3.bf16.msra.mxu0 %v9696_v28  ;;  %v153_v52 = vrot.slane %v11769_v48, 1  ;;  %283 = vmatprep.mubr.f32.mxu0 %v11769_v48  ;;  %v11777_v53 = vld [vmem:[%s12431_s0 + $0x8] sm:$0xff]  ;;  %v176_v55 = vld [vmem:[#allocation2 + $0x50] sm:$0xff]  ;;  %v177_v56 = vld [vmem:[#allocation2 + $0x58] sm:$0xff]  ;;  %v9738_v60 = vpack.c.bf16 %v209_v51, %v208_v50  ;;  %v140_v20 = vrot.slane %v11769_v48, 7 }
  0x55   :  { %9699 = vmatprep.subr.bf16.mxu0 %v9698_v31  ;;  %v154_v57 = vrot.slane %v11777_v53, 1  ;;  %v194_v58 = vld [vmem:[#allocation2 + $0xe0] sm:$0xff]  ;;  %v195_v59 = vld [vmem:[#allocation2 + $0xe8] sm:$0xff]  ;;  %v9708_v62 = vpack.c.bf16 %v177_v56, %v176_v55  ;;  %v196_v4 = vld [vmem:[#allocation2 + $0xf0] sm:$0xff]  ;;  %v141_v32 = vrot.slane %v11777_v53, 7  ;;  %vm11834_vm5 = vcmp.ne.s32.totalorder %v102_v42, 0 }
  0x56   :  { %9729 = vmatpush3.bf16.msra.mxu1 %v9726_v27  ;;  %v210_v63 = vld [vmem:[#allocation2 + $0x160] sm:$0xff]  ;;  %v211_v0 = vld [vmem:[#allocation2 + $0x168] sm:$0xff]  ;;  %v9710_v1 = vpack.c.bf16 %v195_v59, %v194_v58  ;;  %v197_v5 = vld [vmem:[#allocation2 + $0xf8] sm:$0xff] }
  0x57   :  { %9731 = vmatprep.subr.bf16.mxu1 %v9730_v37  ;;  %v160_v61 = vsel %vm157_vm0, %v153_v52, %v154_v57  ;;  %v178_v2 = vld [vmem:[#allocation2 + $0x60] sm:$0xff]  ;;  %v179_v3 = vld [vmem:[#allocation2 + $0x68] sm:$0xff]  ;;  %v9742_v6 = vpack.c.bf16 %v211_v0, %v210_v63  ;;  %v212_v8 = vld [vmem:[#allocation2 + $0x170] sm:$0xff]  ;;  %v9714_v10 = vpack.c.bf16 %v197_v5, %v196_v4 }
  0x58   :  { %9701 = vmatpush3.bf16.msra.mxu0 %v9700_v38  ;;  %8312 = vmatprep.mubr.f32.mxu1 %v160_v61  ;;  %v9712_v7 = vpack.c.bf16 %v179_v3, %v178_v2  ;;  %v213_v9 = vld [vmem:[#allocation2 + $0x178] sm:$0xff]  ;;  %v180_v11 = vld [vmem:[#allocation2 + $0x70] sm:$0xff]  ;;  %v390_v16 = vld [vmem:[#allocation6 + $0x8] sm:$0xff] }
  0x59   :  { %9703 = vmatprep.subr.bf16.mxu0 %v9702_v41  ;;  %v181_v12 = vld [vmem:[#allocation2 + $0x78] sm:$0xff]  ;;  %v9746_v17 = vpack.c.bf16 %v213_v9, %v212_v8  ;;  %v77_v18 = vld [vmem:[%s12431_s0 + $0x10] sm:$0xff]  ;;  %v391_v27 = vld [vmem:[#allocation6 + $0x10] sm:$0xff]  ;;  %v147_v41 = vsel %vm144_vm1, %v140_v20, %v141_v32 }
  0x5a   :  { %9733 = vmatpush3.bf16.msra.mxu1 %v9730_v37  ;;  %v11789_v13 = vld [vmem:[%s12431_s0 + $0x18] sm:$0xff]  ;;  %v9716_v19 = vpack.c.bf16 %v181_v12, %v180_v11  ;;  %v155_v25 = vrot.slane %v77_v18, 1  ;;  %v392_v28 = vld [vmem:[#allocation6 + $0x18] sm:$0xff]  ;;  %v109_v37 = vand.u32 15, %v83_v26  ;;  %v394_v39 = vld [vmem:[#allocation6 + $0x28] sm:$0xff]  ;;  %v142_v43 = vrot.slane %v77_v18, 7 }
  0x5b   :  { %9735 = vmatprep.subr.bf16.mxu1 %v9734_v47  ;;  %v389_v15 = vld [vmem:[#allocation6] sm:$0xff]  ;;  %v143_v22 = vrot.slane %v11789_v13, 7  ;;  %v156_v29 = vrot.slane %v11789_v13, 1  ;;  %v9754_v34 = vpack.c.bf16 %v392_v28, %v391_v27  ;;  %v396_v50 = vld [vmem:[#allocation6 + $0x38] sm:$0xff]  ;;  %v398_v55 = vld [vmem:[#allocation6 + $0x48] sm:$0xff] }
  0x5c   :  { %9705 = vmatpush3.bf16.msra.mxu0 %v9704_v49  ;;  %v9750_v23 = vpack.c.bf16 %v390_v16, %v389_v15  ;;  %v159_v36 = vsel %vm157_vm0, %v154_v57, %v155_v25  ;;  %v393_v38 = vld [vmem:[#allocation6 + $0x20] sm:$0xff]  ;;  %vm11826_vm4 = vcmp.ne.s32.totalorder %v109_v37, 15  ;;  %v395_v49 = vld [vmem:[#allocation6 + $0x30] sm:$0xff]  ;;  %v400_v58 = vld [vmem:[#allocation6 + $0x58] sm:$0xff] }
  0x5d   :  { %9707 = vmatprep.subr.bf16.mxu0 %v9706_v54  ;;  %v148_v31 = vsel %vm144_vm1, %v143_v22, %v140_v20  ;;  %v158_v40 = vsel %vm157_vm0, %v155_v25, %v156_v29  ;;  %v9758_v44 = vpack.c.bf16 %v394_v39, %v393_v38  ;;  %v9762_v48 = vpack.c.bf16 %v396_v50, %v395_v49  ;;  %v397_v54 = vld [vmem:[#allocation6 + $0x40] sm:$0xff]  ;;  %v399_v57 = vld [vmem:[#allocation6 + $0x50] sm:$0xff]  ;;  %v402_v61 = vld [vmem:[#allocation6 + $0x68] sm:$0xff] }
  0x5e   :  { %9737 = vmatpush3.bf16.msra.mxu1 %v9734_v47  ;;  %v161_v47 = vsel %vm157_vm0, %v156_v29, %v153_v52  ;;  %v145_v52 = vsel %vm144_vm1, %v142_v43, %v143_v22  ;;  %v9766_v56 = vpack.c.bf16 %v398_v55, %v397_v54  ;;  %v9770_v59 = vpack.c.bf16 %v400_v58, %v399_v57  ;;  %v403_v63 = vld [vmem:[#allocation6 + $0x70] sm:$0xff]  ;;  %v404_v0 = vld [vmem:[#allocation6 + $0x78] sm:$0xff]  ;;  %v536_v2 = vld [vmem:[#allocation2 + $0x200] sm:$0xff] }
  0x5f   :  { %9739 = vmatprep.subr.bf16.mxu1 %v9738_v60  ;;  %v537_v3 = vld [vmem:[#allocation2 + $0x208] sm:$0xff]  ;;  %v520_v4 = vld [vmem:[#allocation2 + $0x180] sm:$0xff]  ;;  %v538_v11 = vld [vmem:[#allocation2 + $0x210] sm:$0xff] }
  0x60   :  { %9709 = vmatpush3.bf16.msra.mxu0 %v9708_v62  ;;  %v9782_v5 = vpack.c.bf16 %v537_v3, %v536_v2  ;;  %v553_v8 = vld [vmem:[#allocation2 + $0x288] sm:$0xff]  ;;  %v539_v12 = vld [vmem:[#allocation2 + $0x218] sm:$0xff]  ;;  %v524_v20 = vld [vmem:[#allocation2 + $0x1a0] sm:$0xff] }
  0x61   :  { %9711 = vmatprep.subr.bf16.mxu0 %v9710_v1  ;;  %v9778_v1 = vpack.c.bf16 %v404_v0, %v403_v63  ;;  %v9786_v14 = vpack.c.bf16 %v539_v12, %v538_v11  ;;  %v523_v15 = vld [vmem:[#allocation2 + $0x198] sm:$0xff]  ;;  %v525_v21 = vld [vmem:[#allocation2 + $0x1a8] sm:$0xff]  ;;  %v542_v22 = vld [vmem:[#allocation2 + $0x230] sm:$0xff] }
  0x62   :  { %9741 = vmatpush3.bf16.msra.mxu1 %v9738_v60  ;;  %v401_v60 = vld [vmem:[#allocation6 + $0x60] sm:$0xff]  ;;  %v9792_v24 = vpack.c.bf16 %v525_v21, %v524_v20  ;;  %v526_v26 = vld [vmem:[#allocation2 + $0x1b0] sm:$0xff]  ;;  %v544_v28 = vld [vmem:[#allocation2 + $0x240] sm:$0xff] }
  0x63   :  { %9743 = vmatprep.subr.bf16.mxu1 %v9742_v6  ;;  %v9774_v62 = vpack.c.bf16 %v402_v61, %v401_v60  ;;  %v527_v27 = vld [vmem:[#allocation2 + $0x1b8] sm:$0xff]  ;;  %v545_v29 = vld [vmem:[#allocation2 + $0x248] sm:$0xff]  ;;  %v528_v33 = vld [vmem:[#allocation2 + $0x1c0] sm:$0xff] }
  0x64   :  { %9713 = vmatpush3.bf16.msra.mxu0 %v9712_v7  ;;  %v552_v7 = vld [vmem:[#allocation2 + $0x280] sm:$0xff]  ;;  %v554_v54 = vld [vmem:[#allocation2 + $0x290] sm:$0xff]  ;;  %v555_v55 = vld [vmem:[#allocation2 + $0x298] sm:$0xff] }
  0x65   :  { %9715 = vmatprep.subr.bf16.mxu0 %v9714_v10  ;;  %v11847_v10 = vpack.c.bf16 %v553_v8, %v552_v7  ;;  %v6687_v39 = vld [vmem:[#allocation4] ss:$0 sm:$0xff]  ;;  %v9818_v60 = vpack.c.bf16 %v555_v55, %v554_v54  ;;  %v561_v12 = vld [vmem:[#allocation2 + $0x2c8] sm:$0xff]  ;;  %v563_v20 = vld [vmem:[#allocation2 + $0x2d8] sm:$0xff] }
  0x66   :  { %9745 = vmatpush3.bf16.msra.mxu1 %v9742_v6  ;;  %v521_v6 = vld [vmem:[#allocation2 + $0x188] sm:$0xff]  ;;  %v556_v61 = vld [vmem:[#allocation2 + $0x2a0] sm:$0xff]  ;;  %v6787_v46 = vld [vmem:[#allocation4 + $0x10] ss:$0 sm:$0xff] }
  0x67   :  { %9747 = vmatprep.subr.bf16.mxu1 %v9746_v17  ;;  %v9784_v9 = vpack.c.bf16 %v521_v6, %v520_v4  ;;  %v559_v6 = vld [vmem:[#allocation2 + $0x2b8] sm:$0xff]  ;;  %v560_v11 = vld [vmem:[#allocation2 + $0x2c0] sm:$0xff] }
  0x68   :  { %9717 = vmatpush3.bf16.msra.mxu0 %v9716_v19 }
  0x69   :  { %9751 = vmatprep.subr.bf16.mxu0 %v9750_v23 }
  0x6a   :  { %9749 = vmatpush3.bf16.msra.mxu1 %v9746_v17  ;;  %v540_v17 = vld [vmem:[#allocation2 + $0x220] sm:$0xff] }
  0x6b   :  { %6688 = vmatmul.mubr.msk.f32.vlgmr.msra.gmra.mrb[0].mxu0 %vm11801_vm2, %v148_v31  ;;  %9783 = vmatprep.subr.bf16.mxu1 %v9782_v5  ;;  %v9796_v31 = vpack.c.bf16 %v527_v27, %v526_v26  ;;  %v558_v5 = vld [vmem:[#allocation2 + $0x2b0] sm:$0xff]  ;;  %v533_v26 = vld [vmem:[#allocation2 + $0x1e8] sm:$0xff] }
  0x6c   :  { %288 = vmatprep.mubr.f32.mxu0 %v11777_v53  ;;  %9753 = vmatpush3.bf16.msra.mxu0 %v9750_v23  ;;  %v146_v53 = vsel %vm144_vm1, %v141_v32, %v142_v43  ;;  %v543_v23 = vld [vmem:[#allocation2 + $0x238] sm:$0xff]  ;;  %v9798_v32 = vpack.c.bf16 %v545_v29, %v544_v28  ;;  %v564_v28 = vld [vmem:[#allocation2 + $0x2e0] sm:$0xff]  ;;  %v565_v29 = vld [vmem:[#allocation2 + $0x2e8] sm:$0xff] }
  0x6d   :  { %8313 = vmatmul.mubr.msk.f32.vlgmr.msra.gmra.mrb[0].mxu1 %vm11809_vm3, %v159_v36  ;;  %9755 = vmatprep.subr.bf16.mxu0 %v9754_v34  ;;  %v9794_v25 = vpack.c.bf16 %v543_v23, %v542_v22  ;;  %v548_v22 = vld [vmem:[#allocation2 + $0x260] sm:$0xff]  ;;  %v549_v23 = vld [vmem:[#allocation2 + $0x268] sm:$0xff] }
  0x6e   :  { %8315 = vmatprep.mubr.f32.mxu1 %v158_v40  ;;  %9785 = vmatpush3.bf16.msra.mxu1 %v9784_v9  ;;  %v9826_v9 = vpack.c.bf16 %v559_v6, %v558_v5 }
  0x6f   :  { %289 = vmatmul.mubr.f32.gmra.mrb[2].mxu0 %v147_v41  ;;  %9787 = vmatprep.subr.bf16.mxu1 %v9786_v14  ;;  %v547_v14 = vld [vmem:[#allocation2 + $0x258] sm:$0xff] }
  0x70   :  { %293 = vmatprep.mubr.f32.mxu0 %v77_v18  ;;  %9757 = vmatpush3.bf16.msra.mxu0 %v9754_v34  ;;  %v541_v18 = vld [vmem:[#allocation2 + $0x228] sm:$0xff] }
  0x71   :  { %8316 = vmatmul.mubr.msk.f32.gmra.mrb[2].mxu1 %vm11826_vm4, %v161_v47  ;;  %9759 = vmatprep.subr.bf16.mxu0 %v9758_v44  ;;  %v9790_v19 = vpack.c.bf16 %v541_v18, %v540_v17  ;;  %v529_v34 = vld [vmem:[#allocation2 + $0x1c8] sm:$0xff]  ;;  %v531_v17 = vld [vmem:[#allocation2 + $0x1d8] sm:$0xff] }
  0x72   :  { %v9800_v36 = vpack.c.bf16 %v529_v34, %v528_v33  ;;  %v551_v33 = vld [vmem:[#allocation2 + $0x278] sm:$0xff] }
  0x73   :  { %6689 = vmatmul.mubr.msk.f32.gmra.mrb[4].mxu0 %vm11834_vm5, %v146_v53 }
  0x74   :  { %298 = vmatprep.mubr.f32.mxu0 %v11789_v13  ;;  %9761 = vmatpush3.bf16.msra.mxu0 %v9758_v44  ;;  %v522_v13 = vld [vmem:[#allocation2 + $0x190] sm:$0xff] }
  0x75   :  { %9763 = vmatprep.subr.bf16.mxu0 %v9762_v48  ;;  %v9788_v16 = vpack.c.bf16 %v523_v15, %v522_v13  ;;  %v546_v13 = vld [vmem:[#allocation2 + $0x250] sm:$0xff] }
  0x76   :  { %v9802_v15 = vpack.c.bf16 %v547_v14, %v546_v13  ;;  %v749_v13 = vld [vmem:[#allocation6 + $0xa8] sm:$0xff] }
  0x77   :  { %299 = vmatmul.mubr.f32.gmra.mrb[6].mxu0 %v145_v52  ;;  %9789 = vmatpush3.bf16.msra.mxu1 %v9788_v16  ;;  %v530_v16 = vld [vmem:[#allocation2 + $0x1d0] sm:$0xff] }
  0x78   :  { %9765 = vmatpush3.bf16.msra.mxu0 %v9762_v48  ;;  %9791 = vmatprep.subr.bf16.mxu1 %v9790_v19  ;;  %v9804_v18 = vpack.c.bf16 %v531_v17, %v530_v16  ;;  %v562_v19 = vld [vmem:[#allocation2 + $0x2d0] sm:$0xff] }
  0x79   :  { %9767 = vmatprep.subr.bf16.mxu0 %v9766_v56  ;;  %v9834_v21 = vpack.c.bf16 %v563_v20, %v562_v19  ;;  %v750_v19 = vld [vmem:[#allocation6 + $0xb0] sm:$0xff]  ;;  %v751_v20 = vld [vmem:[#allocation6 + $0xb8] sm:$0xff] }
  0x7b   :  { %9793 = vmatpush3.bf16.msra.mxu1 %v9792_v24  ;;  %v9806_v24 = vpack.c.bf16 %v549_v23, %v548_v22  ;;  %v752_v22 = vld [vmem:[#allocation6 + $0xc0] sm:$0xff]  ;;  %v753_v23 = vld [vmem:[#allocation6 + $0xc8] sm:$0xff] }
  0x7c   :  { %9769 = vmatpush3.bf16.msra.mxu0 %v9766_v56  ;;  %9795 = vmatprep.subr.bf16.mxu1 %v9794_v25  ;;  %v532_v25 = vld [vmem:[#allocation2 + $0x1e0] sm:$0xff] }
  0x7d   :  { %9771 = vmatprep.subr.bf16.mxu0 %v9770_v59  ;;  %v9808_v27 = vpack.c.bf16 %v533_v26, %v532_v25  ;;  %v754_v25 = vld [vmem:[#allocation6 + $0xd0] sm:$0xff]  ;;  %v755_v26 = vld [vmem:[#allocation6 + $0xd8] sm:$0xff] }
  0x7f   :  { %9797 = vmatpush3.bf16.msra.mxu1 %v9796_v31  ;;  %v9838_v31 = vpack.c.bf16 %v565_v29, %v564_v28  ;;  %v756_v28 = vld [vmem:[#allocation6 + $0xe0] sm:$0xff]  ;;  %v757_v29 = vld [vmem:[#allocation6 + $0xe8] sm:$0xff] }
  0x80   :  { %9773 = vmatpush3.bf16.msra.mxu0 %v9770_v59  ;;  %9799 = vmatprep.subr.bf16.mxu1 %v9798_v32  ;;  %v550_v32 = vld [vmem:[#allocation2 + $0x270] sm:$0xff] }
  0x81   :  { %9775 = vmatprep.subr.bf16.mxu0 %v9774_v62  ;;  %v9810_v34 = vpack.c.bf16 %v551_v33, %v550_v32  ;;  %v758_v32 = vld [vmem:[#allocation6 + $0xf0] sm:$0xff]  ;;  %v759_v33 = vld [vmem:[#allocation6 + $0xf8] sm:$0xff] }
  0x83   :  { %9801 = vmatpush3.bf16.msra.mxu1 %v9800_v36  ;;  %v534_v36 = vld [vmem:[#allocation2 + $0x1f0] sm:$0xff] }
  0x84   :  { %9777 = vmatpush3.bf16.msra.mxu0 %v9774_v62  ;;  %v557_v62 = vld [vmem:[#allocation2 + $0x2a8] sm:$0xff]  ;;  %9803 = vmatprep.subr.bf16.mxu1 %v9802_v15 }
  0x85   :  { %9779 = vmatprep.subr.bf16.mxu0 %v9778_v1  ;;  %v9822_v4 = vpack.c.bf16 %v557_v62, %v556_v61 }
  0x87   :  { %9805 = vmatpush3.bf16.msra.mxu1 %v9804_v18 }
  0x88   :  { %9781 = vmatpush3.bf16.msra.mxu0 %v9778_v1  ;;  %9807 = vmatprep.subr.bf16.mxu1 %v9806_v24  ;;  %v9862_v24 = vpack.c.bf16 %v753_v23, %v752_v22 }
  0x89   :  { %9815 = vmatprep.subr.bf16.mxu0 %v11847_v10 }
  0x8b   :  { %9809 = vmatpush3.bf16.msra.mxu1 %v9808_v27  ;;  %v9866_v27 = vpack.c.bf16 %v755_v26, %v754_v25  ;;  %v1015_v25 = vld [vmem:[#allocation2 + $0x348] sm:$0xff]  ;;  %v863_v26 = vld [vmem:[#allocation6 + $0x160] sm:$0xff] }
  0x8c   :  { %9811 = vmatprep.subr.bf16.mxu1 %v9810_v34  ;;  %v9874_v34 = vpack.c.bf16 %v759_v33, %v758_v32 }
 0x13e   :  { %v6824_v37 = vpop.f32.mrb[0].mxu0 }
 0x13f   :  { %v6825_v38 = vpop.f32.mrb[1].mxu0 }
 0x140   :  { %v6826_v40 = vadd.f32 %v6825_v38, %v6824_v37  ;;  %v8314_v41 = vpop.f32.mrb[0].mxu1  ;;  %v535_v37 = vld [vmem:[#allocation2 + $0x1f8] sm:$0xff] }
 0x141   :  { %v370_v42 = vpop.f32.mrb[1].mxu1  ;;  %v9812_v38 = vpack.c.bf16 %v535_v37, %v534_v36  ;;  %v851_v36 = vld [vmem:[#allocation6 + $0x100] sm:$0xff]  ;;  %v852_v37 = vld [vmem:[#allocation6 + $0x108] sm:$0xff] }
 0x142   :  { %v6827_v43 = vpop.f32.mrb[2].mxu0  ;;  %v286_v44 = vadd.f32 %v6826_v40, %v6687_v39  ;;  %v567_v40 = vld [vmem:[#allocation2 + $0x2f8] sm:$0xff] }
 0x143   :  { %v6828_v47 = vpop.f32.mrb[3].mxu0  ;;  %9813 = vmatpush3.bf16.msra.mxu1 %v9812_v38  ;;  %v9878_v38 = vpack.c.bf16 %v852_v37, %v851_v36  ;;  %v1017_v36 = vld [vmem:[#allocation2 + $0x358] sm:$0xff] }
 0x144   :  { %v6829_v49 = vadd.f32 %v6828_v47, %v6827_v43  ;;  %v11850_v50 = vadd.f32 %v370_v42, %v286_v44  ;;  %v8317_v53 = vpop.f32.mrb[2].mxu1  ;;  %v744_v42 = vld [vmem:[#allocation6 + $0x80] sm:$0xff]  ;;  %v745_v43 = vld [vmem:[#allocation6 + $0x88] sm:$0xff] }
 0x145   :  { %v380_v48 = vpop.f32.mrb[3].mxu1  ;;  %v9846_v44 = vpack.c.bf16 %v745_v43, %v744_v42  ;;  %v6692_v47 = vld [vmem:[#allocation7] ss:$0 sm:$0xff]  ;;  %v1022_v42 = vld [vmem:[#allocation2 + $0x380] sm:$0xff]  ;;  %v1023_v43 = vld [vmem:[#allocation2 + $0x388] sm:$0xff] }
 0x146   :  { %v291_v52 = vadd.f32 %v6829_v49, %v6687_v39  ;;  %v6830_v56 = vpop.f32.mrb[4].mxu0  ;;  %8350 = vmatprep.mubr.f32.mxu0 %v11850_v50 }
 0x147   :  { %v6831_v57 = vpop.f32.mrb[5].mxu0  ;;  %9847 = vmatprep.subr.bf16.mxu1 %v9846_v44 }
 0x148   :  { %v11853_v58 = vadd.f32 %v8314_v41, %v291_v52  ;;  %v6832_v59 = vadd.f32 %v6831_v57, %v6830_v56 }
 0x14a   :  { %v6833_v63 = vpop.f32.mrb[6].mxu0  ;;  %8351 = vmatmul.mubr.f32.vlgmr.msra.gmra.mrb[8].mxu0 %v11853_v58  ;;  %v296_v0 = vadd.f32 %v6832_v59, %v6687_v39 }
 0x14b   :  { %v6834_v1 = vpop.f32.mrb[7].mxu0  ;;  %9817 = vmatpush3.bf16.msra.mxu0 %v11847_v10  ;;  %v9830_v10 = vpack.c.bf16 %v561_v12, %v560_v11 }
 0x14c   :  { %v6835_v2 = vadd.f32 %v6834_v1, %v6833_v63  ;;  %v11857_v3 = vadd.f32 %v380_v48, %v296_v0  ;;  %9819 = vmatprep.subr.bf16.mxu0 %v9818_v60  ;;  %v746_v0 = vld [vmem:[#allocation6 + $0x90] sm:$0xff]  ;;  %v747_v1 = vld [vmem:[#allocation6 + $0x98] sm:$0xff] }
 0x14e   :  { %v301_v7 = vadd.f32 %v6835_v2, %v6687_v39  ;;  %8353 = vmatprep.mubr.f32.mxu0 %v11857_v3  ;;  %v566_v39 = vld [vmem:[#allocation2 + $0x2f0] sm:$0xff] }
 0x14f   :  { %9821 = vmatpush3.bf16.msra.mxu0 %v9818_v60  ;;  %v9842_v41 = vpack.c.bf16 %v567_v40, %v566_v39  ;;  %v853_v39 = vld [vmem:[#allocation6 + $0x110] sm:$0xff]  ;;  %v854_v40 = vld [vmem:[#allocation6 + $0x118] sm:$0xff] }
 0x150   :  { %v11860_v8 = vadd.f32 %v8317_v53, %v301_v7  ;;  %9823 = vmatprep.subr.bf16.mxu0 %v9822_v4 }
 0x152   :  { %8354 = vmatmul.mubr.f32.gmra.mrb[10].mxu0 %v11860_v8 }
 0x153   :  { %9825 = vmatpush3.bf16.msra.mxu0 %v9822_v4 }
 0x154   :  { %9827 = vmatprep.subr.bf16.mxu0 %v9826_v9 }
 0x157   :  { %9829 = vmatpush3.bf16.msra.mxu0 %v9826_v9  ;;  %v9850_v9 = vpack.c.bf16 %v747_v1, %v746_v0  ;;  %v1026_v1 = vld [vmem:[#allocation2 + $0x3a0] sm:$0xff] }
 0x158   :  { %9831 = vmatprep.subr.bf16.mxu0 %v9830_v10 }
 0x15b   :  { %9833 = vmatpush3.bf16.msra.mxu0 %v9830_v10  ;;  %v748_v10 = vld [vmem:[#allocation6 + $0xa0] sm:$0xff] }
 0x15c   :  { %9835 = vmatprep.subr.bf16.mxu0 %v9834_v21  ;;  %v9854_v18 = vpack.c.bf16 %v749_v13, %v748_v10  ;;  %v1029_v10 = vld [vmem:[#allocation2 + $0x3b8] sm:$0xff] }
 0x15f   :  { %9837 = vmatpush3.bf16.msra.mxu0 %v9834_v21  ;;  %v9858_v21 = vpack.c.bf16 %v751_v20, %v750_v19  ;;  %v862_v19 = vld [vmem:[#allocation6 + $0x158] sm:$0xff]  ;;  %v1030_v20 = vld [vmem:[#allocation2 + $0x3c0] sm:$0xff] }
 0x160   :  { %9839 = vmatprep.subr.bf16.mxu0 %v9838_v31 }
 0x163   :  { %9841 = vmatpush3.bf16.msra.mxu0 %v9838_v31  ;;  %v9870_v31 = vpack.c.bf16 %v757_v29, %v756_v28  ;;  %v1032_v28 = vld [vmem:[#allocation2 + $0x3d0] sm:$0xff]  ;;  %v1033_v29 = vld [vmem:[#allocation2 + $0x3d8] sm:$0xff] }
 0x164   :  { %9843 = vmatprep.subr.bf16.mxu0 %v9842_v41  ;;  %v9930_v33 = vpack.c.bf16 %v1033_v29, %v1032_v28 }
 0x167   :  { %9845 = vmatpush3.bf16.msra.mxu0 %v9842_v41  ;;  %v9882_v41 = vpack.c.bf16 %v854_v40, %v853_v39  ;;  %v866_v39 = vld [vmem:[#allocation6 + $0x178] sm:$0xff] }
 0x168   :  { %9879 = vmatprep.subr.bf16.mxu0 %v9878_v38 }
 0x21d   :  { %v8352_v49 = vpop.f32.mrb[8].mxu0 }
 0x21e   :  { %v482_v53 = vadd.f32 %v8352_v49, %v6692_v47  ;;  %v476_v48 = vpop.f32.mrb[9].mxu0  ;;  %v1007_v49 = vld [vmem:[#allocation2 + $0x308] sm:$0xff] }
 0x21f   :  { %v477_v54 = vadd.f32 %v6692_v47, %v476_v48  ;;  %v855_v48 = vld [vmem:[#allocation6 + $0x120] sm:$0xff] }
 0x220   :  { %v496_v55 = vrot.slane %v482_v53, 7  ;;  %v508_v52 = vrot.slane %v482_v53, 1 }
 0x221   :  { %v495_v56 = vrot.slane %v477_v54, 7  ;;  %v507_v57 = vrot.slane %v477_v54, 1  ;;  %637 = vmatprep.mubr.f32.mxu1 %v477_v54  ;;  %v856_v54 = vld [vmem:[#allocation6 + $0x128] sm:$0xff] }
 0x223   :  { %v513_v59 = vsel %vm157_vm0, %v507_v57, %v508_v52  ;;  %v501_v60 = vsel %vm144_vm1, %v495_v56, %v496_v55 }
 0x224   :  { %8388 = vmatprep.mubr.f32.mxu0 %v513_v59  ;;  %v1008_v59 = vld [vmem:[#allocation2 + $0x310] sm:$0xff] }
 0x225   :  { %v8355_v61 = vpop.f32.mrb[10].mxu0 }
 0x226   :  { %v492_v62 = vadd.f32 %v8355_v61, %v6692_v47  ;;  %v486_v63 = vpop.f32.mrb[11].mxu0 }
 0x227   :  { %v487_v2 = vadd.f32 %v6692_v47, %v486_v63  ;;  %v1006_v47 = vld [vmem:[#allocation2 + $0x300] sm:$0xff]  ;;  %v858_v63 = vld [vmem:[#allocation6 + $0x138] sm:$0xff] }
 0x228   :  { %v498_v4 = vrot.slane %v492_v62, 7  ;;  %v510_v5 = vrot.slane %v492_v62, 1 }
 0x229   :  { %v497_v6 = vrot.slane %v487_v2, 7  ;;  %v509_v7 = vrot.slane %v487_v2, 1 }
 0x22a   :  { %v502_v11 = vsel %vm144_vm1, %v498_v4, %v495_v56  ;;  %v514_v12 = vsel %vm157_vm0, %v510_v5, %v507_v57  ;;  %v1025_v56 = vld [vmem:[#allocation2 + $0x398] sm:$0xff] }
 0x22b   :  { %6694 = vmatmul.mubr.msk.f32.vlgmr.msra.gmra.mrb[4].mxu1 %vm11801_vm2, %v502_v11  ;;  %v512_v14 = vsel %vm157_vm0, %v508_v52, %v509_v7  ;;  %v511_v15 = vsel %vm157_vm0, %v509_v7, %v510_v5  ;;  %v500_v16 = vsel %vm144_vm1, %v496_v55, %v497_v6  ;;  %v499_v17 = vsel %vm144_vm1, %v497_v6, %v498_v4  ;;  %v1024_v52 = vld [vmem:[#allocation2 + $0x390] sm:$0xff]  ;;  %v1010_v5 = vld [vmem:[#allocation2 + $0x320] sm:$0xff]  ;;  %v1011_v6 = vld [vmem:[#allocation2 + $0x328] sm:$0xff] }
 0x22c   :  { %9849 = vmatpush3.bf16.msra.mxu1 %v9846_v44  ;;  %642 = vmatprep.mubr.f32.mxu1 %v482_v53  ;;  %v9910_v44 = vpack.c.bf16 %v1023_v43, %v1022_v42  ;;  %v9912_v53 = vpack.c.bf16 %v1007_v49, %v1006_v47  ;;  %v9886_v55 = vpack.c.bf16 %v856_v54, %v855_v48  ;;  %v859_v7 = vld [vmem:[#allocation6 + $0x140] sm:$0xff]  ;;  %v860_v11 = vld [vmem:[#allocation6 + $0x148] sm:$0xff]  ;;  %v1035_v42 = vld [vmem:[#allocation2 + $0x3e8] sm:$0xff] }
 0x22d   :  { %8389 = vmatmul.mubr.msk.f32.vlgmr.msra.gmra.mrb[12].mxu0 %vm11809_vm3, %v512_v14  ;;  %9851 = vmatprep.subr.bf16.mxu1 %v9850_v9  ;;  %v9914_v57 = vpack.c.bf16 %v1025_v56, %v1024_v52  ;;  %v9894_v13 = vpack.c.bf16 %v860_v11, %v859_v7  ;;  %v1019_v47 = vld [vmem:[#allocation2 + $0x368] sm:$0xff]  ;;  %v1037_v52 = vld [vmem:[#allocation2 + $0x3f8] sm:$0xff] }
 0x22e   :  { %8391 = vmatprep.mubr.f32.mxu0 %v511_v15  ;;  %9881 = vmatpush3.bf16.msra.mxu0 %v9878_v38  ;;  %v1012_v15 = vld [vmem:[#allocation2 + $0x330] sm:$0xff]  ;;  %v865_v38 = vld [vmem:[#allocation6 + $0x170] sm:$0xff] }
 0x22f   :  { %643 = vmatmul.mubr.f32.gmra.mrb[6].mxu1 %v501_v60  ;;  %9883 = vmatprep.subr.bf16.mxu0 %v9882_v41  ;;  %v1009_v60 = vld [vmem:[#allocation2 + $0x318] sm:$0xff]  ;;  %v9906_v40 = vpack.c.bf16 %v866_v39, %v865_v38  ;;  %v1039_v48 = vld [vmem:[#allocation2 + $0x408] sm:$0xff] }
 0x230   :  { %9853 = vmatpush3.bf16.msra.mxu1 %v9850_v9  ;;  %647 = vmatprep.mubr.f32.mxu1 %v487_v2  ;;  %v9916_v61 = vpack.c.bf16 %v1009_v60, %v1008_v59  ;;  %v1027_v2 = vld [vmem:[#allocation2 + $0x3a8] sm:$0xff]  ;;  %v9920_v9 = vpack.c.bf16 %v1011_v6, %v1010_v5  ;;  %v1021_v59 = vld [vmem:[#allocation2 + $0x378] sm:$0xff] }
 0x231   :  { %8392 = vmatmul.mubr.msk.f32.gmra.mrb[14].mxu0 %vm11826_vm4, %v514_v12  ;;  %9855 = vmatprep.subr.bf16.mxu1 %v9854_v18  ;;  %v9918_v4 = vpack.c.bf16 %v1027_v2, %v1026_v1  ;;  %v1028_v12 = vld [vmem:[#allocation2 + $0x3b0] sm:$0xff]  ;;  %v1045_v38 = vld [vmem:[#allocation2 + $0x438] sm:$0xff] }
 0x232   :  { %9885 = vmatpush3.bf16.msra.mxu0 %v9882_v41  ;;  %v9922_v14 = vpack.c.bf16 %v1029_v10, %v1028_v12  ;;  %v1034_v41 = vld [vmem:[#allocation2 + $0x3e0] sm:$0xff]  ;;  %v6698_v12 = vld [vmem:[#allocation7 + $0x1] ss:$0 sm:$0xff] }
 0x233   :  { %6695 = vmatmul.mubr.msk.f32.gmra.mrb[8].mxu1 %vm11834_vm5, %v500_v16  ;;  %9887 = vmatprep.subr.bf16.mxu0 %v9886_v55  ;;  %v1013_v16 = vld [vmem:[#allocation2 + $0x338] sm:$0xff]  ;;  %v9934_v43 = vpack.c.bf16 %v1035_v42, %v1034_v41 }
 0x234   :  { %9857 = vmatpush3.bf16.msra.mxu1 %v9854_v18  ;;  %652 = vmatprep.mubr.f32.mxu1 %v492_v62  ;;  %v857_v62 = vld [vmem:[#allocation6 + $0x130] sm:$0xff]  ;;  %v9924_v18 = vpack.c.bf16 %v1013_v16, %v1012_v15 }
 0x235   :  { %9859 = vmatprep.subr.bf16.mxu1 %v9858_v21  ;;  %v9890_v0 = vpack.c.bf16 %v858_v63, %v857_v62 }
 0x236   :  { %9889 = vmatpush3.bf16.msra.mxu0 %v9886_v55  ;;  %v1036_v55 = vld [vmem:[#allocation2 + $0x3f0] sm:$0xff] }
 0x237   :  { %653 = vmatmul.mubr.f32.gmra.mrb[10].mxu1 %v499_v17  ;;  %9891 = vmatprep.subr.bf16.mxu0 %v9890_v0  ;;  %v861_v17 = vld [vmem:[#allocation6 + $0x150] sm:$0xff]  ;;  %v9938_v56 = vpack.c.bf16 %v1037_v52, %v1036_v55  ;;  %v1048_v55 = vld [vmem:[#allocation2 + $0x450] sm:$0xff]  ;;  %v1049_v52 = vld [vmem:[#allocation2 + $0x458] sm:$0xff] }
 0x238   :  { %9861 = vmatpush3.bf16.msra.mxu1 %v9858_v21  ;;  %8426 = vmatprep.mubr.f32.mxu1 %v11850_v50  ;;  %v1031_v21 = vld [vmem:[#allocation2 + $0x3c8] sm:$0xff]  ;;  %v9898_v22 = vpack.c.bf16 %v862_v19, %v861_v17 }
 0x239   :  { %9863 = vmatprep.subr.bf16.mxu1 %v9862_v24  ;;  %v9926_v23 = vpack.c.bf16 %v1031_v21, %v1030_v20 }
 0x23a   :  { %9893 = vmatpush3.bf16.msra.mxu0 %v9890_v0 }
 0x23b   :  { %9895 = vmatprep.subr.bf16.mxu0 %v9894_v13 }
 0x23c   :  { %9865 = vmatpush3.bf16.msra.mxu1 %v9862_v24  ;;  %v1014_v24 = vld [vmem:[#allocation2 + $0x340] sm:$0xff] }
 0x23d   :  { %9867 = vmatprep.subr.bf16.mxu1 %v9866_v27  ;;  %v9928_v32 = vpack.c.bf16 %v1015_v25, %v1014_v24 }
 0x23e   :  { %9897 = vmatpush3.bf16.msra.mxu0 %v9894_v13  ;;  %v1040_v13 = vld [vmem:[#allocation2 + $0x410] sm:$0xff] }
 0x23f   :  { %9899 = vmatprep.subr.bf16.mxu0 %v9898_v22 }
 0x240   :  { %9869 = vmatpush3.bf16.msra.mxu1 %v9866_v27  ;;  %v864_v27 = vld [vmem:[#allocation6 + $0x168] sm:$0xff] }
 0x241   :  { %9871 = vmatprep.subr.bf16.mxu1 %v9870_v31 }
 0x242   :  { %9901 = vmatpush3.bf16.msra.mxu0 %v9898_v22 }
 0x244   :  { %9873 = vmatpush3.bf16.msra.mxu1 %v9870_v31  ;;  %v9902_v31 = vpack.c.bf16 %v864_v27, %v863_v26  ;;  %v1042_v26 = vld [vmem:[#allocation2 + $0x420] sm:$0xff]  ;;  %v1043_v27 = vld [vmem:[#allocation2 + $0x428] sm:$0xff] }
 0x245   :  { %9875 = vmatprep.subr.bf16.mxu1 %v9874_v34 }
 0x246   :  { %9903 = vmatprep.subr.bf16.mxu0 %v9902_v31 }
 0x247   :  { %9905 = vmatpush3.bf16.msra.mxu0 %v9902_v31 }
 0x248   :  { %9877 = vmatpush3.bf16.msra.mxu1 %v9874_v34  ;;  %v1016_v34 = vld [vmem:[#allocation2 + $0x350] sm:$0xff]  ;;  %9907 = vmatprep.subr.bf16.mxu0 %v9906_v40 }
 0x249   :  { %9911 = vmatprep.subr.bf16.mxu1 %v9910_v44  ;;  %v9932_v37 = vpack.c.bf16 %v1017_v36, %v1016_v34  ;;  %v1018_v44 = vld [vmem:[#allocation2 + $0x360] sm:$0xff]  ;;  %v9950_v36 = vpack.c.bf16 %v1043_v27, %v1042_v26 }
 0x24a   :  { %v9936_v49 = vpack.c.bf16 %v1019_v47, %v1018_v44  ;;  %v1262_v27 = vld [vmem:[#allocation2 + $0x4a0] sm:$0xff] }
 0x24b   :  { %8427 = vmatmul.mubr.f32.vlgmr.msra.gmra.mrb[12].mxu1 %v11853_v58  ;;  %9909 = vmatpush3.bf16.msra.mxu0 %v9906_v40 }
 0x24c   :  { %8429 = vmatprep.mubr.f32.mxu1 %v11857_v3  ;;  %9913 = vmatpush3.bf16.msra.mxu1 %v9912_v53  ;;  %v1038_v53 = vld [vmem:[#allocation2 + $0x400] sm:$0xff] }
 0x24d   :  { %9915 = vmatprep.subr.bf16.mxu1 %v9914_v57  ;;  %v9942_v54 = vpack.c.bf16 %v1039_v48, %v1038_v53  ;;  %v1020_v57 = vld [vmem:[#allocation2 + $0x370] sm:$0xff]  ;;  %v1046_v53 = vld [vmem:[#allocation2 + $0x440] sm:$0xff]  ;;  %v1047_v48 = vld [vmem:[#allocation2 + $0x448] sm:$0xff] }
 0x24e   :  { %v9940_v60 = vpack.c.bf16 %v1021_v59, %v1020_v57  ;;  %v1050_v57 = vld [vmem:[#allocation2 + $0x460] sm:$0xff]  ;;  %v1051_v59 = vld [vmem:[#allocation2 + $0x468] sm:$0xff] }
 0x24f   :  { %8430 = vmatmul.mubr.f32.gmra.mrb[14].mxu1 %v11860_v8  ;;  %9943 = vmatprep.subr.bf16.mxu0 %v9942_v54 }
 0x250   :  { %9917 = vmatpush3.bf16.msra.mxu1 %v9916_v61 }
 0x251   :  { %9919 = vmatprep.subr.bf16.mxu1 %v9918_v4 }
 0x254   :  { %9921 = vmatpush3.bf16.msra.mxu1 %v9920_v9 }
 0x255   :  { %9923 = vmatprep.subr.bf16.mxu1 %v9922_v14  ;;  %v1041_v14 = vld [vmem:[#allocation2 + $0x418] sm:$0xff] }
 0x258   :  { %9925 = vmatpush3.bf16.msra.mxu1 %v9924_v18  ;;  %v9946_v18 = vpack.c.bf16 %v1041_v14, %v1040_v13  ;;  %v1291_v13 = vld [vmem:[#allocation2 + $0x588] sm:$0xff] }
 0x259   :  { %9927 = vmatprep.subr.bf16.mxu1 %v9926_v23 }
 0x25c   :  { %9929 = vmatpush3.bf16.msra.mxu1 %v9928_v32 }
 0x25d   :  { %9931 = vmatprep.subr.bf16.mxu1 %v9930_v33 }
 0x260   :  { %9933 = vmatpush3.bf16.msra.mxu1 %v9932_v37  ;;  %v1044_v37 = vld [vmem:[#allocation2 + $0x430] sm:$0xff] }
 0x261   :  { %9935 = vmatprep.subr.bf16.mxu1 %v9934_v43  ;;  %v9954_v47 = vpack.c.bf16 %v1045_v38, %v1044_v37  ;;  %v1264_v38 = vld [vmem:[#allocation2 + $0x4b0] sm:$0xff] }
 0x264   :  { %9937 = vmatpush3.bf16.msra.mxu1 %v9936_v49 }
 0x265   :  { %9939 = vmatprep.subr.bf16.mxu1 %v9938_v56  ;;  %v9962_v56 = vpack.c.bf16 %v1049_v52, %v1048_v55  ;;  %v1299_v55 = vld [vmem:[#allocation2 + $0x5c8] sm:$0xff] }
 0x268   :  { %9941 = vmatpush3.bf16.msra.mxu1 %v9940_v60  ;;  %v9966_v60 = vpack.c.bf16 %v1051_v59, %v1050_v57  ;;  %v1284_v57 = vld [vmem:[#allocation2 + $0x550] sm:$0xff]  ;;  %v1285_v59 = vld [vmem:[#allocation2 + $0x558] sm:$0xff] }
 0x2fe   :  { %v6908_v61 = vpop.f32.mrb[4].mxu1 }
 0x2ff   :  { %v6909_v62 = vpop.f32.mrb[5].mxu1 }
 0x300   :  { %v11891_v63 = vadd.f32 %v6909_v62, %v6908_v61  ;;  %v1052_v61 = vld [vmem:[#allocation2 + $0x470] sm:$0xff]  ;;  %v1053_v62 = vld [vmem:[#allocation2 + $0x478] sm:$0xff] }
 0x302   :  { %v6911_v0 = vpop.f32.mrb[6].mxu1 }
 0x303   :  { %v6912_v1 = vpop.f32.mrb[7].mxu1 }
 0x304   :  { %v11893_v2 = vadd.f32 %v6912_v1, %v6911_v0  ;;  %v9970_v0 = vpack.c.bf16 %v1053_v62, %v1052_v61  ;;  %v1274_v1 = vld [vmem:[#allocation2 + $0x500] sm:$0xff]  ;;  %v1268_v61 = vld [vmem:[#allocation2 + $0x4d0] sm:$0xff]  ;;  %v1269_v62 = vld [vmem:[#allocation2 + $0x4d8] sm:$0xff] }
 0x306   :  { %v6914_v4 = vpop.f32.mrb[8].mxu1 }
 0x307   :  { %v6915_v5 = vpop.f32.mrb[9].mxu1 }
 0x308   :  { %v11895_v6 = vadd.f32 %v6915_v5, %v6914_v4  ;;  %v1275_v4 = vld [vmem:[#allocation2 + $0x508] sm:$0xff] }
 0x309   :  { %v9974_v5 = vpack.c.bf16 %v1275_v4, %v1274_v1  ;;  %v9996_v1 = vpack.c.bf16 %v1269_v62, %v1268_v61  ;;  %v1301_v4 = vld [vmem:[#allocation2 + $0x5d8] sm:$0xff] }
 0x30a   :  { %v6917_v7 = vpop.f32.mrb[10].mxu1 }
 0x30b   :  { %v6918_v9 = vpop.f32.mrb[11].mxu1  ;;  %9975 = vmatprep.subr.bf16.mxu1 %v9974_v5 }
 0x30c   :  { %v11897_v11 = vadd.f32 %v6918_v9, %v6917_v7  ;;  %v1258_v7 = vld [vmem:[#allocation2 + $0x480] sm:$0xff]  ;;  %v1259_v9 = vld [vmem:[#allocation2 + $0x488] sm:$0xff] }
 0x31e   :  { %v8428_v10 = vpop.f32.mrb[12].mxu1 }
 0x31f   :  { %v837_v15 = vadd.f32 %v8428_v10, %v6698_v12  ;;  %v831_v16 = vpop.f32.mrb[13].mxu1  ;;  %v9976_v10 = vpack.c.bf16 %v1259_v9, %v1258_v7  ;;  %v1286_v7 = vld [vmem:[#allocation2 + $0x560] sm:$0xff]  ;;  %v1287_v9 = vld [vmem:[#allocation2 + $0x568] sm:$0xff] }
 0x320   :  { %v832_v17 = vadd.f32 %v6698_v12, %v831_v16  ;;  %v1277_v16 = vld [vmem:[#allocation2 + $0x518] sm:$0xff] }
 0x321   :  { %v994_v19 = vrot.slane %v837_v15, 1  ;;  %v982_v20 = vrot.slane %v837_v15, 7 }
 0x322   :  { %v981_v21 = vrot.slane %v832_v17, 7  ;;  %v8431_v22 = vpop.f32.mrb[14].mxu1  ;;  %8464 = vmatprep.mubr.f32.mxu0 %v832_v17  ;;  %1123 = vmatprep.mubr.f32.mxu1 %v832_v17  ;;  %v993_v23 = vrot.slane %v832_v17, 1 }
 0x323   :  { %v847_v24 = vadd.f32 %v8431_v22, %v6698_v12  ;;  %v841_v25 = vpop.f32.mrb[15].mxu1  ;;  %8465 = vmatmul.mubr.f32.vlgmr.msra.gmra.mrb[16].mxu0 %v837_v15  ;;  %v1293_v22 = vld [vmem:[#allocation2 + $0x598] sm:$0xff] }
 0x324   :  { %v842_v28 = vadd.f32 %v6698_v12, %v841_v25  ;;  %9945 = vmatpush3.bf16.msra.mxu0 %v9942_v54  ;;  %v999_v29 = vsel %vm157_vm0, %v993_v23, %v994_v19  ;;  %v987_v31 = vsel %vm144_vm1, %v981_v21, %v982_v20  ;;  %v9958_v54 = vpack.c.bf16 %v1047_v48, %v1046_v53  ;;  %v1290_v12 = vld [vmem:[#allocation2 + $0x580] sm:$0xff]  ;;  %v1279_v25 = vld [vmem:[#allocation2 + $0x528] sm:$0xff] }
 0x325   :  { %v984_v32 = vrot.slane %v847_v24, 7  ;;  %9947 = vmatprep.subr.bf16.mxu0 %v9946_v18  ;;  %v996_v33 = vrot.slane %v847_v24, 1  ;;  %v10006_v14 = vpack.c.bf16 %v1291_v13, %v1290_v12  ;;  %v1267_v48 = vld [vmem:[#allocation2 + $0x4c8] sm:$0xff]  ;;  %v9998_v12 = vpack.c.bf16 %v1287_v9, %v1286_v7 }
 0x326   :  { %v995_v34 = vrot.slane %v842_v28, 1  ;;  %8467 = vmatprep.mubr.f32.mxu0 %v842_v28  ;;  %v983_v39 = vrot.slane %v842_v28, 7  ;;  %v1271_v13 = vld [vmem:[#allocation2 + $0x4e8] sm:$0xff] }
 0x327   :  { %8468 = vmatmul.mubr.f32.gmra.mrb[18].mxu0 %v847_v24  ;;  %v988_v40 = vsel %vm144_vm1, %v984_v32, %v981_v21  ;;  %v1000_v41 = vsel %vm157_vm0, %v996_v33, %v993_v23 }
 0x328   :  { %9949 = vmatpush3.bf16.msra.mxu0 %v9946_v18  ;;  %6701 = vmatmul.mubr.msk.f32.vlgmr.msra.gmra.mrb[16].mxu1 %vm11801_vm2, %v988_v40  ;;  %v986_v42 = vsel %vm144_vm1, %v982_v20, %v983_v39  ;;  %v985_v43 = vsel %vm144_vm1, %v983_v39, %v984_v32  ;;  %v998_v44 = vsel %vm157_vm0, %v994_v19, %v995_v34  ;;  %v1260_v18 = vld [vmem:[#allocation2 + $0x490] sm:$0xff]  ;;  %v1261_v19 = vld [vmem:[#allocation2 + $0x498] sm:$0xff]  ;;  %v1295_v32 = vld [vmem:[#allocation2 + $0x5a8] sm:$0xff] }
 0x329   :  { %8502 = vmatprep.mubr.f32.mxu0 %v999_v29  ;;  %1128 = vmatprep.mubr.f32.mxu1 %v837_v15  ;;  %v997_v49 = vsel %vm157_vm0, %v995_v34, %v996_v33  ;;  %v1276_v15 = vld [vmem:[#allocation2 + $0x510] sm:$0xff]  ;;  %v9980_v21 = vpack.c.bf16 %v1261_v19, %v1260_v18  ;;  %v1294_v29 = vld [vmem:[#allocation2 + $0x5a0] sm:$0xff]  ;;  %v1265_v39 = vld [vmem:[#allocation2 + $0x4b8] sm:$0xff] }
 0x32a   :  { %9951 = vmatprep.subr.bf16.mxu0 %v9950_v36  ;;  %9977 = vmatpush3.bf16.msra.mxu1 %v9976_v10  ;;  %v9978_v17 = vpack.c.bf16 %v1277_v16, %v1276_v15  ;;  %v1292_v20 = vld [vmem:[#allocation2 + $0x590] sm:$0xff]  ;;  %v10014_v33 = vpack.c.bf16 %v1295_v32, %v1294_v29  ;;  %v1270_v10 = vld [vmem:[#allocation2 + $0x4e0] sm:$0xff]  ;;  %v1303_v16 = vld [vmem:[#allocation2 + $0x5e8] sm:$0xff] }
 0x32b   :  { %v10010_v23 = vpack.c.bf16 %v1293_v22, %v1292_v20  ;;  %v1280_v34 = vld [vmem:[#allocation2 + $0x530] sm:$0xff]  ;;  %v10000_v15 = vpack.c.bf16 %v1271_v13, %v1270_v10  ;;  %v1289_v19 = vld [vmem:[#allocation2 + $0x578] sm:$0xff] }
 0x32c   :  { %9953 = vmatpush3.bf16.msra.mxu0 %v9950_v36  ;;  %1129 = vmatmul.mubr.f32.gmra.mrb[18].mxu1 %v987_v31  ;;  %v1281_v36 = vld [vmem:[#allocation2 + $0x538] sm:$0xff]  ;;  %v1296_v40 = vld [vmem:[#allocation2 + $0x5b0] sm:$0xff] }
 0x32d   :  { %1133 = vmatprep.mubr.f32.mxu1 %v842_v28  ;;  %9955 = vmatprep.subr.bf16.mxu0 %v9954_v47  ;;  %v1263_v28 = vld [vmem:[#allocation2 + $0x4a8] sm:$0xff]  ;;  %v9986_v37 = vpack.c.bf16 %v1281_v36, %v1280_v34  ;;  %v1288_v18 = vld [vmem:[#allocation2 + $0x570] sm:$0xff]  ;;  %v1273_v22 = vld [vmem:[#allocation2 + $0x4f8] sm:$0xff] }
 0x32e   :  { %9979 = vmatprep.subr.bf16.mxu1 %v9978_v17  ;;  %v9984_v31 = vpack.c.bf16 %v1263_v28, %v1262_v27  ;;  %v10002_v20 = vpack.c.bf16 %v1289_v19, %v1288_v18  ;;  %v1486_v27 = vld [vmem:[#allocation6 + $0x180] sm:$0xff]  ;;  %v1487_v28 = vld [vmem:[#allocation6 + $0x188] sm:$0xff] }
 0x32f   :  { %9981 = vmatpush3.bf16.msra.mxu1 %v9980_v21  ;;  %v1272_v21 = vld [vmem:[#allocation2 + $0x4f0] sm:$0xff]  ;;  %v11923_v29 = vpack.c.bf16 %v1487_v28, %v1486_v27 }
 0x330   :  { %9957 = vmatpush3.bf16.msra.mxu0 %v9954_v47  ;;  %6702 = vmatmul.mubr.msk.f32.gmra.mrb[20].mxu1 %vm11834_vm5, %v986_v42  ;;  %v1297_v42 = vld [vmem:[#allocation2 + $0x5b8] sm:$0xff]  ;;  %v1283_v47 = vld [vmem:[#allocation2 + $0x548] sm:$0xff] }
 0x331   :  { %1138 = vmatprep.mubr.f32.mxu1 %v847_v24  ;;  %9959 = vmatprep.subr.bf16.mxu0 %v9958_v54  ;;  %v1278_v24 = vld [vmem:[#allocation2 + $0x520] sm:$0xff] }
 0x332   :  { %v9982_v26 = vpack.c.bf16 %v1279_v25, %v1278_v24  ;;  %v10004_v24 = vpack.c.bf16 %v1273_v22, %v1272_v21  ;;  %v1305_v25 = vld [vmem:[#allocation2 + $0x5f8] sm:$0xff] }
 0x334   :  { %9961 = vmatpush3.bf16.msra.mxu0 %v9958_v54  ;;  %1139 = vmatmul.mubr.f32.gmra.mrb[22].mxu1 %v985_v43  ;;  %v10018_v43 = vpack.c.bf16 %v1297_v42, %v1296_v40  ;;  %v1298_v54 = vld [vmem:[#allocation2 + $0x5c0] sm:$0xff] }
 0x335   :  { %9963 = vmatprep.subr.bf16.mxu0 %v9962_v56  ;;  %9983 = vmatprep.subr.bf16.mxu1 %v9982_v26 }
 0x336   :  { %9985 = vmatpush3.bf16.msra.mxu1 %v9984_v31  ;;  %v6699_v31 = vld [vmem:[#allocation7 + $0x2] ss:$0 sm:$0xff] }
 0x337   :  { %9987 = vmatprep.subr.bf16.mxu1 %v9986_v37 }
 0x338   :  { %9965 = vmatpush3.bf16.msra.mxu0 %v9962_v56  ;;  %v10022_v56 = vpack.c.bf16 %v1299_v55, %v1298_v54 }
 0x339   :  { %9967 = vmatprep.subr.bf16.mxu0 %v9966_v60 }
 0x33c   :  { %9969 = vmatpush3.bf16.msra.mxu0 %v9966_v60  ;;  %v9994_v60 = vpack.c.bf16 %v1285_v59, %v1284_v57 }
 0x33d   :  { %9971 = vmatprep.subr.bf16.mxu0 %v9970_v0 }
 0x340   :  { %9973 = vmatpush3.bf16.msra.mxu0 %v9970_v0  ;;  %v1300_v0 = vld [vmem:[#allocation2 + $0x5d0] sm:$0xff] }
 0x341   :  { %10007 = vmatprep.subr.bf16.mxu0 %v10006_v14  ;;  %v10026_v5 = vpack.c.bf16 %v1301_v4, %v1300_v0 }
 0x343   :  { %8503 = vmatmul.mubr.msk.f32.vlgmr.msra.gmra.mrb[20].mxu0 %vm11809_vm3, %v998_v44  ;;  %v1282_v44 = vld [vmem:[#allocation2 + $0x540] sm:$0xff] }
 0x344   :  { %8505 = vmatprep.mubr.f32.mxu0 %v997_v49  ;;  %10009 = vmatpush3.bf16.msra.mxu0 %v10006_v14  ;;  %v1266_v49 = vld [vmem:[#allocation2 + $0x4c0] sm:$0xff]  ;;  %v9990_v53 = vpack.c.bf16 %v1283_v47, %v1282_v44 }
 0x345   :  { %10011 = vmatprep.subr.bf16.mxu0 %v10010_v23  ;;  %v9992_v52 = vpack.c.bf16 %v1267_v48, %v1266_v49  ;;  %v1302_v14 = vld [vmem:[#allocation2 + $0x5e0] sm:$0xff] }
 0x346   :  { %v10030_v17 = vpack.c.bf16 %v1303_v16, %v1302_v14  ;;  %v6700_v16 = vld [vmem:[#allocation4 + $0x2] ss:$0 sm:$0xff] }
 0x347   :  { %8506 = vmatmul.mubr.msk.f32.gmra.mrb[22].mxu0 %vm11826_vm4, %v1000_v41  ;;  %v9988_v41 = vpack.c.bf16 %v1265_v39, %v1264_v38 }
 0x348   :  { %10013 = vmatpush3.bf16.msra.mxu0 %v10010_v23  ;;  %v1304_v23 = vld [vmem:[#allocation2 + $0x5f0] sm:$0xff] }
 0x349   :  { %10015 = vmatprep.subr.bf16.mxu0 %v10014_v33  ;;  %9989 = vmatpush3.bf16.msra.mxu1 %v9988_v41  ;;  %v10034_v26 = vpack.c.bf16 %v1305_v25, %v1304_v23 }
 0x34a   :  { %9991 = vmatprep.subr.bf16.mxu1 %v9990_v53 }
 0x34c   :  { %10017 = vmatpush3.bf16.msra.mxu0 %v10014_v33 }
 0x34d   :  { %10019 = vmatprep.subr.bf16.mxu0 %v10018_v43  ;;  %9993 = vmatpush3.bf16.msra.mxu1 %v9992_v52 }
 0x34e   :  { %9995 = vmatprep.subr.bf16.mxu1 %v9994_v60 }
 0x350   :  { %10021 = vmatpush3.bf16.msra.mxu0 %v10018_v43 }
 0x351   :  { %10023 = vmatprep.subr.bf16.mxu0 %v10022_v56  ;;  %9997 = vmatpush3.bf16.msra.mxu1 %v9996_v1 }
 0x352   :  { %9999 = vmatprep.subr.bf16.mxu1 %v9998_v12 }
 0x354   :  { %10025 = vmatpush3.bf16.msra.mxu0 %v10022_v56 }
 0x355   :  { %10027 = vmatprep.subr.bf16.mxu0 %v10026_v5  ;;  %10001 = vmatpush3.bf16.msra.mxu1 %v10000_v15 }
 0x356   :  { %10003 = vmatprep.subr.bf16.mxu1 %v10002_v20 }
 0x358   :  { %10029 = vmatpush3.bf16.msra.mxu0 %v10026_v5 }
 0x359   :  { %10031 = vmatprep.subr.bf16.mxu0 %v10030_v17  ;;  %10005 = vmatpush3.bf16.msra.mxu1 %v10004_v24 }
 0x35a   :  { %10039 = vmatprep.subr.bf16.mxu1 %v11923_v29 }
 0x35c   :  { %10033 = vmatpush3.bf16.msra.mxu0 %v10030_v17 }
 0x35d   :  { %10035 = vmatprep.subr.bf16.mxu0 %v10034_v26 }
 0x360   :  { %10037 = vmatpush3.bf16.msra.mxu0 %v10034_v26 }
 0x3f6   :  { %v8466_v32 = vpop.f32.mrb[16].mxu0 }
 0x3f7   :  { %v944_v33 = vadd.f32 %v8466_v32, %v6699_v31  ;;  %v938_v34 = vpop.f32.mrb[17].mxu0 }
 0x3f8   :  { %v939_v36 = vadd.f32 %v6699_v31, %v938_v34 }
 0x3f9   :  { %v958_v37 = vsub.f32 0.0, %v944_v33 }
 0x3fa   :  { %v957_v38 = vsub.f32 0.0, %v939_v36  ;;  %v8469_v39 = vpop.f32.mrb[18].mxu0 }
 0x3fb   :  { %v963_v40 = vmul.f32 1.442695, %v958_v37  ;;  %v954_v41 = vadd.f32 %v8469_v39, %v6699_v31  ;;  %v948_v42 = vpop.f32.mrb[19].mxu0  ;;  %v7012_v43 = vpop.f32.mrb[16].mxu1 }
 0x3fc   :  { %v961_v44 = vmul.f32 1.442695, %v957_v38  ;;  %v949_v47 = vadd.f32 %v6699_v31, %v948_v42  ;;  %v7013_v49 = vpop.f32.mrb[17].mxu1 }
 0x3fd   :  { %11480 = vpow2.f32 %v963_v40  ;;  %v960_v53 = vsub.f32 0.0, %v954_v41  ;;  %v7014_v48 = vadd.f32 %v7013_v49, %v7012_v43  ;;  %v1488_v49 = vld [vmem:[#allocation6 + $0x190] sm:$0xff] }
 0x3fe   :  { %11482 = vpow2.f32 %v961_v44  ;;  %v959_v54 = vsub.f32 0.0, %v949_v47 }
 0x3ff   :  { %v967_v55 = vmul.f32 1.442695, %v960_v53  ;;  %v7015_v52 = vpop.f32.mrb[18].mxu1  ;;  %v1126_v19 = vadd.f32 %v7014_v48, %v6700_v16  ;;  %v1489_v53 = vld [vmem:[#allocation6 + $0x198] sm:$0xff] }
 0x400   :  { %v965_v56 = vmul.f32 1.442695, %v959_v54  ;;  %v7016_v57 = vpop.f32.mrb[19].mxu1 }
 0x401   :  { %11484 = vpow2.f32 %v967_v55  ;;  %v7017_v59 = vadd.f32 %v7016_v57, %v7015_v52 }
 0x402   :  { %11486 = vpow2.f32 %v965_v56 }
 0x403   :  { %v7018_v60 = vpop.f32.mrb[20].mxu1  ;;  %v1131_v17 = vadd.f32 %v7017_v59, %v6700_v16  ;;  %v10042_v59 = vpack.c.bf16 %v1489_v53, %v1488_v49 }
 0x404   :  { %v7019_v61 = vpop.f32.mrb[21].mxu1 }
 0x405   :  { %v7020_v62 = vadd.f32 %v7019_v61, %v7018_v60 }
 0x407   :  { %v11481_v0 = vpop.eup %11480  ;;  %v7021_v1 = vpop.f32.mrb[22].mxu1  ;;  %v1136_v31 = vadd.f32 %v7020_v62, %v6700_v16 }
 0x408   :  { %v11483_v4 = vpop.eup %11482  ;;  %v7022_v5 = vpop.f32.mrb[23].mxu1  ;;  %v970_v9 = vadd.f32 1.0, %v11481_v0 }
 0x409   :  { %v7023_v7 = vadd.f32 %v7022_v5, %v7021_v1  ;;  %v969_v10 = vadd.f32 1.0, %v11483_v4  ;;  %v1490_v1 = vld [vmem:[#allocation6 + $0x1a0] sm:$0xff]  ;;  %v1491_v4 = vld [vmem:[#allocation6 + $0x1a8] sm:$0xff] }
 0x40a   :  { %11488 = vrcp.f32 %v970_v9  ;;  %v10046_v5 = vpack.c.bf16 %v1491_v4, %v1490_v1  ;;  %v1493_v9 = vld [vmem:[#allocation6 + $0x1b8] sm:$0xff] }
 0x40b   :  { %v11485_v12 = vpop.eup %11484  ;;  %11490 = vrcp.f32 %v969_v10  ;;  %v1141_v26 = vadd.f32 %v7023_v7, %v6700_v16  ;;  %v1492_v7 = vld [vmem:[#allocation6 + $0x1b0] sm:$0xff]  ;;  %v1494_v10 = vld [vmem:[#allocation6 + $0x1c0] sm:$0xff] }
 0x40c   :  { %v11487_v13 = vpop.eup %11486  ;;  %v972_v14 = vadd.f32 1.0, %v11485_v12  ;;  %v10050_v12 = vpack.c.bf16 %v1493_v9, %v1492_v7 }
 0x40d   :  { %v971_v15 = vadd.f32 1.0, %v11487_v13  ;;  %v1495_v13 = vld [vmem:[#allocation6 + $0x1c8] sm:$0xff] }
 0x40e   :  { %11492 = vrcp.f32 %v972_v14  ;;  %v1496_v14 = vld [vmem:[#allocation6 + $0x1d0] sm:$0xff] }
 0x40f   :  { %11494 = vrcp.f32 %v971_v15  ;;  %v1497_v15 = vld [vmem:[#allocation6 + $0x1d8] sm:$0xff] }
 0x410   :  { %v10058_v16 = vpack.c.bf16 %v1497_v15, %v1496_v14 }
 0x414   :  { %v11489_v22 = vpop.eup %11488 }
 0x415   :  { %v11491_v24 = vpop.eup %11490 }
 0x416   :  { %v8504_v18 = vpop.f32.mrb[20].mxu0 }
 0x417   :  { %v1216_v20 = vadd.f32 %v8504_v18, %v1131_v17  ;;  %v1210_v21 = vpop.f32.mrb[21].mxu0  ;;  %v1498_v17 = vld [vmem:[#allocation6 + $0x1e0] sm:$0xff]  ;;  %v1499_v18 = vld [vmem:[#allocation6 + $0x1e8] sm:$0xff] }
 0x418   :  { %v1211_v23 = vadd.f32 %v1210_v21, %v1126_v19  ;;  %v11493_v37 = vpop.eup %11492  ;;  %v10062_v19 = vpack.c.bf16 %v1499_v18, %v1498_v17  ;;  %v1501_v21 = vld [vmem:[#allocation6 + $0x1f8] sm:$0xff] }
 0x419   :  { %v1230_v25 = vmul.f32 %v11489_v22, %v1216_v20  ;;  %v11495_v41 = vpop.eup %11494  ;;  %v1500_v20 = vld [vmem:[#allocation6 + $0x1f0] sm:$0xff] }
 0x41a   :  { %v1229_v27 = vmul.f32 %v11491_v24, %v1211_v23  ;;  %v8507_v28 = vpop.f32.mrb[22].mxu0  ;;  %v10066_v22 = vpack.c.bf16 %v1501_v21, %v1500_v20  ;;  %v1597_v23 = vld [vmem:[#allocation6 + $0x200] sm:$0xff]  ;;  %v1598_v24 = vld [vmem:[#allocation6 + $0x208] sm:$0xff] }
 0x41b   :  { %v1226_v32 = vadd.f32 %v8507_v28, %v1141_v26  ;;  %v1220_v33 = vpop.f32.mrb[23].mxu0  ;;  %v1246_v34 = vrot.slane %v1230_v25, 1  ;;  %v1234_v36 = vrot.slane %v1230_v25, 7  ;;  %v10070_v26 = vpack.c.bf16 %v1598_v24, %v1597_v23 }
 0x41c   :  { %v1233_v38 = vrot.slane %v1229_v27, 7  ;;  %v1221_v39 = vadd.f32 %v1220_v33, %v1136_v31  ;;  %1375 = vmatprep.mubr.f32.mxu1 %v1229_v27  ;;  %v1245_v40 = vrot.slane %v1229_v27, 1  ;;  %v1600_v27 = vld [vmem:[#allocation6 + $0x218] sm:$0xff]  ;;  %v1601_v31 = vld [vmem:[#allocation6 + $0x220] sm:$0xff] }
 0x41d   :  { %v1232_v42 = vmul.f32 %v11493_v37, %v1226_v32  ;;  %v1602_v32 = vld [vmem:[#allocation6 + $0x228] sm:$0xff]  ;;  %10071 = vmatprep.subr.bf16.mxu0 %v10070_v26 }
 0x41e   :  { %v1231_v43 = vmul.f32 %v11495_v41, %v1221_v39  ;;  %v1251_v44 = vsel %vm157_vm0, %v1245_v40, %v1246_v34  ;;  %v1239_v47 = vsel %vm144_vm1, %v1233_v38, %v1234_v36  ;;  %v10078_v33 = vpack.c.bf16 %v1602_v32, %v1601_v31  ;;  %v1606_v39 = vld [vmem:[#allocation6 + $0x248] sm:$0xff]  ;;  %v1607_v41 = vld [vmem:[#allocation6 + $0x250] sm:$0xff] }
 0x41f   :  { %v1236_v48 = vrot.slane %v1232_v42, 7  ;;  %8540 = vmatprep.mubr.f32.mxu0 %v1251_v44  ;;  %v1248_v54 = vrot.slane %v1232_v42, 1  ;;  %v1609_v44 = vld [vmem:[#allocation6 + $0x260] sm:$0xff]  ;;  %v1728_v31 = vld [vmem:[#allocation2 + $0x600] sm:$0xff] }
 0x420   :  { %v1235_v55 = vrot.slane %v1231_v43, 7  ;;  %v1247_v52 = vrot.slane %v1231_v43, 1 }
 0x421   :  { %v1240_v56 = vsel %vm144_vm1, %v1236_v48, %v1233_v38  ;;  %v1252_v57 = vsel %vm157_vm0, %v1248_v54, %v1245_v40  ;;  %v1605_v38 = vld [vmem:[#allocation6 + $0x240] sm:$0xff] }
 0x422   :  { %6706 = vmatmul.mubr.msk.f32.vlgmr.msra.gmra.mrb[24].mxu1 %vm11801_vm2, %v1240_v56  ;;  %v1250_v60 = vsel %vm157_vm0, %v1246_v34, %v1247_v52  ;;  %v1249_v61 = vsel %vm157_vm0, %v1247_v52, %v1248_v54  ;;  %v1238_v62 = vsel %vm144_vm1, %v1234_v36, %v1235_v55  ;;  %v1237_v0 = vsel %vm144_vm1, %v1235_v55, %v1236_v48  ;;  %v1603_v34 = vld [vmem:[#allocation6 + $0x230] sm:$0xff]  ;;  %v1604_v36 = vld [vmem:[#allocation6 + $0x238] sm:$0xff]  ;;  %v6693_v48 = vld [vmem:[#allocation4 + $0x1] ss:$0 sm:$0xff] }
 0x423   :  { %1380 = vmatprep.mubr.f32.mxu1 %v1230_v25  ;;  %8541 = vmatmul.mubr.msk.f32.vlgmr.msra.gmra.mrb[12].mxu0 %vm11809_vm3, %v1250_v60  ;;  %v1599_v25 = vld [vmem:[#allocation6 + $0x210] sm:$0xff]  ;;  %v10082_v37 = vpack.c.bf16 %v1604_v36, %v1603_v34  ;;  %v10086_v40 = vpack.c.bf16 %v1606_v39, %v1605_v38  ;;  %v6705_v54 = vld [vmem:[#allocation4 + $0x3] ss:$0 sm:$0xff]  ;;  %v645_v7 = vadd.f32 %v11893_v2, %v6693_v48  ;;  %v1746_v38 = vld [vmem:[#allocation2 + $0x690] sm:$0xff] }
 0x424   :  { %8543 = vmatprep.mubr.f32.mxu0 %v1249_v61  ;;  %10041 = vmatpush3.bf16.msra.mxu1 %v11923_v29  ;;  %v10054_v29 = vpack.c.bf16 %v1495_v13, %v1494_v10  ;;  %v10074_v28 = vpack.c.bf16 %v1600_v27, %v1599_v25  ;;  %v650_v15 = vadd.f32 %v11895_v6, %v6693_v48  ;;  %v1611_v25 = vld [vmem:[#allocation6 + $0x270] sm:$0xff]  ;;  %v1744_v6 = vld [vmem:[#allocation2 + $0x680] sm:$0xff]  ;;  %v1747_v39 = vld [vmem:[#allocation2 + $0x698] sm:$0xff] }
 0x425   :  { %10043 = vmatprep.subr.bf16.mxu1 %v10042_v59  ;;  %10073 = vmatpush3.bf16.msra.mxu0 %v10070_v26  ;;  %v655_v21 = vadd.f32 %v11897_v11, %v6693_v48  ;;  %v1612_v26 = vld [vmem:[#allocation6 + $0x278] sm:$0xff]  ;;  %v1760_v34 = vld [vmem:[#allocation2 + $0x700] sm:$0xff]  ;;  %v1761_v36 = vld [vmem:[#allocation2 + $0x708] sm:$0xff] }
 0x426   :  { %1381 = vmatmul.mubr.f32.gmra.mrb[26].mxu1 %v1239_v47  ;;  %10075 = vmatprep.subr.bf16.mxu0 %v10074_v28  ;;  %v1610_v47 = vld [vmem:[#allocation6 + $0x268] sm:$0xff]  ;;  %v10098_v27 = vpack.c.bf16 %v1612_v26, %v1611_v25  ;;  %v10134_v11 = vpack.c.bf16 %v1761_v36, %v1760_v34  ;;  %v1770_v34 = vld [vmem:[#allocation2 + $0x750] sm:$0xff]  ;;  %v1771_v36 = vld [vmem:[#allocation2 + $0x758] sm:$0xff] }
 0x427   :  { %1385 = vmatprep.mubr.f32.mxu1 %v1231_v43  ;;  %8544 = vmatmul.mubr.msk.f32.gmra.mrb[14].mxu0 %vm11826_vm4, %v1252_v57  ;;  %v10094_v49 = vpack.c.bf16 %v1610_v47, %v1609_v44  ;;  %v1748_v44 = vld [vmem:[#allocation2 + $0x6a0] sm:$0xff]  ;;  %v1749_v47 = vld [vmem:[#allocation2 + $0x6a8] sm:$0xff] }
 0x428   :  { %10045 = vmatpush3.bf16.msra.mxu1 %v10042_v59  ;;  %v640_v59 = vadd.f32 %v11891_v63, %v6693_v48  ;;  %v1733_v48 = vld [vmem:[#allocation2 + $0x628] sm:$0xff]  ;;  %v1768_v26 = vld [vmem:[#allocation2 + $0x740] sm:$0xff] }
 0x429   :  { %10047 = vmatprep.subr.bf16.mxu1 %v10046_v5  ;;  %10077 = vmatpush3.bf16.msra.mxu0 %v10074_v28  ;;  %v1745_v28 = vld [vmem:[#allocation2 + $0x688] sm:$0xff] }
 0x42a   :  { %6707 = vmatmul.mubr.msk.f32.gmra.mrb[28].mxu1 %vm11834_vm5, %v1238_v62  ;;  %10079 = vmatprep.subr.bf16.mxu0 %v10078_v33  ;;  %v10102_v32 = vpack.c.bf16 %v1745_v28, %v1744_v6  ;;  %v1755_v28 = vld [vmem:[#allocation2 + $0x6d8] sm:$0xff] }
 0x42b   :  { %1390 = vmatprep.mubr.f32.mxu1 %v1232_v42  ;;  %v1608_v42 = vld [vmem:[#allocation6 + $0x258] sm:$0xff] }
 0x42c   :  { %10049 = vmatpush3.bf16.msra.mxu1 %v10046_v5  ;;  %v10090_v43 = vpack.c.bf16 %v1608_v42, %v1607_v41  ;;  %v10106_v41 = vpack.c.bf16 %v1747_v39, %v1746_v38  ;;  %v1731_v42 = vld [vmem:[#allocation2 + $0x618] sm:$0xff]  ;;  %v1757_v38 = vld [vmem:[#allocation2 + $0x6e8] sm:$0xff] }
 0x42d   :  { %10051 = vmatprep.subr.bf16.mxu1 %v10050_v12  ;;  %10081 = vmatpush3.bf16.msra.mxu0 %v10078_v33  ;;  %v1729_v33 = vld [vmem:[#allocation2 + $0x608] sm:$0xff] }
 0x42e   :  { %1391 = vmatmul.mubr.f32.gmra.mrb[30].mxu1 %v1237_v0  ;;  %10083 = vmatprep.subr.bf16.mxu0 %v10082_v37 }
 0x430   :  { %10053 = vmatpush3.bf16.msra.mxu1 %v10050_v12 }
 0x431   :  { %10055 = vmatprep.subr.bf16.mxu1 %v10054_v29  ;;  %10085 = vmatpush3.bf16.msra.mxu0 %v10082_v37  ;;  %v10104_v37 = vpack.c.bf16 %v1729_v33, %v1728_v31 }
 0x432   :  { %10087 = vmatprep.subr.bf16.mxu0 %v10086_v40 }
 0x434   :  { %10057 = vmatpush3.bf16.msra.mxu1 %v10054_v29 }
 0x435   :  { %10059 = vmatprep.subr.bf16.mxu1 %v10058_v16  ;;  %10089 = vmatpush3.bf16.msra.mxu0 %v10086_v40  ;;  %v1730_v40 = vld [vmem:[#allocation2 + $0x610] sm:$0xff] }
 0x436   :  { %10091 = vmatprep.subr.bf16.mxu0 %v10090_v43 }
 0x438   :  { %10061 = vmatpush3.bf16.msra.mxu1 %v10058_v16 }
 0x439   :  { %10063 = vmatprep.subr.bf16.mxu1 %v10062_v19  ;;  %10093 = vmatpush3.bf16.msra.mxu0 %v10090_v43  ;;  %v10108_v43 = vpack.c.bf16 %v1731_v42, %v1730_v40  ;;  %v1740_v40 = vld [vmem:[#allocation2 + $0x660] sm:$0xff] }
 0x43a   :  { %10095 = vmatprep.subr.bf16.mxu0 %v10094_v49 }
 0x43c   :  { %10065 = vmatpush3.bf16.msra.mxu1 %v10062_v19 }
 0x43d   :  { %10067 = vmatprep.subr.bf16.mxu1 %v10066_v22  ;;  %10097 = vmatpush3.bf16.msra.mxu0 %v10094_v49  ;;  %v10110_v49 = vpack.c.bf16 %v1749_v47, %v1748_v44  ;;  %v1773_v44 = vld [vmem:[#allocation2 + $0x768] sm:$0xff] }
 0x43e   :  { %10099 = vmatprep.subr.bf16.mxu0 %v10098_v27 }
 0x440   :  { %10069 = vmatpush3.bf16.msra.mxu1 %v10066_v22 }
 0x441   :  { %10101 = vmatpush3.bf16.msra.mxu0 %v10098_v27  ;;  %10103 = vmatprep.subr.bf16.mxu1 %v10102_v32  ;;  %v1769_v27 = vld [vmem:[#allocation2 + $0x748] sm:$0xff]  ;;  %v1738_v32 = vld [vmem:[#allocation2 + $0x650] sm:$0xff] }
 0x442   :  { %10135 = vmatprep.subr.bf16.mxu0 %v10134_v11  ;;  %v10150_v6 = vpack.c.bf16 %v1769_v27, %v1768_v26 }
 0x4f5   :  { %v7076_v53 = vpop.f32.mrb[24].mxu1 }
 0x4f6   :  { %v7077_v55 = vpop.f32.mrb[25].mxu1  ;;  %v8542_v52 = vpop.f32.mrb[12].mxu0 }
 0x4f7   :  { %v7078_v56 = vadd.f32 %v7077_v55, %v7076_v53  ;;  %v1462_v57 = vpop.f32.mrb[13].mxu0  ;;  %v1732_v53 = vld [vmem:[#allocation2 + $0x620] sm:$0xff]  ;;  %v1751_v55 = vld [vmem:[#allocation2 + $0x6b8] sm:$0xff] }
 0x4f9   :  { %v1378_v60 = vadd.f32 %v7078_v56, %v6705_v54  ;;  %v7079_v61 = vpop.f32.mrb[26].mxu1 }
 0x4fa   :  { %v7080_v62 = vpop.f32.mrb[27].mxu1  ;;  %v8545_v0 = vpop.f32.mrb[14].mxu0 }
 0x4fb   :  { %v11416_v1 = vadd.f32 %v1378_v60, %v640_v59  ;;  %v7081_v4 = vadd.f32 %v7080_v62, %v7079_v61  ;;  %v1472_v5 = vpop.f32.mrb[15].mxu0  ;;  %v1735_v59 = vld [vmem:[#allocation2 + $0x638] sm:$0xff]  ;;  %v1752_v60 = vld [vmem:[#allocation2 + $0x6c0] sm:$0xff]  ;;  %v1753_v61 = vld [vmem:[#allocation2 + $0x6c8] sm:$0xff] }
 0x4fd   :  { %v11417_v9 = vadd.f32 %v11416_v1, %v1462_v57  ;;  %v1383_v12 = vadd.f32 %v7081_v4, %v6705_v54  ;;  %v7082_v10 = vpop.f32.mrb[28].mxu1  ;;  %v1734_v57 = vld [vmem:[#allocation2 + $0x630] sm:$0xff]  ;;  %v1736_v1 = vld [vmem:[#allocation2 + $0x640] sm:$0xff]  ;;  %v1737_v4 = vld [vmem:[#allocation2 + $0x648] sm:$0xff] }
 0x4fe   :  { %v7083_v13 = vpop.f32.mrb[29].mxu1  ;;  %v10116_v62 = vpack.c.bf16 %v1735_v59, %v1734_v57  ;;  %v1775_v57 = vld [vmem:[#allocation2 + $0x778] sm:$0xff] }
 0x4ff   :  { %v11414_v29 = vadd.f32 %v1383_v12, %v645_v7  ;;  %v7084_v14 = vadd.f32 %v7083_v13, %v7082_v10  ;;  %8578 = vmatprep.mubr.f32.mxu1 %v11417_v9  ;;  %v6710_v7 = vld [vmem:[#allocation7 + $0x3] ss:$0 sm:$0xff] }
 0x501   :  { %v11415_v16 = vadd.f32 %v11414_v29, %v8542_v52  ;;  %v1388_v63 = vadd.f32 %v7084_v14, %v6705_v54  ;;  %v7085_v17 = vpop.f32.mrb[30].mxu1  ;;  %v10112_v52 = vpack.c.bf16 %v1733_v48, %v1732_v53  ;;  %v1762_v29 = vld [vmem:[#allocation2 + $0x710] sm:$0xff]  ;;  %v1763_v14 = vld [vmem:[#allocation2 + $0x718] sm:$0xff] }
 0x502   :  { %v7086_v18 = vpop.f32.mrb[31].mxu1  ;;  %v1759_v53 = vld [vmem:[#allocation2 + $0x6f8] sm:$0xff] }
 0x503   :  { %v11420_v19 = vadd.f32 %v1388_v63, %v650_v15  ;;  %v7087_v20 = vadd.f32 %v7086_v18, %v7085_v17  ;;  %8579 = vmatmul.mubr.f32.vlgmr.msra.gmra.mrb[32].mxu1 %v11415_v16  ;;  %v10138_v63 = vpack.c.bf16 %v1763_v14, %v1762_v29  ;;  %v1764_v17 = vld [vmem:[#allocation2 + $0x720] sm:$0xff]  ;;  %v1765_v18 = vld [vmem:[#allocation2 + $0x728] sm:$0xff] }
 0x504   :  { %10105 = vmatpush3.bf16.msra.mxu1 %v10104_v37  ;;  %v10154_v37 = vpack.c.bf16 %v1771_v36, %v1770_v34  ;;  %v1958_v34 = vld [vmem:[#allocation6 + $0x2b0] sm:$0xff]  ;;  %v1959_v36 = vld [vmem:[#allocation6 + $0x2b8] sm:$0xff] }
 0x505   :  { %v1393_v22 = vadd.f32 %v7087_v20, %v6705_v54  ;;  %v11421_v2 = vadd.f32 %v11420_v19, %v1472_v5  ;;  %10107 = vmatprep.subr.bf16.mxu1 %v10106_v41  ;;  %v1750_v54 = vld [vmem:[#allocation2 + $0x6b0] sm:$0xff]  ;;  %v10120_v5 = vpack.c.bf16 %v1737_v4, %v1736_v1  ;;  %v1741_v41 = vld [vmem:[#allocation2 + $0x668] sm:$0xff] }
 0x506   :  { %v10114_v56 = vpack.c.bf16 %v1751_v55, %v1750_v54  ;;  %v10128_v42 = vpack.c.bf16 %v1741_v41, %v1740_v40  ;;  %v1742_v54 = vld [vmem:[#allocation2 + $0x670] sm:$0xff]  ;;  %v1743_v55 = vld [vmem:[#allocation2 + $0x678] sm:$0xff]  ;;  %v1962_v40 = vld [vmem:[#allocation6 + $0x2d0] sm:$0xff] }
 0x507   :  { %v11418_v23 = vadd.f32 %v1393_v22, %v655_v21  ;;  %8581 = vmatprep.mubr.f32.mxu1 %v11421_v2  ;;  %v10142_v22 = vpack.c.bf16 %v1765_v18, %v1764_v17  ;;  %v1963_v41 = vld [vmem:[#allocation6 + $0x2d8] sm:$0xff] }
 0x508   :  { %10109 = vmatpush3.bf16.msra.mxu1 %v10108_v43  ;;  %v1772_v43 = vld [vmem:[#allocation2 + $0x760] sm:$0xff] }
 0x509   :  { %v11419_v24 = vadd.f32 %v11418_v23, %v8545_v0  ;;  %10111 = vmatprep.subr.bf16.mxu1 %v10110_v49  ;;  %v10118_v0 = vpack.c.bf16 %v1753_v61, %v1752_v60  ;;  %v1766_v23 = vld [vmem:[#allocation2 + $0x730] sm:$0xff]  ;;  %v10158_v47 = vpack.c.bf16 %v1773_v44, %v1772_v43  ;;  %v1952_v60 = vld [vmem:[#allocation6 + $0x280] sm:$0xff]  ;;  %v1953_v61 = vld [vmem:[#allocation6 + $0x288] sm:$0xff] }
 0x50a   :  { %v1758_v49 = vld [vmem:[#allocation2 + $0x6f0] sm:$0xff]  ;;  %v1964_v43 = vld [vmem:[#allocation6 + $0x2e0] sm:$0xff]  ;;  %v1965_v44 = vld [vmem:[#allocation6 + $0x2e8] sm:$0xff] }
 0x50b   :  { %8582 = vmatmul.mubr.f32.gmra.mrb[34].mxu1 %v11419_v24  ;;  %v10130_v48 = vpack.c.bf16 %v1759_v53, %v1758_v49  ;;  %v1966_v49 = vld [vmem:[#allocation6 + $0x2f0] sm:$0xff]  ;;  %v1967_v53 = vld [vmem:[#allocation6 + $0x2f8] sm:$0xff] }
 0x50c   :  { %10113 = vmatpush3.bf16.msra.mxu1 %v10112_v52  ;;  %v10132_v52 = vpack.c.bf16 %v1743_v55, %v1742_v54  ;;  %v2059_v54 = vld [vmem:[#allocation6 + $0x300] sm:$0xff]  ;;  %v2060_v55 = vld [vmem:[#allocation6 + $0x308] sm:$0xff] }
 0x50d   :  { %10115 = vmatprep.subr.bf16.mxu1 %v10114_v56  ;;  %v1774_v56 = vld [vmem:[#allocation2 + $0x770] sm:$0xff] }
 0x50e   :  { %v10162_v59 = vpack.c.bf16 %v1775_v57, %v1774_v56  ;;  %v2061_v56 = vld [vmem:[#allocation6 + $0x310] sm:$0xff]  ;;  %v2062_v57 = vld [vmem:[#allocation6 + $0x318] sm:$0xff] }
 0x510   :  { %10117 = vmatpush3.bf16.msra.mxu1 %v10116_v62  ;;  %v10166_v62 = vpack.c.bf16 %v1953_v61, %v1952_v60  ;;  %v2230_v60 = vld [vmem:[#allocation2 + $0x800] sm:$0xff]  ;;  %v2231_v61 = vld [vmem:[#allocation2 + $0x808] sm:$0xff] }
 0x511   :  { %10119 = vmatprep.subr.bf16.mxu1 %v10118_v0  ;;  %v6711_v0 = vld [vmem:[#allocation7 + $0x4] ss:$0 sm:$0xff] }
 0x514   :  { %10121 = vmatpush3.bf16.msra.mxu1 %v10120_v5 }
 0x5d6   :  { %v8580_v9 = vpop.f32.mrb[32].mxu1 }
 0x5d7   :  { %v1579_v12 = vadd.f32 %v8580_v9, %v6710_v7  ;;  %v1573_v10 = vpop.f32.mrb[33].mxu1 }
 0x5d8   :  { %v1574_v13 = vadd.f32 %v6710_v7, %v1573_v10 }
 0x5d9   :  { %v11959_v16 = vadd.f32 %v1579_v12, %v11853_v58 }
 0x5da   :  { %v11956_v15 = vadd.f32 %v1574_v13, %v11850_v50  ;;  %v1767_v50 = vld [vmem:[#allocation2 + $0x738] sm:$0xff] }
 0x5db   :  { %v10146_v25 = vpack.c.bf16 %v1767_v50, %v1766_v23 }
 0x5dc   :  { %8616 = vmatprep.mubr.f32.mxu0 %v11956_v15 }
 0x5dd   :  { %8617 = vmatmul.mubr.f32.vlgmr.msra.gmra.mrb[24].mxu0 %v11959_v16 }
 0x5de   :  { %v8583_v19 = vpop.f32.mrb[34].mxu1  ;;  %10137 = vmatpush3.bf16.msra.mxu0 %v10134_v11  ;;  %v1756_v11 = vld [vmem:[#allocation2 + $0x6e0] sm:$0xff] }
 0x5df   :  { %v1589_v20 = vadd.f32 %v8583_v19, %v6710_v7  ;;  %v1583_v21 = vpop.f32.mrb[35].mxu1  ;;  %10139 = vmatprep.subr.bf16.mxu0 %v10138_v63  ;;  %v10126_v39 = vpack.c.bf16 %v1757_v38, %v1756_v11  ;;  %v1954_v19 = vld [vmem:[#allocation6 + $0x290] sm:$0xff]  ;;  %v1960_v11 = vld [vmem:[#allocation6 + $0x2c0] sm:$0xff]  ;;  %v1961_v38 = vld [vmem:[#allocation6 + $0x2c8] sm:$0xff] }
 0x5e0   :  { %v1584_v2 = vadd.f32 %v6710_v7, %v1583_v21 }
 0x5e1   :  { %v11967_v58 = vadd.f32 %v1589_v20, %v11860_v8  ;;  %v1739_v8 = vld [vmem:[#allocation2 + $0x658] sm:$0xff]  ;;  %v1955_v20 = vld [vmem:[#allocation6 + $0x298] sm:$0xff] }
 0x5e2   :  { %v11964_v24 = vadd.f32 %v1584_v2, %v11857_v3  ;;  %10141 = vmatpush3.bf16.msra.mxu0 %v10138_v63  ;;  %v1754_v3 = vld [vmem:[#allocation2 + $0x6d0] sm:$0xff]  ;;  %v10124_v33 = vpack.c.bf16 %v1739_v8, %v1738_v32 }
 0x5e3   :  { %10143 = vmatprep.subr.bf16.mxu0 %v10142_v22  ;;  %v10122_v31 = vpack.c.bf16 %v1755_v28, %v1754_v3  ;;  %v1957_v3 = vld [vmem:[#allocation6 + $0x2a8] sm:$0xff] }
 0x5e4   :  { %8619 = vmatprep.mubr.f32.mxu0 %v11964_v24 }
 0x5e5   :  { %8620 = vmatmul.mubr.f32.gmra.mrb[26].mxu0 %v11967_v58  ;;  %10123 = vmatprep.subr.bf16.mxu1 %v10122_v31 }
 0x5e6   :  { %10145 = vmatpush3.bf16.msra.mxu0 %v10142_v22  ;;  %10125 = vmatpush3.bf16.msra.mxu1 %v10124_v33 }
 0x5e7   :  { %10147 = vmatprep.subr.bf16.mxu0 %v10146_v25  ;;  %10127 = vmatprep.subr.bf16.mxu1 %v10126_v39  ;;  %v10182_v39 = vpack.c.bf16 %v1961_v38, %v1960_v11 }
 0x5ea   :  { %10149 = vmatpush3.bf16.msra.mxu0 %v10146_v25  ;;  %10129 = vmatpush3.bf16.msra.mxu1 %v10128_v42  ;;  %v10170_v25 = vpack.c.bf16 %v1955_v20, %v1954_v19  ;;  %v10186_v42 = vpack.c.bf16 %v1963_v41, %v1962_v40  ;;  %v2234_v20 = vld [vmem:[#allocation2 + $0x820] sm:$0xff]  ;;  %v2223_v40 = vld [vmem:[#allocation2 + $0x7c8] sm:$0xff]  ;;  %v2071_v41 = vld [vmem:[#allocation6 + $0x360] sm:$0xff] }
 0x5eb   :  { %10151 = vmatprep.subr.bf16.mxu0 %v10150_v6  ;;  %10131 = vmatprep.subr.bf16.mxu1 %v10130_v48  ;;  %v10194_v48 = vpack.c.bf16 %v1967_v53, %v1966_v49 }
 0x5ee   :  { %10153 = vmatpush3.bf16.msra.mxu0 %v10150_v6  ;;  %10133 = vmatpush3.bf16.msra.mxu1 %v10132_v52  ;;  %v1956_v6 = vld [vmem:[#allocation6 + $0x2a0] sm:$0xff]  ;;  %v10198_v52 = vpack.c.bf16 %v2060_v55, %v2059_v54 }
 0x5ef   :  { %10155 = vmatprep.subr.bf16.mxu0 %v10154_v37  ;;  %10167 = vmatprep.subr.bf16.mxu1 %v10166_v62  ;;  %v10174_v33 = vpack.c.bf16 %v1957_v3, %v1956_v6  ;;  %v2237_v6 = vld [vmem:[#allocation2 + $0x838] sm:$0xff] }
 0x5f0   :  { %v2225_v54 = vld [vmem:[#allocation2 + $0x7d8] sm:$0xff] }
 0x5f2   :  { %10157 = vmatpush3.bf16.msra.mxu0 %v10154_v37  ;;  %v10178_v37 = vpack.c.bf16 %v1959_v36, %v1958_v34  ;;  %v2070_v34 = vld [vmem:[#allocation6 + $0x358] sm:$0xff]  ;;  %v2238_v36 = vld [vmem:[#allocation2 + $0x840] sm:$0xff] }
 0x5f3   :  { %10159 = vmatprep.subr.bf16.mxu0 %v10158_v47 }
 0x5f6   :  { %10161 = vmatpush3.bf16.msra.mxu0 %v10158_v47  ;;  %v10190_v47 = vpack.c.bf16 %v1965_v44, %v1964_v43  ;;  %v2240_v43 = vld [vmem:[#allocation2 + $0x850] sm:$0xff]  ;;  %v2241_v44 = vld [vmem:[#allocation2 + $0x858] sm:$0xff] }
 0x5f7   :  { %10163 = vmatprep.subr.bf16.mxu0 %v10162_v59  ;;  %v10250_v53 = vpack.c.bf16 %v2241_v44, %v2240_v43 }
 0x5fa   :  { %10165 = vmatpush3.bf16.msra.mxu0 %v10162_v59  ;;  %v10202_v59 = vpack.c.bf16 %v2062_v57, %v2061_v56  ;;  %v2074_v56 = vld [vmem:[#allocation6 + $0x378] sm:$0xff] }
 0x5fb   :  { %10199 = vmatprep.subr.bf16.mxu0 %v10198_v52 }
 0x6b0   :  { %v8618_v1 = vpop.f32.mrb[24].mxu0 }
 0x6b1   :  { %v1690_v4 = vadd.f32 %v8618_v1, %v6711_v0  ;;  %v1684_v5 = vpop.f32.mrb[25].mxu0  ;;  %v2215_v1 = vld [vmem:[#allocation2 + $0x788] sm:$0xff] }
 0x6b2   :  { %v1685_v7 = vadd.f32 %v6711_v0, %v1684_v5  ;;  %v2063_v5 = vld [vmem:[#allocation6 + $0x320] sm:$0xff] }
 0x6b3   :  { %v1704_v9 = vrot.slane %v1690_v4, 7  ;;  %v1716_v12 = vrot.slane %v1690_v4, 1 }
 0x6b4   :  { %v1703_v10 = vrot.slane %v1685_v7, 7  ;;  %v1715_v13 = vrot.slane %v1685_v7, 1  ;;  %1845 = vmatprep.mubr.f32.mxu1 %v1685_v7  ;;  %v2064_v7 = vld [vmem:[#allocation6 + $0x328] sm:$0xff] }
 0x6b6   :  { %v1721_v29 = vsel %vm157_vm0, %v1715_v13, %v1716_v12  ;;  %v1709_v14 = vsel %vm144_vm1, %v1703_v10, %v1704_v9 }
 0x6b7   :  { %8654 = vmatprep.mubr.f32.mxu0 %v1721_v29  ;;  %v2216_v29 = vld [vmem:[#allocation2 + $0x790] sm:$0xff] }
 0x6b8   :  { %v8621_v63 = vpop.f32.mrb[26].mxu0 }
 0x6b9   :  { %v1700_v17 = vadd.f32 %v8621_v63, %v6711_v0  ;;  %v1694_v18 = vpop.f32.mrb[27].mxu0 }
 0x6ba   :  { %v1695_v21 = vadd.f32 %v6711_v0, %v1694_v18  ;;  %v2214_v0 = vld [vmem:[#allocation2 + $0x780] sm:$0xff]  ;;  %v2066_v18 = vld [vmem:[#allocation6 + $0x338] sm:$0xff] }
 0x6bb   :  { %v1706_v22 = vrot.slane %v1700_v17, 7  ;;  %v1718_v2 = vrot.slane %v1700_v17, 1 }
 0x6bc   :  { %v1705_v23 = vrot.slane %v1695_v21, 7  ;;  %v1717_v50 = vrot.slane %v1695_v21, 1 }
 0x6bd   :  { %v1710_v26 = vsel %vm144_vm1, %v1706_v22, %v1703_v10  ;;  %v1722_v27 = vsel %vm157_vm0, %v1718_v2, %v1715_v13  ;;  %v2233_v10 = vld [vmem:[#allocation2 + $0x818] sm:$0xff] }
 0x6be   :  { %6713 = vmatmul.mubr.msk.f32.vlgmr.msra.gmra.mrb[36].mxu1 %vm11801_vm2, %v1710_v26  ;;  %v1720_v28 = vsel %vm157_vm0, %v1716_v12, %v1717_v50  ;;  %v1719_v31 = vsel %vm157_vm0, %v1717_v50, %v1718_v2  ;;  %v1708_v32 = vsel %vm144_vm1, %v1704_v9, %v1705_v23  ;;  %v1707_v8 = vsel %vm144_vm1, %v1705_v23, %v1706_v22  ;;  %v2232_v12 = vld [vmem:[#allocation2 + $0x810] sm:$0xff]  ;;  %v2218_v2 = vld [vmem:[#allocation2 + $0x7a0] sm:$0xff]  ;;  %v2219_v23 = vld [vmem:[#allocation2 + $0x7a8] sm:$0xff] }
 0x6bf   :  { %10169 = vmatpush3.bf16.msra.mxu1 %v10166_v62  ;;  %1850 = vmatprep.mubr.f32.mxu1 %v1690_v4  ;;  %v10230_v62 = vpack.c.bf16 %v2231_v61, %v2230_v60  ;;  %v10232_v4 = vpack.c.bf16 %v2215_v1, %v2214_v0  ;;  %v10206_v9 = vpack.c.bf16 %v2064_v7, %v2063_v5  ;;  %v2067_v50 = vld [vmem:[#allocation6 + $0x340] sm:$0xff]  ;;  %v2068_v26 = vld [vmem:[#allocation6 + $0x348] sm:$0xff]  ;;  %v2243_v60 = vld [vmem:[#allocation2 + $0x868] sm:$0xff] }
 0x6c0   :  { %8655 = vmatmul.mubr.msk.f32.vlgmr.msra.gmra.mrb[28].mxu0 %vm11809_vm3, %v1720_v28  ;;  %10171 = vmatprep.subr.bf16.mxu1 %v10170_v25  ;;  %v10234_v13 = vpack.c.bf16 %v2233_v10, %v2232_v12  ;;  %v10214_v3 = vpack.c.bf16 %v2068_v26, %v2067_v50  ;;  %v2227_v0 = vld [vmem:[#allocation2 + $0x7e8] sm:$0xff]  ;;  %v2245_v12 = vld [vmem:[#allocation2 + $0x878] sm:$0xff] }
 0x6c1   :  { %8657 = vmatprep.mubr.f32.mxu0 %v1719_v31  ;;  %10201 = vmatpush3.bf16.msra.mxu0 %v10198_v52  ;;  %v2220_v31 = vld [vmem:[#allocation2 + $0x7b0] sm:$0xff]  ;;  %v2073_v52 = vld [vmem:[#allocation6 + $0x370] sm:$0xff] }
 0x6c2   :  { %1851 = vmatmul.mubr.f32.gmra.mrb[38].mxu1 %v1709_v14  ;;  %10203 = vmatprep.subr.bf16.mxu0 %v10202_v59  ;;  %v2217_v14 = vld [vmem:[#allocation2 + $0x798] sm:$0xff]  ;;  %v10226_v57 = vpack.c.bf16 %v2074_v56, %v2073_v52  ;;  %v2247_v5 = vld [vmem:[#allocation2 + $0x888] sm:$0xff] }
 0x6c3   :  { %10173 = vmatpush3.bf16.msra.mxu1 %v10170_v25  ;;  %1855 = vmatprep.mubr.f32.mxu1 %v1695_v21  ;;  %v10236_v63 = vpack.c.bf16 %v2217_v14, %v2216_v29  ;;  %v2235_v21 = vld [vmem:[#allocation2 + $0x828] sm:$0xff]  ;;  %v10240_v25 = vpack.c.bf16 %v2219_v23, %v2218_v2  ;;  %v2229_v29 = vld [vmem:[#allocation2 + $0x7f8] sm:$0xff] }
 0x6c4   :  { %8658 = vmatmul.mubr.msk.f32.gmra.mrb[30].mxu0 %vm11826_vm4, %v1722_v27  ;;  %10175 = vmatprep.subr.bf16.mxu1 %v10174_v33  ;;  %v10238_v22 = vpack.c.bf16 %v2235_v21, %v2234_v20  ;;  %v2236_v27 = vld [vmem:[#allocation2 + $0x830] sm:$0xff]  ;;  %v2253_v52 = vld [vmem:[#allocation2 + $0x8b8] sm:$0xff] }
 0x6c5   :  { %10205 = vmatpush3.bf16.msra.mxu0 %v10202_v59  ;;  %v10242_v28 = vpack.c.bf16 %v2237_v6, %v2236_v27  ;;  %v2242_v59 = vld [vmem:[#allocation2 + $0x860] sm:$0xff]  ;;  %v6717_v27 = vld [vmem:[#allocation7 + $0x5] ss:$0 sm:$0xff] }
 0x6c6   :  { %6714 = vmatmul.mubr.msk.f32.gmra.mrb[40].mxu1 %vm11834_vm5, %v1708_v32  ;;  %10207 = vmatprep.subr.bf16.mxu0 %v10206_v9  ;;  %v2221_v32 = vld [vmem:[#allocation2 + $0x7b8] sm:$0xff]  ;;  %v10254_v61 = vpack.c.bf16 %v2243_v60, %v2242_v59 }
 0x6c7   :  { %10177 = vmatpush3.bf16.msra.mxu1 %v10174_v33  ;;  %1860 = vmatprep.mubr.f32.mxu1 %v1700_v17  ;;  %v2065_v17 = vld [vmem:[#allocation6 + $0x330] sm:$0xff]  ;;  %v10244_v33 = vpack.c.bf16 %v2221_v32, %v2220_v31 }
 0x6c8   :  { %10179 = vmatprep.subr.bf16.mxu1 %v10178_v37  ;;  %v10210_v19 = vpack.c.bf16 %v2066_v18, %v2065_v17 }
 0x6c9   :  { %10209 = vmatpush3.bf16.msra.mxu0 %v10206_v9  ;;  %v2244_v9 = vld [vmem:[#allocation2 + $0x870] sm:$0xff] }
 0x6ca   :  { %1861 = vmatmul.mubr.f32.gmra.mrb[42].mxu1 %v1707_v8  ;;  %10211 = vmatprep.subr.bf16.mxu0 %v10210_v19  ;;  %v2069_v8 = vld [vmem:[#allocation6 + $0x350] sm:$0xff]  ;;  %v10258_v10 = vpack.c.bf16 %v2245_v12, %v2244_v9  ;;  %v2256_v9 = vld [vmem:[#allocation2 + $0x8d0] sm:$0xff]  ;;  %v2257_v12 = vld [vmem:[#allocation2 + $0x8d8] sm:$0xff] }
 0x6cb   :  { %10181 = vmatpush3.bf16.msra.mxu1 %v10178_v37  ;;  %8692 = vmatprep.mubr.f32.mxu1 %v11956_v15  ;;  %v2239_v37 = vld [vmem:[#allocation2 + $0x848] sm:$0xff]  ;;  %v10218_v11 = vpack.c.bf16 %v2070_v34, %v2069_v8 }
 0x6cc   :  { %10183 = vmatprep.subr.bf16.mxu1 %v10182_v39  ;;  %v10246_v38 = vpack.c.bf16 %v2239_v37, %v2238_v36 }
 0x6cd   :  { %10213 = vmatpush3.bf16.msra.mxu0 %v10210_v19 }
 0x6ce   :  { %10215 = vmatprep.subr.bf16.mxu0 %v10214_v3 }
 0x6cf   :  { %10185 = vmatpush3.bf16.msra.mxu1 %v10182_v39  ;;  %v2222_v39 = vld [vmem:[#allocation2 + $0x7c0] sm:$0xff] }
 0x6d0   :  { %10187 = vmatprep.subr.bf16.mxu1 %v10186_v42  ;;  %v10248_v49 = vpack.c.bf16 %v2223_v40, %v2222_v39 }
 0x6d1   :  { %10217 = vmatpush3.bf16.msra.mxu0 %v10214_v3  ;;  %v2248_v3 = vld [vmem:[#allocation2 + $0x890] sm:$0xff] }
 0x6d2   :  { %10219 = vmatprep.subr.bf16.mxu0 %v10218_v11 }
 0x6d3   :  { %10189 = vmatpush3.bf16.msra.mxu1 %v10186_v42  ;;  %v2072_v42 = vld [vmem:[#allocation6 + $0x368] sm:$0xff] }
 0x6d4   :  { %10191 = vmatprep.subr.bf16.mxu1 %v10190_v47 }
 0x6d5   :  { %10221 = vmatpush3.bf16.msra.mxu0 %v10218_v11 }
 0x6d7   :  { %10193 = vmatpush3.bf16.msra.mxu1 %v10190_v47  ;;  %v10222_v47 = vpack.c.bf16 %v2072_v42, %v2071_v41  ;;  %v2250_v41 = vld [vmem:[#allocation2 + $0x8a0] sm:$0xff]  ;;  %v2251_v42 = vld [vmem:[#allocation2 + $0x8a8] sm:$0xff] }
 0x6d8   :  { %10195 = vmatprep.subr.bf16.mxu1 %v10194_v48 }
 0x6d9   :  { %10223 = vmatprep.subr.bf16.mxu0 %v10222_v47 }
 0x6da   :  { %10225 = vmatpush3.bf16.msra.mxu0 %v10222_v47 }
 0x6db   :  { %10197 = vmatpush3.bf16.msra.mxu1 %v10194_v48  ;;  %v2224_v48 = vld [vmem:[#allocation2 + $0x7d0] sm:$0xff]  ;;  %10227 = vmatprep.subr.bf16.mxu0 %v10226_v57 }
 0x6dc   :  { %10231 = vmatprep.subr.bf16.mxu1 %v10230_v62  ;;  %v10252_v55 = vpack.c.bf16 %v2225_v54, %v2224_v48  ;;  %v2226_v62 = vld [vmem:[#allocation2 + $0x7e0] sm:$0xff]  ;;  %v10270_v54 = vpack.c.bf16 %v2251_v42, %v2250_v41 }
 0x6dd   :  { %v10256_v1 = vpack.c.bf16 %v2227_v0, %v2226_v62  ;;  %v2470_v42 = vld [vmem:[#allocation2 + $0x920] sm:$0xff] }
 0x6de   :  { %8693 = vmatmul.mubr.f32.vlgmr.msra.gmra.mrb[44].mxu1 %v11959_v16  ;;  %10229 = vmatpush3.bf16.msra.mxu0 %v10226_v57 }
 0x6df   :  { %8695 = vmatprep.mubr.f32.mxu1 %v11964_v24  ;;  %10233 = vmatpush3.bf16.msra.mxu1 %v10232_v4  ;;  %v2246_v4 = vld [vmem:[#allocation2 + $0x880] sm:$0xff] }
 0x6e0   :  { %10235 = vmatprep.subr.bf16.mxu1 %v10234_v13  ;;  %v10262_v7 = vpack.c.bf16 %v2247_v5, %v2246_v4  ;;  %v2228_v13 = vld [vmem:[#allocation2 + $0x7f0] sm:$0xff]  ;;  %v2254_v4 = vld [vmem:[#allocation2 + $0x8c0] sm:$0xff]  ;;  %v2255_v5 = vld [vmem:[#allocation2 + $0x8c8] sm:$0xff] }
 0x6e1   :  { %v10260_v14 = vpack.c.bf16 %v2229_v29, %v2228_v13  ;;  %v2258_v13 = vld [vmem:[#allocation2 + $0x8e0] sm:$0xff]  ;;  %v2259_v29 = vld [vmem:[#allocation2 + $0x8e8] sm:$0xff] }
 0x6e2   :  { %8696 = vmatmul.mubr.f32.gmra.mrb[46].mxu1 %v11967_v58  ;;  %10263 = vmatprep.subr.bf16.mxu0 %v10262_v7 }
 0x6e3   :  { %10237 = vmatpush3.bf16.msra.mxu1 %v10236_v63 }
 0x6e4   :  { %10239 = vmatprep.subr.bf16.mxu1 %v10238_v22 }
 0x6e7   :  { %10241 = vmatpush3.bf16.msra.mxu1 %v10240_v25 }
 0x6e8   :  { %10243 = vmatprep.subr.bf16.mxu1 %v10242_v28  ;;  %v2249_v28 = vld [vmem:[#allocation2 + $0x898] sm:$0xff] }
 0x6eb   :  { %10245 = vmatpush3.bf16.msra.mxu1 %v10244_v33  ;;  %v10266_v33 = vpack.c.bf16 %v2249_v28, %v2248_v3  ;;  %v2499_v3 = vld [vmem:[#allocation2 + $0xa08] sm:$0xff] }
 0x6ec   :  { %10247 = vmatprep.subr.bf16.mxu1 %v10246_v38 }
 0x6ef   :  { %10249 = vmatpush3.bf16.msra.mxu1 %v10248_v49 }
 0x6f0   :  { %10251 = vmatprep.subr.bf16.mxu1 %v10250_v53 }
 0x6f3   :  { %10253 = vmatpush3.bf16.msra.mxu1 %v10252_v55  ;;  %v2252_v55 = vld [vmem:[#allocation2 + $0x8b0] sm:$0xff] }
 0x6f4   :  { %10255 = vmatprep.subr.bf16.mxu1 %v10254_v61  ;;  %v10274_v0 = vpack.c.bf16 %v2253_v52, %v2252_v55  ;;  %v2472_v52 = vld [vmem:[#allocation2 + $0x930] sm:$0xff] }
 0x6f7   :  { %10257 = vmatpush3.bf16.msra.mxu1 %v10256_v1 }
 0x6f8   :  { %10259 = vmatprep.subr.bf16.mxu1 %v10258_v10  ;;  %v10282_v10 = vpack.c.bf16 %v2257_v12, %v2256_v9  ;;  %v2507_v9 = vld [vmem:[#allocation2 + $0xa48] sm:$0xff] }
 0x6fb   :  { %10261 = vmatpush3.bf16.msra.mxu1 %v10260_v14  ;;  %v10286_v14 = vpack.c.bf16 %v2259_v29, %v2258_v13  ;;  %v2492_v13 = vld [vmem:[#allocation2 + $0x9d0] sm:$0xff]  ;;  %v2493_v29 = vld [vmem:[#allocation2 + $0x9d8] sm:$0xff] }
 0x791   :  { %v7180_v63 = vpop.f32.mrb[36].mxu1 }
 0x792   :  { %v7181_v17 = vpop.f32.mrb[37].mxu1 }
 0x793   :  { %v11999_v18 = vadd.f32 %v7181_v17, %v7180_v63  ;;  %v2260_v63 = vld [vmem:[#allocation2 + $0x8f0] sm:$0xff]  ;;  %v2261_v17 = vld [vmem:[#allocation2 + $0x8f8] sm:$0xff] }
 0x795   :  { %v7183_v19 = vpop.f32.mrb[38].mxu1 }
 0x796   :  { %v7184_v20 = vpop.f32.mrb[39].mxu1 }
 0x797   :  { %v12001_v21 = vadd.f32 %v7184_v20, %v7183_v19  ;;  %v10290_v19 = vpack.c.bf16 %v2261_v17, %v2260_v63  ;;  %v2482_v20 = vld [vmem:[#allocation2 + $0x980] sm:$0xff]  ;;  %v2476_v63 = vld [vmem:[#allocation2 + $0x950] sm:$0xff]  ;;  %v2477_v17 = vld [vmem:[#allocation2 + $0x958] sm:$0xff] }
 0x799   :  { %v7186_v22 = vpop.f32.mrb[40].mxu1 }
 0x79a   :  { %v7187_v2 = vpop.f32.mrb[41].mxu1 }
 0x79b   :  { %v12003_v23 = vadd.f32 %v7187_v2, %v7186_v22  ;;  %v2483_v22 = vld [vmem:[#allocation2 + $0x988] sm:$0xff] }
 0x79c   :  { %v10294_v2 = vpack.c.bf16 %v2483_v22, %v2482_v20  ;;  %v10316_v20 = vpack.c.bf16 %v2477_v17, %v2476_v63  ;;  %v2509_v22 = vld [vmem:[#allocation2 + $0xa58] sm:$0xff] }
 0x79d   :  { %v7189_v50 = vpop.f32.mrb[42].mxu1 }
 0x79e   :  { %v7190_v25 = vpop.f32.mrb[43].mxu1  ;;  %10295 = vmatprep.subr.bf16.mxu1 %v10294_v2 }
 0x79f   :  { %v12005_v26 = vadd.f32 %v7190_v25, %v7189_v50  ;;  %v2466_v50 = vld [vmem:[#allocation2 + $0x900] sm:$0xff]  ;;  %v2467_v25 = vld [vmem:[#allocation2 + $0x908] sm:$0xff] }
 0x7b1   :  { %v8694_v6 = vpop.f32.mrb[44].mxu1 }
 0x7b2   :  { %v2045_v31 = vadd.f32 %v8694_v6, %v6717_v27  ;;  %v2039_v32 = vpop.f32.mrb[45].mxu1  ;;  %v10296_v6 = vpack.c.bf16 %v2467_v25, %v2466_v50  ;;  %v2494_v50 = vld [vmem:[#allocation2 + $0x9e0] sm:$0xff]  ;;  %v2495_v25 = vld [vmem:[#allocation2 + $0x9e8] sm:$0xff] }
 0x7b3   :  { %v2040_v8 = vadd.f32 %v6717_v27, %v2039_v32  ;;  %v2485_v32 = vld [vmem:[#allocation2 + $0x998] sm:$0xff] }
 0x7b4   :  { %v2202_v34 = vrot.slane %v2045_v31, 1  ;;  %v2190_v36 = vrot.slane %v2045_v31, 7 }
 0x7b5   :  { %v2189_v37 = vrot.slane %v2040_v8, 7  ;;  %v8697_v11 = vpop.f32.mrb[46].mxu1  ;;  %8730 = vmatprep.mubr.f32.mxu0 %v2040_v8  ;;  %2331 = vmatprep.mubr.f32.mxu1 %v2040_v8  ;;  %v2201_v38 = vrot.slane %v2040_v8, 1 }
 0x7b6   :  { %v2055_v39 = vadd.f32 %v8697_v11, %v6717_v27  ;;  %v2049_v40 = vpop.f32.mrb[47].mxu1  ;;  %8731 = vmatmul.mubr.f32.vlgmr.msra.gmra.mrb[32].mxu0 %v2045_v31  ;;  %v2501_v11 = vld [vmem:[#allocation2 + $0xa18] sm:$0xff] }
 0x7b7   :  { %v2050_v43 = vadd.f32 %v6717_v27, %v2049_v40  ;;  %10265 = vmatpush3.bf16.msra.mxu0 %v10262_v7  ;;  %v2207_v44 = vsel %vm157_vm0, %v2201_v38, %v2202_v34  ;;  %v2195_v47 = vsel %vm144_vm1, %v2189_v37, %v2190_v36  ;;  %v10278_v7 = vpack.c.bf16 %v2255_v5, %v2254_v4  ;;  %v2498_v27 = vld [vmem:[#allocation2 + $0xa00] sm:$0xff]  ;;  %v2487_v40 = vld [vmem:[#allocation2 + $0x9a8] sm:$0xff] }
 0x7b8   :  { %v2192_v49 = vrot.slane %v2055_v39, 7  ;;  %10267 = vmatprep.subr.bf16.mxu0 %v10266_v33  ;;  %v2204_v53 = vrot.slane %v2055_v39, 1  ;;  %v10326_v28 = vpack.c.bf16 %v2499_v3, %v2498_v27  ;;  %v2475_v5 = vld [vmem:[#allocation2 + $0x948] sm:$0xff]  ;;  %v10318_v27 = vpack.c.bf16 %v2495_v25, %v2494_v50 }
 0x7b9   :  { %v2203_v48 = vrot.slane %v2050_v43, 1  ;;  %8733 = vmatprep.mubr.f32.mxu0 %v2050_v43  ;;  %v2191_v56 = vrot.slane %v2050_v43, 7  ;;  %v2479_v3 = vld [vmem:[#allocation2 + $0x968] sm:$0xff] }
 0x7ba   :  { %8734 = vmatmul.mubr.f32.gmra.mrb[34].mxu0 %v2055_v39  ;;  %v2196_v57 = vsel %vm144_vm1, %v2192_v49, %v2189_v37  ;;  %v2208_v59 = vsel %vm157_vm0, %v2204_v53, %v2201_v38 }
 0x7bb   :  { %10269 = vmatpush3.bf16.msra.mxu0 %v10266_v33  ;;  %6720 = vmatmul.mubr.msk.f32.vlgmr.msra.gmra.mrb[48].mxu1 %vm11801_vm2, %v2196_v57  ;;  %v2194_v60 = vsel %vm144_vm1, %v2190_v36, %v2191_v56  ;;  %v2193_v61 = vsel %vm144_vm1, %v2191_v56, %v2192_v49  ;;  %v2206_v62 = vsel %vm157_vm0, %v2202_v34, %v2203_v48  ;;  %v2468_v33 = vld [vmem:[#allocation2 + $0x910] sm:$0xff]  ;;  %v2469_v34 = vld [vmem:[#allocation2 + $0x918] sm:$0xff]  ;;  %v2503_v49 = vld [vmem:[#allocation2 + $0xa28] sm:$0xff] }
 0x7bc   :  { %8768 = vmatprep.mubr.f32.mxu0 %v2207_v44  ;;  %2336 = vmatprep.mubr.f32.mxu1 %v2045_v31  ;;  %v2205_v1 = vsel %vm157_vm0, %v2203_v48, %v2204_v53  ;;  %v2484_v31 = vld [vmem:[#allocation2 + $0x990] sm:$0xff]  ;;  %v10300_v37 = vpack.c.bf16 %v2469_v34, %v2468_v33  ;;  %v2502_v44 = vld [vmem:[#allocation2 + $0xa20] sm:$0xff]  ;;  %v2473_v56 = vld [vmem:[#allocation2 + $0x938] sm:$0xff] }
 0x7bd   :  { %10271 = vmatprep.subr.bf16.mxu0 %v10270_v54  ;;  %10297 = vmatpush3.bf16.msra.mxu1 %v10296_v6  ;;  %v10298_v8 = vpack.c.bf16 %v2485_v32, %v2484_v31  ;;  %v2500_v36 = vld [vmem:[#allocation2 + $0xa10] sm:$0xff]  ;;  %v10334_v53 = vpack.c.bf16 %v2503_v49, %v2502_v44  ;;  %v2478_v6 = vld [vmem:[#allocation2 + $0x960] sm:$0xff]  ;;  %v2511_v32 = vld [vmem:[#allocation2 + $0xa68] sm:$0xff] }
 0x7be   :  { %v10330_v38 = vpack.c.bf16 %v2501_v11, %v2500_v36  ;;  %v2488_v48 = vld [vmem:[#allocation2 + $0x9b0] sm:$0xff]  ;;  %v10320_v31 = vpack.c.bf16 %v2479_v3, %v2478_v6  ;;  %v2497_v34 = vld [vmem:[#allocation2 + $0x9f8] sm:$0xff] }
 0x7bf   :  { %10273 = vmatpush3.bf16.msra.mxu0 %v10270_v54  ;;  %2337 = vmatmul.mubr.f32.gmra.mrb[50].mxu1 %v2195_v47  ;;  %v2489_v54 = vld [vmem:[#allocation2 + $0x9b8] sm:$0xff]  ;;  %v2504_v57 = vld [vmem:[#allocation2 + $0xa30] sm:$0xff] }
 0x7c0   :  { %2341 = vmatprep.mubr.f32.mxu1 %v2050_v43  ;;  %10275 = vmatprep.subr.bf16.mxu0 %v10274_v0  ;;  %v2471_v43 = vld [vmem:[#allocation2 + $0x928] sm:$0xff]  ;;  %v10306_v55 = vpack.c.bf16 %v2489_v54, %v2488_v48  ;;  %v2496_v33 = vld [vmem:[#allocation2 + $0x9f0] sm:$0xff]  ;;  %v2481_v11 = vld [vmem:[#allocation2 + $0x978] sm:$0xff] }
 0x7c1   :  { %10299 = vmatprep.subr.bf16.mxu1 %v10298_v8  ;;  %v10304_v47 = vpack.c.bf16 %v2471_v43, %v2470_v42  ;;  %v10322_v36 = vpack.c.bf16 %v2497_v34, %v2496_v33  ;;  %v2694_v42 = vld [vmem:[#allocation6 + $0x380] sm:$0xff]  ;;  %v2695_v43 = vld [vmem:[#allocation6 + $0x388] sm:$0xff] }
 0x7c2   :  { %10301 = vmatpush3.bf16.msra.mxu1 %v10300_v37  ;;  %v2480_v37 = vld [vmem:[#allocation2 + $0x970] sm:$0xff]  ;;  %v12031_v44 = vpack.c.bf16 %v2695_v43, %v2694_v42 }
 0x7c3   :  { %10277 = vmatpush3.bf16.msra.mxu0 %v10274_v0  ;;  %6721 = vmatmul.mubr.msk.f32.gmra.mrb[52].mxu1 %vm11834_vm5, %v2194_v60  ;;  %v2505_v60 = vld [vmem:[#allocation2 + $0xa38] sm:$0xff]  ;;  %v2491_v0 = vld [vmem:[#allocation2 + $0x9c8] sm:$0xff] }
 0x7c4   :  { %2346 = vmatprep.mubr.f32.mxu1 %v2055_v39  ;;  %10279 = vmatprep.subr.bf16.mxu0 %v10278_v7  ;;  %v2486_v39 = vld [vmem:[#allocation2 + $0x9a0] sm:$0xff] }
 0x7c5   :  { %v10302_v41 = vpack.c.bf16 %v2487_v40, %v2486_v39  ;;  %v10324_v39 = vpack.c.bf16 %v2481_v11, %v2480_v37  ;;  %v2513_v40 = vld [vmem:[#allocation2 + $0xa78] sm:$0xff] }
 0x7c7   :  { %10281 = vmatpush3.bf16.msra.mxu0 %v10278_v7  ;;  %2347 = vmatmul.mubr.f32.gmra.mrb[54].mxu1 %v2193_v61  ;;  %v10338_v61 = vpack.c.bf16 %v2505_v60, %v2504_v57  ;;  %v2506_v7 = vld [vmem:[#allocation2 + $0xa40] sm:$0xff] }
 0x7c8   :  { %10283 = vmatprep.subr.bf16.mxu0 %v10282_v10  ;;  %10303 = vmatprep.subr.bf16.mxu1 %v10302_v41 }
 0x7c9   :  { %10305 = vmatpush3.bf16.msra.mxu1 %v10304_v47  ;;  %v6718_v47 = vld [vmem:[#allocation7 + $0x6] ss:$0 sm:$0xff] }
 0x7ca   :  { %10307 = vmatprep.subr.bf16.mxu1 %v10306_v55 }
 0x7cb   :  { %10285 = vmatpush3.bf16.msra.mxu0 %v10282_v10  ;;  %v10342_v10 = vpack.c.bf16 %v2507_v9, %v2506_v7 }
 0x7cc   :  { %10287 = vmatprep.subr.bf16.mxu0 %v10286_v14 }
 0x7cf   :  { %10289 = vmatpush3.bf16.msra.mxu0 %v10286_v14  ;;  %v10314_v14 = vpack.c.bf16 %v2493_v29, %v2492_v13 }
 0x7d0   :  { %10291 = vmatprep.subr.bf16.mxu0 %v10290_v19 }
 0x7d3   :  { %10293 = vmatpush3.bf16.msra.mxu0 %v10290_v19  ;;  %v2508_v19 = vld [vmem:[#allocation2 + $0xa50] sm:$0xff] }
 0x7d4   :  { %10327 = vmatprep.subr.bf16.mxu0 %v10326_v28  ;;  %v10346_v2 = vpack.c.bf16 %v2509_v22, %v2508_v19 }
 0x7d6   :  { %8769 = vmatmul.mubr.msk.f32.vlgmr.msra.gmra.mrb[36].mxu0 %vm11809_vm3, %v2206_v62  ;;  %v2490_v62 = vld [vmem:[#allocation2 + $0x9c0] sm:$0xff] }
 0x7d7   :  { %8771 = vmatprep.mubr.f32.mxu0 %v2205_v1  ;;  %10329 = vmatpush3.bf16.msra.mxu0 %v10326_v28  ;;  %v2474_v1 = vld [vmem:[#allocation2 + $0x940] sm:$0xff]  ;;  %v10310_v4 = vpack.c.bf16 %v2491_v0, %v2490_v62 }
 0x7d8   :  { %10331 = vmatprep.subr.bf16.mxu0 %v10330_v38  ;;  %v10312_v12 = vpack.c.bf16 %v2475_v5, %v2474_v1  ;;  %v2510_v28 = vld [vmem:[#allocation2 + $0xa60] sm:$0xff] }
 0x7d9   :  { %v10350_v8 = vpack.c.bf16 %v2511_v32, %v2510_v28  ;;  %v6719_v32 = vld [vmem:[#allocation4 + $0x5] ss:$0 sm:$0xff] }
 0x7da   :  { %8772 = vmatmul.mubr.msk.f32.gmra.mrb[38].mxu0 %vm11826_vm4, %v2208_v59  ;;  %v10308_v59 = vpack.c.bf16 %v2473_v56, %v2472_v52 }
 0x7db   :  { %10333 = vmatpush3.bf16.msra.mxu0 %v10330_v38  ;;  %v2512_v38 = vld [vmem:[#allocation2 + $0xa70] sm:$0xff] }
 0x7dc   :  { %10335 = vmatprep.subr.bf16.mxu0 %v10334_v53  ;;  %10309 = vmatpush3.bf16.msra.mxu1 %v10308_v59  ;;  %v10354_v41 = vpack.c.bf16 %v2513_v40, %v2512_v38 }
 0x7dd   :  { %10311 = vmatprep.subr.bf16.mxu1 %v10310_v4 }
 0x7df   :  { %10337 = vmatpush3.bf16.msra.mxu0 %v10334_v53 }
 0x7e0   :  { %10339 = vmatprep.subr.bf16.mxu0 %v10338_v61  ;;  %10313 = vmatpush3.bf16.msra.mxu1 %v10312_v12 }
 0x7e1   :  { %10315 = vmatprep.subr.bf16.mxu1 %v10314_v14 }
 0x7e3   :  { %10341 = vmatpush3.bf16.msra.mxu0 %v10338_v61 }
 0x7e4   :  { %10343 = vmatprep.subr.bf16.mxu0 %v10342_v10  ;;  %10317 = vmatpush3.bf16.msra.mxu1 %v10316_v20 }
 0x7e5   :  { %10319 = vmatprep.subr.bf16.mxu1 %v10318_v27 }
 0x7e7   :  { %10345 = vmatpush3.bf16.msra.mxu0 %v10342_v10 }
 0x7e8   :  { %10347 = vmatprep.subr.bf16.mxu0 %v10346_v2  ;;  %10321 = vmatpush3.bf16.msra.mxu1 %v10320_v31 }
 0x7e9   :  { %10323 = vmatprep.subr.bf16.mxu1 %v10322_v36 }
 0x7eb   :  { %10349 = vmatpush3.bf16.msra.mxu0 %v10346_v2 }
 0x7ec   :  { %10351 = vmatprep.subr.bf16.mxu0 %v10350_v8  ;;  %10325 = vmatpush3.bf16.msra.mxu1 %v10324_v39 }
 0x7ed   :  { %10359 = vmatprep.subr.bf16.mxu1 %v12031_v44 }
 0x7ef   :  { %10353 = vmatpush3.bf16.msra.mxu0 %v10350_v8 }
 0x7f0   :  { %10355 = vmatprep.subr.bf16.mxu0 %v10354_v41 }
 0x7f3   :  { %10357 = vmatpush3.bf16.msra.mxu0 %v10354_v41 }
 0x889   :  { %v8732_v49 = vpop.f32.mrb[32].mxu0 }
 0x88a   :  { %v2152_v53 = vadd.f32 %v8732_v49, %v6718_v47  ;;  %v2146_v48 = vpop.f32.mrb[33].mxu0 }
 0x88b   :  { %v2147_v54 = vadd.f32 %v6718_v47, %v2146_v48 }
 0x88c   :  { %v2166_v55 = vsub.f32 0.0, %v2152_v53 }
 0x88d   :  { %v2165_v52 = vsub.f32 0.0, %v2147_v54  ;;  %v8735_v56 = vpop.f32.mrb[34].mxu0 }
 0x88e   :  { %v2171_v57 = vmul.f32 1.442695, %v2166_v55  ;;  %v2162_v59 = vadd.f32 %v8735_v56, %v6718_v47  ;;  %v2156_v60 = vpop.f32.mrb[35].mxu0  ;;  %v7284_v61 = vpop.f32.mrb[48].mxu1 }
 0x88f   :  { %v2169_v62 = vmul.f32 1.442695, %v2165_v52  ;;  %v2157_v0 = vadd.f32 %v6718_v47, %v2156_v60  ;;  %v7285_v1 = vpop.f32.mrb[49].mxu1 }
 0x890   :  { %11496 = vpow2.f32 %v2171_v57  ;;  %v2168_v4 = vsub.f32 0.0, %v2162_v59  ;;  %v7286_v5 = vadd.f32 %v7285_v1, %v7284_v61  ;;  %v2696_v1 = vld [vmem:[#allocation6 + $0x390] sm:$0xff] }
 0x891   :  { %11498 = vpow2.f32 %v2169_v62  ;;  %v2167_v7 = vsub.f32 0.0, %v2157_v0 }
 0x892   :  { %v2175_v9 = vmul.f32 1.442695, %v2168_v4  ;;  %v7287_v12 = vpop.f32.mrb[50].mxu1  ;;  %v2334_v34 = vadd.f32 %v7286_v5, %v6719_v32  ;;  %v2697_v4 = vld [vmem:[#allocation6 + $0x398] sm:$0xff] }
 0x893   :  { %v2173_v10 = vmul.f32 1.442695, %v2167_v7  ;;  %v7288_v13 = vpop.f32.mrb[51].mxu1 }
 0x894   :  { %11500 = vpow2.f32 %v2175_v9  ;;  %v7289_v29 = vadd.f32 %v7288_v13, %v7287_v12 }
 0x895   :  { %11502 = vpow2.f32 %v2173_v10 }
 0x896   :  { %v7290_v14 = vpop.f32.mrb[52].mxu1  ;;  %v2339_v8 = vadd.f32 %v7289_v29, %v6719_v32  ;;  %v10362_v29 = vpack.c.bf16 %v2697_v4, %v2696_v1 }
 0x897   :  { %v7291_v63 = vpop.f32.mrb[53].mxu1 }
 0x898   :  { %v7292_v17 = vadd.f32 %v7291_v63, %v7290_v14 }
 0x89a   :  { %v11497_v19 = vpop.eup %11496  ;;  %v7293_v20 = vpop.f32.mrb[54].mxu1  ;;  %v2344_v47 = vadd.f32 %v7292_v17, %v6719_v32 }
 0x89b   :  { %v11499_v22 = vpop.eup %11498  ;;  %v7294_v2 = vpop.f32.mrb[55].mxu1  ;;  %v2178_v25 = vadd.f32 1.0, %v11497_v19 }
 0x89c   :  { %v7295_v50 = vadd.f32 %v7294_v2, %v7293_v20  ;;  %v2177_v6 = vadd.f32 1.0, %v11499_v22  ;;  %v2698_v20 = vld [vmem:[#allocation6 + $0x3a0] sm:$0xff]  ;;  %v2699_v22 = vld [vmem:[#allocation6 + $0x3a8] sm:$0xff] }
 0x89d   :  { %11504 = vrcp.f32 %v2178_v25  ;;  %v10366_v2 = vpack.c.bf16 %v2699_v22, %v2698_v20  ;;  %v2701_v25 = vld [vmem:[#allocation6 + $0x3b8] sm:$0xff] }
 0x89e   :  { %v11501_v27 = vpop.eup %11500  ;;  %11506 = vrcp.f32 %v2177_v6  ;;  %v2349_v41 = vadd.f32 %v7295_v50, %v6719_v32  ;;  %v2700_v50 = vld [vmem:[#allocation6 + $0x3b0] sm:$0xff]  ;;  %v2702_v6 = vld [vmem:[#allocation6 + $0x3c0] sm:$0xff] }
 0x89f   :  { %v11503_v3 = vpop.eup %11502  ;;  %v2180_v28 = vadd.f32 1.0, %v11501_v27  ;;  %v10370_v27 = vpack.c.bf16 %v2701_v25, %v2700_v50 }
 0x8a0   :  { %v2179_v31 = vadd.f32 1.0, %v11503_v3  ;;  %v2703_v3 = vld [vmem:[#allocation6 + $0x3c8] sm:$0xff] }
 0x8a1   :  { %11508 = vrcp.f32 %v2180_v28  ;;  %v2704_v28 = vld [vmem:[#allocation6 + $0x3d0] sm:$0xff] }
 0x8a2   :  { %11510 = vrcp.f32 %v2179_v31  ;;  %v2705_v31 = vld [vmem:[#allocation6 + $0x3d8] sm:$0xff] }
 0x8a3   :  { %v10378_v32 = vpack.c.bf16 %v2705_v31, %v2704_v28 }
 0x8a7   :  { %v11505_v11 = vpop.eup %11504 }
 0x8a8   :  { %v11507_v39 = vpop.eup %11506 }
 0x8a9   :  { %v8770_v33 = vpop.f32.mrb[36].mxu0 }
 0x8aa   :  { %v2424_v36 = vadd.f32 %v8770_v33, %v2339_v8  ;;  %v2418_v37 = vpop.f32.mrb[37].mxu0  ;;  %v2706_v8 = vld [vmem:[#allocation6 + $0x3e0] sm:$0xff]  ;;  %v2707_v33 = vld [vmem:[#allocation6 + $0x3e8] sm:$0xff] }
 0x8ab   :  { %v2419_v38 = vadd.f32 %v2418_v37, %v2334_v34  ;;  %v11509_v55 = vpop.eup %11508  ;;  %v10382_v34 = vpack.c.bf16 %v2707_v33, %v2706_v8  ;;  %v2709_v37 = vld [vmem:[#allocation6 + $0x3f8] sm:$0xff] }
 0x8ac   :  { %v2438_v40 = vmul.f32 %v11505_v11, %v2424_v36  ;;  %v11511_v59 = vpop.eup %11510  ;;  %v2708_v36 = vld [vmem:[#allocation6 + $0x3f0] sm:$0xff] }
 0x8ad   :  { %v2437_v42 = vmul.f32 %v11507_v39, %v2419_v38  ;;  %v8773_v43 = vpop.f32.mrb[38].mxu0  ;;  %v10386_v11 = vpack.c.bf16 %v2709_v37, %v2708_v36  ;;  %v2805_v38 = vld [vmem:[#allocation6 + $0x400] sm:$0xff]  ;;  %v2806_v39 = vld [vmem:[#allocation6 + $0x408] sm:$0xff] }
 0x8ae   :  { %v2434_v49 = vadd.f32 %v8773_v43, %v2349_v41  ;;  %v2428_v53 = vpop.f32.mrb[39].mxu0  ;;  %v2454_v48 = vrot.slane %v2438_v40, 1  ;;  %v2442_v54 = vrot.slane %v2438_v40, 7  ;;  %v10390_v41 = vpack.c.bf16 %v2806_v39, %v2805_v38 }
 0x8af   :  { %v2441_v52 = vrot.slane %v2437_v42, 7  ;;  %v2429_v56 = vadd.f32 %v2428_v53, %v2344_v47  ;;  %2583 = vmatprep.mubr.f32.mxu1 %v2437_v42  ;;  %v2453_v57 = vrot.slane %v2437_v42, 1  ;;  %v2808_v42 = vld [vmem:[#allocation6 + $0x418] sm:$0xff]  ;;  %v2809_v47 = vld [vmem:[#allocation6 + $0x420] sm:$0xff] }
 0x8b0   :  { %v2440_v60 = vmul.f32 %v11509_v55, %v2434_v49  ;;  %v2810_v49 = vld [vmem:[#allocation6 + $0x428] sm:$0xff]  ;;  %10391 = vmatprep.subr.bf16.mxu0 %v10390_v41 }
 0x8b1   :  { %v2439_v61 = vmul.f32 %v11511_v59, %v2429_v56  ;;  %v2459_v62 = vsel %vm157_vm0, %v2453_v57, %v2454_v48  ;;  %v2447_v0 = vsel %vm144_vm1, %v2441_v52, %v2442_v54  ;;  %v10398_v53 = vpack.c.bf16 %v2810_v49, %v2809_v47  ;;  %v2814_v56 = vld [vmem:[#allocation6 + $0x448] sm:$0xff]  ;;  %v2815_v59 = vld [vmem:[#allocation6 + $0x450] sm:$0xff] }
 0x8b2   :  { %v2444_v5 = vrot.slane %v2440_v60, 7  ;;  %8806 = vmatprep.mubr.f32.mxu0 %v2459_v62  ;;  %v2456_v7 = vrot.slane %v2440_v60, 1  ;;  %v2817_v62 = vld [vmem:[#allocation6 + $0x460] sm:$0xff]  ;;  %v2936_v47 = vld [vmem:[#allocation2 + $0xa80] sm:$0xff] }
 0x8b3   :  { %v2443_v9 = vrot.slane %v2439_v61, 7  ;;  %v2455_v12 = vrot.slane %v2439_v61, 1 }
 0x8b4   :  { %v2448_v10 = vsel %vm144_vm1, %v2444_v5, %v2441_v52  ;;  %v2460_v13 = vsel %vm157_vm0, %v2456_v7, %v2453_v57  ;;  %v2813_v52 = vld [vmem:[#allocation6 + $0x440] sm:$0xff] }
 0x8b5   :  { %6725 = vmatmul.mubr.msk.f32.vlgmr.msra.gmra.mrb[56].mxu1 %vm11801_vm2, %v2448_v10  ;;  %v2458_v14 = vsel %vm157_vm0, %v2454_v48, %v2455_v12  ;;  %v2457_v63 = vsel %vm157_vm0, %v2455_v12, %v2456_v7  ;;  %v2446_v17 = vsel %vm144_vm1, %v2442_v54, %v2443_v9  ;;  %v2445_v19 = vsel %vm144_vm1, %v2443_v9, %v2444_v5  ;;  %v2811_v48 = vld [vmem:[#allocation6 + $0x430] sm:$0xff]  ;;  %v2812_v54 = vld [vmem:[#allocation6 + $0x438] sm:$0xff]  ;;  %v6712_v5 = vld [vmem:[#allocation4 + $0x4] ss:$0 sm:$0xff] }
 0x8b6   :  { %2588 = vmatprep.mubr.f32.mxu1 %v2438_v40  ;;  %8807 = vmatmul.mubr.msk.f32.vlgmr.msra.gmra.mrb[28].mxu0 %vm11809_vm3, %v2458_v14  ;;  %v2807_v40 = vld [vmem:[#allocation6 + $0x410] sm:$0xff]  ;;  %v10402_v55 = vpack.c.bf16 %v2812_v54, %v2811_v48  ;;  %v10406_v57 = vpack.c.bf16 %v2814_v56, %v2813_v52  ;;  %v6724_v7 = vld [vmem:[#allocation4 + $0x6] ss:$0 sm:$0xff]  ;;  %v1853_v50 = vadd.f32 %v12001_v21, %v6712_v5  ;;  %v2954_v52 = vld [vmem:[#allocation2 + $0xb10] sm:$0xff] }
 0x8b7   :  { %8809 = vmatprep.mubr.f32.mxu0 %v2457_v63  ;;  %10361 = vmatpush3.bf16.msra.mxu1 %v12031_v44  ;;  %v10374_v44 = vpack.c.bf16 %v2703_v3, %v2702_v6  ;;  %v10394_v43 = vpack.c.bf16 %v2808_v42, %v2807_v40  ;;  %v1858_v31 = vadd.f32 %v12003_v23, %v6712_v5  ;;  %v2819_v40 = vld [vmem:[#allocation6 + $0x470] sm:$0xff]  ;;  %v2952_v23 = vld [vmem:[#allocation2 + $0xb00] sm:$0xff]  ;;  %v2955_v56 = vld [vmem:[#allocation2 + $0xb18] sm:$0xff] }
 0x8b8   :  { %10363 = vmatprep.subr.bf16.mxu1 %v10362_v29  ;;  %10393 = vmatpush3.bf16.msra.mxu0 %v10390_v41  ;;  %v1863_v37 = vadd.f32 %v12005_v26, %v6712_v5  ;;  %v2820_v41 = vld [vmem:[#allocation6 + $0x478] sm:$0xff]  ;;  %v2968_v48 = vld [vmem:[#allocation2 + $0xb80] sm:$0xff]  ;;  %v2969_v54 = vld [vmem:[#allocation2 + $0xb88] sm:$0xff] }
 0x8b9   :  { %2589 = vmatmul.mubr.f32.gmra.mrb[58].mxu1 %v2447_v0  ;;  %10395 = vmatprep.subr.bf16.mxu0 %v10394_v43  ;;  %v2818_v0 = vld [vmem:[#allocation6 + $0x468] sm:$0xff]  ;;  %v10418_v42 = vpack.c.bf16 %v2820_v41, %v2819_v40  ;;  %v10454_v26 = vpack.c.bf16 %v2969_v54, %v2968_v48  ;;  %v2978_v48 = vld [vmem:[#allocation2 + $0xbd0] sm:$0xff]  ;;  %v2979_v54 = vld [vmem:[#allocation2 + $0xbd8] sm:$0xff] }
 0x8ba   :  { %2593 = vmatprep.mubr.f32.mxu1 %v2439_v61  ;;  %8810 = vmatmul.mubr.msk.f32.gmra.mrb[30].mxu0 %vm11826_vm4, %v2460_v13  ;;  %v10414_v1 = vpack.c.bf16 %v2818_v0, %v2817_v62  ;;  %v2956_v62 = vld [vmem:[#allocation2 + $0xb20] sm:$0xff]  ;;  %v2957_v0 = vld [vmem:[#allocation2 + $0xb28] sm:$0xff] }
 0x8bb   :  { %10365 = vmatpush3.bf16.msra.mxu1 %v10362_v29  ;;  %v1848_v29 = vadd.f32 %v11999_v18, %v6712_v5  ;;  %v2941_v5 = vld [vmem:[#allocation2 + $0xaa8] sm:$0xff]  ;;  %v2976_v41 = vld [vmem:[#allocation2 + $0xbc0] sm:$0xff] }
 0x8bc   :  { %10367 = vmatprep.subr.bf16.mxu1 %v10366_v2  ;;  %10397 = vmatpush3.bf16.msra.mxu0 %v10394_v43  ;;  %v2953_v43 = vld [vmem:[#allocation2 + $0xb08] sm:$0xff] }
 0x8bd   :  { %6726 = vmatmul.mubr.msk.f32.gmra.mrb[60].mxu1 %vm11834_vm5, %v2446_v17  ;;  %10399 = vmatprep.subr.bf16.mxu0 %v10398_v53  ;;  %v10422_v49 = vpack.c.bf16 %v2953_v43, %v2952_v23  ;;  %v2963_v43 = vld [vmem:[#allocation2 + $0xb58] sm:$0xff] }
 0x8be   :  { %2598 = vmatprep.mubr.f32.mxu1 %v2440_v60  ;;  %v2816_v60 = vld [vmem:[#allocation6 + $0x458] sm:$0xff] }
 0x8bf   :  { %10369 = vmatpush3.bf16.msra.mxu1 %v10366_v2  ;;  %v10410_v61 = vpack.c.bf16 %v2816_v60, %v2815_v59  ;;  %v10426_v59 = vpack.c.bf16 %v2955_v56, %v2954_v52  ;;  %v2939_v60 = vld [vmem:[#allocation2 + $0xa98] sm:$0xff]  ;;  %v2965_v52 = vld [vmem:[#allocation2 + $0xb68] sm:$0xff] }
 0x8c0   :  { %10371 = vmatprep.subr.bf16.mxu1 %v10370_v27  ;;  %10401 = vmatpush3.bf16.msra.mxu0 %v10398_v53  ;;  %v2937_v53 = vld [vmem:[#allocation2 + $0xa88] sm:$0xff] }
 0x8c1   :  { %2599 = vmatmul.mubr.f32.gmra.mrb[62].mxu1 %v2445_v19  ;;  %10403 = vmatprep.subr.bf16.mxu0 %v10402_v55 }
 0x8c3   :  { %10373 = vmatpush3.bf16.msra.mxu1 %v10370_v27 }
 0x8c4   :  { %10375 = vmatprep.subr.bf16.mxu1 %v10374_v44  ;;  %10405 = vmatpush3.bf16.msra.mxu0 %v10402_v55  ;;  %v10424_v55 = vpack.c.bf16 %v2937_v53, %v2936_v47 }
 0x8c5   :  { %10407 = vmatprep.subr.bf16.mxu0 %v10406_v57 }
 0x8c7   :  { %10377 = vmatpush3.bf16.msra.mxu1 %v10374_v44 }
 0x8c8   :  { %10379 = vmatprep.subr.bf16.mxu1 %v10378_v32  ;;  %10409 = vmatpush3.bf16.msra.mxu0 %v10406_v57  ;;  %v2938_v57 = vld [vmem:[#allocation2 + $0xa90] sm:$0xff] }
 0x8c9   :  { %10411 = vmatprep.subr.bf16.mxu0 %v10410_v61 }
 0x8cb   :  { %10381 = vmatpush3.bf16.msra.mxu1 %v10378_v32 }
 0x8cc   :  { %10383 = vmatprep.subr.bf16.mxu1 %v10382_v34  ;;  %10413 = vmatpush3.bf16.msra.mxu0 %v10410_v61  ;;  %v10428_v61 = vpack.c.bf16 %v2939_v60, %v2938_v57  ;;  %v2948_v57 = vld [vmem:[#allocation2 + $0xae0] sm:$0xff] }
 0x8cd   :  { %10415 = vmatprep.subr.bf16.mxu0 %v10414_v1 }
 0x8cf   :  { %10385 = vmatpush3.bf16.msra.mxu1 %v10382_v34 }
 0x8d0   :  { %10387 = vmatprep.subr.bf16.mxu1 %v10386_v11  ;;  %10417 = vmatpush3.bf16.msra.mxu0 %v10414_v1  ;;  %v10430_v1 = vpack.c.bf16 %v2957_v0, %v2956_v62  ;;  %v2981_v62 = vld [vmem:[#allocation2 + $0xbe8] sm:$0xff] }
 0x8d1   :  { %10419 = vmatprep.subr.bf16.mxu0 %v10418_v42 }
 0x8d3   :  { %10389 = vmatpush3.bf16.msra.mxu1 %v10386_v11 }
 0x8d4   :  { %10421 = vmatpush3.bf16.msra.mxu0 %v10418_v42  ;;  %10423 = vmatprep.subr.bf16.mxu1 %v10422_v49  ;;  %v2977_v42 = vld [vmem:[#allocation2 + $0xbc8] sm:$0xff]  ;;  %v2946_v49 = vld [vmem:[#allocation2 + $0xad0] sm:$0xff] }
 0x8d5   :  { %10455 = vmatprep.subr.bf16.mxu0 %v10454_v26  ;;  %v10470_v23 = vpack.c.bf16 %v2977_v42, %v2976_v41 }
 0x988   :  { %v7348_v4 = vpop.f32.mrb[56].mxu1 }
 0x989   :  { %v7349_v9 = vpop.f32.mrb[57].mxu1  ;;  %v8808_v12 = vpop.f32.mrb[28].mxu0 }
 0x98a   :  { %v7350_v10 = vadd.f32 %v7349_v9, %v7348_v4  ;;  %v2670_v13 = vpop.f32.mrb[29].mxu0  ;;  %v2940_v4 = vld [vmem:[#allocation2 + $0xaa0] sm:$0xff]  ;;  %v2959_v9 = vld [vmem:[#allocation2 + $0xb38] sm:$0xff] }
 0x98c   :  { %v2586_v14 = vadd.f32 %v7350_v10, %v6724_v7  ;;  %v7351_v63 = vpop.f32.mrb[58].mxu1 }
 0x98d   :  { %v7352_v17 = vpop.f32.mrb[59].mxu1  ;;  %v8811_v19 = vpop.f32.mrb[30].mxu0 }
 0x98e   :  { %v11424_v20 = vadd.f32 %v2586_v14, %v1848_v29  ;;  %v7353_v22 = vadd.f32 %v7352_v17, %v7351_v63  ;;  %v2680_v2 = vpop.f32.mrb[31].mxu0  ;;  %v2943_v29 = vld [vmem:[#allocation2 + $0xab8] sm:$0xff]  ;;  %v2960_v14 = vld [vmem:[#allocation2 + $0xb40] sm:$0xff]  ;;  %v2961_v63 = vld [vmem:[#allocation2 + $0xb48] sm:$0xff] }
 0x990   :  { %v11425_v25 = vadd.f32 %v11424_v20, %v2670_v13  ;;  %v2591_v27 = vadd.f32 %v7353_v22, %v6724_v7  ;;  %v7354_v6 = vpop.f32.mrb[60].mxu1  ;;  %v2942_v13 = vld [vmem:[#allocation2 + $0xab0] sm:$0xff]  ;;  %v2944_v20 = vld [vmem:[#allocation2 + $0xac0] sm:$0xff]  ;;  %v2945_v22 = vld [vmem:[#allocation2 + $0xac8] sm:$0xff] }
 0x991   :  { %v7355_v3 = vpop.f32.mrb[61].mxu1  ;;  %v10436_v17 = vpack.c.bf16 %v2943_v29, %v2942_v13  ;;  %v2983_v13 = vld [vmem:[#allocation2 + $0xbf8] sm:$0xff] }
 0x992   :  { %v11422_v44 = vadd.f32 %v2591_v27, %v1853_v50  ;;  %v7356_v28 = vadd.f32 %v7355_v3, %v7354_v6  ;;  %8844 = vmatprep.mubr.f32.mxu1 %v11425_v25  ;;  %v6729_v50 = vld [vmem:[#allocation7 + $0x7] ss:$0 sm:$0xff] }
 0x994   :  { %v11423_v32 = vadd.f32 %v11422_v44, %v8808_v12  ;;  %v2596_v18 = vadd.f32 %v7356_v28, %v6724_v7  ;;  %v7357_v8 = vpop.f32.mrb[62].mxu1  ;;  %v10432_v12 = vpack.c.bf16 %v2941_v5, %v2940_v4  ;;  %v2970_v44 = vld [vmem:[#allocation2 + $0xb90] sm:$0xff]  ;;  %v2971_v28 = vld [vmem:[#allocation2 + $0xb98] sm:$0xff] }
 0x995   :  { %v7358_v33 = vpop.f32.mrb[63].mxu1  ;;  %v2967_v4 = vld [vmem:[#allocation2 + $0xb78] sm:$0xff] }
 0x996   :  { %v11428_v34 = vadd.f32 %v2596_v18, %v1858_v31  ;;  %v7359_v36 = vadd.f32 %v7358_v33, %v7357_v8  ;;  %8845 = vmatmul.mubr.f32.vlgmr.msra.gmra.mrb[64].mxu1 %v11423_v32  ;;  %v10458_v18 = vpack.c.bf16 %v2971_v28, %v2970_v44  ;;  %v2972_v8 = vld [vmem:[#allocation2 + $0xba0] sm:$0xff]  ;;  %v2973_v33 = vld [vmem:[#allocation2 + $0xba8] sm:$0xff] }
 0x997   :  { %10425 = vmatpush3.bf16.msra.mxu1 %v10424_v55  ;;  %v10474_v55 = vpack.c.bf16 %v2979_v54, %v2978_v48  ;;  %v3166_v48 = vld [vmem:[#allocation6 + $0x4b0] sm:$0xff]  ;;  %v3167_v54 = vld [vmem:[#allocation6 + $0x4b8] sm:$0xff] }
 0x998   :  { %v2601_v11 = vadd.f32 %v7359_v36, %v6724_v7  ;;  %v11429_v21 = vadd.f32 %v11428_v34, %v2680_v2  ;;  %10427 = vmatprep.subr.bf16.mxu1 %v10426_v59  ;;  %v2958_v7 = vld [vmem:[#allocation2 + $0xb30] sm:$0xff]  ;;  %v10440_v2 = vpack.c.bf16 %v2945_v22, %v2944_v20  ;;  %v2949_v59 = vld [vmem:[#allocation2 + $0xae8] sm:$0xff] }
 0x999   :  { %v10434_v10 = vpack.c.bf16 %v2959_v9, %v2958_v7  ;;  %v10448_v60 = vpack.c.bf16 %v2949_v59, %v2948_v57  ;;  %v2950_v7 = vld [vmem:[#allocation2 + $0xaf0] sm:$0xff]  ;;  %v2951_v9 = vld [vmem:[#allocation2 + $0xaf8] sm:$0xff]  ;;  %v3170_v57 = vld [vmem:[#allocation6 + $0x4d0] sm:$0xff] }
 0x99a   :  { %v11426_v38 = vadd.f32 %v2601_v11, %v1863_v37  ;;  %8847 = vmatprep.mubr.f32.mxu1 %v11429_v21  ;;  %v10462_v11 = vpack.c.bf16 %v2973_v33, %v2972_v8  ;;  %v3171_v59 = vld [vmem:[#allocation6 + $0x4d8] sm:$0xff] }
 0x99b   :  { %10429 = vmatpush3.bf16.msra.mxu1 %v10428_v61  ;;  %v2980_v61 = vld [vmem:[#allocation2 + $0xbe0] sm:$0xff] }
 0x99c   :  { %v11427_v39 = vadd.f32 %v11426_v38, %v8811_v19  ;;  %10431 = vmatprep.subr.bf16.mxu1 %v10430_v1  ;;  %v10438_v19 = vpack.c.bf16 %v2961_v63, %v2960_v14  ;;  %v2974_v38 = vld [vmem:[#allocation2 + $0xbb0] sm:$0xff]  ;;  %v10478_v0 = vpack.c.bf16 %v2981_v62, %v2980_v61  ;;  %v3160_v14 = vld [vmem:[#allocation6 + $0x480] sm:$0xff]  ;;  %v3161_v63 = vld [vmem:[#allocation6 + $0x488] sm:$0xff] }
 0x99d   :  { %v2966_v1 = vld [vmem:[#allocation2 + $0xb70] sm:$0xff]  ;;  %v3172_v61 = vld [vmem:[#allocation6 + $0x4e0] sm:$0xff]  ;;  %v3173_v62 = vld [vmem:[#allocation6 + $0x4e8] sm:$0xff] }
 0x99e   :  { %8848 = vmatmul.mubr.f32.gmra.mrb[66].mxu1 %v11427_v39  ;;  %v10450_v5 = vpack.c.bf16 %v2967_v4, %v2966_v1  ;;  %v3174_v1 = vld [vmem:[#allocation6 + $0x4f0] sm:$0xff]  ;;  %v3175_v4 = vld [vmem:[#allocation6 + $0x4f8] sm:$0xff] }
 0x99f   :  { %10433 = vmatpush3.bf16.msra.mxu1 %v10432_v12  ;;  %v10452_v12 = vpack.c.bf16 %v2951_v9, %v2950_v7  ;;  %v3267_v7 = vld [vmem:[#allocation6 + $0x500] sm:$0xff]  ;;  %v3268_v9 = vld [vmem:[#allocation6 + $0x508] sm:$0xff] }
 0x9a0   :  { %10435 = vmatprep.subr.bf16.mxu1 %v10434_v10  ;;  %v2982_v10 = vld [vmem:[#allocation2 + $0xbf0] sm:$0xff] }
 0x9a1   :  { %v10482_v29 = vpack.c.bf16 %v2983_v13, %v2982_v10  ;;  %v3269_v10 = vld [vmem:[#allocation6 + $0x510] sm:$0xff]  ;;  %v3270_v13 = vld [vmem:[#allocation6 + $0x518] sm:$0xff] }
 0x9a3   :  { %10437 = vmatpush3.bf16.msra.mxu1 %v10436_v17  ;;  %v10486_v17 = vpack.c.bf16 %v3161_v63, %v3160_v14  ;;  %v3438_v14 = vld [vmem:[#allocation2 + $0xc80] sm:$0xff]  ;;  %v3439_v63 = vld [vmem:[#allocation2 + $0xc88] sm:$0xff] }
 0x9a4   :  { %10439 = vmatprep.subr.bf16.mxu1 %v10438_v19  ;;  %v6730_v19 = vld [vmem:[#allocation7 + $0x8] ss:$0 sm:$0xff] }
 0x9a7   :  { %10441 = vmatpush3.bf16.msra.mxu1 %v10440_v2 }
 0xa69   :  { %v8846_v25 = vpop.f32.mrb[64].mxu1 }
 0xa6a   :  { %v2787_v27 = vadd.f32 %v8846_v25, %v6729_v50  ;;  %v2781_v6 = vpop.f32.mrb[65].mxu1 }
 0xa6b   :  { %v2782_v3 = vadd.f32 %v6729_v50, %v2781_v6 }
 0xa6c   :  { %v12067_v32 = vadd.f32 %v2787_v27, %v11959_v16 }
 0xa6d   :  { %v12064_v31 = vadd.f32 %v2782_v3, %v11956_v15  ;;  %v2975_v15 = vld [vmem:[#allocation2 + $0xbb8] sm:$0xff] }
 0xa6e   :  { %v10466_v40 = vpack.c.bf16 %v2975_v15, %v2974_v38 }
 0xa6f   :  { %8882 = vmatprep.mubr.f32.mxu0 %v12064_v31 }
 0xa70   :  { %8883 = vmatmul.mubr.f32.vlgmr.msra.gmra.mrb[40].mxu0 %v12067_v32 }
 0xa71   :  { %v8849_v34 = vpop.f32.mrb[66].mxu1  ;;  %10457 = vmatpush3.bf16.msra.mxu0 %v10454_v26  ;;  %v2964_v26 = vld [vmem:[#allocation2 + $0xb60] sm:$0xff] }
 0xa72   :  { %v2797_v36 = vadd.f32 %v8849_v34, %v6729_v50  ;;  %v2791_v37 = vpop.f32.mrb[67].mxu1  ;;  %10459 = vmatprep.subr.bf16.mxu0 %v10458_v18  ;;  %v10446_v56 = vpack.c.bf16 %v2965_v52, %v2964_v26  ;;  %v3162_v34 = vld [vmem:[#allocation6 + $0x490] sm:$0xff]  ;;  %v3168_v26 = vld [vmem:[#allocation6 + $0x4c0] sm:$0xff]  ;;  %v3169_v52 = vld [vmem:[#allocation6 + $0x4c8] sm:$0xff] }
 0xa73   :  { %v2792_v21 = vadd.f32 %v6729_v50, %v2791_v37 }
 0xa74   :  { %v12075_v16 = vadd.f32 %v2797_v36, %v11967_v58  ;;  %v2947_v58 = vld [vmem:[#allocation2 + $0xad8] sm:$0xff]  ;;  %v3163_v36 = vld [vmem:[#allocation6 + $0x498] sm:$0xff] }
 0xa75   :  { %v12072_v39 = vadd.f32 %v2792_v21, %v11964_v24  ;;  %10461 = vmatpush3.bf16.msra.mxu0 %v10458_v18  ;;  %v2962_v24 = vld [vmem:[#allocation2 + $0xb50] sm:$0xff]  ;;  %v10444_v53 = vpack.c.bf16 %v2947_v58, %v2946_v49 }
 0xa76   :  { %10463 = vmatprep.subr.bf16.mxu0 %v10462_v11  ;;  %v10442_v47 = vpack.c.bf16 %v2963_v43, %v2962_v24  ;;  %v3165_v24 = vld [vmem:[#allocation6 + $0x4a8] sm:$0xff] }
 0xa77   :  { %8885 = vmatprep.mubr.f32.mxu0 %v12072_v39 }
 0xa78   :  { %8886 = vmatmul.mubr.f32.gmra.mrb[42].mxu0 %v12075_v16  ;;  %10443 = vmatprep.subr.bf16.mxu1 %v10442_v47 }
 0xa79   :  { %10465 = vmatpush3.bf16.msra.mxu0 %v10462_v11  ;;  %10445 = vmatpush3.bf16.msra.mxu1 %v10444_v53 }
 0xa7a   :  { %10467 = vmatprep.subr.bf16.mxu0 %v10466_v40  ;;  %10447 = vmatprep.subr.bf16.mxu1 %v10446_v56  ;;  %v10502_v56 = vpack.c.bf16 %v3169_v52, %v3168_v26 }
 0xa7d   :  { %10469 = vmatpush3.bf16.msra.mxu0 %v10466_v40  ;;  %10449 = vmatpush3.bf16.msra.mxu1 %v10448_v60  ;;  %v10490_v40 = vpack.c.bf16 %v3163_v36, %v3162_v34  ;;  %v10506_v60 = vpack.c.bf16 %v3171_v59, %v3170_v57  ;;  %v3442_v36 = vld [vmem:[#allocation2 + $0xca0] sm:$0xff]  ;;  %v3431_v57 = vld [vmem:[#allocation2 + $0xc48] sm:$0xff]  ;;  %v3279_v59 = vld [vmem:[#allocation6 + $0x560] sm:$0xff] }
 0xa7e   :  { %10471 = vmatprep.subr.bf16.mxu0 %v10470_v23  ;;  %10451 = vmatprep.subr.bf16.mxu1 %v10450_v5  ;;  %v10514_v5 = vpack.c.bf16 %v3175_v4, %v3174_v1 }
 0xa81   :  { %10473 = vmatpush3.bf16.msra.mxu0 %v10470_v23  ;;  %10453 = vmatpush3.bf16.msra.mxu1 %v10452_v12  ;;  %v3164_v23 = vld [vmem:[#allocation6 + $0x4a0] sm:$0xff]  ;;  %v10518_v12 = vpack.c.bf16 %v3268_v9, %v3267_v7 }
 0xa82   :  { %10475 = vmatprep.subr.bf16.mxu0 %v10474_v55  ;;  %10487 = vmatprep.subr.bf16.mxu1 %v10486_v17  ;;  %v10494_v53 = vpack.c.bf16 %v3165_v24, %v3164_v23  ;;  %v3445_v23 = vld [vmem:[#allocation2 + $0xcb8] sm:$0xff] }
 0xa83   :  { %v3433_v7 = vld [vmem:[#allocation2 + $0xc58] sm:$0xff] }
 0xa85   :  { %10477 = vmatpush3.bf16.msra.mxu0 %v10474_v55  ;;  %v10498_v55 = vpack.c.bf16 %v3167_v54, %v3166_v48  ;;  %v3278_v48 = vld [vmem:[#allocation6 + $0x558] sm:$0xff]  ;;  %v3446_v54 = vld [vmem:[#allocation2 + $0xcc0] sm:$0xff] }
 0xa86   :  { %10479 = vmatprep.subr.bf16.mxu0 %v10478_v0 }
 0xa89   :  { %10481 = vmatpush3.bf16.msra.mxu0 %v10478_v0  ;;  %v10510_v0 = vpack.c.bf16 %v3173_v62, %v3172_v61  ;;  %v3448_v61 = vld [vmem:[#allocation2 + $0xcd0] sm:$0xff]  ;;  %v3449_v62 = vld [vmem:[#allocation2 + $0xcd8] sm:$0xff] }
 0xa8a   :  { %10483 = vmatprep.subr.bf16.mxu0 %v10482_v29  ;;  %v10570_v4 = vpack.c.bf16 %v3449_v62, %v3448_v61 }
 0xa8d   :  { %10485 = vmatpush3.bf16.msra.mxu0 %v10482_v29  ;;  %v10522_v29 = vpack.c.bf16 %v3270_v13, %v3269_v10  ;;  %v3282_v10 = vld [vmem:[#allocation6 + $0x578] sm:$0xff] }
 0xa8e   :  { %10519 = vmatprep.subr.bf16.mxu0 %v10518_v12 }
 0xb43   :  { %v8884_v20 = vpop.f32.mrb[40].mxu0 }
 0xb44   :  { %v2898_v22 = vadd.f32 %v8884_v20, %v6730_v19  ;;  %v2892_v2 = vpop.f32.mrb[41].mxu0  ;;  %v3423_v20 = vld [vmem:[#allocation2 + $0xc08] sm:$0xff] }
 0xb45   :  { %v2893_v50 = vadd.f32 %v6730_v19, %v2892_v2  ;;  %v3271_v2 = vld [vmem:[#allocation6 + $0x520] sm:$0xff] }
 0xb46   :  { %v2912_v25 = vrot.slane %v2898_v22, 7  ;;  %v2924_v27 = vrot.slane %v2898_v22, 1 }
 0xb47   :  { %v2911_v6 = vrot.slane %v2893_v50, 7  ;;  %v2923_v3 = vrot.slane %v2893_v50, 1  ;;  %3053 = vmatprep.mubr.f32.mxu1 %v2893_v50  ;;  %v3272_v50 = vld [vmem:[#allocation6 + $0x528] sm:$0xff] }
 0xb49   :  { %v2929_v44 = vsel %vm157_vm0, %v2923_v3, %v2924_v27  ;;  %v2917_v28 = vsel %vm144_vm1, %v2911_v6, %v2912_v25 }
 0xb4a   :  { %8920 = vmatprep.mubr.f32.mxu0 %v2929_v44  ;;  %v3424_v44 = vld [vmem:[#allocation2 + $0xc10] sm:$0xff] }
 0xb4b   :  { %v8887_v18 = vpop.f32.mrb[42].mxu0 }
 0xb4c   :  { %v2908_v8 = vadd.f32 %v8887_v18, %v6730_v19  ;;  %v2902_v33 = vpop.f32.mrb[43].mxu0 }
 0xb4d   :  { %v2903_v37 = vadd.f32 %v6730_v19, %v2902_v33  ;;  %v3422_v19 = vld [vmem:[#allocation2 + $0xc00] sm:$0xff]  ;;  %v3274_v33 = vld [vmem:[#allocation6 + $0x538] sm:$0xff] }
 0xb4e   :  { %v2914_v11 = vrot.slane %v2908_v8, 7  ;;  %v2926_v21 = vrot.slane %v2908_v8, 1 }
 0xb4f   :  { %v2913_v38 = vrot.slane %v2903_v37, 7  ;;  %v2925_v15 = vrot.slane %v2903_v37, 1 }
 0xb50   :  { %v2918_v41 = vsel %vm144_vm1, %v2914_v11, %v2911_v6  ;;  %v2930_v42 = vsel %vm157_vm0, %v2926_v21, %v2923_v3  ;;  %v3441_v6 = vld [vmem:[#allocation2 + $0xc98] sm:$0xff] }
 0xb51   :  { %6732 = vmatmul.mubr.msk.f32.vlgmr.msra.gmra.mrb[68].mxu1 %vm11801_vm2, %v2918_v41  ;;  %v2928_v43 = vsel %vm157_vm0, %v2924_v27, %v2925_v15  ;;  %v2927_v47 = vsel %vm157_vm0, %v2925_v15, %v2926_v21  ;;  %v2916_v49 = vsel %vm144_vm1, %v2912_v25, %v2913_v38  ;;  %v2915_v58 = vsel %vm144_vm1, %v2913_v38, %v2914_v11  ;;  %v3440_v27 = vld [vmem:[#allocation2 + $0xc90] sm:$0xff]  ;;  %v3426_v21 = vld [vmem:[#allocation2 + $0xc20] sm:$0xff]  ;;  %v3427_v38 = vld [vmem:[#allocation2 + $0xc28] sm:$0xff] }
 0xb52   :  { %10489 = vmatpush3.bf16.msra.mxu1 %v10486_v17  ;;  %3058 = vmatprep.mubr.f32.mxu1 %v2898_v22  ;;  %v10550_v17 = vpack.c.bf16 %v3439_v63, %v3438_v14  ;;  %v10552_v22 = vpack.c.bf16 %v3423_v20, %v3422_v19  ;;  %v10526_v25 = vpack.c.bf16 %v3272_v50, %v3271_v2  ;;  %v3275_v15 = vld [vmem:[#allocation6 + $0x540] sm:$0xff]  ;;  %v3276_v41 = vld [vmem:[#allocation6 + $0x548] sm:$0xff]  ;;  %v3451_v14 = vld [vmem:[#allocation2 + $0xce8] sm:$0xff] }
 0xb53   :  { %8921 = vmatmul.mubr.msk.f32.vlgmr.msra.gmra.mrb[44].mxu0 %vm11809_vm3, %v2928_v43  ;;  %10491 = vmatprep.subr.bf16.mxu1 %v10490_v40  ;;  %v10554_v3 = vpack.c.bf16 %v3441_v6, %v3440_v27  ;;  %v10534_v24 = vpack.c.bf16 %v3276_v41, %v3275_v15  ;;  %v3435_v19 = vld [vmem:[#allocation2 + $0xc68] sm:$0xff]  ;;  %v3453_v27 = vld [vmem:[#allocation2 + $0xcf8] sm:$0xff] }
 0xb54   :  { %8923 = vmatprep.mubr.f32.mxu0 %v2927_v47  ;;  %10521 = vmatpush3.bf16.msra.mxu0 %v10518_v12  ;;  %v3428_v47 = vld [vmem:[#allocation2 + $0xc30] sm:$0xff]  ;;  %v3281_v12 = vld [vmem:[#allocation6 + $0x570] sm:$0xff] }
 0xb55   :  { %3059 = vmatmul.mubr.f32.gmra.mrb[70].mxu1 %v2917_v28  ;;  %10523 = vmatprep.subr.bf16.mxu0 %v10522_v29  ;;  %v3425_v28 = vld [vmem:[#allocation2 + $0xc18] sm:$0xff]  ;;  %v10546_v13 = vpack.c.bf16 %v3282_v10, %v3281_v12  ;;  %v3455_v2 = vld [vmem:[#allocation2 + $0xd08] sm:$0xff] }
 0xb56   :  { %10493 = vmatpush3.bf16.msra.mxu1 %v10490_v40  ;;  %3063 = vmatprep.mubr.f32.mxu1 %v2903_v37  ;;  %v10556_v18 = vpack.c.bf16 %v3425_v28, %v3424_v44  ;;  %v3443_v37 = vld [vmem:[#allocation2 + $0xca8] sm:$0xff]  ;;  %v10560_v40 = vpack.c.bf16 %v3427_v38, %v3426_v21  ;;  %v3437_v44 = vld [vmem:[#allocation2 + $0xc78] sm:$0xff] }
 0xb57   :  { %8924 = vmatmul.mubr.msk.f32.gmra.mrb[46].mxu0 %vm11826_vm4, %v2930_v42  ;;  %10495 = vmatprep.subr.bf16.mxu1 %v10494_v53  ;;  %v10558_v11 = vpack.c.bf16 %v3443_v37, %v3442_v36  ;;  %v3444_v42 = vld [vmem:[#allocation2 + $0xcb0] sm:$0xff]  ;;  %v3461_v12 = vld [vmem:[#allocation2 + $0xd38] sm:$0xff] }
 0xb58   :  { %10525 = vmatpush3.bf16.msra.mxu0 %v10522_v29  ;;  %v10562_v43 = vpack.c.bf16 %v3445_v23, %v3444_v42  ;;  %v3450_v29 = vld [vmem:[#allocation2 + $0xce0] sm:$0xff] }
 0xb59   :  { %6733 = vmatmul.mubr.msk.f32.gmra.mrb[72].mxu1 %vm11834_vm5, %v2916_v49  ;;  %10527 = vmatprep.subr.bf16.mxu0 %v10526_v25  ;;  %v3429_v49 = vld [vmem:[#allocation2 + $0xc38] sm:$0xff]  ;;  %v10574_v63 = vpack.c.bf16 %v3451_v14, %v3450_v29  ;;  %v6736_v42 = vld [vmem:[#allocation7 + $0x9] ss:$0 sm:$0xff] }
 0xb5a   :  { %10497 = vmatpush3.bf16.msra.mxu1 %v10494_v53  ;;  %3068 = vmatprep.mubr.f32.mxu1 %v2908_v8  ;;  %v3273_v8 = vld [vmem:[#allocation6 + $0x530] sm:$0xff]  ;;  %v10564_v53 = vpack.c.bf16 %v3429_v49, %v3428_v47 }
 0xb5b   :  { %10499 = vmatprep.subr.bf16.mxu1 %v10498_v55  ;;  %v10530_v34 = vpack.c.bf16 %v3274_v33, %v3273_v8 }
 0xb5c   :  { %10529 = vmatpush3.bf16.msra.mxu0 %v10526_v25  ;;  %v3452_v25 = vld [vmem:[#allocation2 + $0xcf0] sm:$0xff] }
 0xb5d   :  { %3069 = vmatmul.mubr.f32.gmra.mrb[74].mxu1 %v2915_v58  ;;  %10531 = vmatprep.subr.bf16.mxu0 %v10530_v34  ;;  %v3277_v58 = vld [vmem:[#allocation6 + $0x550] sm:$0xff]  ;;  %v10578_v6 = vpack.c.bf16 %v3453_v27, %v3452_v25  ;;  %v3464_v25 = vld [vmem:[#allocation2 + $0xd50] sm:$0xff]  ;;  %v3465_v27 = vld [vmem:[#allocation2 + $0xd58] sm:$0xff] }
 0xb5e   :  { %10501 = vmatpush3.bf16.msra.mxu1 %v10498_v55  ;;  %8958 = vmatprep.mubr.f32.mxu1 %v12064_v31  ;;  %v3447_v55 = vld [vmem:[#allocation2 + $0xcc8] sm:$0xff]  ;;  %v10538_v26 = vpack.c.bf16 %v3278_v48, %v3277_v58 }
 0xb5f   :  { %10503 = vmatprep.subr.bf16.mxu1 %v10502_v56  ;;  %v10566_v52 = vpack.c.bf16 %v3447_v55, %v3446_v54 }
 0xb60   :  { %10533 = vmatpush3.bf16.msra.mxu0 %v10530_v34 }
 0xb61   :  { %10535 = vmatprep.subr.bf16.mxu0 %v10534_v24 }
 0xb62   :  { %10505 = vmatpush3.bf16.msra.mxu1 %v10502_v56  ;;  %v3430_v56 = vld [vmem:[#allocation2 + $0xc40] sm:$0xff] }
 0xb63   :  { %10507 = vmatprep.subr.bf16.mxu1 %v10506_v60  ;;  %v10568_v1 = vpack.c.bf16 %v3431_v57, %v3430_v56 }
 0xb64   :  { %10537 = vmatpush3.bf16.msra.mxu0 %v10534_v24  ;;  %v3456_v24 = vld [vmem:[#allocation2 + $0xd10] sm:$0xff] }
 0xb65   :  { %10539 = vmatprep.subr.bf16.mxu0 %v10538_v26 }
 0xb66   :  { %10509 = vmatpush3.bf16.msra.mxu1 %v10506_v60  ;;  %v3280_v60 = vld [vmem:[#allocation6 + $0x568] sm:$0xff] }
 0xb67   :  { %10511 = vmatprep.subr.bf16.mxu1 %v10510_v0 }
 0xb68   :  { %10541 = vmatpush3.bf16.msra.mxu0 %v10538_v26 }
 0xb6a   :  { %10513 = vmatpush3.bf16.msra.mxu1 %v10510_v0  ;;  %v10542_v0 = vpack.c.bf16 %v3280_v60, %v3279_v59  ;;  %v3458_v59 = vld [vmem:[#allocation2 + $0xd20] sm:$0xff]  ;;  %v3459_v60 = vld [vmem:[#allocation2 + $0xd28] sm:$0xff] }
 0xb6b   :  { %10515 = vmatprep.subr.bf16.mxu1 %v10514_v5 }
 0xb6c   :  { %10543 = vmatprep.subr.bf16.mxu0 %v10542_v0 }
 0xb6d   :  { %10545 = vmatpush3.bf16.msra.mxu0 %v10542_v0 }
 0xb6e   :  { %10517 = vmatpush3.bf16.msra.mxu1 %v10514_v5  ;;  %v3432_v5 = vld [vmem:[#allocation2 + $0xc50] sm:$0xff]  ;;  %10547 = vmatprep.subr.bf16.mxu0 %v10546_v13 }
 0xb6f   :  { %10551 = vmatprep.subr.bf16.mxu1 %v10550_v17  ;;  %v10572_v9 = vpack.c.bf16 %v3433_v7, %v3432_v5  ;;  %v3434_v17 = vld [vmem:[#allocation2 + $0xc60] sm:$0xff]  ;;  %v10590_v7 = vpack.c.bf16 %v3459_v60, %v3458_v59 }
 0xb70   :  { %v10576_v20 = vpack.c.bf16 %v3435_v19, %v3434_v17  ;;  %v3678_v60 = vld [vmem:[#allocation2 + $0xda0] sm:$0xff] }
 0xb71   :  { %8959 = vmatmul.mubr.f32.vlgmr.msra.gmra.mrb[76].mxu1 %v12067_v32  ;;  %10549 = vmatpush3.bf16.msra.mxu0 %v10546_v13 }
 0xb72   :  { %8961 = vmatprep.mubr.f32.mxu1 %v12072_v39  ;;  %10553 = vmatpush3.bf16.msra.mxu1 %v10552_v22  ;;  %v3454_v22 = vld [vmem:[#allocation2 + $0xd00] sm:$0xff] }
 0xb73   :  { %10555 = vmatprep.subr.bf16.mxu1 %v10554_v3  ;;  %v10582_v50 = vpack.c.bf16 %v3455_v2, %v3454_v22  ;;  %v3436_v3 = vld [vmem:[#allocation2 + $0xc70] sm:$0xff]  ;;  %v3462_v22 = vld [vmem:[#allocation2 + $0xd40] sm:$0xff]  ;;  %v3463_v2 = vld [vmem:[#allocation2 + $0xd48] sm:$0xff] }
 0xb74   :  { %v10580_v28 = vpack.c.bf16 %v3437_v44, %v3436_v3  ;;  %v3466_v3 = vld [vmem:[#allocation2 + $0xd60] sm:$0xff]  ;;  %v3467_v44 = vld [vmem:[#allocation2 + $0xd68] sm:$0xff] }
 0xb75   :  { %8962 = vmatmul.mubr.f32.gmra.mrb[78].mxu1 %v12075_v16  ;;  %10583 = vmatprep.subr.bf16.mxu0 %v10582_v50 }
 0xb76   :  { %10557 = vmatpush3.bf16.msra.mxu1 %v10556_v18 }
 0xb77   :  { %10559 = vmatprep.subr.bf16.mxu1 %v10558_v11 }
 0xb7a   :  { %10561 = vmatpush3.bf16.msra.mxu1 %v10560_v40 }
 0xb7b   :  { %10563 = vmatprep.subr.bf16.mxu1 %v10562_v43  ;;  %v3457_v43 = vld [vmem:[#allocation2 + $0xd18] sm:$0xff] }
 0xb7e   :  { %10565 = vmatpush3.bf16.msra.mxu1 %v10564_v53  ;;  %v10586_v53 = vpack.c.bf16 %v3457_v43, %v3456_v24  ;;  %v3707_v24 = vld [vmem:[#allocation2 + $0xe88] sm:$0xff] }
 0xb7f   :  { %10567 = vmatprep.subr.bf16.mxu1 %v10566_v52 }
 0xb82   :  { %10569 = vmatpush3.bf16.msra.mxu1 %v10568_v1 }
 0xb83   :  { %10571 = vmatprep.subr.bf16.mxu1 %v10570_v4 }
 0xb86   :  { %10573 = vmatpush3.bf16.msra.mxu1 %v10572_v9  ;;  %v3460_v9 = vld [vmem:[#allocation2 + $0xd30] sm:$0xff] }
 0xb87   :  { %10575 = vmatprep.subr.bf16.mxu1 %v10574_v63  ;;  %v10594_v19 = vpack.c.bf16 %v3461_v12, %v3460_v9  ;;  %v3680_v12 = vld [vmem:[#allocation2 + $0xdb0] sm:$0xff] }
 0xb8a   :  { %10577 = vmatpush3.bf16.msra.mxu1 %v10576_v20 }
 0xb8b   :  { %10579 = vmatprep.subr.bf16.mxu1 %v10578_v6  ;;  %v10602_v6 = vpack.c.bf16 %v3465_v27, %v3464_v25  ;;  %v3715_v25 = vld [vmem:[#allocation2 + $0xec8] sm:$0xff] }
 0xb8e   :  { %10581 = vmatpush3.bf16.msra.mxu1 %v10580_v28  ;;  %v10606_v28 = vpack.c.bf16 %v3467_v44, %v3466_v3  ;;  %v3700_v3 = vld [vmem:[#allocation2 + $0xe50] sm:$0xff]  ;;  %v3701_v44 = vld [vmem:[#allocation2 + $0xe58] sm:$0xff] }
 0xc24   :  { %v7452_v18 = vpop.f32.mrb[68].mxu1 }
 0xc25   :  { %v7453_v8 = vpop.f32.mrb[69].mxu1 }
 0xc26   :  { %v12107_v33 = vadd.f32 %v7453_v8, %v7452_v18  ;;  %v3468_v18 = vld [vmem:[#allocation2 + $0xd70] sm:$0xff]  ;;  %v3469_v8 = vld [vmem:[#allocation2 + $0xd78] sm:$0xff] }
 0xc28   :  { %v7455_v34 = vpop.f32.mrb[70].mxu1 }
 0xc29   :  { %v7456_v36 = vpop.f32.mrb[71].mxu1 }
 0xc2a   :  { %v12109_v37 = vadd.f32 %v7456_v36, %v7455_v34  ;;  %v10610_v34 = vpack.c.bf16 %v3469_v8, %v3468_v18  ;;  %v3690_v36 = vld [vmem:[#allocation2 + $0xe00] sm:$0xff]  ;;  %v3684_v18 = vld [vmem:[#allocation2 + $0xdd0] sm:$0xff]  ;;  %v3685_v8 = vld [vmem:[#allocation2 + $0xdd8] sm:$0xff] }
 0xc2c   :  { %v7458_v11 = vpop.f32.mrb[72].mxu1 }
 0xc2d   :  { %v7459_v21 = vpop.f32.mrb[73].mxu1 }
 0xc2e   :  { %v12111_v38 = vadd.f32 %v7459_v21, %v7458_v11  ;;  %v3691_v11 = vld [vmem:[#allocation2 + $0xe08] sm:$0xff] }
 0xc2f   :  { %v10614_v21 = vpack.c.bf16 %v3691_v11, %v3690_v36  ;;  %v10636_v36 = vpack.c.bf16 %v3685_v8, %v3684_v18  ;;  %v3717_v11 = vld [vmem:[#allocation2 + $0xed8] sm:$0xff] }
 0xc30   :  { %v7461_v15 = vpop.f32.mrb[74].mxu1 }
 0xc31   :  { %v7462_v40 = vpop.f32.mrb[75].mxu1  ;;  %10615 = vmatprep.subr.bf16.mxu1 %v10614_v21 }
 0xc32   :  { %v12113_v41 = vadd.f32 %v7462_v40, %v7461_v15  ;;  %v3674_v15 = vld [vmem:[#allocation2 + $0xd80] sm:$0xff]  ;;  %v3675_v40 = vld [vmem:[#allocation2 + $0xd88] sm:$0xff] }
 0xc44   :  { %v8960_v23 = vpop.f32.mrb[76].mxu1 }
 0xc45   :  { %v3253_v47 = vadd.f32 %v8960_v23, %v6736_v42  ;;  %v3247_v49 = vpop.f32.mrb[77].mxu1  ;;  %v10616_v23 = vpack.c.bf16 %v3675_v40, %v3674_v15  ;;  %v3702_v15 = vld [vmem:[#allocation2 + $0xe60] sm:$0xff]  ;;  %v3703_v40 = vld [vmem:[#allocation2 + $0xe68] sm:$0xff] }
 0xc46   :  { %v3248_v58 = vadd.f32 %v6736_v42, %v3247_v49  ;;  %v3693_v49 = vld [vmem:[#allocation2 + $0xe18] sm:$0xff] }
 0xc47   :  { %v3410_v48 = vrot.slane %v3253_v47, 1  ;;  %v3398_v54 = vrot.slane %v3253_v47, 7 }
 0xc48   :  { %v3397_v55 = vrot.slane %v3248_v58, 7  ;;  %v8963_v26 = vpop.f32.mrb[78].mxu1  ;;  %8996 = vmatprep.mubr.f32.mxu0 %v3248_v58  ;;  %3539 = vmatprep.mubr.f32.mxu1 %v3248_v58  ;;  %v3409_v52 = vrot.slane %v3248_v58, 1 }
 0xc49   :  { %v3263_v56 = vadd.f32 %v8963_v26, %v6736_v42  ;;  %v3257_v57 = vpop.f32.mrb[79].mxu1  ;;  %8997 = vmatmul.mubr.f32.vlgmr.msra.gmra.mrb[48].mxu0 %v3253_v47  ;;  %v3709_v26 = vld [vmem:[#allocation2 + $0xe98] sm:$0xff] }
 0xc4a   :  { %v3258_v61 = vadd.f32 %v6736_v42, %v3257_v57  ;;  %10585 = vmatpush3.bf16.msra.mxu0 %v10582_v50  ;;  %v3415_v62 = vsel %vm157_vm0, %v3409_v52, %v3410_v48  ;;  %v3403_v0 = vsel %vm144_vm1, %v3397_v55, %v3398_v54  ;;  %v10598_v50 = vpack.c.bf16 %v3463_v2, %v3462_v22  ;;  %v3706_v42 = vld [vmem:[#allocation2 + $0xe80] sm:$0xff]  ;;  %v3695_v57 = vld [vmem:[#allocation2 + $0xe28] sm:$0xff] }
 0xc4b   :  { %v3400_v1 = vrot.slane %v3263_v56, 7  ;;  %10587 = vmatprep.subr.bf16.mxu0 %v10586_v53  ;;  %v3412_v4 = vrot.slane %v3263_v56, 1  ;;  %v10646_v43 = vpack.c.bf16 %v3707_v24, %v3706_v42  ;;  %v3683_v2 = vld [vmem:[#allocation2 + $0xdc8] sm:$0xff]  ;;  %v10638_v42 = vpack.c.bf16 %v3703_v40, %v3702_v15 }
 0xc4c   :  { %v3411_v5 = vrot.slane %v3258_v61, 1  ;;  %8999 = vmatprep.mubr.f32.mxu0 %v3258_v61  ;;  %v3399_v10 = vrot.slane %v3258_v61, 7  ;;  %v3687_v24 = vld [vmem:[#allocation2 + $0xde8] sm:$0xff] }
 0xc4d   :  { %9000 = vmatmul.mubr.f32.gmra.mrb[50].mxu0 %v3263_v56  ;;  %v3404_v13 = vsel %vm144_vm1, %v3400_v1, %v3397_v55  ;;  %v3416_v29 = vsel %vm157_vm0, %v3412_v4, %v3409_v52 }
 0xc4e   :  { %10589 = vmatpush3.bf16.msra.mxu0 %v10586_v53  ;;  %6739 = vmatmul.mubr.msk.f32.vlgmr.msra.gmra.mrb[80].mxu1 %vm11801_vm2, %v3404_v13  ;;  %v3402_v14 = vsel %vm144_vm1, %v3398_v54, %v3399_v10  ;;  %v3401_v63 = vsel %vm144_vm1, %v3399_v10, %v3400_v1  ;;  %v3414_v17 = vsel %vm157_vm0, %v3410_v48, %v3411_v5  ;;  %v3676_v53 = vld [vmem:[#allocation2 + $0xd90] sm:$0xff]  ;;  %v3677_v48 = vld [vmem:[#allocation2 + $0xd98] sm:$0xff]  ;;  %v3711_v1 = vld [vmem:[#allocation2 + $0xea8] sm:$0xff] }
 0xc4f   :  { %9034 = vmatprep.mubr.f32.mxu0 %v3415_v62  ;;  %3544 = vmatprep.mubr.f32.mxu1 %v3253_v47  ;;  %v3413_v20 = vsel %vm157_vm0, %v3411_v5, %v3412_v4  ;;  %v3692_v47 = vld [vmem:[#allocation2 + $0xe10] sm:$0xff]  ;;  %v10620_v55 = vpack.c.bf16 %v3677_v48, %v3676_v53  ;;  %v3710_v62 = vld [vmem:[#allocation2 + $0xea0] sm:$0xff]  ;;  %v3681_v10 = vld [vmem:[#allocation2 + $0xdb8] sm:$0xff] }
 0xc50   :  { %10591 = vmatprep.subr.bf16.mxu0 %v10590_v7  ;;  %10617 = vmatpush3.bf16.msra.mxu1 %v10616_v23  ;;  %v10618_v58 = vpack.c.bf16 %v3693_v49, %v3692_v47  ;;  %v3708_v54 = vld [vmem:[#allocation2 + $0xe90] sm:$0xff]  ;;  %v10654_v4 = vpack.c.bf16 %v3711_v1, %v3710_v62  ;;  %v3686_v23 = vld [vmem:[#allocation2 + $0xde0] sm:$0xff]  ;;  %v3719_v49 = vld [vmem:[#allocation2 + $0xee8] sm:$0xff] }
 0xc51   :  { %v10650_v52 = vpack.c.bf16 %v3709_v26, %v3708_v54  ;;  %v3696_v5 = vld [vmem:[#allocation2 + $0xe30] sm:$0xff]  ;;  %v10640_v47 = vpack.c.bf16 %v3687_v24, %v3686_v23  ;;  %v3705_v48 = vld [vmem:[#allocation2 + $0xe78] sm:$0xff] }
 0xc52   :  { %10593 = vmatpush3.bf16.msra.mxu0 %v10590_v7  ;;  %3545 = vmatmul.mubr.f32.gmra.mrb[82].mxu1 %v3403_v0  ;;  %v3697_v7 = vld [vmem:[#allocation2 + $0xe38] sm:$0xff]  ;;  %v3712_v13 = vld [vmem:[#allocation2 + $0xeb0] sm:$0xff] }
 0xc53   :  { %3549 = vmatprep.mubr.f32.mxu1 %v3258_v61  ;;  %10595 = vmatprep.subr.bf16.mxu0 %v10594_v19  ;;  %v3679_v61 = vld [vmem:[#allocation2 + $0xda8] sm:$0xff]  ;;  %v10626_v9 = vpack.c.bf16 %v3697_v7, %v3696_v5  ;;  %v3704_v53 = vld [vmem:[#allocation2 + $0xe70] sm:$0xff]  ;;  %v3689_v26 = vld [vmem:[#allocation2 + $0xdf8] sm:$0xff] }
 0xc54   :  { %10619 = vmatprep.subr.bf16.mxu1 %v10618_v58  ;;  %v10624_v0 = vpack.c.bf16 %v3679_v61, %v3678_v60  ;;  %v10642_v54 = vpack.c.bf16 %v3705_v48, %v3704_v53  ;;  %v3902_v60 = vld [vmem:[#allocation6 + $0x580] sm:$0xff]  ;;  %v3903_v61 = vld [vmem:[#allocation6 + $0x588] sm:$0xff] }
 0xc55   :  { %10621 = vmatpush3.bf16.msra.mxu1 %v10620_v55  ;;  %v3688_v55 = vld [vmem:[#allocation2 + $0xdf0] sm:$0xff]  ;;  %v12139_v62 = vpack.c.bf16 %v3903_v61, %v3902_v60 }
 0xc56   :  { %10597 = vmatpush3.bf16.msra.mxu0 %v10594_v19  ;;  %6740 = vmatmul.mubr.msk.f32.gmra.mrb[84].mxu1 %vm11834_vm5, %v3402_v14  ;;  %v3713_v14 = vld [vmem:[#allocation2 + $0xeb8] sm:$0xff]  ;;  %v3699_v19 = vld [vmem:[#allocation2 + $0xe48] sm:$0xff] }
 0xc57   :  { %3554 = vmatprep.mubr.f32.mxu1 %v3263_v56  ;;  %10599 = vmatprep.subr.bf16.mxu0 %v10598_v50  ;;  %v3694_v56 = vld [vmem:[#allocation2 + $0xe20] sm:$0xff] }
 0xc58   :  { %v10622_v59 = vpack.c.bf16 %v3695_v57, %v3694_v56  ;;  %v10644_v56 = vpack.c.bf16 %v3689_v26, %v3688_v55  ;;  %v3721_v57 = vld [vmem:[#allocation2 + $0xef8] sm:$0xff] }
 0xc5a   :  { %10601 = vmatpush3.bf16.msra.mxu0 %v10598_v50  ;;  %3555 = vmatmul.mubr.f32.gmra.mrb[86].mxu1 %v3401_v63  ;;  %v10658_v63 = vpack.c.bf16 %v3713_v14, %v3712_v13  ;;  %v3714_v50 = vld [vmem:[#allocation2 + $0xec0] sm:$0xff] }
 0xc5b   :  { %10603 = vmatprep.subr.bf16.mxu0 %v10602_v6  ;;  %10623 = vmatprep.subr.bf16.mxu1 %v10622_v59 }
 0xc5c   :  { %10625 = vmatpush3.bf16.msra.mxu1 %v10624_v0  ;;  %v6737_v0 = vld [vmem:[#allocation7 + $0xa] ss:$0 sm:$0xff] }
 0xc5d   :  { %10627 = vmatprep.subr.bf16.mxu1 %v10626_v9 }
 0xc5e   :  { %10605 = vmatpush3.bf16.msra.mxu0 %v10602_v6  ;;  %v10662_v6 = vpack.c.bf16 %v3715_v25, %v3714_v50 }
 0xc5f   :  { %10607 = vmatprep.subr.bf16.mxu0 %v10606_v28 }
 0xc62   :  { %10609 = vmatpush3.bf16.msra.mxu0 %v10606_v28  ;;  %v10634_v28 = vpack.c.bf16 %v3701_v44, %v3700_v3 }
 0xc63   :  { %10611 = vmatprep.subr.bf16.mxu0 %v10610_v34 }
 0xc66   :  { %10613 = vmatpush3.bf16.msra.mxu0 %v10610_v34  ;;  %v3716_v34 = vld [vmem:[#allocation2 + $0xed0] sm:$0xff] }
 0xc67   :  { %10647 = vmatprep.subr.bf16.mxu0 %v10646_v43  ;;  %v10666_v21 = vpack.c.bf16 %v3717_v11, %v3716_v34 }
 0xc69   :  { %9035 = vmatmul.mubr.msk.f32.vlgmr.msra.gmra.mrb[52].mxu0 %vm11809_vm3, %v3414_v17  ;;  %v3698_v17 = vld [vmem:[#allocation2 + $0xe40] sm:$0xff] }
 0xc6a   :  { %9037 = vmatprep.mubr.f32.mxu0 %v3413_v20  ;;  %10649 = vmatpush3.bf16.msra.mxu0 %v10646_v43  ;;  %v3682_v20 = vld [vmem:[#allocation2 + $0xdc0] sm:$0xff]  ;;  %v10630_v22 = vpack.c.bf16 %v3699_v19, %v3698_v17 }
 0xc6b   :  { %10651 = vmatprep.subr.bf16.mxu0 %v10650_v52  ;;  %v10632_v27 = vpack.c.bf16 %v3683_v2, %v3682_v20  ;;  %v3718_v43 = vld [vmem:[#allocation2 + $0xee0] sm:$0xff] }
 0xc6c   :  { %v10670_v58 = vpack.c.bf16 %v3719_v49, %v3718_v43  ;;  %v6738_v49 = vld [vmem:[#allocation4 + $0x8] ss:$0 sm:$0xff] }
 0xc6d   :  { %9038 = vmatmul.mubr.msk.f32.gmra.mrb[54].mxu0 %vm11826_vm4, %v3416_v29  ;;  %v10628_v29 = vpack.c.bf16 %v3681_v10, %v3680_v12 }
 0xc6e   :  { %10653 = vmatpush3.bf16.msra.mxu0 %v10650_v52  ;;  %v3720_v52 = vld [vmem:[#allocation2 + $0xef0] sm:$0xff] }
 0xc6f   :  { %10655 = vmatprep.subr.bf16.mxu0 %v10654_v4  ;;  %10629 = vmatpush3.bf16.msra.mxu1 %v10628_v29  ;;  %v10674_v59 = vpack.c.bf16 %v3721_v57, %v3720_v52 }
 0xc70   :  { %10631 = vmatprep.subr.bf16.mxu1 %v10630_v22 }
 0xc72   :  { %10657 = vmatpush3.bf16.msra.mxu0 %v10654_v4 }
 0xc73   :  { %10659 = vmatprep.subr.bf16.mxu0 %v10658_v63  ;;  %10633 = vmatpush3.bf16.msra.mxu1 %v10632_v27 }
 0xc74   :  { %10635 = vmatprep.subr.bf16.mxu1 %v10634_v28 }
 0xc76   :  { %10661 = vmatpush3.bf16.msra.mxu0 %v10658_v63 }
 0xc77   :  { %10663 = vmatprep.subr.bf16.mxu0 %v10662_v6  ;;  %10637 = vmatpush3.bf16.msra.mxu1 %v10636_v36 }
 0xc78   :  { %10639 = vmatprep.subr.bf16.mxu1 %v10638_v42 }
 0xc7a   :  { %10665 = vmatpush3.bf16.msra.mxu0 %v10662_v6 }
 0xc7b   :  { %10667 = vmatprep.subr.bf16.mxu0 %v10666_v21  ;;  %10641 = vmatpush3.bf16.msra.mxu1 %v10640_v47 }
 0xc7c   :  { %10643 = vmatprep.subr.bf16.mxu1 %v10642_v54 }
 0xc7e   :  { %10669 = vmatpush3.bf16.msra.mxu0 %v10666_v21 }
 0xc7f   :  { %10671 = vmatprep.subr.bf16.mxu0 %v10670_v58  ;;  %10645 = vmatpush3.bf16.msra.mxu1 %v10644_v56 }
 0xc80   :  { %10679 = vmatprep.subr.bf16.mxu1 %v12139_v62 }
 0xc82   :  { %10673 = vmatpush3.bf16.msra.mxu0 %v10670_v58 }
 0xc83   :  { %10675 = vmatprep.subr.bf16.mxu0 %v10674_v59 }
 0xc86   :  { %10677 = vmatpush3.bf16.msra.mxu0 %v10674_v59 }
 0xd1c   :  { %v8998_v1 = vpop.f32.mrb[48].mxu0 }
 0xd1d   :  { %v3360_v4 = vadd.f32 %v8998_v1, %v6737_v0  ;;  %v3354_v5 = vpop.f32.mrb[49].mxu0 }
 0xd1e   :  { %v3355_v7 = vadd.f32 %v6737_v0, %v3354_v5 }
 0xd1f   :  { %v3374_v9 = vsub.f32 0.0, %v3360_v4 }
 0xd20   :  { %v3373_v12 = vsub.f32 0.0, %v3355_v7  ;;  %v9001_v10 = vpop.f32.mrb[50].mxu0 }
 0xd21   :  { %v3379_v13 = vmul.f32 1.442695, %v3374_v9  ;;  %v3370_v29 = vadd.f32 %v9001_v10, %v6737_v0  ;;  %v3364_v14 = vpop.f32.mrb[51].mxu0  ;;  %v7556_v63 = vpop.f32.mrb[80].mxu1 }
 0xd22   :  { %v3377_v17 = vmul.f32 1.442695, %v3373_v12  ;;  %v3365_v19 = vadd.f32 %v6737_v0, %v3364_v14  ;;  %v7557_v20 = vpop.f32.mrb[81].mxu1 }
 0xd23   :  { %11512 = vpow2.f32 %v3379_v13  ;;  %v3376_v22 = vsub.f32 0.0, %v3370_v29  ;;  %v7558_v2 = vadd.f32 %v7557_v20, %v7556_v63  ;;  %v3904_v20 = vld [vmem:[#allocation6 + $0x590] sm:$0xff] }
 0xd24   :  { %11514 = vpow2.f32 %v3377_v17  ;;  %v3375_v50 = vsub.f32 0.0, %v3365_v19 }
 0xd25   :  { %v3383_v25 = vmul.f32 1.442695, %v3376_v22  ;;  %v7559_v27 = vpop.f32.mrb[82].mxu1  ;;  %v3542_v48 = vadd.f32 %v7558_v2, %v6738_v49  ;;  %v3905_v22 = vld [vmem:[#allocation6 + $0x598] sm:$0xff] }
 0xd26   :  { %v3381_v6 = vmul.f32 1.442695, %v3375_v50  ;;  %v7560_v3 = vpop.f32.mrb[83].mxu1 }
 0xd27   :  { %11516 = vpow2.f32 %v3383_v25  ;;  %v7561_v44 = vadd.f32 %v7560_v3, %v7559_v27 }
 0xd28   :  { %11518 = vpow2.f32 %v3381_v6 }
 0xd29   :  { %v7562_v28 = vpop.f32.mrb[84].mxu1  ;;  %v3547_v58 = vadd.f32 %v7561_v44, %v6738_v49  ;;  %v10682_v44 = vpack.c.bf16 %v3905_v22, %v3904_v20 }
 0xd2a   :  { %v7563_v18 = vpop.f32.mrb[85].mxu1 }
 0xd2b   :  { %v7564_v8 = vadd.f32 %v7563_v18, %v7562_v28 }
 0xd2d   :  { %v11513_v34 = vpop.eup %11512  ;;  %v7565_v36 = vpop.f32.mrb[86].mxu1  ;;  %v3552_v0 = vadd.f32 %v7564_v8, %v6738_v49 }
 0xd2e   :  { %v11515_v11 = vpop.eup %11514  ;;  %v7566_v21 = vpop.f32.mrb[87].mxu1  ;;  %v3386_v40 = vadd.f32 1.0, %v11513_v34 }
 0xd2f   :  { %v7567_v15 = vadd.f32 %v7566_v21, %v7565_v36  ;;  %v3385_v23 = vadd.f32 1.0, %v11515_v11  ;;  %v3906_v36 = vld [vmem:[#allocation6 + $0x5a0] sm:$0xff]  ;;  %v3907_v11 = vld [vmem:[#allocation6 + $0x5a8] sm:$0xff] }
 0xd30   :  { %11520 = vrcp.f32 %v3386_v40  ;;  %v10686_v21 = vpack.c.bf16 %v3907_v11, %v3906_v36  ;;  %v3909_v40 = vld [vmem:[#allocation6 + $0x5b8] sm:$0xff] }
 0xd31   :  { %v11517_v42 = vpop.eup %11516  ;;  %11522 = vrcp.f32 %v3385_v23  ;;  %v3557_v59 = vadd.f32 %v7567_v15, %v6738_v49  ;;  %v3908_v15 = vld [vmem:[#allocation6 + $0x5b0] sm:$0xff]  ;;  %v3910_v23 = vld [vmem:[#allocation6 + $0x5c0] sm:$0xff] }
 0xd32   :  { %v11519_v24 = vpop.eup %11518  ;;  %v3388_v43 = vadd.f32 1.0, %v11517_v42  ;;  %v10690_v42 = vpack.c.bf16 %v3909_v40, %v3908_v15 }
 0xd33   :  { %v3387_v47 = vadd.f32 1.0, %v11519_v24  ;;  %v3911_v24 = vld [vmem:[#allocation6 + $0x5c8] sm:$0xff] }
 0xd34   :  { %11524 = vrcp.f32 %v3388_v43  ;;  %v3912_v43 = vld [vmem:[#allocation6 + $0x5d0] sm:$0xff] }
 0xd35   :  { %11526 = vrcp.f32 %v3387_v47  ;;  %v3913_v47 = vld [vmem:[#allocation6 + $0x5d8] sm:$0xff] }
 0xd36   :  { %v10698_v49 = vpack.c.bf16 %v3913_v47, %v3912_v43 }
 0xd3a   :  { %v11521_v26 = vpop.eup %11520 }
 0xd3b   :  { %v11523_v56 = vpop.eup %11522 }
 0xd3c   :  { %v9036_v53 = vpop.f32.mrb[52].mxu0 }
 0xd3d   :  { %v3632_v54 = vadd.f32 %v9036_v53, %v3547_v58  ;;  %v3626_v55 = vpop.f32.mrb[53].mxu0  ;;  %v3914_v58 = vld [vmem:[#allocation6 + $0x5e0] sm:$0xff]  ;;  %v3915_v53 = vld [vmem:[#allocation6 + $0x5e8] sm:$0xff] }
 0xd3e   :  { %v3627_v52 = vadd.f32 %v3626_v55, %v3542_v48  ;;  %v11525_v9 = vpop.eup %11524  ;;  %v10702_v48 = vpack.c.bf16 %v3915_v53, %v3914_v58  ;;  %v3917_v55 = vld [vmem:[#allocation6 + $0x5f8] sm:$0xff] }
 0xd3f   :  { %v3646_v57 = vmul.f32 %v11521_v26, %v3632_v54  ;;  %v11527_v29 = vpop.eup %11526  ;;  %v3916_v54 = vld [vmem:[#allocation6 + $0x5f0] sm:$0xff] }
 0xd40   :  { %v3645_v60 = vmul.f32 %v11523_v56, %v3627_v52  ;;  %v9039_v61 = vpop.f32.mrb[54].mxu0  ;;  %v10706_v26 = vpack.c.bf16 %v3917_v55, %v3916_v54  ;;  %v4013_v52 = vld [vmem:[#allocation6 + $0x600] sm:$0xff]  ;;  %v4014_v56 = vld [vmem:[#allocation6 + $0x608] sm:$0xff] }
 0xd41   :  { %v3642_v1 = vadd.f32 %v9039_v61, %v3557_v59  ;;  %v3636_v4 = vpop.f32.mrb[55].mxu0  ;;  %v3662_v5 = vrot.slane %v3646_v57, 1  ;;  %v3650_v7 = vrot.slane %v3646_v57, 7  ;;  %v10710_v59 = vpack.c.bf16 %v4014_v56, %v4013_v52 }
 0xd42   :  { %v3649_v12 = vrot.slane %v3645_v60, 7  ;;  %v3637_v10 = vadd.f32 %v3636_v4, %v3552_v0  ;;  %3791 = vmatprep.mubr.f32.mxu1 %v3645_v60  ;;  %v3661_v13 = vrot.slane %v3645_v60, 1  ;;  %v4016_v60 = vld [vmem:[#allocation6 + $0x618] sm:$0xff]  ;;  %v4017_v0 = vld [vmem:[#allocation6 + $0x620] sm:$0xff] }
 0xd43   :  { %v3648_v14 = vmul.f32 %v11525_v9, %v3642_v1  ;;  %v4018_v1 = vld [vmem:[#allocation6 + $0x628] sm:$0xff]  ;;  %10711 = vmatprep.subr.bf16.mxu0 %v10710_v59 }
 0xd44   :  { %v3647_v63 = vmul.f32 %v11527_v29, %v3637_v10  ;;  %v3667_v17 = vsel %vm157_vm0, %v3661_v13, %v3662_v5  ;;  %v3655_v19 = vsel %vm144_vm1, %v3649_v12, %v3650_v7  ;;  %v10718_v4 = vpack.c.bf16 %v4018_v1, %v4017_v0  ;;  %v4022_v10 = vld [vmem:[#allocation6 + $0x648] sm:$0xff]  ;;  %v4023_v29 = vld [vmem:[#allocation6 + $0x650] sm:$0xff] }
 0xd45   :  { %v3652_v2 = vrot.slane %v3648_v14, 7  ;;  %9072 = vmatprep.mubr.f32.mxu0 %v3667_v17  ;;  %v3664_v50 = vrot.slane %v3648_v14, 1  ;;  %v4025_v17 = vld [vmem:[#allocation6 + $0x660] sm:$0xff]  ;;  %v4144_v0 = vld [vmem:[#allocation2 + $0xf00] sm:$0xff] }
 0xd46   :  { %v3651_v25 = vrot.slane %v3647_v63, 7  ;;  %v3663_v27 = vrot.slane %v3647_v63, 1 }
 0xd47   :  { %v3656_v6 = vsel %vm144_vm1, %v3652_v2, %v3649_v12  ;;  %v3668_v3 = vsel %vm157_vm0, %v3664_v50, %v3661_v13  ;;  %v4021_v12 = vld [vmem:[#allocation6 + $0x640] sm:$0xff] }
 0xd48   :  { %6744 = vmatmul.mubr.msk.f32.vlgmr.msra.gmra.mrb[88].mxu1 %vm11801_vm2, %v3656_v6  ;;  %v3666_v28 = vsel %vm157_vm0, %v3662_v5, %v3663_v27  ;;  %v3665_v18 = vsel %vm157_vm0, %v3663_v27, %v3664_v50  ;;  %v3654_v8 = vsel %vm144_vm1, %v3650_v7, %v3651_v25  ;;  %v3653_v34 = vsel %vm144_vm1, %v3651_v25, %v3652_v2  ;;  %v4019_v5 = vld [vmem:[#allocation6 + $0x630] sm:$0xff]  ;;  %v4020_v7 = vld [vmem:[#allocation6 + $0x638] sm:$0xff]  ;;  %v6731_v2 = vld [vmem:[#allocation4 + $0x7] ss:$0 sm:$0xff] }
 0xd49   :  { %3796 = vmatprep.mubr.f32.mxu1 %v3646_v57  ;;  %9073 = vmatmul.mubr.msk.f32.vlgmr.msra.gmra.mrb[44].mxu0 %vm11809_vm3, %v3666_v28  ;;  %v4015_v57 = vld [vmem:[#allocation6 + $0x610] sm:$0xff]  ;;  %v10722_v9 = vpack.c.bf16 %v4020_v7, %v4019_v5  ;;  %v10726_v13 = vpack.c.bf16 %v4022_v10, %v4021_v12  ;;  %v3061_v15 = vadd.f32 %v12109_v37, %v6731_v2  ;;  %v4176_v5 = vld [vmem:[#allocation2 + $0x1000] sm:$0xff]  ;;  %v4162_v12 = vld [vmem:[#allocation2 + $0xf90] sm:$0xff] }
 0xd4a   :  { %9075 = vmatprep.mubr.f32.mxu0 %v3665_v18  ;;  %10681 = vmatpush3.bf16.msra.mxu1 %v12139_v62  ;;  %v10694_v62 = vpack.c.bf16 %v3911_v24, %v3910_v23  ;;  %v10714_v61 = vpack.c.bf16 %v4016_v60, %v4015_v57  ;;  %v6743_v50 = vld [vmem:[#allocation4 + $0x9] ss:$0 sm:$0xff]  ;;  %v3066_v47 = vadd.f32 %v12111_v38, %v6731_v2  ;;  %v4160_v38 = vld [vmem:[#allocation2 + $0xf80] sm:$0xff]  ;;  %v4163_v10 = vld [vmem:[#allocation2 + $0xf98] sm:$0xff] }
 0xd4b   :  { %10683 = vmatprep.subr.bf16.mxu1 %v10682_v44  ;;  %10713 = vmatpush3.bf16.msra.mxu0 %v10710_v59  ;;  %v3071_v55 = vadd.f32 %v12113_v41, %v6731_v2  ;;  %v4027_v57 = vld [vmem:[#allocation6 + $0x670] sm:$0xff]  ;;  %v4028_v59 = vld [vmem:[#allocation6 + $0x678] sm:$0xff] }
 0xd4c   :  { %3797 = vmatmul.mubr.f32.gmra.mrb[90].mxu1 %v3655_v19  ;;  %10715 = vmatprep.subr.bf16.mxu0 %v10714_v61  ;;  %v4026_v19 = vld [vmem:[#allocation6 + $0x668] sm:$0xff]  ;;  %v10738_v60 = vpack.c.bf16 %v4028_v59, %v4027_v57  ;;  %v4177_v7 = vld [vmem:[#allocation2 + $0x1008] sm:$0xff] }
 0xd4d   :  { %3801 = vmatprep.mubr.f32.mxu1 %v3647_v63  ;;  %9076 = vmatmul.mubr.msk.f32.gmra.mrb[46].mxu0 %vm11826_vm4, %v3668_v3  ;;  %v10734_v20 = vpack.c.bf16 %v4026_v19, %v4025_v17  ;;  %v10774_v41 = vpack.c.bf16 %v4177_v7, %v4176_v5  ;;  %v4164_v17 = vld [vmem:[#allocation2 + $0xfa0] sm:$0xff]  ;;  %v4165_v19 = vld [vmem:[#allocation2 + $0xfa8] sm:$0xff]  ;;  %v4186_v5 = vld [vmem:[#allocation2 + $0x1050] sm:$0xff] }
 0xd4e   :  { %10685 = vmatpush3.bf16.msra.mxu1 %v10682_v44  ;;  %v3056_v44 = vadd.f32 %v12107_v33, %v6731_v2  ;;  %v4149_v2 = vld [vmem:[#allocation2 + $0xf28] sm:$0xff]  ;;  %v4184_v59 = vld [vmem:[#allocation2 + $0x1040] sm:$0xff]  ;;  %v4187_v7 = vld [vmem:[#allocation2 + $0x1058] sm:$0xff] }
 0xd4f   :  { %10687 = vmatprep.subr.bf16.mxu1 %v10686_v21  ;;  %10717 = vmatpush3.bf16.msra.mxu0 %v10714_v61  ;;  %v4161_v61 = vld [vmem:[#allocation2 + $0xf88] sm:$0xff] }
 0xd50   :  { %6745 = vmatmul.mubr.msk.f32.gmra.mrb[92].mxu1 %vm11834_vm5, %v3654_v8  ;;  %10719 = vmatprep.subr.bf16.mxu0 %v10718_v4  ;;  %v10742_v1 = vpack.c.bf16 %v4161_v61, %v4160_v38  ;;  %v4171_v61 = vld [vmem:[#allocation2 + $0xfd8] sm:$0xff] }
 0xd51   :  { %3806 = vmatprep.mubr.f32.mxu1 %v3648_v14  ;;  %v4024_v14 = vld [vmem:[#allocation6 + $0x658] sm:$0xff] }
 0xd52   :  { %10689 = vmatpush3.bf16.msra.mxu1 %v10686_v21  ;;  %v10730_v63 = vpack.c.bf16 %v4024_v14, %v4023_v29  ;;  %v10746_v29 = vpack.c.bf16 %v4163_v10, %v4162_v12  ;;  %v4147_v14 = vld [vmem:[#allocation2 + $0xf18] sm:$0xff]  ;;  %v4173_v12 = vld [vmem:[#allocation2 + $0xfe8] sm:$0xff] }
 0xd53   :  { %10691 = vmatprep.subr.bf16.mxu1 %v10690_v42  ;;  %10721 = vmatpush3.bf16.msra.mxu0 %v10718_v4  ;;  %v4145_v4 = vld [vmem:[#allocation2 + $0xf08] sm:$0xff] }
 0xd54   :  { %3807 = vmatmul.mubr.f32.gmra.mrb[94].mxu1 %v3653_v34  ;;  %10723 = vmatprep.subr.bf16.mxu0 %v10722_v9 }
 0xd56   :  { %10693 = vmatpush3.bf16.msra.mxu1 %v10690_v42 }
 0xd57   :  { %10695 = vmatprep.subr.bf16.mxu1 %v10694_v62  ;;  %10725 = vmatpush3.bf16.msra.mxu0 %v10722_v9  ;;  %v10744_v9 = vpack.c.bf16 %v4145_v4, %v4144_v0 }
 0xd58   :  { %10727 = vmatprep.subr.bf16.mxu0 %v10726_v13 }
 0xd5a   :  { %10697 = vmatpush3.bf16.msra.mxu1 %v10694_v62 }
 0xd5b   :  { %10699 = vmatprep.subr.bf16.mxu1 %v10698_v49  ;;  %10729 = vmatpush3.bf16.msra.mxu0 %v10726_v13  ;;  %v4146_v13 = vld [vmem:[#allocation2 + $0xf10] sm:$0xff] }
 0xd5c   :  { %10731 = vmatprep.subr.bf16.mxu0 %v10730_v63 }
 0xd5e   :  { %10701 = vmatpush3.bf16.msra.mxu1 %v10698_v49 }
 0xd5f   :  { %10703 = vmatprep.subr.bf16.mxu1 %v10702_v48  ;;  %10733 = vmatpush3.bf16.msra.mxu0 %v10730_v63  ;;  %v10748_v63 = vpack.c.bf16 %v4147_v14, %v4146_v13  ;;  %v4156_v13 = vld [vmem:[#allocation2 + $0xf60] sm:$0xff] }
 0xd60   :  { %10735 = vmatprep.subr.bf16.mxu0 %v10734_v20 }
 0xd62   :  { %10705 = vmatpush3.bf16.msra.mxu1 %v10702_v48 }
 0xd63   :  { %10707 = vmatprep.subr.bf16.mxu1 %v10706_v26  ;;  %10737 = vmatpush3.bf16.msra.mxu0 %v10734_v20  ;;  %v10750_v20 = vpack.c.bf16 %v4165_v19, %v4164_v17  ;;  %v4189_v17 = vld [vmem:[#allocation2 + $0x1068] sm:$0xff] }
 0xd64   :  { %10739 = vmatprep.subr.bf16.mxu0 %v10738_v60 }
 0xd66   :  { %10709 = vmatpush3.bf16.msra.mxu1 %v10706_v26 }
 0xd67   :  { %10741 = vmatpush3.bf16.msra.mxu0 %v10738_v60  ;;  %10743 = vmatprep.subr.bf16.mxu1 %v10742_v1  ;;  %v4185_v60 = vld [vmem:[#allocation2 + $0x1048] sm:$0xff]  ;;  %v4154_v1 = vld [vmem:[#allocation2 + $0xf50] sm:$0xff] }
 0xd68   :  { %10775 = vmatprep.subr.bf16.mxu0 %v10774_v41  ;;  %v10790_v38 = vpack.c.bf16 %v4185_v60, %v4184_v59 }
 0xe1b   :  { %v7620_v22 = vpop.f32.mrb[88].mxu1 }
 0xe1c   :  { %v7621_v25 = vpop.f32.mrb[89].mxu1  ;;  %v9074_v27 = vpop.f32.mrb[44].mxu0 }
 0xe1d   :  { %v7622_v6 = vadd.f32 %v7621_v25, %v7620_v22  ;;  %v3878_v3 = vpop.f32.mrb[45].mxu0  ;;  %v4148_v22 = vld [vmem:[#allocation2 + $0xf20] sm:$0xff]  ;;  %v4167_v25 = vld [vmem:[#allocation2 + $0xfb8] sm:$0xff] }
 0xe1f   :  { %v3794_v28 = vadd.f32 %v7622_v6, %v6743_v50  ;;  %v7623_v18 = vpop.f32.mrb[90].mxu1 }
 0xe20   :  { %v7624_v8 = vpop.f32.mrb[91].mxu1  ;;  %v9077_v34 = vpop.f32.mrb[46].mxu0 }
 0xe21   :  { %v11432_v36 = vadd.f32 %v3794_v28, %v3056_v44  ;;  %v7625_v11 = vadd.f32 %v7624_v8, %v7623_v18  ;;  %v3888_v21 = vpop.f32.mrb[47].mxu0  ;;  %v4151_v44 = vld [vmem:[#allocation2 + $0xf38] sm:$0xff]  ;;  %v4168_v28 = vld [vmem:[#allocation2 + $0xfc0] sm:$0xff]  ;;  %v4169_v18 = vld [vmem:[#allocation2 + $0xfc8] sm:$0xff] }
 0xe23   :  { %v11433_v40 = vadd.f32 %v11432_v36, %v3878_v3  ;;  %v3799_v42 = vadd.f32 %v7625_v11, %v6743_v50  ;;  %v7626_v23 = vpop.f32.mrb[92].mxu1  ;;  %v4150_v3 = vld [vmem:[#allocation2 + $0xf30] sm:$0xff]  ;;  %v4152_v36 = vld [vmem:[#allocation2 + $0xf40] sm:$0xff]  ;;  %v4153_v11 = vld [vmem:[#allocation2 + $0xf48] sm:$0xff] }
 0xe24   :  { %v7627_v24 = vpop.f32.mrb[93].mxu1  ;;  %v10756_v8 = vpack.c.bf16 %v4151_v44, %v4150_v3  ;;  %v4191_v3 = vld [vmem:[#allocation2 + $0x1078] sm:$0xff] }
 0xe25   :  { %v11430_v62 = vadd.f32 %v3799_v42, %v3061_v15  ;;  %v7628_v43 = vadd.f32 %v7627_v24, %v7626_v23  ;;  %9110 = vmatprep.mubr.f32.mxu1 %v11433_v40  ;;  %v6748_v15 = vld [vmem:[#allocation7 + $0xb] ss:$0 sm:$0xff] }
 0xe27   :  { %v11431_v49 = vadd.f32 %v11430_v62, %v9074_v27  ;;  %v3804_v33 = vadd.f32 %v7628_v43, %v6743_v50  ;;  %v7629_v58 = vpop.f32.mrb[94].mxu1  ;;  %v10752_v27 = vpack.c.bf16 %v4149_v2, %v4148_v22  ;;  %v4178_v62 = vld [vmem:[#allocation2 + $0x1010] sm:$0xff]  ;;  %v4179_v43 = vld [vmem:[#allocation2 + $0x1018] sm:$0xff] }
 0xe28   :  { %v7630_v53 = vpop.f32.mrb[95].mxu1  ;;  %v4175_v22 = vld [vmem:[#allocation2 + $0xff8] sm:$0xff] }
 0xe29   :  { %v11436_v48 = vadd.f32 %v3804_v33, %v3066_v47  ;;  %v7631_v54 = vadd.f32 %v7630_v53, %v7629_v58  ;;  %9111 = vmatmul.mubr.f32.vlgmr.msra.gmra.mrb[96].mxu1 %v11431_v49  ;;  %v10778_v33 = vpack.c.bf16 %v4179_v43, %v4178_v62  ;;  %v4180_v58 = vld [vmem:[#allocation2 + $0x1020] sm:$0xff]  ;;  %v4181_v53 = vld [vmem:[#allocation2 + $0x1028] sm:$0xff] }
 0xe2a   :  { %10745 = vmatpush3.bf16.msra.mxu1 %v10744_v9  ;;  %v10794_v9 = vpack.c.bf16 %v4187_v7, %v4186_v5  ;;  %v4374_v5 = vld [vmem:[#allocation6 + $0x6b0] sm:$0xff]  ;;  %v4375_v7 = vld [vmem:[#allocation6 + $0x6b8] sm:$0xff] }
 0xe2b   :  { %v3809_v26 = vadd.f32 %v7631_v54, %v6743_v50  ;;  %v11437_v37 = vadd.f32 %v11436_v48, %v3888_v21  ;;  %10747 = vmatprep.subr.bf16.mxu1 %v10746_v29  ;;  %v4166_v50 = vld [vmem:[#allocation2 + $0xfb0] sm:$0xff]  ;;  %v10760_v21 = vpack.c.bf16 %v4153_v11, %v4152_v36  ;;  %v4157_v29 = vld [vmem:[#allocation2 + $0xf68] sm:$0xff] }
 0xe2c   :  { %v10754_v6 = vpack.c.bf16 %v4167_v25, %v4166_v50  ;;  %v10768_v14 = vpack.c.bf16 %v4157_v29, %v4156_v13  ;;  %v4158_v50 = vld [vmem:[#allocation2 + $0xf70] sm:$0xff]  ;;  %v4159_v25 = vld [vmem:[#allocation2 + $0xf78] sm:$0xff]  ;;  %v4378_v13 = vld [vmem:[#allocation6 + $0x6d0] sm:$0xff] }
 0xe2d   :  { %v11434_v52 = vadd.f32 %v3809_v26, %v3071_v55  ;;  %9113 = vmatprep.mubr.f32.mxu1 %v11437_v37  ;;  %v10782_v26 = vpack.c.bf16 %v4181_v53, %v4180_v58  ;;  %v4379_v29 = vld [vmem:[#allocation6 + $0x6d8] sm:$0xff] }
 0xe2e   :  { %10749 = vmatpush3.bf16.msra.mxu1 %v10748_v63  ;;  %v4188_v63 = vld [vmem:[#allocation2 + $0x1060] sm:$0xff] }
 0xe2f   :  { %v11435_v56 = vadd.f32 %v11434_v52, %v9077_v34  ;;  %10751 = vmatprep.subr.bf16.mxu1 %v10750_v20  ;;  %v10758_v34 = vpack.c.bf16 %v4169_v18, %v4168_v28  ;;  %v4182_v52 = vld [vmem:[#allocation2 + $0x1030] sm:$0xff]  ;;  %v10798_v19 = vpack.c.bf16 %v4189_v17, %v4188_v63  ;;  %v4368_v28 = vld [vmem:[#allocation6 + $0x680] sm:$0xff]  ;;  %v4369_v18 = vld [vmem:[#allocation6 + $0x688] sm:$0xff] }
 0xe30   :  { %v4174_v20 = vld [vmem:[#allocation2 + $0xff0] sm:$0xff]  ;;  %v4380_v63 = vld [vmem:[#allocation6 + $0x6e0] sm:$0xff]  ;;  %v4381_v17 = vld [vmem:[#allocation6 + $0x6e8] sm:$0xff] }
 0xe31   :  { %9114 = vmatmul.mubr.f32.gmra.mrb[98].mxu1 %v11435_v56  ;;  %v10770_v2 = vpack.c.bf16 %v4175_v22, %v4174_v20  ;;  %v4382_v20 = vld [vmem:[#allocation6 + $0x6f0] sm:$0xff]  ;;  %v4383_v22 = vld [vmem:[#allocation6 + $0x6f8] sm:$0xff] }
 0xe32   :  { %10753 = vmatpush3.bf16.msra.mxu1 %v10752_v27  ;;  %v10772_v27 = vpack.c.bf16 %v4159_v25, %v4158_v50  ;;  %v4475_v50 = vld [vmem:[#allocation6 + $0x700] sm:$0xff]  ;;  %v4476_v25 = vld [vmem:[#allocation6 + $0x708] sm:$0xff] }
 0xe33   :  { %10755 = vmatprep.subr.bf16.mxu1 %v10754_v6  ;;  %v4190_v6 = vld [vmem:[#allocation2 + $0x1070] sm:$0xff] }
 0xe34   :  { %v10802_v44 = vpack.c.bf16 %v4191_v3, %v4190_v6  ;;  %v4477_v6 = vld [vmem:[#allocation6 + $0x710] sm:$0xff]  ;;  %v4478_v3 = vld [vmem:[#allocation6 + $0x718] sm:$0xff] }
 0xe36   :  { %10757 = vmatpush3.bf16.msra.mxu1 %v10756_v8  ;;  %v10806_v8 = vpack.c.bf16 %v4369_v18, %v4368_v28  ;;  %v4646_v28 = vld [vmem:[#allocation2 + $0x1100] sm:$0xff]  ;;  %v4647_v18 = vld [vmem:[#allocation2 + $0x1108] sm:$0xff] }
 0xe37   :  { %10759 = vmatprep.subr.bf16.mxu1 %v10758_v34  ;;  %v6749_v34 = vld [vmem:[#allocation7 + $0xc] ss:$0 sm:$0xff] }
 0xe3a   :  { %10761 = vmatpush3.bf16.msra.mxu1 %v10760_v21 }
 0xefc   :  { %v9112_v40 = vpop.f32.mrb[96].mxu1 }
 0xefd   :  { %v3995_v42 = vadd.f32 %v9112_v40, %v6748_v15  ;;  %v3989_v23 = vpop.f32.mrb[97].mxu1 }
 0xefe   :  { %v3990_v24 = vadd.f32 %v6748_v15, %v3989_v23 }
 0xeff   :  { %v12175_v49 = vadd.f32 %v3995_v42, %v12067_v32 }
 0xf00   :  { %v12172_v47 = vadd.f32 %v3990_v24, %v12064_v31  ;;  %v4183_v31 = vld [vmem:[#allocation2 + $0x1038] sm:$0xff] }
 0xf01   :  { %v10786_v57 = vpack.c.bf16 %v4183_v31, %v4182_v52 }
 0xf02   :  { %9148 = vmatprep.mubr.f32.mxu0 %v12172_v47 }
 0xf03   :  { %9149 = vmatmul.mubr.f32.vlgmr.msra.gmra.mrb[56].mxu0 %v12175_v49 }
 0xf04   :  { %v9115_v48 = vpop.f32.mrb[98].mxu1  ;;  %10777 = vmatpush3.bf16.msra.mxu0 %v10774_v41  ;;  %v4172_v41 = vld [vmem:[#allocation2 + $0xfe0] sm:$0xff] }
 0xf05   :  { %v4005_v54 = vadd.f32 %v9115_v48, %v6748_v15  ;;  %v3999_v55 = vpop.f32.mrb[99].mxu1  ;;  %10779 = vmatprep.subr.bf16.mxu0 %v10778_v33  ;;  %v10766_v10 = vpack.c.bf16 %v4173_v12, %v4172_v41  ;;  %v4370_v48 = vld [vmem:[#allocation6 + $0x690] sm:$0xff]  ;;  %v4376_v41 = vld [vmem:[#allocation6 + $0x6c0] sm:$0xff]  ;;  %v4377_v12 = vld [vmem:[#allocation6 + $0x6c8] sm:$0xff] }
 0xf06   :  { %v4000_v37 = vadd.f32 %v6748_v15, %v3999_v55 }
 0xf07   :  { %v12183_v32 = vadd.f32 %v4005_v54, %v12075_v16  ;;  %v4155_v16 = vld [vmem:[#allocation2 + $0xf58] sm:$0xff]  ;;  %v4371_v54 = vld [vmem:[#allocation6 + $0x698] sm:$0xff] }
 0xf08   :  { %v12180_v56 = vadd.f32 %v4000_v37, %v12072_v39  ;;  %10781 = vmatpush3.bf16.msra.mxu0 %v10778_v33  ;;  %v4170_v39 = vld [vmem:[#allocation2 + $0xfd0] sm:$0xff]  ;;  %v10764_v4 = vpack.c.bf16 %v4155_v16, %v4154_v1 }
 0xf09   :  { %10783 = vmatprep.subr.bf16.mxu0 %v10782_v26  ;;  %v10762_v0 = vpack.c.bf16 %v4171_v61, %v4170_v39  ;;  %v4373_v39 = vld [vmem:[#allocation6 + $0x6a8] sm:$0xff] }
 0xf0a   :  { %9151 = vmatprep.mubr.f32.mxu0 %v12180_v56 }
 0xf0b   :  { %9152 = vmatmul.mubr.f32.gmra.mrb[58].mxu0 %v12183_v32  ;;  %10763 = vmatprep.subr.bf16.mxu1 %v10762_v0 }
 0xf0c   :  { %10785 = vmatpush3.bf16.msra.mxu0 %v10782_v26  ;;  %10765 = vmatpush3.bf16.msra.mxu1 %v10764_v4 }
 0xf0d   :  { %10787 = vmatprep.subr.bf16.mxu0 %v10786_v57  ;;  %10767 = vmatprep.subr.bf16.mxu1 %v10766_v10  ;;  %v10822_v10 = vpack.c.bf16 %v4377_v12, %v4376_v41 }
 0xf10   :  { %10789 = vmatpush3.bf16.msra.mxu0 %v10786_v57  ;;  %10769 = vmatpush3.bf16.msra.mxu1 %v10768_v14  ;;  %v10810_v57 = vpack.c.bf16 %v4371_v54, %v4370_v48  ;;  %v10826_v14 = vpack.c.bf16 %v4379_v29, %v4378_v13  ;;  %v4650_v54 = vld [vmem:[#allocation2 + $0x1120] sm:$0xff]  ;;  %v4639_v13 = vld [vmem:[#allocation2 + $0x10c8] sm:$0xff]  ;;  %v4487_v29 = vld [vmem:[#allocation6 + $0x760] sm:$0xff] }
 0xf11   :  { %10791 = vmatprep.subr.bf16.mxu0 %v10790_v38  ;;  %10771 = vmatprep.subr.bf16.mxu1 %v10770_v2  ;;  %v10834_v2 = vpack.c.bf16 %v4383_v22, %v4382_v20 }
 0xf14   :  { %10793 = vmatpush3.bf16.msra.mxu0 %v10790_v38  ;;  %10773 = vmatpush3.bf16.msra.mxu1 %v10772_v27  ;;  %v4372_v38 = vld [vmem:[#allocation6 + $0x6a0] sm:$0xff]  ;;  %v10838_v27 = vpack.c.bf16 %v4476_v25, %v4475_v50 }
 0xf15   :  { %10795 = vmatprep.subr.bf16.mxu0 %v10794_v9  ;;  %10807 = vmatprep.subr.bf16.mxu1 %v10806_v8  ;;  %v10814_v4 = vpack.c.bf16 %v4373_v39, %v4372_v38  ;;  %v4653_v38 = vld [vmem:[#allocation2 + $0x1138] sm:$0xff] }
 0xf16   :  { %v4641_v50 = vld [vmem:[#allocation2 + $0x10d8] sm:$0xff] }
 0xf18   :  { %10797 = vmatpush3.bf16.msra.mxu0 %v10794_v9  ;;  %v10818_v9 = vpack.c.bf16 %v4375_v7, %v4374_v5  ;;  %v4486_v5 = vld [vmem:[#allocation6 + $0x758] sm:$0xff]  ;;  %v4654_v7 = vld [vmem:[#allocation2 + $0x1140] sm:$0xff] }
 0xf19   :  { %10799 = vmatprep.subr.bf16.mxu0 %v10798_v19 }
 0xf1c   :  { %10801 = vmatpush3.bf16.msra.mxu0 %v10798_v19  ;;  %v10830_v19 = vpack.c.bf16 %v4381_v17, %v4380_v63  ;;  %v4656_v63 = vld [vmem:[#allocation2 + $0x1150] sm:$0xff]  ;;  %v4657_v17 = vld [vmem:[#allocation2 + $0x1158] sm:$0xff] }
 0xf1d   :  { %10803 = vmatprep.subr.bf16.mxu0 %v10802_v44  ;;  %v10890_v22 = vpack.c.bf16 %v4657_v17, %v4656_v63 }
 0xf20   :  { %10805 = vmatpush3.bf16.msra.mxu0 %v10802_v44  ;;  %v10842_v44 = vpack.c.bf16 %v4478_v3, %v4477_v6  ;;  %v4490_v6 = vld [vmem:[#allocation6 + $0x778] sm:$0xff] }
 0xf21   :  { %10839 = vmatprep.subr.bf16.mxu0 %v10838_v27 }
 0xfd6   :  { %v9150_v36 = vpop.f32.mrb[56].mxu0 }
 0xfd7   :  { %v4106_v11 = vadd.f32 %v9150_v36, %v6749_v34  ;;  %v4100_v21 = vpop.f32.mrb[57].mxu0  ;;  %v4631_v36 = vld [vmem:[#allocation2 + $0x1088] sm:$0xff] }
 0xfd8   :  { %v4101_v15 = vadd.f32 %v6749_v34, %v4100_v21  ;;  %v4479_v21 = vld [vmem:[#allocation6 + $0x720] sm:$0xff] }
 0xfd9   :  { %v4120_v40 = vrot.slane %v4106_v11, 7  ;;  %v4132_v42 = vrot.slane %v4106_v11, 1 }
 0xfda   :  { %v4119_v23 = vrot.slane %v4101_v15, 7  ;;  %v4131_v24 = vrot.slane %v4101_v15, 1  ;;  %4261 = vmatprep.mubr.f32.mxu1 %v4101_v15  ;;  %v4480_v15 = vld [vmem:[#allocation6 + $0x728] sm:$0xff] }
 0xfdc   :  { %v4137_v62 = vsel %vm157_vm0, %v4131_v24, %v4132_v42  ;;  %v4125_v43 = vsel %vm144_vm1, %v4119_v23, %v4120_v40 }
 0xfdd   :  { %9186 = vmatprep.mubr.f32.mxu0 %v4137_v62  ;;  %v4632_v62 = vld [vmem:[#allocation2 + $0x1090] sm:$0xff] }
 0xfde   :  { %v9153_v33 = vpop.f32.mrb[58].mxu0 }
 0xfdf   :  { %v4116_v58 = vadd.f32 %v9153_v33, %v6749_v34  ;;  %v4110_v53 = vpop.f32.mrb[59].mxu0 }
 0xfe0   :  { %v4111_v55 = vadd.f32 %v6749_v34, %v4110_v53  ;;  %v4630_v34 = vld [vmem:[#allocation2 + $0x1080] sm:$0xff]  ;;  %v4482_v53 = vld [vmem:[#allocation6 + $0x738] sm:$0xff] }
 0xfe1   :  { %v4122_v26 = vrot.slane %v4116_v58, 7  ;;  %v4134_v37 = vrot.slane %v4116_v58, 1 }
 0xfe2   :  { %v4121_v52 = vrot.slane %v4111_v55, 7  ;;  %v4133_v31 = vrot.slane %v4111_v55, 1 }
 0xfe3   :  { %v4126_v59 = vsel %vm144_vm1, %v4122_v26, %v4119_v23  ;;  %v4138_v60 = vsel %vm157_vm0, %v4134_v37, %v4131_v24  ;;  %v4649_v23 = vld [vmem:[#allocation2 + $0x1118] sm:$0xff] }
 0xfe4   :  { %6751 = vmatmul.mubr.msk.f32.vlgmr.msra.gmra.mrb[100].mxu1 %vm11801_vm2, %v4126_v59  ;;  %v4136_v61 = vsel %vm157_vm0, %v4132_v42, %v4133_v31  ;;  %v4135_v0 = vsel %vm157_vm0, %v4133_v31, %v4134_v37  ;;  %v4124_v1 = vsel %vm144_vm1, %v4120_v40, %v4121_v52  ;;  %v4123_v16 = vsel %vm144_vm1, %v4121_v52, %v4122_v26  ;;  %v4648_v42 = vld [vmem:[#allocation2 + $0x1110] sm:$0xff]  ;;  %v4634_v37 = vld [vmem:[#allocation2 + $0x10a0] sm:$0xff]  ;;  %v4635_v52 = vld [vmem:[#allocation2 + $0x10a8] sm:$0xff] }
 0xfe5   :  { %10809 = vmatpush3.bf16.msra.mxu1 %v10806_v8  ;;  %4266 = vmatprep.mubr.f32.mxu1 %v4106_v11  ;;  %v10870_v8 = vpack.c.bf16 %v4647_v18, %v4646_v28  ;;  %v10872_v11 = vpack.c.bf16 %v4631_v36, %v4630_v34  ;;  %v10846_v40 = vpack.c.bf16 %v4480_v15, %v4479_v21  ;;  %v4483_v31 = vld [vmem:[#allocation6 + $0x740] sm:$0xff]  ;;  %v4484_v59 = vld [vmem:[#allocation6 + $0x748] sm:$0xff]  ;;  %v4659_v28 = vld [vmem:[#allocation2 + $0x1168] sm:$0xff] }
 0xfe6   :  { %9187 = vmatmul.mubr.msk.f32.vlgmr.msra.gmra.mrb[60].mxu0 %vm11809_vm3, %v4136_v61  ;;  %10811 = vmatprep.subr.bf16.mxu1 %v10810_v57  ;;  %v10874_v24 = vpack.c.bf16 %v4649_v23, %v4648_v42  ;;  %v10854_v39 = vpack.c.bf16 %v4484_v59, %v4483_v31  ;;  %v4643_v34 = vld [vmem:[#allocation2 + $0x10e8] sm:$0xff]  ;;  %v4661_v42 = vld [vmem:[#allocation2 + $0x1178] sm:$0xff] }
 0xfe7   :  { %9189 = vmatprep.mubr.f32.mxu0 %v4135_v0  ;;  %10841 = vmatpush3.bf16.msra.mxu0 %v10838_v27  ;;  %v4636_v0 = vld [vmem:[#allocation2 + $0x10b0] sm:$0xff]  ;;  %v4489_v27 = vld [vmem:[#allocation6 + $0x770] sm:$0xff] }
 0xfe8   :  { %4267 = vmatmul.mubr.f32.gmra.mrb[102].mxu1 %v4125_v43  ;;  %10843 = vmatprep.subr.bf16.mxu0 %v10842_v44  ;;  %v4633_v43 = vld [vmem:[#allocation2 + $0x1098] sm:$0xff]  ;;  %v10866_v3 = vpack.c.bf16 %v4490_v6, %v4489_v27  ;;  %v4663_v21 = vld [vmem:[#allocation2 + $0x1188] sm:$0xff] }
 0xfe9   :  { %10813 = vmatpush3.bf16.msra.mxu1 %v10810_v57  ;;  %4271 = vmatprep.mubr.f32.mxu1 %v4111_v55  ;;  %v10876_v33 = vpack.c.bf16 %v4633_v43, %v4632_v62  ;;  %v4651_v55 = vld [vmem:[#allocation2 + $0x1128] sm:$0xff]  ;;  %v10880_v57 = vpack.c.bf16 %v4635_v52, %v4634_v37  ;;  %v4645_v62 = vld [vmem:[#allocation2 + $0x10f8] sm:$0xff] }
 0xfea   :  { %9190 = vmatmul.mubr.msk.f32.gmra.mrb[62].mxu0 %vm11826_vm4, %v4138_v60  ;;  %10815 = vmatprep.subr.bf16.mxu1 %v10814_v4  ;;  %v10878_v26 = vpack.c.bf16 %v4651_v55, %v4650_v54  ;;  %v4652_v60 = vld [vmem:[#allocation2 + $0x1130] sm:$0xff]  ;;  %v4669_v27 = vld [vmem:[#allocation2 + $0x11b8] sm:$0xff] }
 0xfeb   :  { %10845 = vmatpush3.bf16.msra.mxu0 %v10842_v44  ;;  %v10882_v61 = vpack.c.bf16 %v4653_v38, %v4652_v60  ;;  %v4658_v44 = vld [vmem:[#allocation2 + $0x1160] sm:$0xff] }
 0xfec   :  { %6752 = vmatmul.mubr.msk.f32.gmra.mrb[104].mxu1 %vm11834_vm5, %v4124_v1  ;;  %10847 = vmatprep.subr.bf16.mxu0 %v10846_v40  ;;  %v4637_v1 = vld [vmem:[#allocation2 + $0x10b8] sm:$0xff]  ;;  %v10894_v18 = vpack.c.bf16 %v4659_v28, %v4658_v44  ;;  %v6755_v60 = vld [vmem:[#allocation7 + $0xd] ss:$0 sm:$0xff] }
 0xfed   :  { %10817 = vmatpush3.bf16.msra.mxu1 %v10814_v4  ;;  %4276 = vmatprep.mubr.f32.mxu1 %v4116_v58  ;;  %v4481_v58 = vld [vmem:[#allocation6 + $0x730] sm:$0xff]  ;;  %v10884_v4 = vpack.c.bf16 %v4637_v1, %v4636_v0 }
 0xfee   :  { %10819 = vmatprep.subr.bf16.mxu1 %v10818_v9  ;;  %v10850_v48 = vpack.c.bf16 %v4482_v53, %v4481_v58 }
 0xfef   :  { %10849 = vmatpush3.bf16.msra.mxu0 %v10846_v40  ;;  %v4660_v40 = vld [vmem:[#allocation2 + $0x1170] sm:$0xff] }
 0xff0   :  { %4277 = vmatmul.mubr.f32.gmra.mrb[106].mxu1 %v4123_v16  ;;  %10851 = vmatprep.subr.bf16.mxu0 %v10850_v48  ;;  %v4485_v16 = vld [vmem:[#allocation6 + $0x750] sm:$0xff]  ;;  %v10898_v23 = vpack.c.bf16 %v4661_v42, %v4660_v40  ;;  %v4672_v40 = vld [vmem:[#allocation2 + $0x11d0] sm:$0xff]  ;;  %v4673_v42 = vld [vmem:[#allocation2 + $0x11d8] sm:$0xff] }
 0xff1   :  { %10821 = vmatpush3.bf16.msra.mxu1 %v10818_v9  ;;  %9224 = vmatprep.mubr.f32.mxu1 %v12172_v47  ;;  %v4655_v9 = vld [vmem:[#allocation2 + $0x1148] sm:$0xff]  ;;  %v10858_v41 = vpack.c.bf16 %v4486_v5, %v4485_v16 }
 0xff2   :  { %10823 = vmatprep.subr.bf16.mxu1 %v10822_v10  ;;  %v10886_v12 = vpack.c.bf16 %v4655_v9, %v4654_v7 }
 0xff3   :  { %10853 = vmatpush3.bf16.msra.mxu0 %v10850_v48 }
 0xff4   :  { %10855 = vmatprep.subr.bf16.mxu0 %v10854_v39 }
 0xff5   :  { %10825 = vmatpush3.bf16.msra.mxu1 %v10822_v10  ;;  %v4638_v10 = vld [vmem:[#allocation2 + $0x10c0] sm:$0xff] }
 0xff6   :  { %10827 = vmatprep.subr.bf16.mxu1 %v10826_v14  ;;  %v10888_v20 = vpack.c.bf16 %v4639_v13, %v4638_v10 }
 0xff7   :  { %10857 = vmatpush3.bf16.msra.mxu0 %v10854_v39  ;;  %v4664_v39 = vld [vmem:[#allocation2 + $0x1190] sm:$0xff] }
 0xff8   :  { %10859 = vmatprep.subr.bf16.mxu0 %v10858_v41 }
 0xff9   :  { %10829 = vmatpush3.bf16.msra.mxu1 %v10826_v14  ;;  %v4488_v14 = vld [vmem:[#allocation6 + $0x768] sm:$0xff] }
 0xffa   :  { %10831 = vmatprep.subr.bf16.mxu1 %v10830_v19 }
 0xffb   :  { %10861 = vmatpush3.bf16.msra.mxu0 %v10858_v41 }
 0xffd   :  { %10833 = vmatpush3.bf16.msra.mxu1 %v10830_v19  ;;  %v10862_v19 = vpack.c.bf16 %v4488_v14, %v4487_v29  ;;  %v4666_v29 = vld [vmem:[#allocation2 + $0x11a0] sm:$0xff]  ;;  %v4667_v14 = vld [vmem:[#allocation2 + $0x11a8] sm:$0xff] }
 0xffe   :  { %10835 = vmatprep.subr.bf16.mxu1 %v10834_v2 }
 0xfff   :  { %10863 = vmatprep.subr.bf16.mxu0 %v10862_v19 }
0x1000   :  { %10865 = vmatpush3.bf16.msra.mxu0 %v10862_v19 }
0x1001   :  { %10837 = vmatpush3.bf16.msra.mxu1 %v10834_v2  ;;  %v4640_v2 = vld [vmem:[#allocation2 + $0x10d0] sm:$0xff]  ;;  %10867 = vmatprep.subr.bf16.mxu0 %v10866_v3 }
0x1002   :  { %10871 = vmatprep.subr.bf16.mxu1 %v10870_v8  ;;  %v10892_v25 = vpack.c.bf16 %v4641_v50, %v4640_v2  ;;  %v4642_v8 = vld [vmem:[#allocation2 + $0x10e0] sm:$0xff]  ;;  %v10910_v50 = vpack.c.bf16 %v4667_v14, %v4666_v29 }
0x1003   :  { %v10896_v36 = vpack.c.bf16 %v4643_v34, %v4642_v8  ;;  %v4886_v14 = vld [vmem:[#allocation2 + $0x1220] sm:$0xff] }
0x1004   :  { %9225 = vmatmul.mubr.f32.vlgmr.msra.gmra.mrb[108].mxu1 %v12175_v49  ;;  %10869 = vmatpush3.bf16.msra.mxu0 %v10866_v3 }
0x1005   :  { %9227 = vmatprep.mubr.f32.mxu1 %v12180_v56  ;;  %10873 = vmatpush3.bf16.msra.mxu1 %v10872_v11  ;;  %v4662_v11 = vld [vmem:[#allocation2 + $0x1180] sm:$0xff] }
0x1006   :  { %10875 = vmatprep.subr.bf16.mxu1 %v10874_v24  ;;  %v10902_v15 = vpack.c.bf16 %v4663_v21, %v4662_v11  ;;  %v4644_v24 = vld [vmem:[#allocation2 + $0x10f0] sm:$0xff]  ;;  %v4670_v11 = vld [vmem:[#allocation2 + $0x11c0] sm:$0xff]  ;;  %v4671_v21 = vld [vmem:[#allocation2 + $0x11c8] sm:$0xff] }
0x1007   :  { %v10900_v43 = vpack.c.bf16 %v4645_v62, %v4644_v24  ;;  %v4674_v24 = vld [vmem:[#allocation2 + $0x11e0] sm:$0xff]  ;;  %v4675_v62 = vld [vmem:[#allocation2 + $0x11e8] sm:$0xff] }
0x1008   :  { %9228 = vmatmul.mubr.f32.gmra.mrb[110].mxu1 %v12183_v32  ;;  %10903 = vmatprep.subr.bf16.mxu0 %v10902_v15 }
0x1009   :  { %10877 = vmatpush3.bf16.msra.mxu1 %v10876_v33 }
0x100a   :  { %10879 = vmatprep.subr.bf16.mxu1 %v10878_v26 }
0x100d   :  { %10881 = vmatpush3.bf16.msra.mxu1 %v10880_v57 }
0x100e   :  { %10883 = vmatprep.subr.bf16.mxu1 %v10882_v61  ;;  %v4665_v61 = vld [vmem:[#allocation2 + $0x1198] sm:$0xff] }
0x1011   :  { %10885 = vmatpush3.bf16.msra.mxu1 %v10884_v4  ;;  %v10906_v4 = vpack.c.bf16 %v4665_v61, %v4664_v39  ;;  %v4915_v39 = vld [vmem:[#allocation2 + $0x1308] sm:$0xff] }
0x1012   :  { %10887 = vmatprep.subr.bf16.mxu1 %v10886_v12 }
0x1015   :  { %10889 = vmatpush3.bf16.msra.mxu1 %v10888_v20 }
0x1016   :  { %10891 = vmatprep.subr.bf16.mxu1 %v10890_v22 }
0x1019   :  { %10893 = vmatpush3.bf16.msra.mxu1 %v10892_v25  ;;  %v4668_v25 = vld [vmem:[#allocation2 + $0x11b0] sm:$0xff] }
0x101a   :  { %10895 = vmatprep.subr.bf16.mxu1 %v10894_v18  ;;  %v10914_v34 = vpack.c.bf16 %v4669_v27, %v4668_v25  ;;  %v4888_v27 = vld [vmem:[#allocation2 + $0x1230] sm:$0xff] }
0x101d   :  { %10897 = vmatpush3.bf16.msra.mxu1 %v10896_v36 }
0x101e   :  { %10899 = vmatprep.subr.bf16.mxu1 %v10898_v23  ;;  %v10922_v23 = vpack.c.bf16 %v4673_v42, %v4672_v40  ;;  %v4923_v40 = vld [vmem:[#allocation2 + $0x1348] sm:$0xff] }
0x1021   :  { %10901 = vmatpush3.bf16.msra.mxu1 %v10900_v43  ;;  %v10926_v43 = vpack.c.bf16 %v4675_v62, %v4674_v24  ;;  %v4908_v24 = vld [vmem:[#allocation2 + $0x12d0] sm:$0xff]  ;;  %v4909_v62 = vld [vmem:[#allocation2 + $0x12d8] sm:$0xff] }
0x10b7   :  { %v7724_v33 = vpop.f32.mrb[100].mxu1 }
0x10b8   :  { %v7725_v58 = vpop.f32.mrb[101].mxu1 }
0x10b9   :  { %v12215_v53 = vadd.f32 %v7725_v58, %v7724_v33  ;;  %v4676_v33 = vld [vmem:[#allocation2 + $0x11f0] sm:$0xff]  ;;  %v4677_v58 = vld [vmem:[#allocation2 + $0x11f8] sm:$0xff] }
0x10bb   :  { %v7727_v48 = vpop.f32.mrb[102].mxu1 }
0x10bc   :  { %v7728_v54 = vpop.f32.mrb[103].mxu1 }
0x10bd   :  { %v12217_v55 = vadd.f32 %v7728_v54, %v7727_v48  ;;  %v10930_v48 = vpack.c.bf16 %v4677_v58, %v4676_v33  ;;  %v4898_v54 = vld [vmem:[#allocation2 + $0x1280] sm:$0xff]  ;;  %v4892_v33 = vld [vmem:[#allocation2 + $0x1250] sm:$0xff]  ;;  %v4893_v58 = vld [vmem:[#allocation2 + $0x1258] sm:$0xff] }
0x10bf   :  { %v7730_v26 = vpop.f32.mrb[104].mxu1 }
0x10c0   :  { %v7731_v37 = vpop.f32.mrb[105].mxu1 }
0x10c1   :  { %v12219_v52 = vadd.f32 %v7731_v37, %v7730_v26  ;;  %v4899_v26 = vld [vmem:[#allocation2 + $0x1288] sm:$0xff] }
0x10c2   :  { %v10934_v37 = vpack.c.bf16 %v4899_v26, %v4898_v54  ;;  %v10956_v54 = vpack.c.bf16 %v4893_v58, %v4892_v33  ;;  %v4925_v26 = vld [vmem:[#allocation2 + $0x1358] sm:$0xff] }
0x10c3   :  { %v7733_v31 = vpop.f32.mrb[106].mxu1 }
0x10c4   :  { %v7734_v57 = vpop.f32.mrb[107].mxu1  ;;  %10935 = vmatprep.subr.bf16.mxu1 %v10934_v37 }
0x10c5   :  { %v12221_v59 = vadd.f32 %v7734_v57, %v7733_v31  ;;  %v4882_v31 = vld [vmem:[#allocation2 + $0x1200] sm:$0xff]  ;;  %v4883_v57 = vld [vmem:[#allocation2 + $0x1208] sm:$0xff] }
0x10d7   :  { %v9226_v38 = vpop.f32.mrb[108].mxu1 }
0x10d8   :  { %v4461_v0 = vadd.f32 %v9226_v38, %v6755_v60  ;;  %v4455_v1 = vpop.f32.mrb[109].mxu1  ;;  %v10936_v38 = vpack.c.bf16 %v4883_v57, %v4882_v31  ;;  %v4910_v31 = vld [vmem:[#allocation2 + $0x12e0] sm:$0xff]  ;;  %v4911_v57 = vld [vmem:[#allocation2 + $0x12e8] sm:$0xff] }
0x10d9   :  { %v4456_v16 = vadd.f32 %v6755_v60, %v4455_v1  ;;  %v4901_v1 = vld [vmem:[#allocation2 + $0x1298] sm:$0xff] }
0x10da   :  { %v4618_v5 = vrot.slane %v4461_v0, 1  ;;  %v4606_v7 = vrot.slane %v4461_v0, 7 }
0x10db   :  { %v4605_v9 = vrot.slane %v4456_v16, 7  ;;  %v9229_v41 = vpop.f32.mrb[110].mxu1  ;;  %9262 = vmatprep.mubr.f32.mxu0 %v4456_v16  ;;  %4747 = vmatprep.mubr.f32.mxu1 %v4456_v16  ;;  %v4617_v12 = vrot.slane %v4456_v16, 1 }
0x10dc   :  { %v4471_v10 = vadd.f32 %v9229_v41, %v6755_v60  ;;  %v4465_v13 = vpop.f32.mrb[111].mxu1  ;;  %9263 = vmatmul.mubr.f32.vlgmr.msra.gmra.mrb[64].mxu0 %v4461_v0  ;;  %v4917_v41 = vld [vmem:[#allocation2 + $0x1318] sm:$0xff] }
0x10dd   :  { %v4466_v63 = vadd.f32 %v6755_v60, %v4465_v13  ;;  %10905 = vmatpush3.bf16.msra.mxu0 %v10902_v15  ;;  %v4623_v17 = vsel %vm157_vm0, %v4617_v12, %v4618_v5  ;;  %v4611_v19 = vsel %vm144_vm1, %v4605_v9, %v4606_v7  ;;  %v10918_v15 = vpack.c.bf16 %v4671_v21, %v4670_v11  ;;  %v4914_v60 = vld [vmem:[#allocation2 + $0x1300] sm:$0xff]  ;;  %v4903_v13 = vld [vmem:[#allocation2 + $0x12a8] sm:$0xff] }
0x10de   :  { %v4608_v20 = vrot.slane %v4471_v10, 7  ;;  %10907 = vmatprep.subr.bf16.mxu0 %v10906_v4  ;;  %v4620_v22 = vrot.slane %v4471_v10, 1  ;;  %v10966_v61 = vpack.c.bf16 %v4915_v39, %v4914_v60  ;;  %v4891_v21 = vld [vmem:[#allocation2 + $0x1248] sm:$0xff]  ;;  %v10958_v60 = vpack.c.bf16 %v4911_v57, %v4910_v31 }
0x10df   :  { %v4619_v2 = vrot.slane %v4466_v63, 1  ;;  %9265 = vmatprep.mubr.f32.mxu0 %v4466_v63  ;;  %v4607_v6 = vrot.slane %v4466_v63, 7  ;;  %v4895_v39 = vld [vmem:[#allocation2 + $0x1268] sm:$0xff] }
0x10e0   :  { %9266 = vmatmul.mubr.f32.gmra.mrb[66].mxu0 %v4471_v10  ;;  %v4612_v3 = vsel %vm144_vm1, %v4608_v20, %v4605_v9  ;;  %v4624_v44 = vsel %vm157_vm0, %v4620_v22, %v4617_v12 }
0x10e1   :  { %10909 = vmatpush3.bf16.msra.mxu0 %v10906_v4  ;;  %6758 = vmatmul.mubr.msk.f32.vlgmr.msra.gmra.mrb[112].mxu1 %vm11801_vm2, %v4612_v3  ;;  %v4610_v28 = vsel %vm144_vm1, %v4606_v7, %v4607_v6  ;;  %v4609_v18 = vsel %vm144_vm1, %v4607_v6, %v4608_v20  ;;  %v4622_v8 = vsel %vm157_vm0, %v4618_v5, %v4619_v2  ;;  %v4884_v4 = vld [vmem:[#allocation2 + $0x1210] sm:$0xff]  ;;  %v4885_v5 = vld [vmem:[#allocation2 + $0x1218] sm:$0xff]  ;;  %v4919_v20 = vld [vmem:[#allocation2 + $0x1328] sm:$0xff] }
0x10e2   :  { %9300 = vmatprep.mubr.f32.mxu0 %v4623_v17  ;;  %4752 = vmatprep.mubr.f32.mxu1 %v4461_v0  ;;  %v4621_v36 = vsel %vm157_vm0, %v4619_v2, %v4620_v22  ;;  %v4900_v0 = vld [vmem:[#allocation2 + $0x1290] sm:$0xff]  ;;  %v10940_v9 = vpack.c.bf16 %v4885_v5, %v4884_v4  ;;  %v4918_v17 = vld [vmem:[#allocation2 + $0x1320] sm:$0xff]  ;;  %v4889_v6 = vld [vmem:[#allocation2 + $0x1238] sm:$0xff] }
0x10e3   :  { %10911 = vmatprep.subr.bf16.mxu0 %v10910_v50  ;;  %10937 = vmatpush3.bf16.msra.mxu1 %v10936_v38  ;;  %v10938_v16 = vpack.c.bf16 %v4901_v1, %v4900_v0  ;;  %v4916_v7 = vld [vmem:[#allocation2 + $0x1310] sm:$0xff]  ;;  %v10974_v22 = vpack.c.bf16 %v4919_v20, %v4918_v17  ;;  %v4894_v38 = vld [vmem:[#allocation2 + $0x1260] sm:$0xff]  ;;  %v4927_v1 = vld [vmem:[#allocation2 + $0x1368] sm:$0xff] }
0x10e4   :  { %v10970_v12 = vpack.c.bf16 %v4917_v41, %v4916_v7  ;;  %v4904_v2 = vld [vmem:[#allocation2 + $0x12b0] sm:$0xff]  ;;  %v10960_v0 = vpack.c.bf16 %v4895_v39, %v4894_v38  ;;  %v4913_v5 = vld [vmem:[#allocation2 + $0x12f8] sm:$0xff] }
0x10e5   :  { %10913 = vmatpush3.bf16.msra.mxu0 %v10910_v50  ;;  %4753 = vmatmul.mubr.f32.gmra.mrb[114].mxu1 %v4611_v19  ;;  %v4905_v50 = vld [vmem:[#allocation2 + $0x12b8] sm:$0xff]  ;;  %v4920_v3 = vld [vmem:[#allocation2 + $0x1330] sm:$0xff] }
0x10e6   :  { %4757 = vmatprep.mubr.f32.mxu1 %v4466_v63  ;;  %10915 = vmatprep.subr.bf16.mxu0 %v10914_v34  ;;  %v4887_v63 = vld [vmem:[#allocation2 + $0x1228] sm:$0xff]  ;;  %v10946_v25 = vpack.c.bf16 %v4905_v50, %v4904_v2  ;;  %v4912_v4 = vld [vmem:[#allocation2 + $0x12f0] sm:$0xff]  ;;  %v4897_v41 = vld [vmem:[#allocation2 + $0x1278] sm:$0xff] }
0x10e7   :  { %10939 = vmatprep.subr.bf16.mxu1 %v10938_v16  ;;  %v10944_v19 = vpack.c.bf16 %v4887_v63, %v4886_v14  ;;  %v10962_v7 = vpack.c.bf16 %v4913_v5, %v4912_v4  ;;  %v5110_v14 = vld [vmem:[#allocation6 + $0x780] sm:$0xff]  ;;  %v5111_v63 = vld [vmem:[#allocation6 + $0x788] sm:$0xff] }
0x10e8   :  { %10941 = vmatpush3.bf16.msra.mxu1 %v10940_v9  ;;  %v4896_v9 = vld [vmem:[#allocation2 + $0x1270] sm:$0xff]  ;;  %v12247_v17 = vpack.c.bf16 %v5111_v63, %v5110_v14 }
0x10e9   :  { %10917 = vmatpush3.bf16.msra.mxu0 %v10914_v34  ;;  %6759 = vmatmul.mubr.msk.f32.gmra.mrb[116].mxu1 %vm11834_vm5, %v4610_v28  ;;  %v4921_v28 = vld [vmem:[#allocation2 + $0x1338] sm:$0xff]  ;;  %v4907_v34 = vld [vmem:[#allocation2 + $0x12c8] sm:$0xff] }
0x10ea   :  { %4762 = vmatprep.mubr.f32.mxu1 %v4471_v10  ;;  %10919 = vmatprep.subr.bf16.mxu0 %v10918_v15  ;;  %v4902_v10 = vld [vmem:[#allocation2 + $0x12a0] sm:$0xff] }
0x10eb   :  { %v10942_v29 = vpack.c.bf16 %v4903_v13, %v4902_v10  ;;  %v10964_v10 = vpack.c.bf16 %v4897_v41, %v4896_v9  ;;  %v4929_v13 = vld [vmem:[#allocation2 + $0x1378] sm:$0xff] }
0x10ed   :  { %10921 = vmatpush3.bf16.msra.mxu0 %v10918_v15  ;;  %4763 = vmatmul.mubr.f32.gmra.mrb[118].mxu1 %v4609_v18  ;;  %v10978_v18 = vpack.c.bf16 %v4921_v28, %v4920_v3  ;;  %v4922_v15 = vld [vmem:[#allocation2 + $0x1340] sm:$0xff] }
0x10ee   :  { %10923 = vmatprep.subr.bf16.mxu0 %v10922_v23  ;;  %10943 = vmatprep.subr.bf16.mxu1 %v10942_v29 }
0x10ef   :  { %10945 = vmatpush3.bf16.msra.mxu1 %v10944_v19  ;;  %v6756_v19 = vld [vmem:[#allocation7 + $0xe] ss:$0 sm:$0xff] }
0x10f0   :  { %10947 = vmatprep.subr.bf16.mxu1 %v10946_v25 }
0x10f1   :  { %10925 = vmatpush3.bf16.msra.mxu0 %v10922_v23  ;;  %v10982_v23 = vpack.c.bf16 %v4923_v40, %v4922_v15 }
0x10f2   :  { %10927 = vmatprep.subr.bf16.mxu0 %v10926_v43 }
0x10f5   :  { %10929 = vmatpush3.bf16.msra.mxu0 %v10926_v43  ;;  %v10954_v43 = vpack.c.bf16 %v4909_v62, %v4908_v24 }
0x10f6   :  { %10931 = vmatprep.subr.bf16.mxu0 %v10930_v48 }
0x10f9   :  { %10933 = vmatpush3.bf16.msra.mxu0 %v10930_v48  ;;  %v4924_v48 = vld [vmem:[#allocation2 + $0x1350] sm:$0xff] }
0x10fa   :  { %10967 = vmatprep.subr.bf16.mxu0 %v10966_v61  ;;  %v10986_v37 = vpack.c.bf16 %v4925_v26, %v4924_v48 }
0x10fc   :  { %9301 = vmatmul.mubr.msk.f32.vlgmr.msra.gmra.mrb[68].mxu0 %vm11809_vm3, %v4622_v8  ;;  %v4906_v8 = vld [vmem:[#allocation2 + $0x12c0] sm:$0xff] }
0x10fd   :  { %9303 = vmatprep.mubr.f32.mxu0 %v4621_v36  ;;  %10969 = vmatpush3.bf16.msra.mxu0 %v10966_v61  ;;  %v4890_v36 = vld [vmem:[#allocation2 + $0x1240] sm:$0xff]  ;;  %v10950_v11 = vpack.c.bf16 %v4907_v34, %v4906_v8 }
0x10fe   :  { %10971 = vmatprep.subr.bf16.mxu0 %v10970_v12  ;;  %v10952_v42 = vpack.c.bf16 %v4891_v21, %v4890_v36  ;;  %v4926_v61 = vld [vmem:[#allocation2 + $0x1360] sm:$0xff] }
0x10ff   :  { %v10990_v16 = vpack.c.bf16 %v4927_v1, %v4926_v61  ;;  %v6757_v1 = vld [vmem:[#allocation4 + $0xb] ss:$0 sm:$0xff] }
0x1100   :  { %9304 = vmatmul.mubr.msk.f32.gmra.mrb[70].mxu0 %vm11826_vm4, %v4624_v44  ;;  %v10948_v44 = vpack.c.bf16 %v4889_v6, %v4888_v27 }
0x1101   :  { %10973 = vmatpush3.bf16.msra.mxu0 %v10970_v12  ;;  %v4928_v12 = vld [vmem:[#allocation2 + $0x1370] sm:$0xff] }
0x1102   :  { %10975 = vmatprep.subr.bf16.mxu0 %v10974_v22  ;;  %10949 = vmatpush3.bf16.msra.mxu1 %v10948_v44  ;;  %v10994_v29 = vpack.c.bf16 %v4929_v13, %v4928_v12 }
0x1103   :  { %10951 = vmatprep.subr.bf16.mxu1 %v10950_v11 }
0x1105   :  { %10977 = vmatpush3.bf16.msra.mxu0 %v10974_v22 }
0x1106   :  { %10979 = vmatprep.subr.bf16.mxu0 %v10978_v18  ;;  %10953 = vmatpush3.bf16.msra.mxu1 %v10952_v42 }
0x1107   :  { %10955 = vmatprep.subr.bf16.mxu1 %v10954_v43 }
0x1109   :  { %10981 = vmatpush3.bf16.msra.mxu0 %v10978_v18 }
0x110a   :  { %10983 = vmatprep.subr.bf16.mxu0 %v10982_v23  ;;  %10957 = vmatpush3.bf16.msra.mxu1 %v10956_v54 }
0x110b   :  { %10959 = vmatprep.subr.bf16.mxu1 %v10958_v60 }
0x110d   :  { %10985 = vmatpush3.bf16.msra.mxu0 %v10982_v23 }
0x110e   :  { %10987 = vmatprep.subr.bf16.mxu0 %v10986_v37  ;;  %10961 = vmatpush3.bf16.msra.mxu1 %v10960_v0 }
0x110f   :  { %10963 = vmatprep.subr.bf16.mxu1 %v10962_v7 }
0x1111   :  { %10989 = vmatpush3.bf16.msra.mxu0 %v10986_v37 }
0x1112   :  { %10991 = vmatprep.subr.bf16.mxu0 %v10990_v16  ;;  %10965 = vmatpush3.bf16.msra.mxu1 %v10964_v10 }
0x1113   :  { %10999 = vmatprep.subr.bf16.mxu1 %v12247_v17 }
0x1115   :  { %10993 = vmatpush3.bf16.msra.mxu0 %v10990_v16 }
0x1116   :  { %10995 = vmatprep.subr.bf16.mxu0 %v10994_v29 }
0x1119   :  { %10997 = vmatpush3.bf16.msra.mxu0 %v10994_v29 }
0x11af   :  { %v9264_v20 = vpop.f32.mrb[64].mxu0 }
0x11b0   :  { %v4568_v22 = vadd.f32 %v9264_v20, %v6756_v19  ;;  %v4562_v2 = vpop.f32.mrb[65].mxu0 }
0x11b1   :  { %v4563_v50 = vadd.f32 %v6756_v19, %v4562_v2 }
0x11b2   :  { %v4582_v25 = vsub.f32 0.0, %v4568_v22 }
0x11b3   :  { %v4581_v27 = vsub.f32 0.0, %v4563_v50  ;;  %v9267_v6 = vpop.f32.mrb[66].mxu0 }
0x11b4   :  { %v4587_v3 = vmul.f32 1.442695, %v4582_v25  ;;  %v4578_v44 = vadd.f32 %v9267_v6, %v6756_v19  ;;  %v4572_v28 = vpop.f32.mrb[67].mxu0  ;;  %v7828_v18 = vpop.f32.mrb[112].mxu1 }
0x11b5   :  { %v4585_v8 = vmul.f32 1.442695, %v4581_v27  ;;  %v4573_v34 = vadd.f32 %v6756_v19, %v4572_v28  ;;  %v7829_v36 = vpop.f32.mrb[113].mxu1 }
0x11b6   :  { %11528 = vpow2.f32 %v4587_v3  ;;  %v4584_v11 = vsub.f32 0.0, %v4578_v44  ;;  %v7830_v21 = vadd.f32 %v7829_v36, %v7828_v18  ;;  %v5112_v36 = vld [vmem:[#allocation6 + $0x790] sm:$0xff] }
0x11b7   :  { %11530 = vpow2.f32 %v4585_v8  ;;  %v4583_v15 = vsub.f32 0.0, %v4573_v34 }
0x11b8   :  { %v4591_v40 = vmul.f32 1.442695, %v4584_v11  ;;  %v7831_v42 = vpop.f32.mrb[114].mxu1  ;;  %v4750_v5 = vadd.f32 %v7830_v21, %v6757_v1  ;;  %v5113_v11 = vld [vmem:[#allocation6 + $0x798] sm:$0xff] }
0x11b9   :  { %v4589_v23 = vmul.f32 1.442695, %v4583_v15  ;;  %v7832_v24 = vpop.f32.mrb[115].mxu1 }
0x11ba   :  { %11532 = vpow2.f32 %v4591_v40  ;;  %v7833_v62 = vadd.f32 %v7832_v24, %v7831_v42 }
0x11bb   :  { %11534 = vpow2.f32 %v4589_v23 }
0x11bc   :  { %v7834_v43 = vpop.f32.mrb[116].mxu1  ;;  %v4755_v16 = vadd.f32 %v7833_v62, %v6757_v1  ;;  %v11002_v62 = vpack.c.bf16 %v5113_v11, %v5112_v36 }
0x11bd   :  { %v7835_v33 = vpop.f32.mrb[117].mxu1 }
0x11be   :  { %v7836_v58 = vadd.f32 %v7835_v33, %v7834_v43 }
0x11c0   :  { %v11529_v48 = vpop.eup %11528  ;;  %v7837_v54 = vpop.f32.mrb[118].mxu1  ;;  %v4760_v19 = vadd.f32 %v7836_v58, %v6757_v1 }
0x11c1   :  { %v11531_v26 = vpop.eup %11530  ;;  %v7838_v37 = vpop.f32.mrb[119].mxu1  ;;  %v4594_v57 = vadd.f32 1.0, %v11529_v48 }
0x11c2   :  { %v7839_v31 = vadd.f32 %v7838_v37, %v7837_v54  ;;  %v4593_v38 = vadd.f32 1.0, %v11531_v26  ;;  %v5114_v54 = vld [vmem:[#allocation6 + $0x7a0] sm:$0xff]  ;;  %v5115_v26 = vld [vmem:[#allocation6 + $0x7a8] sm:$0xff] }
0x11c3   :  { %11536 = vrcp.f32 %v4594_v57  ;;  %v11006_v37 = vpack.c.bf16 %v5115_v26, %v5114_v54  ;;  %v5117_v57 = vld [vmem:[#allocation6 + $0x7b8] sm:$0xff] }
0x11c4   :  { %v11533_v60 = vpop.eup %11532  ;;  %11538 = vrcp.f32 %v4593_v38  ;;  %v4765_v29 = vadd.f32 %v7839_v31, %v6757_v1  ;;  %v5116_v31 = vld [vmem:[#allocation6 + $0x7b0] sm:$0xff]  ;;  %v5118_v38 = vld [vmem:[#allocation6 + $0x7c0] sm:$0xff] }
0x11c5   :  { %v11535_v39 = vpop.eup %11534  ;;  %v4596_v61 = vadd.f32 1.0, %v11533_v60  ;;  %v11010_v60 = vpack.c.bf16 %v5117_v57, %v5116_v31 }
0x11c6   :  { %v4595_v0 = vadd.f32 1.0, %v11535_v39  ;;  %v5119_v39 = vld [vmem:[#allocation6 + $0x7c8] sm:$0xff] }
0x11c7   :  { %11540 = vrcp.f32 %v4596_v61  ;;  %v5120_v61 = vld [vmem:[#allocation6 + $0x7d0] sm:$0xff] }
0x11c8   :  { %11542 = vrcp.f32 %v4595_v0  ;;  %v5121_v0 = vld [vmem:[#allocation6 + $0x7d8] sm:$0xff] }
0x11c9   :  { %v11018_v1 = vpack.c.bf16 %v5121_v0, %v5120_v61 }
0x11cd   :  { %v11537_v41 = vpop.eup %11536 }
0x11ce   :  { %v11539_v10 = vpop.eup %11538 }
0x11cf   :  { %v9302_v4 = vpop.f32.mrb[68].mxu0 }
0x11d0   :  { %v4840_v7 = vadd.f32 %v9302_v4, %v4755_v16  ;;  %v4834_v9 = vpop.f32.mrb[69].mxu0  ;;  %v5122_v16 = vld [vmem:[#allocation6 + $0x7e0] sm:$0xff]  ;;  %v5123_v4 = vld [vmem:[#allocation6 + $0x7e8] sm:$0xff] }
0x11d1   :  { %v4835_v12 = vadd.f32 %v4834_v9, %v4750_v5  ;;  %v11541_v25 = vpop.eup %11540  ;;  %v11022_v5 = vpack.c.bf16 %v5123_v4, %v5122_v16  ;;  %v5125_v9 = vld [vmem:[#allocation6 + $0x7f8] sm:$0xff] }
0x11d2   :  { %v4854_v13 = vmul.f32 %v11537_v41, %v4840_v7  ;;  %v11543_v44 = vpop.eup %11542  ;;  %v5124_v7 = vld [vmem:[#allocation6 + $0x7f0] sm:$0xff] }
0x11d3   :  { %v4853_v14 = vmul.f32 %v11539_v10, %v4835_v12  ;;  %v9305_v63 = vpop.f32.mrb[70].mxu0  ;;  %v11026_v41 = vpack.c.bf16 %v5125_v9, %v5124_v7  ;;  %v5221_v12 = vld [vmem:[#allocation6 + $0x800] sm:$0xff]  ;;  %v5222_v10 = vld [vmem:[#allocation6 + $0x808] sm:$0xff] }
0x11d4   :  { %v4850_v20 = vadd.f32 %v9305_v63, %v4765_v29  ;;  %v4844_v22 = vpop.f32.mrb[71].mxu0  ;;  %v4870_v2 = vrot.slane %v4854_v13, 1  ;;  %v4858_v50 = vrot.slane %v4854_v13, 7  ;;  %v11030_v29 = vpack.c.bf16 %v5222_v10, %v5221_v12 }
0x11d5   :  { %v4857_v27 = vrot.slane %v4853_v14, 7  ;;  %v4845_v6 = vadd.f32 %v4844_v22, %v4760_v19  ;;  %4999 = vmatprep.mubr.f32.mxu1 %v4853_v14  ;;  %v4869_v3 = vrot.slane %v4853_v14, 1  ;;  %v5224_v14 = vld [vmem:[#allocation6 + $0x818] sm:$0xff]  ;;  %v5225_v19 = vld [vmem:[#allocation6 + $0x820] sm:$0xff] }
0x11d6   :  { %v4856_v28 = vmul.f32 %v11541_v25, %v4850_v20  ;;  %v5226_v20 = vld [vmem:[#allocation6 + $0x828] sm:$0xff]  ;;  %11031 = vmatprep.subr.bf16.mxu0 %v11030_v29 }
0x11d7   :  { %v4855_v18 = vmul.f32 %v11543_v44, %v4845_v6  ;;  %v4875_v8 = vsel %vm157_vm0, %v4869_v3, %v4870_v2  ;;  %v4863_v34 = vsel %vm144_vm1, %v4857_v27, %v4858_v50  ;;  %v11038_v22 = vpack.c.bf16 %v5226_v20, %v5225_v19  ;;  %v5230_v6 = vld [vmem:[#allocation6 + $0x848] sm:$0xff]  ;;  %v5231_v44 = vld [vmem:[#allocation6 + $0x850] sm:$0xff] }
0x11d8   :  { %v4860_v21 = vrot.slane %v4856_v28, 7  ;;  %9338 = vmatprep.mubr.f32.mxu0 %v4875_v8  ;;  %v4872_v15 = vrot.slane %v4856_v28, 1  ;;  %v5233_v8 = vld [vmem:[#allocation6 + $0x860] sm:$0xff]  ;;  %v5352_v19 = vld [vmem:[#allocation2 + $0x1380] sm:$0xff] }
0x11d9   :  { %v4859_v40 = vrot.slane %v4855_v18, 7  ;;  %v4871_v42 = vrot.slane %v4855_v18, 1 }
0x11da   :  { %v4864_v23 = vsel %vm144_vm1, %v4860_v21, %v4857_v27  ;;  %v4876_v24 = vsel %vm157_vm0, %v4872_v15, %v4869_v3  ;;  %v5229_v27 = vld [vmem:[#allocation6 + $0x840] sm:$0xff] }
0x11db   :  { %6763 = vmatmul.mubr.msk.f32.vlgmr.msra.gmra.mrb[120].mxu1 %vm11801_vm2, %v4864_v23  ;;  %v4874_v43 = vsel %vm157_vm0, %v4870_v2, %v4871_v42  ;;  %v4873_v33 = vsel %vm157_vm0, %v4871_v42, %v4872_v15  ;;  %v4862_v58 = vsel %vm144_vm1, %v4858_v50, %v4859_v40  ;;  %v4861_v48 = vsel %vm144_vm1, %v4859_v40, %v4860_v21  ;;  %v5227_v2 = vld [vmem:[#allocation6 + $0x830] sm:$0xff]  ;;  %v5228_v50 = vld [vmem:[#allocation6 + $0x838] sm:$0xff] }
0x11dc   :  { %5004 = vmatprep.mubr.f32.mxu1 %v4854_v13  ;;  %9339 = vmatmul.mubr.msk.f32.vlgmr.msra.gmra.mrb[60].mxu0 %vm11809_vm3, %v4874_v43  ;;  %v5223_v13 = vld [vmem:[#allocation6 + $0x810] sm:$0xff]  ;;  %v11042_v25 = vpack.c.bf16 %v5228_v50, %v5227_v2  ;;  %v11046_v3 = vpack.c.bf16 %v5230_v6, %v5229_v27  ;;  %v5384_v2 = vld [vmem:[#allocation2 + $0x1480] sm:$0xff]  ;;  %v5370_v27 = vld [vmem:[#allocation2 + $0x1410] sm:$0xff] }
0x11dd   :  { %9341 = vmatprep.mubr.f32.mxu0 %v4873_v33  ;;  %11001 = vmatpush3.bf16.msra.mxu1 %v12247_v17  ;;  %v11014_v17 = vpack.c.bf16 %v5119_v39, %v5118_v38  ;;  %v11034_v63 = vpack.c.bf16 %v5224_v14, %v5223_v13  ;;  %v6750_v21 = vld [vmem:[#allocation4 + $0xa] ss:$0 sm:$0xff]  ;;  %v6762_v15 = vld [vmem:[#allocation4 + $0xc] ss:$0 sm:$0xff]  ;;  %v5371_v6 = vld [vmem:[#allocation2 + $0x1418] sm:$0xff] }
0x11de   :  { %11003 = vmatprep.subr.bf16.mxu1 %v11002_v62  ;;  %11033 = vmatpush3.bf16.msra.mxu0 %v11030_v29  ;;  %v4269_v31 = vadd.f32 %v12217_v55, %v6750_v21  ;;  %v4274_v0 = vadd.f32 %v12219_v52, %v6750_v21  ;;  %v4279_v9 = vadd.f32 %v12221_v59, %v6750_v21  ;;  %v5235_v13 = vld [vmem:[#allocation6 + $0x870] sm:$0xff]  ;;  %v5236_v29 = vld [vmem:[#allocation6 + $0x878] sm:$0xff]  ;;  %v5368_v52 = vld [vmem:[#allocation2 + $0x1400] sm:$0xff] }
0x11df   :  { %5005 = vmatmul.mubr.f32.gmra.mrb[122].mxu1 %v4863_v34  ;;  %11035 = vmatprep.subr.bf16.mxu0 %v11034_v63  ;;  %v5234_v34 = vld [vmem:[#allocation6 + $0x868] sm:$0xff]  ;;  %v11058_v14 = vpack.c.bf16 %v5236_v29, %v5235_v13  ;;  %v5385_v50 = vld [vmem:[#allocation2 + $0x1488] sm:$0xff] }
0x11e0   :  { %5009 = vmatprep.mubr.f32.mxu1 %v4855_v18  ;;  %9342 = vmatmul.mubr.msk.f32.gmra.mrb[62].mxu0 %vm11826_vm4, %v4876_v24  ;;  %v11054_v36 = vpack.c.bf16 %v5234_v34, %v5233_v8  ;;  %v11094_v59 = vpack.c.bf16 %v5385_v50, %v5384_v2  ;;  %v5372_v8 = vld [vmem:[#allocation2 + $0x1420] sm:$0xff]  ;;  %v5373_v34 = vld [vmem:[#allocation2 + $0x1428] sm:$0xff]  ;;  %v5394_v2 = vld [vmem:[#allocation2 + $0x14d0] sm:$0xff] }
0x11e1   :  { %11005 = vmatpush3.bf16.msra.mxu1 %v11002_v62  ;;  %v4264_v62 = vadd.f32 %v12215_v53, %v6750_v21  ;;  %v5357_v21 = vld [vmem:[#allocation2 + $0x13a8] sm:$0xff]  ;;  %v5392_v29 = vld [vmem:[#allocation2 + $0x14c0] sm:$0xff]  ;;  %v5395_v50 = vld [vmem:[#allocation2 + $0x14d8] sm:$0xff] }
0x11e2   :  { %11007 = vmatprep.subr.bf16.mxu1 %v11006_v37  ;;  %11037 = vmatpush3.bf16.msra.mxu0 %v11034_v63  ;;  %v5369_v63 = vld [vmem:[#allocation2 + $0x1408] sm:$0xff] }
0x11e3   :  { %6764 = vmatmul.mubr.msk.f32.gmra.mrb[124].mxu1 %vm11834_vm5, %v4862_v58  ;;  %11039 = vmatprep.subr.bf16.mxu0 %v11038_v22  ;;  %v11062_v20 = vpack.c.bf16 %v5369_v63, %v5368_v52  ;;  %v5379_v63 = vld [vmem:[#allocation2 + $0x1458] sm:$0xff] }
0x11e4   :  { %5014 = vmatprep.mubr.f32.mxu1 %v4856_v28  ;;  %v5232_v28 = vld [vmem:[#allocation6 + $0x858] sm:$0xff] }
0x11e5   :  { %11009 = vmatpush3.bf16.msra.mxu1 %v11006_v37  ;;  %v11050_v18 = vpack.c.bf16 %v5232_v28, %v5231_v44  ;;  %v11066_v44 = vpack.c.bf16 %v5371_v6, %v5370_v27  ;;  %v5355_v28 = vld [vmem:[#allocation2 + $0x1398] sm:$0xff]  ;;  %v5381_v27 = vld [vmem:[#allocation2 + $0x1468] sm:$0xff] }
0x11e6   :  { %11011 = vmatprep.subr.bf16.mxu1 %v11010_v60  ;;  %11041 = vmatpush3.bf16.msra.mxu0 %v11038_v22  ;;  %v5353_v22 = vld [vmem:[#allocation2 + $0x1388] sm:$0xff] }
0x11e7   :  { %5015 = vmatmul.mubr.f32.gmra.mrb[126].mxu1 %v4861_v48  ;;  %11043 = vmatprep.subr.bf16.mxu0 %v11042_v25 }
0x11e9   :  { %11013 = vmatpush3.bf16.msra.mxu1 %v11010_v60 }
0x11ea   :  { %11015 = vmatprep.subr.bf16.mxu1 %v11014_v17  ;;  %11045 = vmatpush3.bf16.msra.mxu0 %v11042_v25  ;;  %v11064_v25 = vpack.c.bf16 %v5353_v22, %v5352_v19 }
0x11eb   :  { %11047 = vmatprep.subr.bf16.mxu0 %v11046_v3 }
0x11ed   :  { %11017 = vmatpush3.bf16.msra.mxu1 %v11014_v17 }
0x11ee   :  { %11019 = vmatprep.subr.bf16.mxu1 %v11018_v1  ;;  %11049 = vmatpush3.bf16.msra.mxu0 %v11046_v3  ;;  %v5354_v3 = vld [vmem:[#allocation2 + $0x1390] sm:$0xff] }
0x11ef   :  { %11051 = vmatprep.subr.bf16.mxu0 %v11050_v18 }
0x11f1   :  { %11021 = vmatpush3.bf16.msra.mxu1 %v11018_v1 }
0x11f2   :  { %11023 = vmatprep.subr.bf16.mxu1 %v11022_v5  ;;  %11053 = vmatpush3.bf16.msra.mxu0 %v11050_v18  ;;  %v11068_v18 = vpack.c.bf16 %v5355_v28, %v5354_v3  ;;  %v5364_v3 = vld [vmem:[#allocation2 + $0x13e0] sm:$0xff] }
0x11f3   :  { %11055 = vmatprep.subr.bf16.mxu0 %v11054_v36 }
0x11f5   :  { %11025 = vmatpush3.bf16.msra.mxu1 %v11022_v5 }
0x11f6   :  { %11027 = vmatprep.subr.bf16.mxu1 %v11026_v41  ;;  %11057 = vmatpush3.bf16.msra.mxu0 %v11054_v36  ;;  %v11070_v36 = vpack.c.bf16 %v5373_v34, %v5372_v8  ;;  %v5397_v8 = vld [vmem:[#allocation2 + $0x14e8] sm:$0xff] }
0x11f7   :  { %11059 = vmatprep.subr.bf16.mxu0 %v11058_v14 }
0x11f9   :  { %11029 = vmatpush3.bf16.msra.mxu1 %v11026_v41 }
0x11fa   :  { %11061 = vmatpush3.bf16.msra.mxu0 %v11058_v14  ;;  %11063 = vmatprep.subr.bf16.mxu1 %v11062_v20  ;;  %v5393_v14 = vld [vmem:[#allocation2 + $0x14c8] sm:$0xff]  ;;  %v5362_v20 = vld [vmem:[#allocation2 + $0x13d0] sm:$0xff] }
0x11fb   :  { %11095 = vmatprep.subr.bf16.mxu0 %v11094_v59  ;;  %v11110_v52 = vpack.c.bf16 %v5393_v14, %v5392_v29 }
0x12ae   :  { %v7892_v11 = vpop.f32.mrb[120].mxu1 }
0x12af   :  { %v7893_v40 = vpop.f32.mrb[121].mxu1  ;;  %v9340_v42 = vpop.f32.mrb[60].mxu0 }
0x12b0   :  { %v7894_v23 = vadd.f32 %v7893_v40, %v7892_v11  ;;  %v5086_v24 = vpop.f32.mrb[61].mxu0  ;;  %v5356_v11 = vld [vmem:[#allocation2 + $0x13a0] sm:$0xff]  ;;  %v5375_v40 = vld [vmem:[#allocation2 + $0x1438] sm:$0xff] }
0x12b2   :  { %v5002_v43 = vadd.f32 %v7894_v23, %v6762_v15  ;;  %v7895_v33 = vpop.f32.mrb[122].mxu1 }
0x12b3   :  { %v7896_v58 = vpop.f32.mrb[123].mxu1  ;;  %v9343_v48 = vpop.f32.mrb[62].mxu0 }
0x12b4   :  { %v11440_v54 = vadd.f32 %v5002_v43, %v4264_v62  ;;  %v7897_v26 = vadd.f32 %v7896_v58, %v7895_v33  ;;  %v5096_v37 = vpop.f32.mrb[63].mxu0  ;;  %v5359_v62 = vld [vmem:[#allocation2 + $0x13b8] sm:$0xff]  ;;  %v5376_v43 = vld [vmem:[#allocation2 + $0x1440] sm:$0xff]  ;;  %v5377_v33 = vld [vmem:[#allocation2 + $0x1448] sm:$0xff] }
0x12b6   :  { %v11441_v57 = vadd.f32 %v11440_v54, %v5086_v24  ;;  %v5007_v60 = vadd.f32 %v7897_v26, %v6762_v15  ;;  %v7898_v38 = vpop.f32.mrb[124].mxu1  ;;  %v5358_v24 = vld [vmem:[#allocation2 + $0x13b0] sm:$0xff]  ;;  %v5360_v54 = vld [vmem:[#allocation2 + $0x13c0] sm:$0xff]  ;;  %v5361_v26 = vld [vmem:[#allocation2 + $0x13c8] sm:$0xff] }
0x12b7   :  { %v7899_v39 = vpop.f32.mrb[125].mxu1  ;;  %v11076_v58 = vpack.c.bf16 %v5359_v62, %v5358_v24  ;;  %v5399_v24 = vld [vmem:[#allocation2 + $0x14f8] sm:$0xff] }
0x12b8   :  { %v11438_v17 = vadd.f32 %v5007_v60, %v4269_v31  ;;  %v7900_v61 = vadd.f32 %v7899_v39, %v7898_v38  ;;  %9376 = vmatprep.mubr.f32.mxu1 %v11441_v57  ;;  %v6767_v31 = vld [vmem:[#allocation7 + $0xf] ss:$0 sm:$0xff] }
0x12ba   :  { %v11439_v1 = vadd.f32 %v11438_v17, %v9340_v42  ;;  %v5012_v53 = vadd.f32 %v7900_v61, %v6762_v15  ;;  %v7901_v16 = vpop.f32.mrb[126].mxu1  ;;  %v11072_v42 = vpack.c.bf16 %v5357_v21, %v5356_v11  ;;  %v5386_v17 = vld [vmem:[#allocation2 + $0x1490] sm:$0xff]  ;;  %v5387_v61 = vld [vmem:[#allocation2 + $0x1498] sm:$0xff] }
0x12bb   :  { %v7902_v4 = vpop.f32.mrb[127].mxu1  ;;  %v5383_v11 = vld [vmem:[#allocation2 + $0x1478] sm:$0xff] }
0x12bc   :  { %v11444_v5 = vadd.f32 %v5012_v53, %v4274_v0  ;;  %v7903_v7 = vadd.f32 %v7902_v4, %v7901_v16  ;;  %9377 = vmatmul.mubr.f32.vlgmr.msra.gmra.mrb[128].mxu1 %v11439_v1  ;;  %v11098_v53 = vpack.c.bf16 %v5387_v61, %v5386_v17  ;;  %v5388_v16 = vld [vmem:[#allocation2 + $0x14a0] sm:$0xff]  ;;  %v5389_v4 = vld [vmem:[#allocation2 + $0x14a8] sm:$0xff] }
0x12bd   :  { %11065 = vmatpush3.bf16.msra.mxu1 %v11064_v25  ;;  %v11114_v25 = vpack.c.bf16 %v5395_v50, %v5394_v2  ;;  %v5582_v2 = vld [vmem:[#allocation6 + $0x8b0] sm:$0xff]  ;;  %v5583_v50 = vld [vmem:[#allocation6 + $0x8b8] sm:$0xff] }
0x12be   :  { %v5017_v41 = vadd.f32 %v7903_v7, %v6762_v15  ;;  %v11445_v55 = vadd.f32 %v11444_v5, %v5096_v37  ;;  %11067 = vmatprep.subr.bf16.mxu1 %v11066_v44  ;;  %v5374_v15 = vld [vmem:[#allocation2 + $0x1430] sm:$0xff]  ;;  %v11080_v37 = vpack.c.bf16 %v5361_v26, %v5360_v54  ;;  %v5365_v44 = vld [vmem:[#allocation2 + $0x13e8] sm:$0xff] }
0x12bf   :  { %v11074_v23 = vpack.c.bf16 %v5375_v40, %v5374_v15  ;;  %v11088_v28 = vpack.c.bf16 %v5365_v44, %v5364_v3  ;;  %v5366_v15 = vld [vmem:[#allocation2 + $0x13f0] sm:$0xff]  ;;  %v5367_v40 = vld [vmem:[#allocation2 + $0x13f8] sm:$0xff]  ;;  %v5586_v3 = vld [vmem:[#allocation6 + $0x8d0] sm:$0xff] }
0x12c0   :  { %v11442_v12 = vadd.f32 %v5017_v41, %v4279_v9  ;;  %9379 = vmatprep.mubr.f32.mxu1 %v11445_v55  ;;  %v11102_v41 = vpack.c.bf16 %v5389_v4, %v5388_v16  ;;  %v5587_v44 = vld [vmem:[#allocation6 + $0x8d8] sm:$0xff] }
0x12c1   :  { %11069 = vmatpush3.bf16.msra.mxu1 %v11068_v18  ;;  %v5396_v18 = vld [vmem:[#allocation2 + $0x14e0] sm:$0xff] }
0x12c2   :  { %v11443_v10 = vadd.f32 %v11442_v12, %v9343_v48  ;;  %11071 = vmatprep.subr.bf16.mxu1 %v11070_v36  ;;  %v11078_v48 = vpack.c.bf16 %v5377_v33, %v5376_v43  ;;  %v5390_v12 = vld [vmem:[#allocation2 + $0x14b0] sm:$0xff]  ;;  %v11118_v34 = vpack.c.bf16 %v5397_v8, %v5396_v18  ;;  %v5576_v43 = vld [vmem:[#allocation6 + $0x880] sm:$0xff]  ;;  %v5577_v33 = vld [vmem:[#allocation6 + $0x888] sm:$0xff] }
0x12c3   :  { %v5382_v36 = vld [vmem:[#allocation2 + $0x1470] sm:$0xff]  ;;  %v5588_v18 = vld [vmem:[#allocation6 + $0x8e0] sm:$0xff]  ;;  %v5589_v8 = vld [vmem:[#allocation6 + $0x8e8] sm:$0xff] }
0x12c4   :  { %9380 = vmatmul.mubr.f32.gmra.mrb[130].mxu1 %v11443_v10  ;;  %v11090_v21 = vpack.c.bf16 %v5383_v11, %v5382_v36  ;;  %v5590_v36 = vld [vmem:[#allocation6 + $0x8f0] sm:$0xff]  ;;  %v5591_v11 = vld [vmem:[#allocation6 + $0x8f8] sm:$0xff] }
0x12c5   :  { %11073 = vmatpush3.bf16.msra.mxu1 %v11072_v42  ;;  %v11092_v42 = vpack.c.bf16 %v5367_v40, %v5366_v15  ;;  %v5683_v15 = vld [vmem:[#allocation6 + $0x900] sm:$0xff]  ;;  %v5684_v40 = vld [vmem:[#allocation6 + $0x908] sm:$0xff] }
0x12c6   :  { %11075 = vmatprep.subr.bf16.mxu1 %v11074_v23  ;;  %v5398_v23 = vld [vmem:[#allocation2 + $0x14f0] sm:$0xff] }
0x12c7   :  { %v11122_v62 = vpack.c.bf16 %v5399_v24, %v5398_v23  ;;  %v5685_v23 = vld [vmem:[#allocation6 + $0x910] sm:$0xff]  ;;  %v5686_v24 = vld [vmem:[#allocation6 + $0x918] sm:$0xff] }
0x12c9   :  { %11077 = vmatpush3.bf16.msra.mxu1 %v11076_v58  ;;  %v11126_v58 = vpack.c.bf16 %v5577_v33, %v5576_v43  ;;  %v5854_v43 = vld [vmem:[#allocation2 + $0x1580] sm:$0xff]  ;;  %v5855_v33 = vld [vmem:[#allocation2 + $0x1588] sm:$0xff] }
0x12ca   :  { %11079 = vmatprep.subr.bf16.mxu1 %v11078_v48  ;;  %v6768_v48 = vld [vmem:[#allocation7 + $0x10] ss:$0 sm:$0xff] }
0x12cd   :  { %11081 = vmatpush3.bf16.msra.mxu1 %v11080_v37 }
0x138f   :  { %v9378_v57 = vpop.f32.mrb[128].mxu1 }
0x1390   :  { %v5203_v60 = vadd.f32 %v9378_v57, %v6767_v31  ;;  %v5197_v38 = vpop.f32.mrb[129].mxu1 }
0x1391   :  { %v5198_v39 = vadd.f32 %v6767_v31, %v5197_v38 }
0x1392   :  { %v12283_v1 = vadd.f32 %v5203_v60, %v12175_v49 }
0x1393   :  { %v12280_v0 = vadd.f32 %v5198_v39, %v12172_v47  ;;  %v5391_v47 = vld [vmem:[#allocation2 + $0x14b8] sm:$0xff] }
0x1394   :  { %v11106_v13 = vpack.c.bf16 %v5391_v47, %v5390_v12 }
0x1395   :  { %9414 = vmatprep.mubr.f32.mxu0 %v12280_v0 }
0x1396   :  { %9415 = vmatmul.mubr.f32.vlgmr.msra.gmra.mrb[72].mxu0 %v12283_v1 }
0x1397   :  { %v9381_v5 = vpop.f32.mrb[130].mxu1  ;;  %11097 = vmatpush3.bf16.msra.mxu0 %v11094_v59  ;;  %v5380_v59 = vld [vmem:[#allocation2 + $0x1460] sm:$0xff] }
0x1398   :  { %v5213_v7 = vadd.f32 %v9381_v5, %v6767_v31  ;;  %v5207_v9 = vpop.f32.mrb[131].mxu1  ;;  %11099 = vmatprep.subr.bf16.mxu0 %v11098_v53  ;;  %v11086_v6 = vpack.c.bf16 %v5381_v27, %v5380_v59  ;;  %v5578_v5 = vld [vmem:[#allocation6 + $0x890] sm:$0xff]  ;;  %v5584_v59 = vld [vmem:[#allocation6 + $0x8c0] sm:$0xff]  ;;  %v5585_v27 = vld [vmem:[#allocation6 + $0x8c8] sm:$0xff] }
0x1399   :  { %v5208_v55 = vadd.f32 %v6767_v31, %v5207_v9 }
0x139a   :  { %v12291_v49 = vadd.f32 %v5213_v7, %v12183_v32  ;;  %v5363_v32 = vld [vmem:[#allocation2 + $0x13d8] sm:$0xff]  ;;  %v5579_v7 = vld [vmem:[#allocation6 + $0x898] sm:$0xff] }
0x139b   :  { %v12288_v10 = vadd.f32 %v5208_v55, %v12180_v56  ;;  %11101 = vmatpush3.bf16.msra.mxu0 %v11098_v53  ;;  %v5378_v56 = vld [vmem:[#allocation2 + $0x1450] sm:$0xff]  ;;  %v11084_v22 = vpack.c.bf16 %v5363_v32, %v5362_v20 }
0x139c   :  { %11103 = vmatprep.subr.bf16.mxu0 %v11102_v41  ;;  %v11082_v19 = vpack.c.bf16 %v5379_v63, %v5378_v56  ;;  %v5581_v56 = vld [vmem:[#allocation6 + $0x8a8] sm:$0xff] }
0x139d   :  { %9417 = vmatprep.mubr.f32.mxu0 %v12288_v10 }
0x139e   :  { %9418 = vmatmul.mubr.f32.gmra.mrb[74].mxu0 %v12291_v49  ;;  %11083 = vmatprep.subr.bf16.mxu1 %v11082_v19 }
0x139f   :  { %11105 = vmatpush3.bf16.msra.mxu0 %v11102_v41  ;;  %11085 = vmatpush3.bf16.msra.mxu1 %v11084_v22 }
0x13a0   :  { %11107 = vmatprep.subr.bf16.mxu0 %v11106_v13  ;;  %11087 = vmatprep.subr.bf16.mxu1 %v11086_v6  ;;  %v11142_v6 = vpack.c.bf16 %v5585_v27, %v5584_v59 }
0x13a3   :  { %11109 = vmatpush3.bf16.msra.mxu0 %v11106_v13  ;;  %11089 = vmatpush3.bf16.msra.mxu1 %v11088_v28  ;;  %v11130_v13 = vpack.c.bf16 %v5579_v7, %v5578_v5  ;;  %v11146_v28 = vpack.c.bf16 %v5587_v44, %v5586_v3  ;;  %v5858_v7 = vld [vmem:[#allocation2 + $0x15a0] sm:$0xff]  ;;  %v5847_v3 = vld [vmem:[#allocation2 + $0x1548] sm:$0xff]  ;;  %v5695_v44 = vld [vmem:[#allocation6 + $0x960] sm:$0xff] }
0x13a4   :  { %11111 = vmatprep.subr.bf16.mxu0 %v11110_v52  ;;  %11091 = vmatprep.subr.bf16.mxu1 %v11090_v21  ;;  %v11154_v21 = vpack.c.bf16 %v5591_v11, %v5590_v36 }
0x13a7   :  { %11113 = vmatpush3.bf16.msra.mxu0 %v11110_v52  ;;  %11093 = vmatpush3.bf16.msra.mxu1 %v11092_v42  ;;  %v5580_v52 = vld [vmem:[#allocation6 + $0x8a0] sm:$0xff]  ;;  %v11158_v42 = vpack.c.bf16 %v5684_v40, %v5683_v15 }
0x13a8   :  { %11115 = vmatprep.subr.bf16.mxu0 %v11114_v25  ;;  %11127 = vmatprep.subr.bf16.mxu1 %v11126_v58  ;;  %v11134_v22 = vpack.c.bf16 %v5581_v56, %v5580_v52  ;;  %v5861_v52 = vld [vmem:[#allocation2 + $0x15b8] sm:$0xff] }
0x13a9   :  { %v5849_v15 = vld [vmem:[#allocation2 + $0x1558] sm:$0xff] }
0x13ab   :  { %11117 = vmatpush3.bf16.msra.mxu0 %v11114_v25  ;;  %v11138_v25 = vpack.c.bf16 %v5583_v50, %v5582_v2  ;;  %v5694_v2 = vld [vmem:[#allocation6 + $0x958] sm:$0xff]  ;;  %v5862_v50 = vld [vmem:[#allocation2 + $0x15c0] sm:$0xff] }
0x13ac   :  { %11119 = vmatprep.subr.bf16.mxu0 %v11118_v34 }
0x13af   :  { %11121 = vmatpush3.bf16.msra.mxu0 %v11118_v34  ;;  %v11150_v34 = vpack.c.bf16 %v5589_v8, %v5588_v18  ;;  %v5864_v18 = vld [vmem:[#allocation2 + $0x15d0] sm:$0xff]  ;;  %v5865_v8 = vld [vmem:[#allocation2 + $0x15d8] sm:$0xff] }
0x13b0   :  { %11123 = vmatprep.subr.bf16.mxu0 %v11122_v62  ;;  %v11210_v11 = vpack.c.bf16 %v5865_v8, %v5864_v18 }
0x13b3   :  { %11125 = vmatpush3.bf16.msra.mxu0 %v11122_v62  ;;  %v11162_v62 = vpack.c.bf16 %v5686_v24, %v5685_v23  ;;  %v5698_v23 = vld [vmem:[#allocation6 + $0x978] sm:$0xff] }
0x13b4   :  { %11159 = vmatprep.subr.bf16.mxu0 %v11158_v42 }
0x1469   :  { %v9416_v54 = vpop.f32.mrb[72].mxu0 }
0x146a   :  { %v5314_v26 = vadd.f32 %v9416_v54, %v6768_v48  ;;  %v5308_v37 = vpop.f32.mrb[73].mxu0  ;;  %v5839_v54 = vld [vmem:[#allocation2 + $0x1508] sm:$0xff] }
0x146b   :  { %v5309_v31 = vadd.f32 %v6768_v48, %v5308_v37  ;;  %v5687_v37 = vld [vmem:[#allocation6 + $0x920] sm:$0xff] }
0x146c   :  { %v5328_v57 = vrot.slane %v5314_v26, 7  ;;  %v5340_v60 = vrot.slane %v5314_v26, 1 }
0x146d   :  { %v5327_v38 = vrot.slane %v5309_v31, 7  ;;  %v5339_v39 = vrot.slane %v5309_v31, 1  ;;  %5469 = vmatprep.mubr.f32.mxu1 %v5309_v31  ;;  %v5688_v31 = vld [vmem:[#allocation6 + $0x928] sm:$0xff] }
0x146f   :  { %v5345_v17 = vsel %vm157_vm0, %v5339_v39, %v5340_v60  ;;  %v5333_v61 = vsel %vm144_vm1, %v5327_v38, %v5328_v57 }
0x1470   :  { %9452 = vmatprep.mubr.f32.mxu0 %v5345_v17  ;;  %v5840_v17 = vld [vmem:[#allocation2 + $0x1510] sm:$0xff] }
0x1471   :  { %v9419_v53 = vpop.f32.mrb[74].mxu0 }
0x1472   :  { %v5324_v16 = vadd.f32 %v9419_v53, %v6768_v48  ;;  %v5318_v4 = vpop.f32.mrb[75].mxu0 }
0x1473   :  { %v5319_v9 = vadd.f32 %v6768_v48, %v5318_v4  ;;  %v5838_v48 = vld [vmem:[#allocation2 + $0x1500] sm:$0xff]  ;;  %v5690_v4 = vld [vmem:[#allocation6 + $0x938] sm:$0xff] }
0x1474   :  { %v5330_v41 = vrot.slane %v5324_v16, 7  ;;  %v5342_v55 = vrot.slane %v5324_v16, 1 }
0x1475   :  { %v5329_v12 = vrot.slane %v5319_v9, 7  ;;  %v5341_v47 = vrot.slane %v5319_v9, 1 }
0x1476   :  { %v5334_v29 = vsel %vm144_vm1, %v5330_v41, %v5327_v38  ;;  %v5346_v14 = vsel %vm157_vm0, %v5342_v55, %v5339_v39  ;;  %v5857_v38 = vld [vmem:[#allocation2 + $0x1598] sm:$0xff] }
0x1477   :  { %6770 = vmatmul.mubr.msk.f32.vlgmr.msra.gmra.mrb[132].mxu1 %vm11801_vm2, %v5334_v29  ;;  %v5344_v63 = vsel %vm157_vm0, %v5340_v60, %v5341_v47  ;;  %v5343_v19 = vsel %vm157_vm0, %v5341_v47, %v5342_v55  ;;  %v5332_v20 = vsel %vm144_vm1, %v5328_v57, %v5329_v12  ;;  %v5331_v32 = vsel %vm144_vm1, %v5329_v12, %v5330_v41  ;;  %v5856_v60 = vld [vmem:[#allocation2 + $0x1590] sm:$0xff]  ;;  %v5842_v55 = vld [vmem:[#allocation2 + $0x1520] sm:$0xff]  ;;  %v5843_v12 = vld [vmem:[#allocation2 + $0x1528] sm:$0xff] }
0x1478   :  { %11129 = vmatpush3.bf16.msra.mxu1 %v11126_v58  ;;  %5474 = vmatprep.mubr.f32.mxu1 %v5314_v26  ;;  %v11190_v58 = vpack.c.bf16 %v5855_v33, %v5854_v43  ;;  %v11192_v26 = vpack.c.bf16 %v5839_v54, %v5838_v48  ;;  %v11166_v57 = vpack.c.bf16 %v5688_v31, %v5687_v37  ;;  %v5691_v47 = vld [vmem:[#allocation6 + $0x940] sm:$0xff]  ;;  %v5692_v29 = vld [vmem:[#allocation6 + $0x948] sm:$0xff]  ;;  %v5867_v43 = vld [vmem:[#allocation2 + $0x15e8] sm:$0xff] }
0x1479   :  { %9453 = vmatmul.mubr.msk.f32.vlgmr.msra.gmra.mrb[76].mxu0 %vm11809_vm3, %v5344_v63  ;;  %11131 = vmatprep.subr.bf16.mxu1 %v11130_v13  ;;  %v11194_v39 = vpack.c.bf16 %v5857_v38, %v5856_v60  ;;  %v11174_v56 = vpack.c.bf16 %v5692_v29, %v5691_v47  ;;  %v5851_v48 = vld [vmem:[#allocation2 + $0x1568] sm:$0xff]  ;;  %v5869_v60 = vld [vmem:[#allocation2 + $0x15f8] sm:$0xff] }
0x147a   :  { %9455 = vmatprep.mubr.f32.mxu0 %v5343_v19  ;;  %11161 = vmatpush3.bf16.msra.mxu0 %v11158_v42  ;;  %v5844_v19 = vld [vmem:[#allocation2 + $0x1530] sm:$0xff]  ;;  %v5697_v42 = vld [vmem:[#allocation6 + $0x970] sm:$0xff] }
0x147b   :  { %5475 = vmatmul.mubr.f32.gmra.mrb[134].mxu1 %v5333_v61  ;;  %11163 = vmatprep.subr.bf16.mxu0 %v11162_v62  ;;  %v5841_v61 = vld [vmem:[#allocation2 + $0x1518] sm:$0xff]  ;;  %v11186_v24 = vpack.c.bf16 %v5698_v23, %v5697_v42  ;;  %v5871_v37 = vld [vmem:[#allocation2 + $0x1608] sm:$0xff] }
0x147c   :  { %11133 = vmatpush3.bf16.msra.mxu1 %v11130_v13  ;;  %5479 = vmatprep.mubr.f32.mxu1 %v5319_v9  ;;  %v11196_v53 = vpack.c.bf16 %v5841_v61, %v5840_v17  ;;  %v5859_v9 = vld [vmem:[#allocation2 + $0x15a8] sm:$0xff]  ;;  %v11200_v13 = vpack.c.bf16 %v5843_v12, %v5842_v55  ;;  %v5853_v17 = vld [vmem:[#allocation2 + $0x1578] sm:$0xff] }
0x147d   :  { %9456 = vmatmul.mubr.msk.f32.gmra.mrb[78].mxu0 %vm11826_vm4, %v5346_v14  ;;  %11135 = vmatprep.subr.bf16.mxu1 %v11134_v22  ;;  %v11198_v41 = vpack.c.bf16 %v5859_v9, %v5858_v7  ;;  %v5860_v14 = vld [vmem:[#allocation2 + $0x15b0] sm:$0xff]  ;;  %v5877_v42 = vld [vmem:[#allocation2 + $0x1638] sm:$0xff] }
0x147e   :  { %11165 = vmatpush3.bf16.msra.mxu0 %v11162_v62  ;;  %v11202_v63 = vpack.c.bf16 %v5861_v52, %v5860_v14  ;;  %v5866_v62 = vld [vmem:[#allocation2 + $0x15e0] sm:$0xff]  ;;  %v6774_v14 = vld [vmem:[#allocation7 + $0x11] ss:$0 sm:$0xff] }
0x147f   :  { %6771 = vmatmul.mubr.msk.f32.gmra.mrb[136].mxu1 %vm11834_vm5, %v5332_v20  ;;  %11167 = vmatprep.subr.bf16.mxu0 %v11166_v57  ;;  %v5845_v20 = vld [vmem:[#allocation2 + $0x1538] sm:$0xff]  ;;  %v11214_v33 = vpack.c.bf16 %v5867_v43, %v5866_v62 }
0x1480   :  { %11137 = vmatpush3.bf16.msra.mxu1 %v11134_v22  ;;  %5484 = vmatprep.mubr.f32.mxu1 %v5324_v16  ;;  %v5689_v16 = vld [vmem:[#allocation6 + $0x930] sm:$0xff]  ;;  %v11204_v22 = vpack.c.bf16 %v5845_v20, %v5844_v19 }
0x1481   :  { %11139 = vmatprep.subr.bf16.mxu1 %v11138_v25  ;;  %v11170_v5 = vpack.c.bf16 %v5690_v4, %v5689_v16 }
0x1482   :  { %11169 = vmatpush3.bf16.msra.mxu0 %v11166_v57  ;;  %v5868_v57 = vld [vmem:[#allocation2 + $0x15f0] sm:$0xff] }
0x1483   :  { %5485 = vmatmul.mubr.f32.gmra.mrb[138].mxu1 %v5331_v32  ;;  %11171 = vmatprep.subr.bf16.mxu0 %v11170_v5  ;;  %v5693_v32 = vld [vmem:[#allocation6 + $0x950] sm:$0xff]  ;;  %v11218_v38 = vpack.c.bf16 %v5869_v60, %v5868_v57  ;;  %v5880_v57 = vld [vmem:[#allocation2 + $0x1650] sm:$0xff]  ;;  %v5881_v60 = vld [vmem:[#allocation2 + $0x1658] sm:$0xff] }
0x1484   :  { %11141 = vmatpush3.bf16.msra.mxu1 %v11138_v25  ;;  %9490 = vmatprep.mubr.f32.mxu1 %v12280_v0  ;;  %v5863_v25 = vld [vmem:[#allocation2 + $0x15c8] sm:$0xff]  ;;  %v11178_v59 = vpack.c.bf16 %v5694_v2, %v5693_v32 }
0x1485   :  { %11143 = vmatprep.subr.bf16.mxu1 %v11142_v6  ;;  %v11206_v27 = vpack.c.bf16 %v5863_v25, %v5862_v50 }
0x1486   :  { %11173 = vmatpush3.bf16.msra.mxu0 %v11170_v5 }
0x1487   :  { %11175 = vmatprep.subr.bf16.mxu0 %v11174_v56 }
0x1488   :  { %11145 = vmatpush3.bf16.msra.mxu1 %v11142_v6  ;;  %v5846_v6 = vld [vmem:[#allocation2 + $0x1540] sm:$0xff] }
0x1489   :  { %11147 = vmatprep.subr.bf16.mxu1 %v11146_v28  ;;  %v11208_v36 = vpack.c.bf16 %v5847_v3, %v5846_v6 }
0x148a   :  { %11177 = vmatpush3.bf16.msra.mxu0 %v11174_v56  ;;  %v5872_v56 = vld [vmem:[#allocation2 + $0x1610] sm:$0xff] }
0x148b   :  { %11179 = vmatprep.subr.bf16.mxu0 %v11178_v59 }
0x148c   :  { %11149 = vmatpush3.bf16.msra.mxu1 %v11146_v28  ;;  %v5696_v28 = vld [vmem:[#allocation6 + $0x968] sm:$0xff] }
0x148d   :  { %11151 = vmatprep.subr.bf16.mxu1 %v11150_v34 }
0x148e   :  { %11181 = vmatpush3.bf16.msra.mxu0 %v11178_v59 }
0x1490   :  { %11153 = vmatpush3.bf16.msra.mxu1 %v11150_v34  ;;  %v11182_v34 = vpack.c.bf16 %v5696_v28, %v5695_v44  ;;  %v5874_v44 = vld [vmem:[#allocation2 + $0x1620] sm:$0xff]  ;;  %v5875_v28 = vld [vmem:[#allocation2 + $0x1628] sm:$0xff] }
0x1491   :  { %11155 = vmatprep.subr.bf16.mxu1 %v11154_v21 }
0x1492   :  { %11183 = vmatprep.subr.bf16.mxu0 %v11182_v34 }
0x1493   :  { %11185 = vmatpush3.bf16.msra.mxu0 %v11182_v34 }
0x1494   :  { %11157 = vmatpush3.bf16.msra.mxu1 %v11154_v21  ;;  %v5848_v21 = vld [vmem:[#allocation2 + $0x1550] sm:$0xff]  ;;  %11187 = vmatprep.subr.bf16.mxu0 %v11186_v24 }
0x1495   :  { %11191 = vmatprep.subr.bf16.mxu1 %v11190_v58  ;;  %v11212_v40 = vpack.c.bf16 %v5849_v15, %v5848_v21  ;;  %v5850_v58 = vld [vmem:[#allocation2 + $0x1560] sm:$0xff]  ;;  %v11230_v15 = vpack.c.bf16 %v5875_v28, %v5874_v44 }
0x1496   :  { %v11216_v54 = vpack.c.bf16 %v5851_v48, %v5850_v58  ;;  %v6094_v28 = vld [vmem:[#allocation2 + $0x16a0] sm:$0xff] }
0x1497   :  { %9491 = vmatmul.mubr.f32.vlgmr.msra.gmra.mrb[140].mxu1 %v12283_v1  ;;  %11189 = vmatpush3.bf16.msra.mxu0 %v11186_v24 }
0x1498   :  { %9493 = vmatprep.mubr.f32.mxu1 %v12288_v10  ;;  %11193 = vmatpush3.bf16.msra.mxu1 %v11192_v26  ;;  %v5870_v26 = vld [vmem:[#allocation2 + $0x1600] sm:$0xff] }
0x1499   :  { %11195 = vmatprep.subr.bf16.mxu1 %v11194_v39  ;;  %v11222_v31 = vpack.c.bf16 %v5871_v37, %v5870_v26  ;;  %v5852_v39 = vld [vmem:[#allocation2 + $0x1570] sm:$0xff]  ;;  %v5878_v26 = vld [vmem:[#allocation2 + $0x1640] sm:$0xff]  ;;  %v5879_v37 = vld [vmem:[#allocation2 + $0x1648] sm:$0xff] }
0x149a   :  { %v11220_v61 = vpack.c.bf16 %v5853_v17, %v5852_v39  ;;  %v5882_v39 = vld [vmem:[#allocation2 + $0x1660] sm:$0xff]  ;;  %v5883_v17 = vld [vmem:[#allocation2 + $0x1668] sm:$0xff] }
0x149b   :  { %9494 = vmatmul.mubr.f32.gmra.mrb[142].mxu1 %v12291_v49  ;;  %11223 = vmatprep.subr.bf16.mxu0 %v11222_v31 }
0x149c   :  { %11197 = vmatpush3.bf16.msra.mxu1 %v11196_v53 }
0x149d   :  { %11199 = vmatprep.subr.bf16.mxu1 %v11198_v41 }
0x14a0   :  { %11201 = vmatpush3.bf16.msra.mxu1 %v11200_v13 }
0x14a1   :  { %11203 = vmatprep.subr.bf16.mxu1 %v11202_v63  ;;  %v5873_v63 = vld [vmem:[#allocation2 + $0x1618] sm:$0xff] }
0x14a4   :  { %11205 = vmatpush3.bf16.msra.mxu1 %v11204_v22  ;;  %v11226_v22 = vpack.c.bf16 %v5873_v63, %v5872_v56  ;;  %v6123_v56 = vld [vmem:[#allocation2 + $0x1788] sm:$0xff] }
0x14a5   :  { %11207 = vmatprep.subr.bf16.mxu1 %v11206_v27 }
0x14a8   :  { %11209 = vmatpush3.bf16.msra.mxu1 %v11208_v36 }
0x14a9   :  { %11211 = vmatprep.subr.bf16.mxu1 %v11210_v11 }
0x14ac   :  { %11213 = vmatpush3.bf16.msra.mxu1 %v11212_v40  ;;  %v5876_v40 = vld [vmem:[#allocation2 + $0x1630] sm:$0xff] }
0x14ad   :  { %11215 = vmatprep.subr.bf16.mxu1 %v11214_v33  ;;  %v11234_v48 = vpack.c.bf16 %v5877_v42, %v5876_v40  ;;  %v6096_v42 = vld [vmem:[#allocation2 + $0x16b0] sm:$0xff] }
0x14b0   :  { %11217 = vmatpush3.bf16.msra.mxu1 %v11216_v54 }
0x14b1   :  { %11219 = vmatprep.subr.bf16.mxu1 %v11218_v38  ;;  %v11242_v38 = vpack.c.bf16 %v5881_v60, %v5880_v57  ;;  %v6131_v57 = vld [vmem:[#allocation2 + $0x17c8] sm:$0xff] }
0x14b4   :  { %11221 = vmatpush3.bf16.msra.mxu1 %v11220_v61  ;;  %v11246_v61 = vpack.c.bf16 %v5883_v17, %v5882_v39  ;;  %v6116_v39 = vld [vmem:[#allocation2 + $0x1750] sm:$0xff]  ;;  %v6117_v17 = vld [vmem:[#allocation2 + $0x1758] sm:$0xff] }
0x154a   :  { %v7996_v53 = vpop.f32.mrb[132].mxu1 }
0x154b   :  { %v7997_v16 = vpop.f32.mrb[133].mxu1 }
0x154c   :  { %v12323_v4 = vadd.f32 %v7997_v16, %v7996_v53  ;;  %v5884_v53 = vld [vmem:[#allocation2 + $0x1670] sm:$0xff]  ;;  %v5885_v16 = vld [vmem:[#allocation2 + $0x1678] sm:$0xff] }
0x154e   :  { %v7999_v5 = vpop.f32.mrb[134].mxu1 }
0x154f   :  { %v8000_v7 = vpop.f32.mrb[135].mxu1 }
0x1550   :  { %v12325_v9 = vadd.f32 %v8000_v7, %v7999_v5  ;;  %v11250_v5 = vpack.c.bf16 %v5885_v16, %v5884_v53  ;;  %v6106_v7 = vld [vmem:[#allocation2 + $0x1700] sm:$0xff]  ;;  %v6100_v53 = vld [vmem:[#allocation2 + $0x16d0] sm:$0xff]  ;;  %v6101_v16 = vld [vmem:[#allocation2 + $0x16d8] sm:$0xff] }
0x1552   :  { %v8002_v41 = vpop.f32.mrb[136].mxu1 }
0x1553   :  { %v8003_v55 = vpop.f32.mrb[137].mxu1 }
0x1554   :  { %v12327_v12 = vadd.f32 %v8003_v55, %v8002_v41  ;;  %v6107_v41 = vld [vmem:[#allocation2 + $0x1708] sm:$0xff] }
0x1555   :  { %v11254_v55 = vpack.c.bf16 %v6107_v41, %v6106_v7  ;;  %v11276_v7 = vpack.c.bf16 %v6101_v16, %v6100_v53  ;;  %v6133_v41 = vld [vmem:[#allocation2 + $0x17d8] sm:$0xff] }
0x1556   :  { %v8005_v47 = vpop.f32.mrb[138].mxu1 }
0x1557   :  { %v8006_v13 = vpop.f32.mrb[139].mxu1  ;;  %11255 = vmatprep.subr.bf16.mxu1 %v11254_v55 }
0x1558   :  { %v12329_v29 = vadd.f32 %v8006_v13, %v8005_v47  ;;  %v6090_v47 = vld [vmem:[#allocation2 + $0x1680] sm:$0xff]  ;;  %v6091_v13 = vld [vmem:[#allocation2 + $0x1688] sm:$0xff] }
0x156a   :  { %v9492_v52 = vpop.f32.mrb[140].mxu1 }
0x156b   :  { %v5669_v19 = vadd.f32 %v9492_v52, %v6774_v14  ;;  %v5663_v20 = vpop.f32.mrb[141].mxu1  ;;  %v11256_v52 = vpack.c.bf16 %v6091_v13, %v6090_v47  ;;  %v6118_v47 = vld [vmem:[#allocation2 + $0x1760] sm:$0xff]  ;;  %v6119_v13 = vld [vmem:[#allocation2 + $0x1768] sm:$0xff] }
0x156c   :  { %v5664_v32 = vadd.f32 %v6774_v14, %v5663_v20  ;;  %v6109_v20 = vld [vmem:[#allocation2 + $0x1718] sm:$0xff] }
0x156d   :  { %v5826_v2 = vrot.slane %v5669_v19, 1  ;;  %v5814_v50 = vrot.slane %v5669_v19, 7 }
0x156e   :  { %v5813_v25 = vrot.slane %v5664_v32, 7  ;;  %v9495_v59 = vpop.f32.mrb[142].mxu1  ;;  %9528 = vmatprep.mubr.f32.mxu0 %v5664_v32  ;;  %5955 = vmatprep.mubr.f32.mxu1 %v5664_v32  ;;  %v5825_v27 = vrot.slane %v5664_v32, 1 }
0x156f   :  { %v5679_v6 = vadd.f32 %v9495_v59, %v6774_v14  ;;  %v5673_v3 = vpop.f32.mrb[143].mxu1  ;;  %9529 = vmatmul.mubr.f32.vlgmr.msra.gmra.mrb[80].mxu0 %v5669_v19  ;;  %v6125_v59 = vld [vmem:[#allocation2 + $0x1798] sm:$0xff] }
0x1570   :  { %v5674_v18 = vadd.f32 %v6774_v14, %v5673_v3  ;;  %11225 = vmatpush3.bf16.msra.mxu0 %v11222_v31  ;;  %v5831_v8 = vsel %vm157_vm0, %v5825_v27, %v5826_v2  ;;  %v5819_v34 = vsel %vm144_vm1, %v5813_v25, %v5814_v50  ;;  %v11238_v31 = vpack.c.bf16 %v5879_v37, %v5878_v26  ;;  %v6122_v14 = vld [vmem:[#allocation2 + $0x1780] sm:$0xff]  ;;  %v6111_v3 = vld [vmem:[#allocation2 + $0x1728] sm:$0xff] }
0x1571   :  { %v5816_v36 = vrot.slane %v5679_v6, 7  ;;  %11227 = vmatprep.subr.bf16.mxu0 %v11226_v22  ;;  %v5828_v11 = vrot.slane %v5679_v6, 1  ;;  %v11286_v63 = vpack.c.bf16 %v6123_v56, %v6122_v14  ;;  %v6099_v37 = vld [vmem:[#allocation2 + $0x16c8] sm:$0xff]  ;;  %v11278_v14 = vpack.c.bf16 %v6119_v13, %v6118_v47 }
0x1572   :  { %v5827_v21 = vrot.slane %v5674_v18, 1  ;;  %9531 = vmatprep.mubr.f32.mxu0 %v5674_v18  ;;  %v5815_v23 = vrot.slane %v5674_v18, 7  ;;  %v6103_v56 = vld [vmem:[#allocation2 + $0x16e8] sm:$0xff] }
0x1573   :  { %9532 = vmatmul.mubr.f32.gmra.mrb[82].mxu0 %v5679_v6  ;;  %v5820_v24 = vsel %vm144_vm1, %v5816_v36, %v5813_v25  ;;  %v5832_v62 = vsel %vm157_vm0, %v5828_v11, %v5825_v27 }
0x1574   :  { %11229 = vmatpush3.bf16.msra.mxu0 %v11226_v22  ;;  %6777 = vmatmul.mubr.msk.f32.vlgmr.msra.gmra.mrb[144].mxu1 %vm11801_vm2, %v5820_v24  ;;  %v5818_v43 = vsel %vm144_vm1, %v5814_v50, %v5815_v23  ;;  %v5817_v33 = vsel %vm144_vm1, %v5815_v23, %v5816_v36  ;;  %v5830_v58 = vsel %vm157_vm0, %v5826_v2, %v5827_v21  ;;  %v6092_v22 = vld [vmem:[#allocation2 + $0x1690] sm:$0xff]  ;;  %v6093_v2 = vld [vmem:[#allocation2 + $0x1698] sm:$0xff]  ;;  %v6127_v36 = vld [vmem:[#allocation2 + $0x17a8] sm:$0xff] }
0x1575   :  { %9566 = vmatprep.mubr.f32.mxu0 %v5831_v8  ;;  %5960 = vmatprep.mubr.f32.mxu1 %v5669_v19  ;;  %v5829_v54 = vsel %vm157_vm0, %v5827_v21, %v5828_v11  ;;  %v6108_v19 = vld [vmem:[#allocation2 + $0x1710] sm:$0xff]  ;;  %v11260_v25 = vpack.c.bf16 %v6093_v2, %v6092_v22  ;;  %v6126_v8 = vld [vmem:[#allocation2 + $0x17a0] sm:$0xff]  ;;  %v6097_v23 = vld [vmem:[#allocation2 + $0x16b8] sm:$0xff] }
0x1576   :  { %11231 = vmatprep.subr.bf16.mxu0 %v11230_v15  ;;  %11257 = vmatpush3.bf16.msra.mxu1 %v11256_v52  ;;  %v11258_v32 = vpack.c.bf16 %v6109_v20, %v6108_v19  ;;  %v6124_v50 = vld [vmem:[#allocation2 + $0x1790] sm:$0xff]  ;;  %v11294_v11 = vpack.c.bf16 %v6127_v36, %v6126_v8  ;;  %v6102_v52 = vld [vmem:[#allocation2 + $0x16e0] sm:$0xff]  ;;  %v6135_v20 = vld [vmem:[#allocation2 + $0x17e8] sm:$0xff] }
0x1577   :  { %v11290_v27 = vpack.c.bf16 %v6125_v59, %v6124_v50  ;;  %v6112_v21 = vld [vmem:[#allocation2 + $0x1730] sm:$0xff]  ;;  %v11280_v19 = vpack.c.bf16 %v6103_v56, %v6102_v52  ;;  %v6121_v2 = vld [vmem:[#allocation2 + $0x1778] sm:$0xff] }
0x1578   :  { %11233 = vmatpush3.bf16.msra.mxu0 %v11230_v15  ;;  %5961 = vmatmul.mubr.f32.gmra.mrb[146].mxu1 %v5819_v34  ;;  %v6113_v15 = vld [vmem:[#allocation2 + $0x1738] sm:$0xff]  ;;  %v6128_v24 = vld [vmem:[#allocation2 + $0x17b0] sm:$0xff] }
0x1579   :  { %5965 = vmatprep.mubr.f32.mxu1 %v5674_v18  ;;  %11235 = vmatprep.subr.bf16.mxu0 %v11234_v48  ;;  %v6095_v18 = vld [vmem:[#allocation2 + $0x16a8] sm:$0xff]  ;;  %v11266_v40 = vpack.c.bf16 %v6113_v15, %v6112_v21  ;;  %v6120_v22 = vld [vmem:[#allocation2 + $0x1770] sm:$0xff]  ;;  %v6105_v59 = vld [vmem:[#allocation2 + $0x16f8] sm:$0xff] }
0x157a   :  { %11259 = vmatprep.subr.bf16.mxu1 %v11258_v32  ;;  %v11264_v34 = vpack.c.bf16 %v6095_v18, %v6094_v28  ;;  %v11282_v50 = vpack.c.bf16 %v6121_v2, %v6120_v22  ;;  %v6318_v28 = vld [vmem:[#allocation6 + $0x980] sm:$0xff]  ;;  %v6319_v18 = vld [vmem:[#allocation6 + $0x988] sm:$0xff] }
0x157b   :  { %11261 = vmatpush3.bf16.msra.mxu1 %v11260_v25  ;;  %v6104_v25 = vld [vmem:[#allocation2 + $0x16f0] sm:$0xff]  ;;  %v12355_v8 = vpack.c.bf16 %v6319_v18, %v6318_v28 }
0x157c   :  { %11237 = vmatpush3.bf16.msra.mxu0 %v11234_v48  ;;  %6778 = vmatmul.mubr.msk.f32.gmra.mrb[148].mxu1 %vm11834_vm5, %v5818_v43  ;;  %v6129_v43 = vld [vmem:[#allocation2 + $0x17b8] sm:$0xff]  ;;  %v6115_v48 = vld [vmem:[#allocation2 + $0x1748] sm:$0xff] }
0x157d   :  { %5970 = vmatprep.mubr.f32.mxu1 %v5679_v6  ;;  %11239 = vmatprep.subr.bf16.mxu0 %v11238_v31  ;;  %v6110_v6 = vld [vmem:[#allocation2 + $0x1720] sm:$0xff] }
0x157e   :  { %v11262_v44 = vpack.c.bf16 %v6111_v3, %v6110_v6  ;;  %v11284_v6 = vpack.c.bf16 %v6105_v59, %v6104_v25  ;;  %v6137_v3 = vld [vmem:[#allocation2 + $0x17f8] sm:$0xff] }
0x1580   :  { %11241 = vmatpush3.bf16.msra.mxu0 %v11238_v31  ;;  %5971 = vmatmul.mubr.f32.gmra.mrb[150].mxu1 %v5817_v33  ;;  %v11298_v33 = vpack.c.bf16 %v6129_v43, %v6128_v24  ;;  %v6130_v31 = vld [vmem:[#allocation2 + $0x17c0] sm:$0xff] }
0x1581   :  { %11243 = vmatprep.subr.bf16.mxu0 %v11242_v38  ;;  %11263 = vmatprep.subr.bf16.mxu1 %v11262_v44 }
0x1582   :  { %11265 = vmatpush3.bf16.msra.mxu1 %v11264_v34  ;;  %v6775_v34 = vld [vmem:[#allocation7 + $0x12] ss:$0 sm:$0xff] }
0x1583   :  { %11267 = vmatprep.subr.bf16.mxu1 %v11266_v40 }
0x1584   :  { %11245 = vmatpush3.bf16.msra.mxu0 %v11242_v38  ;;  %v11302_v38 = vpack.c.bf16 %v6131_v57, %v6130_v31 }
0x1585   :  { %11247 = vmatprep.subr.bf16.mxu0 %v11246_v61 }
0x1588   :  { %11249 = vmatpush3.bf16.msra.mxu0 %v11246_v61  ;;  %v11274_v61 = vpack.c.bf16 %v6117_v17, %v6116_v39 }
0x1589   :  { %11251 = vmatprep.subr.bf16.mxu0 %v11250_v5 }
0x158c   :  { %11253 = vmatpush3.bf16.msra.mxu0 %v11250_v5  ;;  %v6132_v5 = vld [vmem:[#allocation2 + $0x17d0] sm:$0xff] }
0x158d   :  { %11287 = vmatprep.subr.bf16.mxu0 %v11286_v63  ;;  %v11306_v55 = vpack.c.bf16 %v6133_v41, %v6132_v5 }
0x158f   :  { %9567 = vmatmul.mubr.msk.f32.vlgmr.msra.gmra.mrb[84].mxu0 %vm11809_vm3, %v5830_v58  ;;  %v6114_v58 = vld [vmem:[#allocation2 + $0x1740] sm:$0xff] }
0x1590   :  { %9569 = vmatprep.mubr.f32.mxu0 %v5829_v54  ;;  %11289 = vmatpush3.bf16.msra.mxu0 %v11286_v63  ;;  %v6098_v54 = vld [vmem:[#allocation2 + $0x16c0] sm:$0xff]  ;;  %v11270_v26 = vpack.c.bf16 %v6115_v48, %v6114_v58 }
0x1591   :  { %11291 = vmatprep.subr.bf16.mxu0 %v11290_v27  ;;  %v11272_v60 = vpack.c.bf16 %v6099_v37, %v6098_v54  ;;  %v6134_v63 = vld [vmem:[#allocation2 + $0x17e0] sm:$0xff] }
0x1592   :  { %v11310_v32 = vpack.c.bf16 %v6135_v20, %v6134_v63  ;;  %v6776_v20 = vld [vmem:[#allocation4 + $0xe] ss:$0 sm:$0xff] }
0x1593   :  { %9570 = vmatmul.mubr.msk.f32.gmra.mrb[86].mxu0 %vm11826_vm4, %v5832_v62  ;;  %v11268_v62 = vpack.c.bf16 %v6097_v23, %v6096_v42 }
0x1594   :  { %11293 = vmatpush3.bf16.msra.mxu0 %v11290_v27  ;;  %v6136_v27 = vld [vmem:[#allocation2 + $0x17f0] sm:$0xff] }
0x1595   :  { %11295 = vmatprep.subr.bf16.mxu0 %v11294_v11  ;;  %11269 = vmatpush3.bf16.msra.mxu1 %v11268_v62  ;;  %v11314_v44 = vpack.c.bf16 %v6137_v3, %v6136_v27 }
0x1596   :  { %11271 = vmatprep.subr.bf16.mxu1 %v11270_v26 }
0x1598   :  { %11297 = vmatpush3.bf16.msra.mxu0 %v11294_v11 }
0x1599   :  { %11299 = vmatprep.subr.bf16.mxu0 %v11298_v33  ;;  %11273 = vmatpush3.bf16.msra.mxu1 %v11272_v60 }
0x159a   :  { %11275 = vmatprep.subr.bf16.mxu1 %v11274_v61 }
0x159c   :  { %11301 = vmatpush3.bf16.msra.mxu0 %v11298_v33 }
0x159d   :  { %11303 = vmatprep.subr.bf16.mxu0 %v11302_v38  ;;  %11277 = vmatpush3.bf16.msra.mxu1 %v11276_v7 }
0x159e   :  { %11279 = vmatprep.subr.bf16.mxu1 %v11278_v14 }
0x15a0   :  { %11305 = vmatpush3.bf16.msra.mxu0 %v11302_v38 }
0x15a1   :  { %11307 = vmatprep.subr.bf16.mxu0 %v11306_v55  ;;  %11281 = vmatpush3.bf16.msra.mxu1 %v11280_v19 }
0x15a2   :  { %11283 = vmatprep.subr.bf16.mxu1 %v11282_v50 }
0x15a4   :  { %11309 = vmatpush3.bf16.msra.mxu0 %v11306_v55 }
0x15a5   :  { %11311 = vmatprep.subr.bf16.mxu0 %v11310_v32  ;;  %11285 = vmatpush3.bf16.msra.mxu1 %v11284_v6 }
0x15a6   :  { %11319 = vmatprep.subr.bf16.mxu1 %v12355_v8 }
0x15a8   :  { %11313 = vmatpush3.bf16.msra.mxu0 %v11310_v32 }
0x15a9   :  { %11315 = vmatprep.subr.bf16.mxu0 %v11314_v44 }
0x15ac   :  { %11317 = vmatpush3.bf16.msra.mxu0 %v11314_v44 }
0x1642   :  { %v9530_v36 = vpop.f32.mrb[80].mxu0 }
0x1643   :  { %v5776_v11 = vadd.f32 %v9530_v36, %v6775_v34  ;;  %v5770_v21 = vpop.f32.mrb[81].mxu0 }
0x1644   :  { %v5771_v15 = vadd.f32 %v6775_v34, %v5770_v21 }
0x1645   :  { %v5790_v40 = vsub.f32 0.0, %v5776_v11 }
0x1646   :  { %v5789_v42 = vsub.f32 0.0, %v5771_v15  ;;  %v9533_v23 = vpop.f32.mrb[82].mxu0 }
0x1647   :  { %v5795_v24 = vmul.f32 1.442695, %v5790_v40  ;;  %v5786_v62 = vadd.f32 %v9533_v23, %v6775_v34  ;;  %v5780_v43 = vpop.f32.mrb[83].mxu0  ;;  %v8100_v33 = vpop.f32.mrb[144].mxu1 }
0x1648   :  { %v5793_v58 = vmul.f32 1.442695, %v5789_v42  ;;  %v5781_v48 = vadd.f32 %v6775_v34, %v5780_v43  ;;  %v8101_v54 = vpop.f32.mrb[145].mxu1 }
0x1649   :  { %11544 = vpow2.f32 %v5795_v24  ;;  %v5792_v26 = vsub.f32 0.0, %v5786_v62  ;;  %v8102_v37 = vadd.f32 %v8101_v54, %v8100_v33  ;;  %v6320_v54 = vld [vmem:[#allocation6 + $0x990] sm:$0xff] }
0x164a   :  { %11546 = vpow2.f32 %v5793_v58  ;;  %v5791_v31 = vsub.f32 0.0, %v5781_v48 }
0x164b   :  { %v5799_v57 = vmul.f32 1.442695, %v5792_v26  ;;  %v8103_v60 = vpop.f32.mrb[146].mxu1  ;;  %v5958_v2 = vadd.f32 %v8102_v37, %v6776_v20  ;;  %v6321_v26 = vld [vmem:[#allocation6 + $0x998] sm:$0xff] }
0x164c   :  { %v5797_v38 = vmul.f32 1.442695, %v5791_v31  ;;  %v8104_v39 = vpop.f32.mrb[147].mxu1 }
0x164d   :  { %11548 = vpow2.f32 %v5799_v57  ;;  %v8105_v17 = vadd.f32 %v8104_v39, %v8103_v60 }
0x164e   :  { %11550 = vpow2.f32 %v5797_v38 }
0x164f   :  { %v8106_v61 = vpop.f32.mrb[148].mxu1  ;;  %v5963_v32 = vadd.f32 %v8105_v17, %v6776_v20  ;;  %v11322_v17 = vpack.c.bf16 %v6321_v26, %v6320_v54  ;;  %v6475_v54 = vld [vmem:[#allocation2 + $0x18b0] sm:$0xff]  ;;  %v6476_v26 = vld [vmem:[#allocation2 + $0x18b8] sm:$0xff] }
0x1650   :  { %v8107_v53 = vpop.f32.mrb[149].mxu1 }
0x1651   :  { %v8108_v16 = vadd.f32 %v8107_v53, %v8106_v61 }
0x1653   :  { %v11545_v5 = vpop.eup %11544  ;;  %v8109_v7 = vpop.f32.mrb[150].mxu1  ;;  %v5968_v34 = vadd.f32 %v8108_v16, %v6776_v20 }
0x1654   :  { %v11547_v41 = vpop.eup %11546  ;;  %v8110_v55 = vpop.f32.mrb[151].mxu1  ;;  %v5802_v13 = vadd.f32 1.0, %v11545_v5 }
0x1655   :  { %v8111_v47 = vadd.f32 %v8110_v55, %v8109_v7  ;;  %v5801_v52 = vadd.f32 1.0, %v11547_v41  ;;  %v6322_v7 = vld [vmem:[#allocation6 + $0x9a0] sm:$0xff]  ;;  %v6323_v41 = vld [vmem:[#allocation6 + $0x9a8] sm:$0xff] }
0x1656   :  { %11552 = vrcp.f32 %v5802_v13  ;;  %v11326_v55 = vpack.c.bf16 %v6323_v41, %v6322_v7  ;;  %v6325_v13 = vld [vmem:[#allocation6 + $0x9b8] sm:$0xff] }
0x1657   :  { %v11549_v14 = vpop.eup %11548  ;;  %11554 = vrcp.f32 %v5801_v52  ;;  %v5973_v44 = vadd.f32 %v8111_v47, %v6776_v20  ;;  %v6324_v47 = vld [vmem:[#allocation6 + $0x9b0] sm:$0xff]  ;;  %v6326_v52 = vld [vmem:[#allocation6 + $0x9c0] sm:$0xff] }
0x1658   :  { %v11551_v56 = vpop.eup %11550  ;;  %v5804_v63 = vadd.f32 1.0, %v11549_v14  ;;  %v11330_v14 = vpack.c.bf16 %v6325_v13, %v6324_v47 }
0x1659   :  { %v5803_v19 = vadd.f32 1.0, %v11551_v56  ;;  %v6327_v56 = vld [vmem:[#allocation6 + $0x9c8] sm:$0xff] }
0x165a   :  { %11556 = vrcp.f32 %v5804_v63  ;;  %v6328_v63 = vld [vmem:[#allocation6 + $0x9d0] sm:$0xff] }
0x165b   :  { %11558 = vrcp.f32 %v5803_v19  ;;  %v6329_v19 = vld [vmem:[#allocation6 + $0x9d8] sm:$0xff] }
0x165c   :  { %v11338_v20 = vpack.c.bf16 %v6329_v19, %v6328_v63 }
0x1660   :  { %v11553_v59 = vpop.eup %11552 }
0x1661   :  { %v11555_v6 = vpop.eup %11554 }
0x1662   :  { %v9568_v22 = vpop.f32.mrb[84].mxu0 }
0x1663   :  { %v6048_v50 = vadd.f32 %v9568_v22, %v5963_v32  ;;  %v6042_v25 = vpop.f32.mrb[85].mxu0  ;;  %v6330_v32 = vld [vmem:[#allocation6 + $0x9e0] sm:$0xff]  ;;  %v6331_v22 = vld [vmem:[#allocation6 + $0x9e8] sm:$0xff] }
0x1664   :  { %v6043_v27 = vadd.f32 %v6042_v25, %v5958_v2  ;;  %v11557_v40 = vpop.eup %11556  ;;  %v11342_v2 = vpack.c.bf16 %v6331_v22, %v6330_v32  ;;  %v6333_v25 = vld [vmem:[#allocation6 + $0x9f8] sm:$0xff] }
0x1665   :  { %v6062_v3 = vmul.f32 %v11553_v59, %v6048_v50  ;;  %v11559_v62 = vpop.eup %11558  ;;  %v6332_v50 = vld [vmem:[#allocation6 + $0x9f0] sm:$0xff] }
0x1666   :  { %v6061_v28 = vmul.f32 %v11555_v6, %v6043_v27  ;;  %v9571_v18 = vpop.f32.mrb[86].mxu0  ;;  %v11346_v59 = vpack.c.bf16 %v6333_v25, %v6332_v50  ;;  %v6469_v27 = vld [vmem:[#allocation2 + $0x1880] sm:$0xff]  ;;  %v6470_v6 = vld [vmem:[#allocation2 + $0x1888] sm:$0xff]  ;;  %v6488_v50 = vld [vmem:[#allocation2 + $0x1918] sm:$0xff] }
0x1667   :  { %v6058_v36 = vadd.f32 %v9571_v18, %v5973_v44  ;;  %v6052_v11 = vpop.f32.mrb[87].mxu0  ;;  %v6078_v21 = vrot.slane %v6062_v3, 1  ;;  %v6066_v15 = vrot.slane %v6062_v3, 7  ;;  %v11350_v44 = vpack.c.bf16 %v6470_v6, %v6469_v27  ;;  %v6485_v18 = vld [vmem:[#allocation2 + $0x1900] sm:$0xff] }
0x1668   :  { %v6065_v42 = vrot.slane %v6061_v28, 7  ;;  %v6053_v23 = vadd.f32 %v6052_v11, %v5968_v34  ;;  %6207 = vmatprep.mubr.f32.mxu1 %v6061_v28  ;;  %v6077_v24 = vrot.slane %v6061_v28, 1  ;;  %v6454_v28 = vld [vmem:[#allocation2 + $0x1808] sm:$0xff] }
0x1669   :  { %v6064_v43 = vmul.f32 %v11557_v40, %v6058_v36  ;;  %v6486_v34 = vld [vmem:[#allocation2 + $0x1908] sm:$0xff]  ;;  %v6455_v40 = vld [vmem:[#allocation2 + $0x1810] sm:$0xff]  ;;  %11351 = vmatprep.subr.bf16.mxu0 %v11350_v44 }
0x166a   :  { %v6063_v33 = vmul.f32 %v11559_v62, %v6053_v23  ;;  %v6083_v58 = vsel %vm157_vm0, %v6077_v24, %v6078_v21  ;;  %v6071_v48 = vsel %vm144_vm1, %v6065_v42, %v6066_v15  ;;  %v12383_v11 = vpack.c.bf16 %v6486_v34, %v6485_v18  ;;  %v6456_v23 = vld [vmem:[#allocation2 + $0x1818] sm:$0xff]  ;;  %v6473_v62 = vld [vmem:[#allocation2 + $0x18a0] sm:$0xff]  ;;  %v6490_v34 = vld [vmem:[#allocation2 + $0x1928] sm:$0xff] }
0x166b   :  { %v6068_v37 = vrot.slane %v6064_v43, 7  ;;  %9604 = vmatprep.mubr.f32.mxu0 %v6083_v58  ;;  %v6080_v31 = vrot.slane %v6064_v43, 1  ;;  %v6457_v58 = vld [vmem:[#allocation2 + $0x1820] sm:$0xff] }
0x166c   :  { %v6067_v57 = vrot.slane %v6063_v33, 7  ;;  %v6079_v60 = vrot.slane %v6063_v33, 1  ;;  %v6489_v18 = vld [vmem:[#allocation2 + $0x1920] sm:$0xff] }
0x166d   :  { %v6072_v38 = vsel %vm144_vm1, %v6068_v37, %v6065_v42  ;;  %v6084_v39 = vsel %vm157_vm0, %v6080_v31, %v6077_v24  ;;  %v11356_v24 = vpack.c.bf16 %v6456_v23, %v6455_v40  ;;  %v6491_v23 = vld [vmem:[#allocation2 + $0x1930] sm:$0xff] }
0x166e   :  { %6782 = vmatmul.mubr.msk.f32.vlgmr.msra.gmra.mrb[152].mxu1 %vm11801_vm2, %v6072_v38  ;;  %v6082_v61 = vsel %vm157_vm0, %v6078_v21, %v6079_v60  ;;  %v6081_v53 = vsel %vm157_vm0, %v6079_v60, %v6080_v31  ;;  %v6070_v16 = vsel %vm144_vm1, %v6066_v15, %v6067_v57  ;;  %v6069_v5 = vsel %vm144_vm1, %v6067_v57, %v6068_v37  ;;  %v6471_v21 = vld [vmem:[#allocation2 + $0x1890] sm:$0xff]  ;;  %v6472_v15 = vld [vmem:[#allocation2 + $0x1898] sm:$0xff] }
0x166f   :  { %6212 = vmatprep.mubr.f32.mxu1 %v6062_v3  ;;  %9605 = vmatmul.mubr.msk.f32.vlgmr.msra.gmra.mrb[76].mxu0 %vm11809_vm3, %v6082_v61  ;;  %v6453_v3 = vld [vmem:[#allocation2 + $0x1800] sm:$0xff]  ;;  %v11354_v42 = vpack.c.bf16 %v6472_v15, %v6471_v21  ;;  %v11362_v31 = vpack.c.bf16 %v6476_v26, %v6475_v54  ;;  %v6459_v57 = vld [vmem:[#allocation2 + $0x1830] sm:$0xff]  ;;  %v6460_v60 = vld [vmem:[#allocation2 + $0x1838] sm:$0xff] }
0x1670   :  { %9607 = vmatprep.mubr.f32.mxu0 %v6081_v53  ;;  %11321 = vmatpush3.bf16.msra.mxu1 %v12355_v8  ;;  %v11334_v8 = vpack.c.bf16 %v6327_v56, %v6326_v52  ;;  %v11352_v36 = vpack.c.bf16 %v6454_v28, %v6453_v3  ;;  %v11364_v38 = vpack.c.bf16 %v6460_v60, %v6459_v57  ;;  %v6781_v61 = vld [vmem:[#allocation4 + $0xf] ss:$0 sm:$0xff]  ;;  %v6493_v54 = vld [vmem:[#allocation2 + $0x1940] sm:$0xff]  ;;  %v6479_v57 = vld [vmem:[#allocation2 + $0x18d0] sm:$0xff] }
0x1671   :  { %11323 = vmatprep.subr.bf16.mxu1 %v11322_v17  ;;  %v6480_v60 = vld [vmem:[#allocation2 + $0x18d8] sm:$0xff] }
0x1672   :  { %6213 = vmatmul.mubr.f32.gmra.mrb[154].mxu1 %v6071_v48  ;;  %11353 = vmatpush3.bf16.msra.mxu0 %v11352_v36  ;;  %v6458_v48 = vld [vmem:[#allocation2 + $0x1828] sm:$0xff] }
0x1673   :  { %6217 = vmatprep.mubr.f32.mxu1 %v6063_v33  ;;  %9608 = vmatmul.mubr.msk.f32.gmra.mrb[78].mxu0 %vm11826_vm4, %v6084_v39  ;;  %v11360_v37 = vpack.c.bf16 %v6458_v48, %v6457_v58  ;;  %v6462_v48 = vld [vmem:[#allocation2 + $0x1848] sm:$0xff] }
0x1674   :  { %11325 = vmatpush3.bf16.msra.mxu1 %v11322_v17  ;;  %11355 = vmatprep.subr.bf16.mxu0 %v11354_v42  ;;  %v6769_v17 = vld [vmem:[#allocation4 + $0xd] ss:$0 sm:$0xff]  ;;  %v11390_v42 = vpack.c.bf16 %v6490_v34, %v6489_v18 }
0x1675   :  { %11327 = vmatprep.subr.bf16.mxu1 %v11326_v55  ;;  %v5472_v41 = vadd.f32 %v12323_v4, %v6769_v17  ;;  %v5477_v63 = vadd.f32 %v12325_v9, %v6769_v17  ;;  %v5482_v4 = vadd.f32 %v12327_v12, %v6769_v17  ;;  %v5487_v21 = vadd.f32 %v12329_v29, %v6769_v17  ;;  %v6492_v12 = vld [vmem:[#allocation2 + $0x1938] sm:$0xff]  ;;  %v6461_v29 = vld [vmem:[#allocation2 + $0x1840] sm:$0xff] }
0x1676   :  { %6783 = vmatmul.mubr.msk.f32.gmra.mrb[156].mxu1 %vm11834_vm5, %v6070_v16  ;;  %11357 = vmatpush3.bf16.msra.mxu0 %v11356_v24  ;;  %v11368_v26 = vpack.c.bf16 %v6462_v48, %v6461_v29  ;;  %v6464_v17 = vld [vmem:[#allocation2 + $0x1858] sm:$0xff] }
0x1677   :  { %6222 = vmatprep.mubr.f32.mxu1 %v6064_v43  ;;  %v6474_v43 = vld [vmem:[#allocation2 + $0x18a8] sm:$0xff] }
0x1678   :  { %11329 = vmatpush3.bf16.msra.mxu1 %v11326_v55  ;;  %v11358_v33 = vpack.c.bf16 %v6474_v43, %v6473_v62  ;;  %v11394_v43 = vpack.c.bf16 %v6492_v12, %v6491_v23 }
0x1679   :  { %11331 = vmatprep.subr.bf16.mxu1 %v11330_v14 }
0x167a   :  { %6223 = vmatmul.mubr.f32.gmra.mrb[158].mxu1 %v6069_v5  ;;  %11359 = vmatprep.subr.bf16.mxu0 %v11358_v33  ;;  %v6477_v33 = vld [vmem:[#allocation2 + $0x18c0] sm:$0xff] }
0x167b   :  { %11361 = vmatpush3.bf16.msra.mxu0 %v11360_v37  ;;  %v6494_v37 = vld [vmem:[#allocation2 + $0x1948] sm:$0xff] }
0x167c   :  { %11333 = vmatpush3.bf16.msra.mxu1 %v11330_v14  ;;  %11363 = vmatprep.subr.bf16.mxu0 %v11362_v31  ;;  %v11398_v31 = vpack.c.bf16 %v6494_v37, %v6493_v54 }
0x167d   :  { %11335 = vmatprep.subr.bf16.mxu1 %v11334_v8 }
0x167f   :  { %11365 = vmatpush3.bf16.msra.mxu0 %v11364_v38  ;;  %v11370_v38 = vpack.c.bf16 %v6480_v60, %v6479_v57 }
0x1680   :  { %11337 = vmatpush3.bf16.msra.mxu1 %v11334_v8 }
0x1681   :  { %11339 = vmatprep.subr.bf16.mxu1 %v11338_v20 }
0x1684   :  { %11341 = vmatpush3.bf16.msra.mxu1 %v11338_v20 }
0x1685   :  { %11343 = vmatprep.subr.bf16.mxu1 %v11342_v2 }
0x1688   :  { %11345 = vmatpush3.bf16.msra.mxu1 %v11342_v2  ;;  %v6487_v2 = vld [vmem:[#allocation2 + $0x1910] sm:$0xff] }
0x1689   :  { %11347 = vmatprep.subr.bf16.mxu1 %v11346_v59  ;;  %v11386_v44 = vpack.c.bf16 %v6488_v50, %v6487_v2  ;;  %v6499_v2 = vld [vmem:[#allocation2 + $0x1970] sm:$0xff] }
0x168c   :  { %11349 = vmatpush3.bf16.msra.mxu1 %v11346_v59 }
0x168d   :  { %11383 = vmatprep.subr.bf16.mxu1 %v12383_v11 }
0x1741   :  { %v8164_v39 = vpop.f32.mrb[152].mxu1 }
0x1742   :  { %v8165_v53 = vpop.f32.mrb[153].mxu1  ;;  %v9606_v16 = vpop.f32.mrb[76].mxu0 }
0x1743   :  { %v8166_v5 = vadd.f32 %v8165_v53, %v8164_v39  ;;  %v6294_v7 = vpop.f32.mrb[77].mxu0  ;;  %v6463_v39 = vld [vmem:[#allocation2 + $0x1850] sm:$0xff] }
0x1744   :  { %v11372_v53 = vpack.c.bf16 %v6464_v17, %v6463_v39 }
0x1745   :  { %v6210_v55 = vadd.f32 %v8166_v5, %v6781_v61  ;;  %v8167_v47 = vpop.f32.mrb[154].mxu1 }
0x1746   :  { %v8168_v13 = vpop.f32.mrb[155].mxu1  ;;  %v9609_v14 = vpop.f32.mrb[78].mxu0 }
0x1747   :  { %v11448_v52 = vadd.f32 %v6210_v55, %v5472_v41  ;;  %v8169_v56 = vadd.f32 %v8168_v13, %v8167_v47  ;;  %v6304_v8 = vpop.f32.mrb[79].mxu0  ;;  %v6482_v41 = vld [vmem:[#allocation2 + $0x18e8] sm:$0xff]  ;;  %v6465_v47 = vld [vmem:[#allocation2 + $0x1860] sm:$0xff] }
0x1748   :  { %v6466_v13 = vld [vmem:[#allocation2 + $0x1868] sm:$0xff] }
0x1749   :  { %v11449_v19 = vadd.f32 %v11448_v52, %v6294_v7  ;;  %v6215_v20 = vadd.f32 %v8169_v56, %v6781_v61  ;;  %v8170_v32 = vpop.f32.mrb[156].mxu1  ;;  %v6481_v7 = vld [vmem:[#allocation2 + $0x18e0] sm:$0xff]  ;;  %v11376_v52 = vpack.c.bf16 %v6466_v13, %v6465_v47  ;;  %v6498_v56 = vld [vmem:[#allocation2 + $0x1968] sm:$0xff] }
0x174a   :  { %v8171_v22 = vpop.f32.mrb[157].mxu1  ;;  %v11374_v55 = vpack.c.bf16 %v6482_v41, %v6481_v7 }
0x174b   :  { %v11446_v25 = vadd.f32 %v6215_v20, %v5477_v63  ;;  %v8172_v59 = vadd.f32 %v8171_v22, %v8170_v32  ;;  %9642 = vmatprep.mubr.f32.mxu1 %v11449_v19  ;;  %v6483_v63 = vld [vmem:[#allocation2 + $0x18f0] sm:$0xff]  ;;  %v6484_v19 = vld [vmem:[#allocation2 + $0x18f8] sm:$0xff] }
0x174c   :  { %v11378_v20 = vpack.c.bf16 %v6484_v19, %v6483_v63  ;;  %v6467_v32 = vld [vmem:[#allocation2 + $0x1870] sm:$0xff]  ;;  %v6468_v22 = vld [vmem:[#allocation2 + $0x1878] sm:$0xff] }
0x174d   :  { %v11447_v27 = vadd.f32 %v11446_v25, %v9606_v16  ;;  %v6220_v6 = vadd.f32 %v8172_v59, %v6781_v61  ;;  %v8173_v3 = vpop.f32.mrb[158].mxu1  ;;  %v6496_v16 = vld [vmem:[#allocation2 + $0x1958] sm:$0xff]  ;;  %v11380_v50 = vpack.c.bf16 %v6468_v22, %v6467_v32 }
0x174e   :  { %v8174_v28 = vpop.f32.mrb[159].mxu1  ;;  %v6500_v25 = vld [vmem:[#allocation2 + $0x1978] sm:$0xff] }
0x174f   :  { %v11452_v36 = vadd.f32 %v6220_v6, %v5482_v4  ;;  %v8175_v9 = vadd.f32 %v8174_v28, %v8173_v3  ;;  %9643 = vmatmul.mubr.f32.vlgmr.msra.gmra.mrb[160].mxu1 %v11447_v27  ;;  %v11410_v59 = vpack.c.bf16 %v6500_v25, %v6499_v2  ;;  %v6786_v4 = vld [vmem:[#allocation7 + $0x13] ss:$0 sm:$0xff] }
0x1750   :  { %11385 = vmatpush3.bf16.msra.mxu1 %v12383_v11  ;;  %v6478_v11 = vld [vmem:[#allocation2 + $0x18c8] sm:$0xff] }
0x1751   :  { %v6225_v15 = vadd.f32 %v8175_v9, %v6781_v61  ;;  %v11453_v40 = vadd.f32 %v11452_v36, %v6304_v8  ;;  %11387 = vmatprep.subr.bf16.mxu1 %v11386_v44  ;;  %v11366_v58 = vpack.c.bf16 %v6478_v11, %v6477_v33  ;;  %v6495_v61 = vld [vmem:[#allocation2 + $0x1950] sm:$0xff] }
0x1752   :  { %v11402_v5 = vpack.c.bf16 %v6496_v16, %v6495_v61 }
0x1753   :  { %v11450_v24 = vadd.f32 %v6225_v15, %v5487_v21  ;;  %9645 = vmatprep.mubr.f32.mxu1 %v11453_v40  ;;  %11367 = vmatprep.subr.bf16.mxu0 %v11366_v58 }
0x1754   :  { %11389 = vmatpush3.bf16.msra.mxu1 %v11386_v44  ;;  %11369 = vmatpush3.bf16.msra.mxu0 %v11368_v26 }
0x1755   :  { %v11451_v62 = vadd.f32 %v11450_v24, %v9609_v14  ;;  %11391 = vmatprep.subr.bf16.mxu1 %v11390_v42  ;;  %11371 = vmatprep.subr.bf16.mxu0 %v11370_v38  ;;  %v6497_v14 = vld [vmem:[#allocation2 + $0x1960] sm:$0xff] }
0x1756   :  { %v11406_v8 = vpack.c.bf16 %v6498_v56, %v6497_v14 }
0x1757   :  { %9646 = vmatmul.mubr.f32.gmra.mrb[162].mxu1 %v11451_v62 }
0x1758   :  { %11393 = vmatpush3.bf16.msra.mxu1 %v11390_v42  ;;  %11373 = vmatpush3.bf16.msra.mxu0 %v11372_v53 }
0x1759   :  { %11395 = vmatprep.subr.bf16.mxu1 %v11394_v43  ;;  %11375 = vmatprep.subr.bf16.mxu0 %v11374_v55 }
0x175c   :  { %11397 = vmatpush3.bf16.msra.mxu1 %v11394_v43  ;;  %11377 = vmatpush3.bf16.msra.mxu0 %v11376_v52 }
0x175d   :  { %11399 = vmatprep.subr.bf16.mxu1 %v11398_v31  ;;  %11379 = vmatprep.subr.bf16.mxu0 %v11378_v20 }
0x1760   :  { %11401 = vmatpush3.bf16.msra.mxu1 %v11398_v31  ;;  %11381 = vmatpush3.bf16.msra.mxu0 %v11380_v50 }
0x1761   :  { %11403 = vmatprep.subr.bf16.mxu1 %v11402_v5 }
0x1764   :  { %11405 = vmatpush3.bf16.msra.mxu1 %v11402_v5 }
0x1765   :  { %11407 = vmatprep.subr.bf16.mxu1 %v11406_v8 }
0x1768   :  { %11409 = vmatpush3.bf16.msra.mxu1 %v11406_v8 }
0x1769   :  { %11411 = vmatprep.subr.bf16.mxu1 %v11410_v59 }
0x176c   :  { %11413 = vmatpush3.bf16.msra.mxu1 %v11410_v59 }
0x1822   :  { %v9644_v27 = vpop.f32.mrb[160].mxu1 }
0x1823   :  { %v6411_v6 = vadd.f32 %v9644_v27, %v6786_v4  ;;  %v6405_v3 = vpop.f32.mrb[161].mxu1 }
0x1824   :  { %v6406_v44 = vadd.f32 %v6786_v4, %v6405_v3 }
0x1825   :  { %v6425_v28 = vadd.f32 %v6411_v6, %v12283_v1 }
0x1826   :  { %v6424_v18 = vadd.f32 %v6406_v44, %v12280_v0 }
0x1827   :  { %v6441_v34 = vrot.slane %v6425_v28, 1  ;;  %v6429_v36 = vrot.slane %v6425_v28, 7 }
0x1828   :  { %v6428_v9 = vrot.slane %v6424_v18, 7  ;;  %6570 = vmatprep.mubr.f32.mxu0 %v6424_v18  ;;  %v6440_v21 = vrot.slane %v6424_v18, 1 }
0x182a   :  { %v9647_v15 = vpop.f32.mrb[162].mxu1  ;;  %v6446_v40 = vsel %vm157_vm0, %v6440_v21, %v6441_v34  ;;  %v6434_v42 = vsel %vm144_vm1, %v6428_v9, %v6429_v36 }
0x182b   :  { %v6421_v23 = vadd.f32 %v9647_v15, %v6786_v4  ;;  %v6415_v12 = vpop.f32.mrb[163].mxu1  ;;  %9680 = vmatprep.mubr.f32.mxu1 %v6446_v40 }
0x182c   :  { %v6416_v24 = vadd.f32 %v6786_v4, %v6415_v12 }
0x182d   :  { %v6427_v1 = vadd.f32 %v6421_v23, %v12291_v49 }
0x182e   :  { %v6426_v0 = vadd.f32 %v6416_v24, %v12288_v10 }
0x182f   :  { %v6431_v62 = vrot.slane %v6427_v1, 7  ;;  %v6443_v43 = vrot.slane %v6427_v1, 1 }
0x1830   :  { %v6430_v33 = vrot.slane %v6426_v0, 7  ;;  %v6442_v11 = vrot.slane %v6426_v0, 1 }
0x1831   :  { %v6435_v58 = vsel %vm144_vm1, %v6431_v62, %v6428_v9  ;;  %v6447_v29 = vsel %vm157_vm0, %v6443_v43, %v6440_v21 }
0x1832   :  { %6788 = vmatmul.mubr.msk.f32.vlgmr.msra.gmra.mrb[88].mxu0 %vm11801_vm2, %v6435_v58  ;;  %v6445_v48 = vsel %vm157_vm0, %v6441_v34, %v6442_v11  ;;  %v6444_v49 = vsel %vm157_vm0, %v6442_v11, %v6443_v43  ;;  %v6433_v10 = vsel %vm144_vm1, %v6429_v36, %v6430_v33  ;;  %v6432_v54 = vsel %vm144_vm1, %v6430_v33, %v6431_v62 }
0x1833   :  { %6575 = vmatprep.mubr.f32.mxu0 %v6425_v28  ;;  %9681 = vmatmul.mubr.msk.f32.vlgmr.msra.gmra.mrb[164].mxu1 %vm11809_vm3, %v6445_v48 }
0x1834   :  { %9683 = vmatprep.mubr.f32.mxu1 %v6444_v49 }
0x1836   :  { %6576 = vmatmul.mubr.f32.gmra.mrb[90].mxu0 %v6434_v42 }
0x1837   :  { %6580 = vmatprep.mubr.f32.mxu0 %v6426_v0  ;;  %9684 = vmatmul.mubr.msk.f32.gmra.mrb[166].mxu1 %vm11826_vm4, %v6447_v29 }
0x183a   :  { %6789 = vmatmul.mubr.msk.f32.gmra.mrb[92].mxu0 %vm11834_vm5, %v6433_v10 }
0x183b   :  { %6585 = vmatprep.mubr.f32.mxu0 %v6427_v1 }
0x183e   :  { %6586 = vmatmul.mubr.f32.gmra.mrb[94].mxu0 %v6432_v54 }
0x1905   :  { %v8248_v30 = vpop.f32.mrb[88].mxu0 }
0x1906   :  { %v8249_v26 = vpop.f32.mrb[89].mxu0  ;;  %v9682_v37 = vpop.f32.mrb[164].mxu1 }
0x1907   :  { %v8250_v31 = vadd.f32 %v8249_v26, %v8248_v30  ;;  %v6657_v57 = vpop.f32.mrb[165].mxu1 }
0x1909   :  { %v6573_v60 = vadd.f32 %v8250_v31, %v6787_v46  ;;  %v8251_v35 = vpop.f32.mrb[90].mxu0 }
0x190a   :  { %v8252_v38 = vpop.f32.mrb[91].mxu0  ;;  %v9685_v39 = vpop.f32.mrb[166].mxu1 }
0x190b   :  { %v6658_v17 = vadd.f32 %v6657_v57, %v6573_v60  ;;  %v8253_v61 = vadd.f32 %v8252_v38, %v8251_v35  ;;  %v6667_v53 = vpop.f32.mrb[167].mxu1 }
0x190d   :  { %6676 = vst [vmem:[%s12436_s5] sm:$0xff] %v6658_v17  ;;  %v6578_v45 = vadd.f32 %v8253_v61, %v6787_v46  ;;  %v8254_v51 = vpop.f32.mrb[92].mxu0 }
0x190e   :  { %v8255_v16 = vpop.f32.mrb[93].mxu0 }
0x190f   :  { %v6663_v5 = vadd.f32 %v9682_v37, %v6578_v45  ;;  %v8256_v7 = vadd.f32 %v8255_v16, %v8254_v51 }
0x1911   :  { %6677 = vst [vmem:[%s12436_s5 + $0x8] sm:$0xff] %v6663_v5  ;;  %v6583_v41 = vadd.f32 %v8256_v7, %v6787_v46  ;;  %v8257_v55 = vpop.f32.mrb[94].mxu0 }
0x1912   :  { %v8258_v47 = vpop.f32.mrb[95].mxu0 }
0x1913   :  { %v6668_v13 = vadd.f32 %v6667_v53, %v6583_v41  ;;  %v8259_v14 = vadd.f32 %v8258_v47, %v8257_v55 }
0x1915   :  { %6678 = vst [vmem:[%s12436_s5 + $0x10] sm:$0xff] %v6668_v13  ;;  %v6588_v52 = vadd.f32 %v8259_v14, %v6787_v46 }
0x1917   :  { %v6673_v56 = vadd.f32 %v9685_v39, %v6588_v52 }
0x1919   :  { %6679 = vst [vmem:[%s12436_s5 + $0x18] sm:$0xff] %v6673_v56 }
0x191a   :  { %6684 = vsyncpa [#allocation3], 1 }
0x191b   :  { %6685 = vsyncpa [#allocation5], 1 }
0x191c   :  { %6686 = vsyncpa [#allocation8], 1 }

</bundles_post_ra>
